<compile_context>
chip_gen: v6e
topology: v6e:2x2x1
jax: 0.10.0
libtpu: 0.0.40
codegen_flags: <defaults>
</compile_context>

<pallas_src>
import functools
import math

import numpy as np
import jax
import jax.numpy as jnp
from jax import lax
from jax.experimental import pallas as pl
from jax.experimental.pallas import tpu as pltpu

_LOG_2PI = math.log(2.0 * math.pi)


# ----------------------------- fused whole-net kernel -------------------------

def _sum_all(x):
    """Full reduction of a 2-D block to a (1, 1) value (avoids rank-0)."""
    return jnp.sum(jnp.sum(x, axis=1, keepdims=True), axis=0, keepdims=True)


def _flownet_kernel(x_ref, w_ref, z_ref, ld_ref, *, off, K, hid, N1, W1d, C1):
    """Entire FlowNet encode for one batch element, fully resident in VMEM.

    x_ref : (1, N1, C1)  level-1 squeezed input; rows=(h,w), cols=torch channels
    w_ref : (R, 64)      f32 slab: every folded weight / bias / selector matrix
    z_ref : (1, C2, N2)  output; rows = torch channels, cols = h2*W2 + w2
    ld_ref: (1, 1, 1)    data-dependent logdet for this element
    """
    f32 = jnp.float32
    N2, W2d, C2 = N1 // 4, W1d // 2, C1 * 2

    def lane_masks(NT, Wd):
        # per-row masks killing taps that fall off the left/right image edge
        r = lax.broadcasted_iota(jnp.int32, (NT, 1), 0)
        w = r % Wd
        return {-1: (w >= 1).astype(f32), 1: (w <= Wd - 2).astype(f32)}

    def shift_rows(x, s):
        # xs[r] = x[r + s] for 0 <= r + s < NT, else 0   (s is a Python int)
        if s == 0:
            return x
        pad = jnp.zeros((abs(s), x.shape[1]), x.dtype)
        if s > 0:
            return jnp.concatenate([x[s:, :], pad], axis=0)
        return jnp.concatenate([pad, x[:s, :]], axis=0)

    def conv3x3(x, w_off, cin, cout, b_off, Wd, masks):
        # 'same' 3x3 conv as 9 accumulated per-tap matmuls (no im2col concat)
        acc = w_ref[b_off:b_off + 1, :cout]                 # folded bias row
        for kh in range(3):
            for kw in range(3):
                dh, dw = kh - 1, kw - 1
                xs = shift_rows(x, dh * Wd + dw)
                if dw != 0:
                    xs = xs * masks[dw]
                t0 = w_off + (kh * 3 + kw) * cin
                acc = acc + jnp.dot(xs, w_ref[t0:t0 + cin, :cout],
                                    preferred_element_type=f32)
        return acc

    def actnorm_invconv(za, zb, o, C):
        # ActNorm2d + InvertibleConv1x1 folded into one affine map (f32).
        Ch = C // 2
        return (jnp.dot(za, w_ref[o["M"]:o["M"] + Ch, :C],
                        preferred_element_type=f32)
                + jnp.dot(zb, w_ref[o["M"] + Ch:o["M"] + C, :C],
                          preferred_element_type=f32)
                + w_ref[o["bvec"]:o["bvec"] + 1, :C])

    def coupling(y, o, Wd, masks, C):
        # affine coupling; 'cross' split folded into W3 output-channel perm
        Ch = C // 2
        z1, z2 = y[:, :Ch], y[:, Ch:]
        h = jnp.maximum(conv3x3(z1, o["W1"], Ch, hid, o["b1"], Wd, masks), 0.0)
        h = jnp.maximum(
            jnp.dot(h, w_ref[o["W2"]:o["W2"] + hid, :hid],
                    preferred_element_type=f32)
            + w_ref[o["b2"]:o["b2"] + 1, :hid], 0.0)
        h3 = conv3x3(h, o["W3"], hid, C, o["b3"], Wd, masks)
        shift = h3[:, :Ch]
        t = h3[:, Ch:] + 2.0
        # log(sigmoid(t)) computed stably; scale = exp(log_s)
        log_s = jnp.minimum(t, 0.0) - jnp.log(1.0 + jnp.exp(-jnp.abs(t)))
        return z1, (z2 + shift) * jnp.exp(log_s), _sum_all(log_s)

    # ------------------------------- level 1 ---------------------------------
    m1 = lane_masks(N1, W1d)
    z = x_ref[0]                                        # (N1, C1)
    za, zb = z[:, :C1 // 2], z[:, C1 // 2:]
    ld = jnp.zeros((1, 1), f32)
    for k in range(K):
        o = off["l1"][k]
        za, zb, dld = coupling(actnorm_invconv(za, zb, o, C1), o, W1d, m1, C1)
        ld = ld + dld

    # Split2d: learned Gaussian prior on second half, keep the first half
    osp = off["split"]
    hp = conv3x3(za, osp["W"], C1 // 2, C1, osp["b"], W1d, m1)
    mean, logs = hp[:, :C1 // 2], hp[:, C1 // 2:]
    d = zb - mean
    ld = ld + _sum_all(-0.5 * (2.0 * logs + d * d * jnp.exp(-2.0 * logs)
                               + _LOG_2PI))

    # ------------- squeeze2d into level 2, entirely in VMEM ------------------
    # Constant selector R groups the 4 spatial phases on the (idle) MXU; the
    # channel interleave is folded into the row-permuted first M of level 2.
    rz = jnp.dot(w_ref[off["R"]:off["R"] + N1, :N1], za,
                 preferred_element_type=f32)            # (N1, C1/2)

    # ------------------------------- level 2 ---------------------------------
    m2 = lane_masks(N2, W2d)
    o = off["l2"][0]
    csub = C1 // 2
    y = w_ref[o["bvec"]:o["bvec"] + 1, :C2]
    for ph in range(4):
        y = y + jnp.dot(rz[ph * N2:(ph + 1) * N2, :],
                        w_ref[o["M"] + ph * csub:o["M"] + (ph + 1) * csub, :C2],
                        preferred_element_type=f32)
    za, zb, dld = coupling(y, o, W2d, m2, C2)
    ld = ld + dld
    for k in range(1, K):
        o = off["l2"][k]
        za, zb, dld = coupling(actnorm_invconv(za, zb, o, C2), o, W2d, m2, C2)
        ld = ld + dld

    # --------------------- NCHW-ready output (channels-major) ----------------
    zt = jnp.concatenate([jnp.transpose(za), jnp.transpose(zb)], axis=0)
    z_ref[...] = zt.reshape(1, C2, N2)
    ld_ref[...] = ld.reshape(1, 1, 1)


# --------------------------- parameter init / folding -------------------------

def _normal(key, shape, std):
    return std * jax.random.normal(key, shape, jnp.float32)


def _cross_perm(C):
    # shift/mean = channels 0::2, scale/logs = channels 1::2 -> contiguous halves
    return list(range(0, C, 2)) + list(range(1, C, 2))


def init_flowstep(key, C, hid):
    ks = jax.random.split(key, 12)
    Ci = C // 2
    # TODO(synk): torch ActNorm does data-dependent init on the first training
    # batch; here bias/logs are plain parameters (post-init semantics).
    return {
        "an_bias": _normal(ks[0], (C,), 0.1),
        "an_logs": _normal(ks[1], (C,), 0.1),
        "inv_w": jnp.linalg.qr(jax.random.normal(ks[2], (C, C), jnp.float32))[0],
        "w1": _normal(ks[3], (3, 3, Ci, hid), 0.05),
        "an1_bias": _normal(ks[4], (hid,), 0.1),
        "an1_logs": _normal(ks[5], (hid,), 0.1),
        "w2": _normal(ks[6], (1, 1, hid, hid), 0.05),
        "an2_bias": _normal(ks[7], (hid,), 0.1),
        "an2_logs": _normal(ks[8], (hid,), 0.1),
        # Conv2dZeros is zero-init in torch; small random values exercise the path.
        "w3": _normal(ks[9], (3, 3, hid, C), 0.01),
        "b3": _normal(ks[10], (C,), 0.01),
        "logs3": _normal(ks[11], (C,), 0.01),
    }


def init_split2d(key, C):
    ks = jax.random.split(key, 3)
    return {
        "w": _normal(ks[0], (3, 3, C // 2, C), 0.01),
        "b": _normal(ks[1], (C,), 0.01),
        "logs": _normal(ks[2], (C,), 0.01),
    }


def fold_flowstep(p, h, w, squeeze_perm=None):
    """Fold ActNorm scales into weights; precompute data-independent logdet."""
    C = p["an_bias"].shape[0]
    hid = p["an1_bias"].shape[0]
    Ci = C // 2
    s = jnp.exp(p["an_logs"])
    M = s[:, None] * p["inv_w"].T                          # y = x @ M + bvec
    bvec = ((p["an_bias"] * s)[None, :]) @ p["inv_w"].T
    if squeeze_perm is not None:                           # absorb squeeze2d perm
        M = M[jnp.asarray(squeeze_perm), :]
    s1 = jnp.exp(p["an1_logs"])
    W1 = p["w1"].reshape(9 * Ci, hid) * s1[None, :]
    b1 = (p["an1_bias"] * s1)[None, :]
    s2 = jnp.exp(p["an2_logs"])
    W2 = p["w2"].reshape(hid, hid) * s2[None, :]
    b2 = (p["an2_bias"] * s2)[None, :]
    e3 = jnp.exp(3.0 * p["logs3"])
    perm = jnp.asarray(_cross_perm(C))
    W3 = (p["w3"].reshape(9 * hid, C) * e3[None, :])[:, perm]
    b3 = ((p["b3"] * e3)[None, :])[:, perm]
    ld_const = (jnp.sum(p["an_logs"])
                + jnp.linalg.slogdet(p["inv_w"])[1]) * float(h * w)
    return ({"M": M, "W1": W1, "W2": W2, "W3": W3},
            {"bvec": bvec, "b1": b1, "b2": b2, "b3": b3},
            ld_const)


def fold_split2d(p, C):
    Ci = C // 2
    e = jnp.exp(3.0 * p["logs"])
    perm = jnp.asarray(_cross_perm(C))
    W = (p["w"].reshape(9 * Ci, C) * e[None, :])[:, perm]
    b = ((p["b"] * e)[None, :])[:, perm]
    return {"W": W}, {"b": b}


def build_flownet(key, image_shape, hidden_channels, K, L):
    """Random-init, fold, and pack every parameter into one f32 slab."""
    assert L == 2, "kernel is specialised for the bcglow FlowNet config (L=2)"
    H0, W0, C0 = image_shape
    hid = hidden_channels
    H1, W1, C1 = H0 // 2, W0 // 2, C0 * 4          # level-1 geometry
    H2, W2, C2 = H1 // 2, W1 // 2, C1 * 2          # level-2 geometry
    N1 = H1 * W1

    mats, biases = [], []
    mrows, brows = [0], [0]

    def add_mat(a):
        a = jnp.asarray(a, jnp.float32)
        o = mrows[0]
        mats.append(a)
        mrows[0] += a.shape[0]
        return o

    def add_bias(a):
        a = jnp.asarray(a, jnp.float32)
        o = brows[0]
        biases.append(a)
        brows[0] += a.shape[0]
        return o

    ld_const = jnp.zeros((), jnp.float32)
    off = {"l1": [], "l2": []}

    # level 1: K FlowSteps + Split2d
    for _ in range(K):
        key, sub = jax.random.split(key)
        m, b, ldc = fold_flowstep(init_flowstep(sub, C1, hid), H1, W1)
        ld_const = ld_const + ldc
        off["l1"].append({**{n: add_mat(a) for n, a in m.items()},
                          **{n: add_bias(a) for n, a in b.items()}})
    key, sub = jax.random.split(key)
    m, b = fold_split2d(init_split2d(sub, C1), C1)
    off["split"] = {**{n: add_mat(a) for n, a in m.items()},
                    **{n: add_bias(a) for n, a in b.items()}}

    # in-kernel squeeze2d: spatial-phase row selector + channel row-perm of M
    R = np.zeros((N1, N1), np.float32)
    for k in range(4):
        fh, fw = k // 2, k % 2
        for h2 in range(H2):
            for w2 in range(W2):
                R[k * (H2 * W2) + h2 * W2 + w2,
                  (2 * h2 + fh) * W1 + (2 * w2 + fw)] = 1.0
    off["R"] = add_mat(R)
    perm_sq = [c * 4 + 2 * (k // 2) + (k % 2)
               for k in range(4) for c in range(C1 // 2)]

    # level 2: K FlowSteps (first one absorbs the squeeze channel permutation)
    for k in range(K):
        key, sub = jax.random.split(key)
        m, b, ldc = fold_flowstep(init_flowstep(sub, C2, hid), H2, W2,
                                  squeeze_perm=perm_sq if k == 0 else None)
        ld_const = ld_const + ldc
        off["l2"].append({**{n: add_mat(a) for n, a in m.items()},
                          **{n: add_bias(a) for n, a in b.items()}})

    # single f32 slab: 8-row-aligned matrices first, then single-row biases
    width = max(a.shape[1] for a in mats + biases)

    def padw(a):
        return jnp.pad(a, ((0, 0), (0, width - a.shape[1])))

    slab = jnp.concatenate([padw(a) for a in mats] + [padw(a) for a in biases],
                           axis=0)
    pad_rows = (-slab.shape[0]) % 8
    if pad_rows:
        slab = jnp.pad(slab, ((0, pad_rows), (0, 0)))
    base = mrows[0]
    for grp in off["l1"] + off["l2"] + [off["split"]]:
        for nm in grp:
            if nm in ("bvec", "b1", "b2", "b3", "b"):
                grp[nm] += base

    dims = dict(N1=N1, W1d=W1, C1=C1, hid=hid, K=K)
    return slab, off, ld_const, dims


# ------------------------------ pallas_call wrapper ---------------------------

def make_flownet_call(B, dims, off, slab_shape):
    N1, W1d, C1 = dims["N1"], dims["W1d"], dims["C1"]
    hid, K = dims["hid"], dims["K"]
    N2, C2 = N1 // 4, C1 * 2
    kern = functools.partial(_flownet_kernel, off=off, K=K, hid=hid,
                             N1=N1, W1d=W1d, C1=C1)
    return pl.pallas_call(
        kern,
        grid=(B,),
        in_specs=[
            pl.BlockSpec((1, N1, C1), lambda b: (b, 0, 0)),
            pl.BlockSpec(tuple(slab_shape), lambda b: (0, 0)),
        ],
        out_specs=(
            pl.BlockSpec((1, C2, N2), lambda b: (b, 0, 0)),
            pl.BlockSpec((1, 1, 1), lambda b: (b, 0, 0)),
        ),
        out_shape=(
            jax.ShapeDtypeStruct((B, C2, N2), jnp.float32),
            jax.ShapeDtypeStruct((B, 1, 1), jnp.float32),
        ),
        compiler_params=pltpu.CompilerParams(
            dimension_semantics=("parallel",)),
    )


def flownet_encode(x_nchw, slab, call, ld_const):
    """NCHW input -> (z NCHW, logdet); all flow math inside one pallas_call."""
    B, C0, H0, W0 = x_nchw.shape
    # TODO(synk): the entry squeeze2d + NCHW->(N,C) relayout stays as one XLA
    # fusion; it moves the W axis from lanes to sublanes, which has no cheap
    # matmul-free in-kernel form.
    xs = x_nchw.reshape(B, C0, H0 // 2, 2, W0 // 2, 2)
    xs = jnp.transpose(xs, (0, 2, 4, 1, 3, 5))
    xs = xs.reshape(B, (H0 // 2) * (W0 // 2), C0 * 4)
    z2d, ld = call(xs, slab)
    z = z2d.reshape(B, C0 * 8, H0 // 4, W0 // 4)   # free reshape: NCHW-ordered rows
    return z, ld[:, 0, 0] + ld_const


# ----------------------------------- main -------------------------------------

if __name__ == "__main__":
    B = 2
    image_shape = (16, 16, 4)            # (H, W, C) as in FlowNet.__init__
    hidden_channels, K, L = 32, 2, 2

    key = jax.random.PRNGKey(0)
    kp, kx = jax.random.split(key)
    slab, off, ld_const, dims = build_flownet(
        kp, image_shape, hidden_channels, K, L)
    call = make_flownet_call(B, dims, off, slab.shape)

    x = jax.random.normal(
        kx, (B, image_shape[2], image_shape[0], image_shape[1]), jnp.float32)

    @jax.jit
    def encode(inp, slab_):
        return flownet_encode(inp, slab_, call, ld_const)

    z, logdet = jax.block_until_ready(encode(x, slab))

    assert z.shape == (B, 32, 4, 4), z.shape      # final [-1, C, H, W] level
    assert logdet.shape == (B,), logdet.shape
    assert bool(jnp.all(jnp.isfinite(z))) and bool(jnp.all(jnp.isfinite(logdet)))
    print("KERNEL_OK")
</pallas_src>

<mosaic_0001>
module attributes {stable_mosaic.version = 11 : i64} {
  func.func @_flownet_kernel(%arg0: i32, %arg1: memref<1x64x16xf32, #tpu.memory_space<vmem>>, %arg2: memref<1968x64xf32, #tpu.memory_space<vmem>>, %arg3: memref<1x32x16xf32, #tpu.memory_space<vmem>>, %arg4: memref<1x1x1xf32, #tpu.memory_space<vmem>>) attributes {dimension_semantics = [#tpu.dimension_semantics<parallel>], iteration_bounds = array<i64: 2>, scalar_prefetch = 0 : i64, scratch_operands = 0 : i64, tpu.core_type = #tpu.core_type<tc>, window_params = [{transform_indices = @transform_0, window_bounds = array<i64: 1, 64, 16>}, {pipeline_mode = #tpu.pipeline_mode<synchronous>, transform_indices = @transform_1, window_bounds = array<i64: 1968, 64>}, {transform_indices = @transform_2, window_bounds = array<i64: 1, 32, 16>}, {transform_indices = @transform_3, window_bounds = array<i64: 1, 1, 1>}]} {
    %0 = tpu.iota {dimensions = array<i32: 0>} : vector<64x1xi32>
    %c8_i32 = arith.constant 8 : i32
    %c0_i32 = arith.constant 0 : i32
    %1 = arith.cmpi eq, %c8_i32, %c0_i32 : i32
    %c1_i32 = arith.constant 1 : i32
    %2 = arith.select %1, %c1_i32, %c8_i32 : i32
    %3 = vector.broadcast %2 : i32 to vector<64x1xi32>
    %4 = arith.remsi %0, %3 : vector<64x1xi32>
    %c0_i32_0 = arith.constant 0 : i32
    %5 = vector.broadcast %c0_i32_0 : i32 to vector<64x1xi32>
    %6 = arith.cmpi ne, %4, %5 : vector<64x1xi32>
    %c0_i32_1 = arith.constant 0 : i32
    %7 = vector.broadcast %c0_i32_1 : i32 to vector<64x1xi32>
    %8 = arith.cmpi slt, %4, %7 : vector<64x1xi32>
    %c0_i32_2 = arith.constant 0 : i32
    %9 = arith.cmpi slt, %2, %c0_i32_2 : i32
    %10 = vector.broadcast %9 : i1 to vector<64x1xi1>
    %11 = vector.broadcast %10 : vector<64x1xi1> to vector<64x1xi1>
    %12 = arith.xori %8, %11 : vector<64x1xi1>
    %13 = arith.andi %12, %6 : vector<64x1xi1>
    %14 = vector.broadcast %2 : i32 to vector<64x1xi32>
    %15 = arith.addi %4, %14 : vector<64x1xi32>
    %16 = arith.select %13, %15, %4 : vector<64x1xi1>, vector<64x1xi32>
    %c1_i32_3 = arith.constant 1 : i32
    %17 = vector.broadcast %c1_i32_3 : i32 to vector<64x1xi32>
    %18 = arith.cmpi sge, %16, %17 : vector<64x1xi32>
    %19 = arith.extui %18 : vector<64x1xi1> to vector<64x1xi32>
    %20 = arith.sitofp %19 : vector<64x1xi32> to vector<64x1xf32>
    %c6_i32 = arith.constant 6 : i32
    %21 = vector.broadcast %c6_i32 : i32 to vector<64x1xi32>
    %22 = arith.cmpi sle, %16, %21 : vector<64x1xi32>
    %23 = arith.extui %22 : vector<64x1xi1> to vector<64x1xi32>
    %24 = arith.sitofp %23 : vector<64x1xi32> to vector<64x1xf32>
    %c0 = arith.constant 0 : index
    %c0_4 = arith.constant 0 : index
    %c0_5 = arith.constant 0 : index
    %25 = vector.load %arg1[%c0, %c0_4, %c0_5] : memref<1x64x16xf32, #tpu.memory_space<vmem>>, vector<1x64x16xf32>
    %26 = vector.shape_cast %25 : vector<1x64x16xf32> to vector<64x16xf32>
    %27 = vector.extract_strided_slice %26 {offsets = [0, 0], sizes = [64, 8], strides = [1, 1]} : vector<64x16xf32> to vector<64x8xf32>
    %28 = vector.extract_strided_slice %26 {offsets = [0, 8], sizes = [64, 8], strides = [1, 1]} : vector<64x16xf32> to vector<64x8xf32>
    %cst = arith.constant 0.000000e+00 : f32
    %29 = vector.broadcast %cst : f32 to vector<1x1xf32>
    %c0_6 = arith.constant 0 : index
    %c0_7 = arith.constant 0 : index
    %30 = vector.load %arg2[%c0_6, %c0_7] : memref<1968x64xf32, #tpu.memory_space<vmem>>, vector<8x16xf32>
    %cst_8 = arith.constant dense<0.000000e+00> : vector<64x16xf32>
    %31 = tpu.matmul %27, %30, %cst_8 {dimension_numbers = #tpu.dot_dimension_numbers<[1], [0], [0], [1], [0, 0, 1, 1], [], []>} : vector<64x8xf32>, vector<8x16xf32>, vector<64x16xf32> -> vector<64x16xf32>
    %c8 = arith.constant 8 : index
    %c0_9 = arith.constant 0 : index
    %32 = vector.load %arg2[%c8, %c0_9] : memref<1968x64xf32, #tpu.memory_space<vmem>>, vector<8x16xf32>
    %cst_10 = arith.constant dense<0.000000e+00> : vector<64x16xf32>
    %33 = tpu.matmul %28, %32, %cst_10 {dimension_numbers = #tpu.dot_dimension_numbers<[1], [0], [0], [1], [0, 0, 1, 1], [], []>} : vector<64x8xf32>, vector<8x16xf32>, vector<64x16xf32> -> vector<64x16xf32>
    %34 = arith.addf %31, %33 : vector<64x16xf32>
    %c1944 = arith.constant 1944 : index
    %c0_11 = arith.constant 0 : index
    %35 = vector.load %arg2[%c1944, %c0_11] : memref<1968x64xf32, #tpu.memory_space<vmem>>, vector<1x16xf32>
    %36 = vector.broadcast %35 : vector<1x16xf32> to vector<64x16xf32>
    %37 = arith.addf %34, %36 : vector<64x16xf32>
    %38 = vector.extract_strided_slice %37 {offsets = [0, 0], sizes = [64, 8], strides = [1, 1]} : vector<64x16xf32> to vector<64x8xf32>
    %39 = vector.extract_strided_slice %37 {offsets = [0, 8], sizes = [64, 8], strides = [1, 1]} : vector<64x16xf32> to vector<64x8xf32>
    %c1945 = arith.constant 1945 : index
    %c0_12 = arith.constant 0 : index
    %40 = vector.load %arg2[%c1945, %c0_12] : memref<1968x64xf32, #tpu.memory_space<vmem>>, vector<1x32xf32>
    %cst_13 = arith.constant 0.000000e+00 : f32
    %41 = vector.broadcast %cst_13 : f32 to vector<9x8xf32>
    %42 = vector.extract_strided_slice %38 {offsets = [0, 0], sizes = [55, 8], strides = [1, 1]} : vector<64x8xf32> to vector<55x8xf32>
    %43 = tpu.concatenate %41, %42 in 0 : vector<9x8xf32>, vector<55x8xf32> -> vector<64x8xf32>
    %44 = vector.broadcast %20 : vector<64x1xf32> to vector<64x8xf32>
    %45 = arith.mulf %43, %44 : vector<64x8xf32>
    %c16 = arith.constant 16 : index
    %c0_14 = arith.constant 0 : index
    %46 = vector.load %arg2[%c16, %c0_14] : memref<1968x64xf32, #tpu.memory_space<vmem>>, vector<8x32xf32>
    %cst_15 = arith.constant dense<0.000000e+00> : vector<64x32xf32>
    %47 = tpu.matmul %45, %46, %cst_15 {dimension_numbers = #tpu.dot_dimension_numbers<[1], [0], [0], [1], [0, 0, 1, 1], [], []>} : vector<64x8xf32>, vector<8x32xf32>, vector<64x32xf32> -> vector<64x32xf32>
    %48 = vector.broadcast %40 : vector<1x32xf32> to vector<64x32xf32>
    %49 = arith.addf %48, %47 : vector<64x32xf32>
    %cst_16 = arith.constant 0.000000e+00 : f32
    %50 = vector.broadcast %cst_16 : f32 to vector<8x8xf32>
    %51 = vector.extract_strided_slice %38 {offsets = [0, 0], sizes = [56, 8], strides = [1, 1]} : vector<64x8xf32> to vector<56x8xf32>
    %52 = tpu.concatenate %50, %51 in 0 : vector<8x8xf32>, vector<56x8xf32> -> vector<64x8xf32>
    %c24 = arith.constant 24 : index
    %c0_17 = arith.constant 0 : index
    %53 = vector.load %arg2[%c24, %c0_17] : memref<1968x64xf32, #tpu.memory_space<vmem>>, vector<8x32xf32>
    %cst_18 = arith.constant dense<0.000000e+00> : vector<64x32xf32>
    %54 = tpu.matmul %52, %53, %cst_18 {dimension_numbers = #tpu.dot_dimension_numbers<[1], [0], [0], [1], [0, 0, 1, 1], [], []>} : vector<64x8xf32>, vector<8x32xf32>, vector<64x32xf32> -> vector<64x32xf32>
    %55 = arith.addf %49, %54 : vector<64x32xf32>
    %cst_19 = arith.constant 0.000000e+00 : f32
    %56 = vector.broadcast %cst_19 : f32 to vector<7x8xf32>
    %57 = vector.extract_strided_slice %38 {offsets = [0, 0], sizes = [57, 8], strides = [1, 1]} : vector<64x8xf32> to vector<57x8xf32>
    %58 = tpu.concatenate %56, %57 in 0 : vector<7x8xf32>, vector<57x8xf32> -> vector<64x8xf32>
    %59 = vector.broadcast %24 : vector<64x1xf32> to vector<64x8xf32>
    %60 = arith.mulf %58, %59 : vector<64x8xf32>
    %c32 = arith.constant 32 : index
    %c0_20 = arith.constant 0 : index
    %61 = vector.load %arg2[%c32, %c0_20] : memref<1968x64xf32, #tpu.memory_space<vmem>>, vector<8x32xf32>
    %cst_21 = arith.constant dense<0.000000e+00> : vector<64x32xf32>
    %62 = tpu.matmul %60, %61, %cst_21 {dimension_numbers = #tpu.dot_dimension_numbers<[1], [0], [0], [1], [0, 0, 1, 1], [], []>} : vector<64x8xf32>, vector<8x32xf32>, vector<64x32xf32> -> vector<64x32xf32>
    %63 = arith.addf %55, %62 : vector<64x32xf32>
    %cst_22 = arith.constant 0.000000e+00 : f32
    %64 = vector.broadcast %cst_22 : f32 to vector<1x8xf32>
    %65 = vector.extract_strided_slice %38 {offsets = [0, 0], sizes = [63, 8], strides = [1, 1]} : vector<64x8xf32> to vector<63x8xf32>
    %66 = tpu.concatenate %64, %65 in 0 : vector<1x8xf32>, vector<63x8xf32> -> vector<64x8xf32>
    %67 = vector.broadcast %20 : vector<64x1xf32> to vector<64x8xf32>
    %68 = arith.mulf %66, %67 : vector<64x8xf32>
    %c40 = arith.constant 40 : index
    %c0_23 = arith.constant 0 : index
    %69 = vector.load %arg2[%c40, %c0_23] : memref<1968x64xf32, #tpu.memory_space<vmem>>, vector<8x32xf32>
    %cst_24 = arith.constant dense<0.000000e+00> : vector<64x32xf32>
    %70 = tpu.matmul %68, %69, %cst_24 {dimension_numbers = #tpu.dot_dimension_numbers<[1], [0], [0], [1], [0, 0, 1, 1], [], []>} : vector<64x8xf32>, vector<8x32xf32>, vector<64x32xf32> -> vector<64x32xf32>
    %71 = arith.addf %63, %70 : vector<64x32xf32>
    %c48 = arith.constant 48 : index
    %c0_25 = arith.constant 0 : index
    %72 = vector.load %arg2[%c48, %c0_25] : memref<1968x64xf32, #tpu.memory_space<vmem>>, vector<8x32xf32>
    %cst_26 = arith.constant dense<0.000000e+00> : vector<64x32xf32>
    %73 = tpu.matmul %38, %72, %cst_26 {dimension_numbers = #tpu.dot_dimension_numbers<[1], [0], [0], [1], [0, 0, 1, 1], [], []>} : vector<64x8xf32>, vector<8x32xf32>, vector<64x32xf32> -> vector<64x32xf32>
    %74 = arith.addf %71, %73 : vector<64x32xf32>
    %cst_27 = arith.constant 0.000000e+00 : f32
    %75 = vector.broadcast %cst_27 : f32 to vector<1x8xf32>
    %76 = vector.extract_strided_slice %38 {offsets = [1, 0], sizes = [63, 8], strides = [1, 1]} : vector<64x8xf32> to vector<63x8xf32>
    %77 = tpu.concatenate %76, %75 in 0 : vector<63x8xf32>, vector<1x8xf32> -> vector<64x8xf32>
    %78 = vector.broadcast %24 : vector<64x1xf32> to vector<64x8xf32>
    %79 = arith.mulf %77, %78 : vector<64x8xf32>
    %c56 = arith.constant 56 : index
    %c0_28 = arith.constant 0 : index
    %80 = vector.load %arg2[%c56, %c0_28] : memref<1968x64xf32, #tpu.memory_space<vmem>>, vector<8x32xf32>
    %cst_29 = arith.constant dense<0.000000e+00> : vector<64x32xf32>
    %81 = tpu.matmul %79, %80, %cst_29 {dimension_numbers = #tpu.dot_dimension_numbers<[1], [0], [0], [1], [0, 0, 1, 1], [], []>} : vector<64x8xf32>, vector<8x32xf32>, vector<64x32xf32> -> vector<64x32xf32>
    %82 = arith.addf %74, %81 : vector<64x32xf32>
    %cst_30 = arith.constant 0.000000e+00 : f32
    %83 = vector.broadcast %cst_30 : f32 to vector<7x8xf32>
    %84 = vector.extract_strided_slice %38 {offsets = [7, 0], sizes = [57, 8], strides = [1, 1]} : vector<64x8xf32> to vector<57x8xf32>
    %85 = tpu.concatenate %84, %83 in 0 : vector<57x8xf32>, vector<7x8xf32> -> vector<64x8xf32>
    %86 = vector.broadcast %20 : vector<64x1xf32> to vector<64x8xf32>
    %87 = arith.mulf %85, %86 : vector<64x8xf32>
    %c64 = arith.constant 64 : index
    %c0_31 = arith.constant 0 : index
    %88 = vector.load %arg2[%c64, %c0_31] : memref<1968x64xf32, #tpu.memory_space<vmem>>, vector<8x32xf32>
    %cst_32 = arith.constant dense<0.000000e+00> : vector<64x32xf32>
    %89 = tpu.matmul %87, %88, %cst_32 {dimension_numbers = #tpu.dot_dimension_numbers<[1], [0], [0], [1], [0, 0, 1, 1], [], []>} : vector<64x8xf32>, vector<8x32xf32>, vector<64x32xf32> -> vector<64x32xf32>
    %90 = arith.addf %82, %89 : vector<64x32xf32>
    %cst_33 = arith.constant 0.000000e+00 : f32
    %91 = vector.broadcast %cst_33 : f32 to vector<8x8xf32>
    %92 = vector.extract_strided_slice %38 {offsets = [8, 0], sizes = [56, 8], strides = [1, 1]} : vector<64x8xf32> to vector<56x8xf32>
    %93 = tpu.concatenate %92, %91 in 0 : vector<56x8xf32>, vector<8x8xf32> -> vector<64x8xf32>
    %c72 = arith.constant 72 : index
    %c0_34 = arith.constant 0 : index
    %94 = vector.load %arg2[%c72, %c0_34] : memref<1968x64xf32, #tpu.memory_space<vmem>>, vector<8x32xf32>
    %cst_35 = arith.constant dense<0.000000e+00> : vector<64x32xf32>
    %95 = tpu.matmul %93, %94, %cst_35 {dimension_numbers = #tpu.dot_dimension_numbers<[1], [0], [0], [1], [0, 0, 1, 1], [], []>} : vector<64x8xf32>, vector<8x32xf32>, vector<64x32xf32> -> vector<64x32xf32>
    %96 = arith.addf %90, %95 : vector<64x32xf32>
    %cst_36 = arith.constant 0.000000e+00 : f32
    %97 = vector.broadcast %cst_36 : f32 to vector<9x8xf32>
    %98 = vector.extract_strided_slice %38 {offsets = [9, 0], sizes = [55, 8], strides = [1, 1]} : vector<64x8xf32> to vector<55x8xf32>
    %99 = tpu.concatenate %98, %97 in 0 : vector<55x8xf32>, vector<9x8xf32> -> vector<64x8xf32>
    %100 = vector.broadcast %24 : vector<64x1xf32> to vector<64x8xf32>
    %101 = arith.mulf %99, %100 : vector<64x8xf32>
    %c80 = arith.constant 80 : index
    %c0_37 = arith.constant 0 : index
    %102 = vector.load %arg2[%c80, %c0_37] : memref<1968x64xf32, #tpu.memory_space<vmem>>, vector<8x32xf32>
    %cst_38 = arith.constant dense<0.000000e+00> : vector<64x32xf32>
    %103 = tpu.matmul %101, %102, %cst_38 {dimension_numbers = #tpu.dot_dimension_numbers<[1], [0], [0], [1], [0, 0, 1, 1], [], []>} : vector<64x8xf32>, vector<8x32xf32>, vector<64x32xf32> -> vector<64x32xf32>
    %104 = arith.addf %96, %103 : vector<64x32xf32>
    %cst_39 = arith.constant 0.000000e+00 : f32
    %105 = vector.broadcast %cst_39 : f32 to vector<64x32xf32>
    %106 = arith.maximumf %104, %105 : vector<64x32xf32>
    %c88 = arith.constant 88 : index
    %c0_40 = arith.constant 0 : index
    %107 = vector.load %arg2[%c88, %c0_40] : memref<1968x64xf32, #tpu.memory_space<vmem>>, vector<32x32xf32>
    %cst_41 = arith.constant dense<0.000000e+00> : vector<64x32xf32>
    %108 = tpu.matmul %106, %107, %cst_41 {dimension_numbers = #tpu.dot_dimension_numbers<[1], [0], [0], [1], [0, 0, 1, 1], [], []>} : vector<64x32xf32>, vector<32x32xf32>, vector<64x32xf32> -> vector<64x32xf32>
    %c1946 = arith.constant 1946 : index
    %c0_42 = arith.constant 0 : index
    %109 = vector.load %arg2[%c1946, %c0_42] : memref<1968x64xf32, #tpu.memory_space<vmem>>, vector<1x32xf32>
    %110 = vector.broadcast %109 : vector<1x32xf32> to vector<64x32xf32>
    %111 = arith.addf %108, %110 : vector<64x32xf32>
    %cst_43 = arith.constant 0.000000e+00 : f32
    %112 = vector.broadcast %cst_43 : f32 to vector<64x32xf32>
    %113 = arith.maximumf %111, %112 : vector<64x32xf32>
    %c1947 = arith.constant 1947 : index
    %c0_44 = arith.constant 0 : index
    %114 = vector.load %arg2[%c1947, %c0_44] : memref<1968x64xf32, #tpu.memory_space<vmem>>, vector<1x16xf32>
    %cst_45 = arith.constant 0.000000e+00 : f32
    %115 = vector.broadcast %cst_45 : f32 to vector<9x32xf32>
    %116 = vector.extract_strided_slice %113 {offsets = [0, 0], sizes = [55, 32], strides = [1, 1]} : vector<64x32xf32> to vector<55x32xf32>
    %117 = tpu.concatenate %115, %116 in 0 : vector<9x32xf32>, vector<55x32xf32> -> vector<64x32xf32>
    %118 = vector.broadcast %20 : vector<64x1xf32> to vector<64x32xf32>
    %119 = arith.mulf %117, %118 : vector<64x32xf32>
    %c120 = arith.constant 120 : index
    %c0_46 = arith.constant 0 : index
    %120 = vector.load %arg2[%c120, %c0_46] : memref<1968x64xf32, #tpu.memory_space<vmem>>, vector<32x16xf32>
    %cst_47 = arith.constant dense<0.000000e+00> : vector<64x16xf32>
    %121 = tpu.matmul %119, %120, %cst_47 {dimension_numbers = #tpu.dot_dimension_numbers<[1], [0], [0], [1], [0, 0, 1, 1], [], []>} : vector<64x32xf32>, vector<32x16xf32>, vector<64x16xf32> -> vector<64x16xf32>
    %122 = vector.broadcast %114 : vector<1x16xf32> to vector<64x16xf32>
    %123 = arith.addf %122, %121 : vector<64x16xf32>
    %cst_48 = arith.constant 0.000000e+00 : f32
    %124 = vector.broadcast %cst_48 : f32 to vector<8x32xf32>
    %125 = vector.extract_strided_slice %113 {offsets = [0, 0], sizes = [56, 32], strides = [1, 1]} : vector<64x32xf32> to vector<56x32xf32>
    %126 = tpu.concatenate %124, %125 in 0 : vector<8x32xf32>, vector<56x32xf32> -> vector<64x32xf32>
    %c152 = arith.constant 152 : index
    %c0_49 = arith.constant 0 : index
    %127 = vector.load %arg2[%c152, %c0_49] : memref<1968x64xf32, #tpu.memory_space<vmem>>, vector<32x16xf32>
    %cst_50 = arith.constant dense<0.000000e+00> : vector<64x16xf32>
    %128 = tpu.matmul %126, %127, %cst_50 {dimension_numbers = #tpu.dot_dimension_numbers<[1], [0], [0], [1], [0, 0, 1, 1], [], []>} : vector<64x32xf32>, vector<32x16xf32>, vector<64x16xf32> -> vector<64x16xf32>
    %129 = arith.addf %123, %128 : vector<64x16xf32>
    %cst_51 = arith.constant 0.000000e+00 : f32
    %130 = vector.broadcast %cst_51 : f32 to vector<7x32xf32>
    %131 = vector.extract_strided_slice %113 {offsets = [0, 0], sizes = [57, 32], strides = [1, 1]} : vector<64x32xf32> to vector<57x32xf32>
    %132 = tpu.concatenate %130, %131 in 0 : vector<7x32xf32>, vector<57x32xf32> -> vector<64x32xf32>
    %133 = vector.broadcast %24 : vector<64x1xf32> to vector<64x32xf32>
    %134 = arith.mulf %132, %133 : vector<64x32xf32>
    %c184 = arith.constant 184 : index
    %c0_52 = arith.constant 0 : index
    %135 = vector.load %arg2[%c184, %c0_52] : memref<1968x64xf32, #tpu.memory_space<vmem>>, vector<32x16xf32>
    %cst_53 = arith.constant dense<0.000000e+00> : vector<64x16xf32>
    %136 = tpu.matmul %134, %135, %cst_53 {dimension_numbers = #tpu.dot_dimension_numbers<[1], [0], [0], [1], [0, 0, 1, 1], [], []>} : vector<64x32xf32>, vector<32x16xf32>, vector<64x16xf32> -> vector<64x16xf32>
    %137 = arith.addf %129, %136 : vector<64x16xf32>
    %cst_54 = arith.constant 0.000000e+00 : f32
    %138 = vector.broadcast %cst_54 : f32 to vector<1x32xf32>
    %139 = vector.extract_strided_slice %113 {offsets = [0, 0], sizes = [63, 32], strides = [1, 1]} : vector<64x32xf32> to vector<63x32xf32>
    %140 = tpu.concatenate %138, %139 in 0 : vector<1x32xf32>, vector<63x32xf32> -> vector<64x32xf32>
    %141 = vector.broadcast %20 : vector<64x1xf32> to vector<64x32xf32>
    %142 = arith.mulf %140, %141 : vector<64x32xf32>
    %c216 = arith.constant 216 : index
    %c0_55 = arith.constant 0 : index
    %143 = vector.load %arg2[%c216, %c0_55] : memref<1968x64xf32, #tpu.memory_space<vmem>>, vector<32x16xf32>
    %cst_56 = arith.constant dense<0.000000e+00> : vector<64x16xf32>
    %144 = tpu.matmul %142, %143, %cst_56 {dimension_numbers = #tpu.dot_dimension_numbers<[1], [0], [0], [1], [0, 0, 1, 1], [], []>} : vector<64x32xf32>, vector<32x16xf32>, vector<64x16xf32> -> vector<64x16xf32>
    %145 = arith.addf %137, %144 : vector<64x16xf32>
    %c248 = arith.constant 248 : index
    %c0_57 = arith.constant 0 : index
    %146 = vector.load %arg2[%c248, %c0_57] : memref<1968x64xf32, #tpu.memory_space<vmem>>, vector<32x16xf32>
    %cst_58 = arith.constant dense<0.000000e+00> : vector<64x16xf32>
    %147 = tpu.matmul %113, %146, %cst_58 {dimension_numbers = #tpu.dot_dimension_numbers<[1], [0], [0], [1], [0, 0, 1, 1], [], []>} : vector<64x32xf32>, vector<32x16xf32>, vector<64x16xf32> -> vector<64x16xf32>
    %148 = arith.addf %145, %147 : vector<64x16xf32>
    %cst_59 = arith.constant 0.000000e+00 : f32
    %149 = vector.broadcast %cst_59 : f32 to vector<1x32xf32>
    %150 = vector.extract_strided_slice %113 {offsets = [1, 0], sizes = [63, 32], strides = [1, 1]} : vector<64x32xf32> to vector<63x32xf32>
    %151 = tpu.concatenate %150, %149 in 0 : vector<63x32xf32>, vector<1x32xf32> -> vector<64x32xf32>
    %152 = vector.broadcast %24 : vector<64x1xf32> to vector<64x32xf32>
    %153 = arith.mulf %151, %152 : vector<64x32xf32>
    %c280 = arith.constant 280 : index
    %c0_60 = arith.constant 0 : index
    %154 = vector.load %arg2[%c280, %c0_60] : memref<1968x64xf32, #tpu.memory_space<vmem>>, vector<32x16xf32>
    %cst_61 = arith.constant dense<0.000000e+00> : vector<64x16xf32>
    %155 = tpu.matmul %153, %154, %cst_61 {dimension_numbers = #tpu.dot_dimension_numbers<[1], [0], [0], [1], [0, 0, 1, 1], [], []>} : vector<64x32xf32>, vector<32x16xf32>, vector<64x16xf32> -> vector<64x16xf32>
    %156 = arith.addf %148, %155 : vector<64x16xf32>
    %cst_62 = arith.constant 0.000000e+00 : f32
    %157 = vector.broadcast %cst_62 : f32 to vector<7x32xf32>
    %158 = vector.extract_strided_slice %113 {offsets = [7, 0], sizes = [57, 32], strides = [1, 1]} : vector<64x32xf32> to vector<57x32xf32>
    %159 = tpu.concatenate %158, %157 in 0 : vector<57x32xf32>, vector<7x32xf32> -> vector<64x32xf32>
    %160 = vector.broadcast %20 : vector<64x1xf32> to vector<64x32xf32>
    %161 = arith.mulf %159, %160 : vector<64x32xf32>
    %c312 = arith.constant 312 : index
    %c0_63 = arith.constant 0 : index
    %162 = vector.load %arg2[%c312, %c0_63] : memref<1968x64xf32, #tpu.memory_space<vmem>>, vector<32x16xf32>
    %cst_64 = arith.constant dense<0.000000e+00> : vector<64x16xf32>
    %163 = tpu.matmul %161, %162, %cst_64 {dimension_numbers = #tpu.dot_dimension_numbers<[1], [0], [0], [1], [0, 0, 1, 1], [], []>} : vector<64x32xf32>, vector<32x16xf32>, vector<64x16xf32> -> vector<64x16xf32>
    %164 = arith.addf %156, %163 : vector<64x16xf32>
    %cst_65 = arith.constant 0.000000e+00 : f32
    %165 = vector.broadcast %cst_65 : f32 to vector<8x32xf32>
    %166 = vector.extract_strided_slice %113 {offsets = [8, 0], sizes = [56, 32], strides = [1, 1]} : vector<64x32xf32> to vector<56x32xf32>
    %167 = tpu.concatenate %166, %165 in 0 : vector<56x32xf32>, vector<8x32xf32> -> vector<64x32xf32>
    %c344 = arith.constant 344 : index
    %c0_66 = arith.constant 0 : index
    %168 = vector.load %arg2[%c344, %c0_66] : memref<1968x64xf32, #tpu.memory_space<vmem>>, vector<32x16xf32>
    %cst_67 = arith.constant dense<0.000000e+00> : vector<64x16xf32>
    %169 = tpu.matmul %167, %168, %cst_67 {dimension_numbers = #tpu.dot_dimension_numbers<[1], [0], [0], [1], [0, 0, 1, 1], [], []>} : vector<64x32xf32>, vector<32x16xf32>, vector<64x16xf32> -> vector<64x16xf32>
    %170 = arith.addf %164, %169 : vector<64x16xf32>
    %cst_68 = arith.constant 0.000000e+00 : f32
    %171 = vector.broadcast %cst_68 : f32 to vector<9x32xf32>
    %172 = vector.extract_strided_slice %113 {offsets = [9, 0], sizes = [55, 32], strides = [1, 1]} : vector<64x32xf32> to vector<55x32xf32>
    %173 = tpu.concatenate %172, %171 in 0 : vector<55x32xf32>, vector<9x32xf32> -> vector<64x32xf32>
    %174 = vector.broadcast %24 : vector<64x1xf32> to vector<64x32xf32>
    %175 = arith.mulf %173, %174 : vector<64x32xf32>
    %c376 = arith.constant 376 : index
    %c0_69 = arith.constant 0 : index
    %176 = vector.load %arg2[%c376, %c0_69] : memref<1968x64xf32, #tpu.memory_space<vmem>>, vector<32x16xf32>
    %cst_70 = arith.constant dense<0.000000e+00> : vector<64x16xf32>
    %177 = tpu.matmul %175, %176, %cst_70 {dimension_numbers = #tpu.dot_dimension_numbers<[1], [0], [0], [1], [0, 0, 1, 1], [], []>} : vector<64x32xf32>, vector<32x16xf32>, vector<64x16xf32> -> vector<64x16xf32>
    %178 = arith.addf %170, %177 : vector<64x16xf32>
    %179 = vector.extract_strided_slice %178 {offsets = [0, 0], sizes = [64, 8], strides = [1, 1]} : vector<64x16xf32> to vector<64x8xf32>
    %180 = vector.extract_strided_slice %178 {offsets = [0, 8], sizes = [64, 8], strides = [1, 1]} : vector<64x16xf32> to vector<64x8xf32>
    %cst_71 = arith.constant 2.000000e+00 : f32
    %181 = vector.broadcast %cst_71 : f32 to vector<64x8xf32>
    %182 = arith.addf %180, %181 : vector<64x8xf32>
    %cst_72 = arith.constant 0.000000e+00 : f32
    %183 = vector.broadcast %cst_72 : f32 to vector<64x8xf32>
    %184 = arith.minimumf %182, %183 : vector<64x8xf32>
    %185 = math.absf %182 : vector<64x8xf32>
    %cst_73 = arith.constant 0.000000e+00 : f32
    %186 = vector.broadcast %cst_73 : f32 to vector<64x8xf32>
    %187 = arith.subf %186, %185 : vector<64x8xf32>
    %188 = math.exp %187 : vector<64x8xf32>
    %cst_74 = arith.constant 1.000000e+00 : f32
    %189 = vector.broadcast %cst_74 : f32 to vector<64x8xf32>
    %190 = arith.addf %189, %188 : vector<64x8xf32>
    %191 = math.log %190 : vector<64x8xf32>
    %192 = arith.subf %184, %191 : vector<64x8xf32>
    %193 = arith.addf %39, %179 : vector<64x8xf32>
    %194 = math.exp %192 : vector<64x8xf32>
    %195 = arith.mulf %193, %194 : vector<64x8xf32>
    %cst_75 = arith.constant dense<0.000000e+00> : vector<64xf32>
    %196 = vector.multi_reduction <add>, %192, %cst_75 [1] : vector<64x8xf32> to vector<64xf32>
    %197 = vector.shape_cast %196 : vector<64xf32> to vector<64x1xf32>
    %cst_76 = arith.constant dense<0.000000e+00> : vector<1xf32>
    %198 = vector.multi_reduction <add>, %197, %cst_76 [0] : vector<64x1xf32> to vector<1xf32>
    %199 = vector.shape_cast %198 : vector<1xf32> to vector<1x1xf32>
    %200 = arith.addf %29, %199 : vector<1x1xf32>
    %c408 = arith.constant 408 : index
    %c0_77 = arith.constant 0 : index
    %201 = vector.load %arg2[%c408, %c0_77] : memref<1968x64xf32, #tpu.memory_space<vmem>>, vector<8x16xf32>
    %cst_78 = arith.constant dense<0.000000e+00> : vector<64x16xf32>
    %202 = tpu.matmul %38, %201, %cst_78 {dimension_numbers = #tpu.dot_dimension_numbers<[1], [0], [0], [1], [0, 0, 1, 1], [], []>} : vector<64x8xf32>, vector<8x16xf32>, vector<64x16xf32> -> vector<64x16xf32>
    %c416 = arith.constant 416 : index
    %c0_79 = arith.constant 0 : index
    %203 = vector.load %arg2[%c416, %c0_79] : memref<1968x64xf32, #tpu.memory_space<vmem>>, vector<8x16xf32>
    %cst_80 = arith.constant dense<0.000000e+00> : vector<64x16xf32>
    %204 = tpu.matmul %195, %203, %cst_80 {dimension_numbers = #tpu.dot_dimension_numbers<[1], [0], [0], [1], [0, 0, 1, 1], [], []>} : vector<64x8xf32>, vector<8x16xf32>, vector<64x16xf32> -> vector<64x16xf32>
    %205 = arith.addf %202, %204 : vector<64x16xf32>
    %c1948 = arith.constant 1948 : index
    %c0_81 = arith.constant 0 : index
    %206 = vector.load %arg2[%c1948, %c0_81] : memref<1968x64xf32, #tpu.memory_space<vmem>>, vector<1x16xf32>
    %207 = vector.broadcast %206 : vector<1x16xf32> to vector<64x16xf32>
    %208 = arith.addf %205, %207 : vector<64x16xf32>
    %209 = vector.extract_strided_slice %208 {offsets = [0, 0], sizes = [64, 8], strides = [1, 1]} : vector<64x16xf32> to vector<64x8xf32>
    %210 = vector.extract_strided_slice %208 {offsets = [0, 8], sizes = [64, 8], strides = [1, 1]} : vector<64x16xf32> to vector<64x8xf32>
    %c1949 = arith.constant 1949 : index
    %c0_82 = arith.constant 0 : index
    %211 = vector.load %arg2[%c1949, %c0_82] : memref<1968x64xf32, #tpu.memory_space<vmem>>, vector<1x32xf32>
    %cst_83 = arith.constant 0.000000e+00 : f32
    %212 = vector.broadcast %cst_83 : f32 to vector<9x8xf32>
    %213 = vector.extract_strided_slice %209 {offsets = [0, 0], sizes = [55, 8], strides = [1, 1]} : vector<64x8xf32> to vector<55x8xf32>
    %214 = tpu.concatenate %212, %213 in 0 : vector<9x8xf32>, vector<55x8xf32> -> vector<64x8xf32>
    %215 = vector.broadcast %20 : vector<64x1xf32> to vector<64x8xf32>
    %216 = arith.mulf %214, %215 : vector<64x8xf32>
    %c424 = arith.constant 424 : index
    %c0_84 = arith.constant 0 : index
    %217 = vector.load %arg2[%c424, %c0_84] : memref<1968x64xf32, #tpu.memory_space<vmem>>, vector<8x32xf32>
    %cst_85 = arith.constant dense<0.000000e+00> : vector<64x32xf32>
    %218 = tpu.matmul %216, %217, %cst_85 {dimension_numbers = #tpu.dot_dimension_numbers<[1], [0], [0], [1], [0, 0, 1, 1], [], []>} : vector<64x8xf32>, vector<8x32xf32>, vector<64x32xf32> -> vector<64x32xf32>
    %219 = vector.broadcast %211 : vector<1x32xf32> to vector<64x32xf32>
    %220 = arith.addf %219, %218 : vector<64x32xf32>
    %cst_86 = arith.constant 0.000000e+00 : f32
    %221 = vector.broadcast %cst_86 : f32 to vector<8x8xf32>
    %222 = vector.extract_strided_slice %209 {offsets = [0, 0], sizes = [56, 8], strides = [1, 1]} : vector<64x8xf32> to vector<56x8xf32>
    %223 = tpu.concatenate %221, %222 in 0 : vector<8x8xf32>, vector<56x8xf32> -> vector<64x8xf32>
    %c432 = arith.constant 432 : index
    %c0_87 = arith.constant 0 : index
    %224 = vector.load %arg2[%c432, %c0_87] : memref<1968x64xf32, #tpu.memory_space<vmem>>, vector<8x32xf32>
    %cst_88 = arith.constant dense<0.000000e+00> : vector<64x32xf32>
    %225 = tpu.matmul %223, %224, %cst_88 {dimension_numbers = #tpu.dot_dimension_numbers<[1], [0], [0], [1], [0, 0, 1, 1], [], []>} : vector<64x8xf32>, vector<8x32xf32>, vector<64x32xf32> -> vector<64x32xf32>
    %226 = arith.addf %220, %225 : vector<64x32xf32>
    %cst_89 = arith.constant 0.000000e+00 : f32
    %227 = vector.broadcast %cst_89 : f32 to vector<7x8xf32>
    %228 = vector.extract_strided_slice %209 {offsets = [0, 0], sizes = [57, 8], strides = [1, 1]} : vector<64x8xf32> to vector<57x8xf32>
    %229 = tpu.concatenate %227, %228 in 0 : vector<7x8xf32>, vector<57x8xf32> -> vector<64x8xf32>
    %230 = vector.broadcast %24 : vector<64x1xf32> to vector<64x8xf32>
    %231 = arith.mulf %229, %230 : vector<64x8xf32>
    %c440 = arith.constant 440 : index
    %c0_90 = arith.constant 0 : index
    %232 = vector.load %arg2[%c440, %c0_90] : memref<1968x64xf32, #tpu.memory_space<vmem>>, vector<8x32xf32>
    %cst_91 = arith.constant dense<0.000000e+00> : vector<64x32xf32>
    %233 = tpu.matmul %231, %232, %cst_91 {dimension_numbers = #tpu.dot_dimension_numbers<[1], [0], [0], [1], [0, 0, 1, 1], [], []>} : vector<64x8xf32>, vector<8x32xf32>, vector<64x32xf32> -> vector<64x32xf32>
    %234 = arith.addf %226, %233 : vector<64x32xf32>
    %cst_92 = arith.constant 0.000000e+00 : f32
    %235 = vector.broadcast %cst_92 : f32 to vector<1x8xf32>
    %236 = vector.extract_strided_slice %209 {offsets = [0, 0], sizes = [63, 8], strides = [1, 1]} : vector<64x8xf32> to vector<63x8xf32>
    %237 = tpu.concatenate %235, %236 in 0 : vector<1x8xf32>, vector<63x8xf32> -> vector<64x8xf32>
    %238 = vector.broadcast %20 : vector<64x1xf32> to vector<64x8xf32>
    %239 = arith.mulf %237, %238 : vector<64x8xf32>
    %c448 = arith.constant 448 : index
    %c0_93 = arith.constant 0 : index
    %240 = vector.load %arg2[%c448, %c0_93] : memref<1968x64xf32, #tpu.memory_space<vmem>>, vector<8x32xf32>
    %cst_94 = arith.constant dense<0.000000e+00> : vector<64x32xf32>
    %241 = tpu.matmul %239, %240, %cst_94 {dimension_numbers = #tpu.dot_dimension_numbers<[1], [0], [0], [1], [0, 0, 1, 1], [], []>} : vector<64x8xf32>, vector<8x32xf32>, vector<64x32xf32> -> vector<64x32xf32>
    %242 = arith.addf %234, %241 : vector<64x32xf32>
    %c456 = arith.constant 456 : index
    %c0_95 = arith.constant 0 : index
    %243 = vector.load %arg2[%c456, %c0_95] : memref<1968x64xf32, #tpu.memory_space<vmem>>, vector<8x32xf32>
    %cst_96 = arith.constant dense<0.000000e+00> : vector<64x32xf32>
    %244 = tpu.matmul %209, %243, %cst_96 {dimension_numbers = #tpu.dot_dimension_numbers<[1], [0], [0], [1], [0, 0, 1, 1], [], []>} : vector<64x8xf32>, vector<8x32xf32>, vector<64x32xf32> -> vector<64x32xf32>
    %245 = arith.addf %242, %244 : vector<64x32xf32>
    %cst_97 = arith.constant 0.000000e+00 : f32
    %246 = vector.broadcast %cst_97 : f32 to vector<1x8xf32>
    %247 = vector.extract_strided_slice %209 {offsets = [1, 0], sizes = [63, 8], strides = [1, 1]} : vector<64x8xf32> to vector<63x8xf32>
    %248 = tpu.concatenate %247, %246 in 0 : vector<63x8xf32>, vector<1x8xf32> -> vector<64x8xf32>
    %249 = vector.broadcast %24 : vector<64x1xf32> to vector<64x8xf32>
    %250 = arith.mulf %248, %249 : vector<64x8xf32>
    %c464 = arith.constant 464 : index
    %c0_98 = arith.constant 0 : index
    %251 = vector.load %arg2[%c464, %c0_98] : memref<1968x64xf32, #tpu.memory_space<vmem>>, vector<8x32xf32>
    %cst_99 = arith.constant dense<0.000000e+00> : vector<64x32xf32>
    %252 = tpu.matmul %250, %251, %cst_99 {dimension_numbers = #tpu.dot_dimension_numbers<[1], [0], [0], [1], [0, 0, 1, 1], [], []>} : vector<64x8xf32>, vector<8x32xf32>, vector<64x32xf32> -> vector<64x32xf32>
    %253 = arith.addf %245, %252 : vector<64x32xf32>
    %cst_100 = arith.constant 0.000000e+00 : f32
    %254 = vector.broadcast %cst_100 : f32 to vector<7x8xf32>
    %255 = vector.extract_strided_slice %209 {offsets = [7, 0], sizes = [57, 8], strides = [1, 1]} : vector<64x8xf32> to vector<57x8xf32>
    %256 = tpu.concatenate %255, %254 in 0 : vector<57x8xf32>, vector<7x8xf32> -> vector<64x8xf32>
    %257 = vector.broadcast %20 : vector<64x1xf32> to vector<64x8xf32>
    %258 = arith.mulf %256, %257 : vector<64x8xf32>
    %c472 = arith.constant 472 : index
    %c0_101 = arith.constant 0 : index
    %259 = vector.load %arg2[%c472, %c0_101] : memref<1968x64xf32, #tpu.memory_space<vmem>>, vector<8x32xf32>
    %cst_102 = arith.constant dense<0.000000e+00> : vector<64x32xf32>
    %260 = tpu.matmul %258, %259, %cst_102 {dimension_numbers = #tpu.dot_dimension_numbers<[1], [0], [0], [1], [0, 0, 1, 1], [], []>} : vector<64x8xf32>, vector<8x32xf32>, vector<64x32xf32> -> vector<64x32xf32>
    %261 = arith.addf %253, %260 : vector<64x32xf32>
    %cst_103 = arith.constant 0.000000e+00 : f32
    %262 = vector.broadcast %cst_103 : f32 to vector<8x8xf32>
    %263 = vector.extract_strided_slice %209 {offsets = [8, 0], sizes = [56, 8], strides = [1, 1]} : vector<64x8xf32> to vector<56x8xf32>
    %264 = tpu.concatenate %263, %262 in 0 : vector<56x8xf32>, vector<8x8xf32> -> vector<64x8xf32>
    %c480 = arith.constant 480 : index
    %c0_104 = arith.constant 0 : index
    %265 = vector.load %arg2[%c480, %c0_104] : memref<1968x64xf32, #tpu.memory_space<vmem>>, vector<8x32xf32>
    %cst_105 = arith.constant dense<0.000000e+00> : vector<64x32xf32>
    %266 = tpu.matmul %264, %265, %cst_105 {dimension_numbers = #tpu.dot_dimension_numbers<[1], [0], [0], [1], [0, 0, 1, 1], [], []>} : vector<64x8xf32>, vector<8x32xf32>, vector<64x32xf32> -> vector<64x32xf32>
    %267 = arith.addf %261, %266 : vector<64x32xf32>
    %cst_106 = arith.constant 0.000000e+00 : f32
    %268 = vector.broadcast %cst_106 : f32 to vector<9x8xf32>
    %269 = vector.extract_strided_slice %209 {offsets = [9, 0], sizes = [55, 8], strides = [1, 1]} : vector<64x8xf32> to vector<55x8xf32>
    %270 = tpu.concatenate %269, %268 in 0 : vector<55x8xf32>, vector<9x8xf32> -> vector<64x8xf32>
    %271 = vector.broadcast %24 : vector<64x1xf32> to vector<64x8xf32>
    %272 = arith.mulf %270, %271 : vector<64x8xf32>
    %c488 = arith.constant 488 : index
    %c0_107 = arith.constant 0 : index
    %273 = vector.load %arg2[%c488, %c0_107] : memref<1968x64xf32, #tpu.memory_space<vmem>>, vector<8x32xf32>
    %cst_108 = arith.constant dense<0.000000e+00> : vector<64x32xf32>
    %274 = tpu.matmul %272, %273, %cst_108 {dimension_numbers = #tpu.dot_dimension_numbers<[1], [0], [0], [1], [0, 0, 1, 1], [], []>} : vector<64x8xf32>, vector<8x32xf32>, vector<64x32xf32> -> vector<64x32xf32>
    %275 = arith.addf %267, %274 : vector<64x32xf32>
    %cst_109 = arith.constant 0.000000e+00 : f32
    %276 = vector.broadcast %cst_109 : f32 to vector<64x32xf32>
    %277 = arith.maximumf %275, %276 : vector<64x32xf32>
    %c496 = arith.constant 496 : index
    %c0_110 = arith.constant 0 : index
    %278 = vector.load %arg2[%c496, %c0_110] : memref<1968x64xf32, #tpu.memory_space<vmem>>, vector<32x32xf32>
    %cst_111 = arith.constant dense<0.000000e+00> : vector<64x32xf32>
    %279 = tpu.matmul %277, %278, %cst_111 {dimension_numbers = #tpu.dot_dimension_numbers<[1], [0], [0], [1], [0, 0, 1, 1], [], []>} : vector<64x32xf32>, vector<32x32xf32>, vector<64x32xf32> -> vector<64x32xf32>
    %c1950 = arith.constant 1950 : index
    %c0_112 = arith.constant 0 : index
    %280 = vector.load %arg2[%c1950, %c0_112] : memref<1968x64xf32, #tpu.memory_space<vmem>>, vector<1x32xf32>
    %281 = vector.broadcast %280 : vector<1x32xf32> to vector<64x32xf32>
    %282 = arith.addf %279, %281 : vector<64x32xf32>
    %cst_113 = arith.constant 0.000000e+00 : f32
    %283 = vector.broadcast %cst_113 : f32 to vector<64x32xf32>
    %284 = arith.maximumf %282, %283 : vector<64x32xf32>
    %c1951 = arith.constant 1951 : index
    %c0_114 = arith.constant 0 : index
    %285 = vector.load %arg2[%c1951, %c0_114] : memref<1968x64xf32, #tpu.memory_space<vmem>>, vector<1x16xf32>
    %cst_115 = arith.constant 0.000000e+00 : f32
    %286 = vector.broadcast %cst_115 : f32 to vector<9x32xf32>
    %287 = vector.extract_strided_slice %284 {offsets = [0, 0], sizes = [55, 32], strides = [1, 1]} : vector<64x32xf32> to vector<55x32xf32>
    %288 = tpu.concatenate %286, %287 in 0 : vector<9x32xf32>, vector<55x32xf32> -> vector<64x32xf32>
    %289 = vector.broadcast %20 : vector<64x1xf32> to vector<64x32xf32>
    %290 = arith.mulf %288, %289 : vector<64x32xf32>
    %c528 = arith.constant 528 : index
    %c0_116 = arith.constant 0 : index
    %291 = vector.load %arg2[%c528, %c0_116] : memref<1968x64xf32, #tpu.memory_space<vmem>>, vector<32x16xf32>
    %cst_117 = arith.constant dense<0.000000e+00> : vector<64x16xf32>
    %292 = tpu.matmul %290, %291, %cst_117 {dimension_numbers = #tpu.dot_dimension_numbers<[1], [0], [0], [1], [0, 0, 1, 1], [], []>} : vector<64x32xf32>, vector<32x16xf32>, vector<64x16xf32> -> vector<64x16xf32>
    %293 = vector.broadcast %285 : vector<1x16xf32> to vector<64x16xf32>
    %294 = arith.addf %293, %292 : vector<64x16xf32>
    %cst_118 = arith.constant 0.000000e+00 : f32
    %295 = vector.broadcast %cst_118 : f32 to vector<8x32xf32>
    %296 = vector.extract_strided_slice %284 {offsets = [0, 0], sizes = [56, 32], strides = [1, 1]} : vector<64x32xf32> to vector<56x32xf32>
    %297 = tpu.concatenate %295, %296 in 0 : vector<8x32xf32>, vector<56x32xf32> -> vector<64x32xf32>
    %c560 = arith.constant 560 : index
    %c0_119 = arith.constant 0 : index
    %298 = vector.load %arg2[%c560, %c0_119] : memref<1968x64xf32, #tpu.memory_space<vmem>>, vector<32x16xf32>
    %cst_120 = arith.constant dense<0.000000e+00> : vector<64x16xf32>
    %299 = tpu.matmul %297, %298, %cst_120 {dimension_numbers = #tpu.dot_dimension_numbers<[1], [0], [0], [1], [0, 0, 1, 1], [], []>} : vector<64x32xf32>, vector<32x16xf32>, vector<64x16xf32> -> vector<64x16xf32>
    %300 = arith.addf %294, %299 : vector<64x16xf32>
    %cst_121 = arith.constant 0.000000e+00 : f32
    %301 = vector.broadcast %cst_121 : f32 to vector<7x32xf32>
    %302 = vector.extract_strided_slice %284 {offsets = [0, 0], sizes = [57, 32], strides = [1, 1]} : vector<64x32xf32> to vector<57x32xf32>
    %303 = tpu.concatenate %301, %302 in 0 : vector<7x32xf32>, vector<57x32xf32> -> vector<64x32xf32>
    %304 = vector.broadcast %24 : vector<64x1xf32> to vector<64x32xf32>
    %305 = arith.mulf %303, %304 : vector<64x32xf32>
    %c592 = arith.constant 592 : index
    %c0_122 = arith.constant 0 : index
    %306 = vector.load %arg2[%c592, %c0_122] : memref<1968x64xf32, #tpu.memory_space<vmem>>, vector<32x16xf32>
    %cst_123 = arith.constant dense<0.000000e+00> : vector<64x16xf32>
    %307 = tpu.matmul %305, %306, %cst_123 {dimension_numbers = #tpu.dot_dimension_numbers<[1], [0], [0], [1], [0, 0, 1, 1], [], []>} : vector<64x32xf32>, vector<32x16xf32>, vector<64x16xf32> -> vector<64x16xf32>
    %308 = arith.addf %300, %307 : vector<64x16xf32>
    %cst_124 = arith.constant 0.000000e+00 : f32
    %309 = vector.broadcast %cst_124 : f32 to vector<1x32xf32>
    %310 = vector.extract_strided_slice %284 {offsets = [0, 0], sizes = [63, 32], strides = [1, 1]} : vector<64x32xf32> to vector<63x32xf32>
    %311 = tpu.concatenate %309, %310 in 0 : vector<1x32xf32>, vector<63x32xf32> -> vector<64x32xf32>
    %312 = vector.broadcast %20 : vector<64x1xf32> to vector<64x32xf32>
    %313 = arith.mulf %311, %312 : vector<64x32xf32>
    %c624 = arith.constant 624 : index
    %c0_125 = arith.constant 0 : index
    %314 = vector.load %arg2[%c624, %c0_125] : memref<1968x64xf32, #tpu.memory_space<vmem>>, vector<32x16xf32>
    %cst_126 = arith.constant dense<0.000000e+00> : vector<64x16xf32>
    %315 = tpu.matmul %313, %314, %cst_126 {dimension_numbers = #tpu.dot_dimension_numbers<[1], [0], [0], [1], [0, 0, 1, 1], [], []>} : vector<64x32xf32>, vector<32x16xf32>, vector<64x16xf32> -> vector<64x16xf32>
    %316 = arith.addf %308, %315 : vector<64x16xf32>
    %c656 = arith.constant 656 : index
    %c0_127 = arith.constant 0 : index
    %317 = vector.load %arg2[%c656, %c0_127] : memref<1968x64xf32, #tpu.memory_space<vmem>>, vector<32x16xf32>
    %cst_128 = arith.constant dense<0.000000e+00> : vector<64x16xf32>
    %318 = tpu.matmul %284, %317, %cst_128 {dimension_numbers = #tpu.dot_dimension_numbers<[1], [0], [0], [1], [0, 0, 1, 1], [], []>} : vector<64x32xf32>, vector<32x16xf32>, vector<64x16xf32> -> vector<64x16xf32>
    %319 = arith.addf %316, %318 : vector<64x16xf32>
    %cst_129 = arith.constant 0.000000e+00 : f32
    %320 = vector.broadcast %cst_129 : f32 to vector<1x32xf32>
    %321 = vector.extract_strided_slice %284 {offsets = [1, 0], sizes = [63, 32], strides = [1, 1]} : vector<64x32xf32> to vector<63x32xf32>
    %322 = tpu.concatenate %321, %320 in 0 : vector<63x32xf32>, vector<1x32xf32> -> vector<64x32xf32>
    %323 = vector.broadcast %24 : vector<64x1xf32> to vector<64x32xf32>
    %324 = arith.mulf %322, %323 : vector<64x32xf32>
    %c688 = arith.constant 688 : index
    %c0_130 = arith.constant 0 : index
    %325 = vector.load %arg2[%c688, %c0_130] : memref<1968x64xf32, #tpu.memory_space<vmem>>, vector<32x16xf32>
    %cst_131 = arith.constant dense<0.000000e+00> : vector<64x16xf32>
    %326 = tpu.matmul %324, %325, %cst_131 {dimension_numbers = #tpu.dot_dimension_numbers<[1], [0], [0], [1], [0, 0, 1, 1], [], []>} : vector<64x32xf32>, vector<32x16xf32>, vector<64x16xf32> -> vector<64x16xf32>
    %327 = arith.addf %319, %326 : vector<64x16xf32>
    %cst_132 = arith.constant 0.000000e+00 : f32
    %328 = vector.broadcast %cst_132 : f32 to vector<7x32xf32>
    %329 = vector.extract_strided_slice %284 {offsets = [7, 0], sizes = [57, 32], strides = [1, 1]} : vector<64x32xf32> to vector<57x32xf32>
    %330 = tpu.concatenate %329, %328 in 0 : vector<57x32xf32>, vector<7x32xf32> -> vector<64x32xf32>
    %331 = vector.broadcast %20 : vector<64x1xf32> to vector<64x32xf32>
    %332 = arith.mulf %330, %331 : vector<64x32xf32>
    %c720 = arith.constant 720 : index
    %c0_133 = arith.constant 0 : index
    %333 = vector.load %arg2[%c720, %c0_133] : memref<1968x64xf32, #tpu.memory_space<vmem>>, vector<32x16xf32>
    %cst_134 = arith.constant dense<0.000000e+00> : vector<64x16xf32>
    %334 = tpu.matmul %332, %333, %cst_134 {dimension_numbers = #tpu.dot_dimension_numbers<[1], [0], [0], [1], [0, 0, 1, 1], [], []>} : vector<64x32xf32>, vector<32x16xf32>, vector<64x16xf32> -> vector<64x16xf32>
    %335 = arith.addf %327, %334 : vector<64x16xf32>
    %cst_135 = arith.constant 0.000000e+00 : f32
    %336 = vector.broadcast %cst_135 : f32 to vector<8x32xf32>
    %337 = vector.extract_strided_slice %284 {offsets = [8, 0], sizes = [56, 32], strides = [1, 1]} : vector<64x32xf32> to vector<56x32xf32>
    %338 = tpu.concatenate %337, %336 in 0 : vector<56x32xf32>, vector<8x32xf32> -> vector<64x32xf32>
    %c752 = arith.constant 752 : index
    %c0_136 = arith.constant 0 : index
    %339 = vector.load %arg2[%c752, %c0_136] : memref<1968x64xf32, #tpu.memory_space<vmem>>, vector<32x16xf32>
    %cst_137 = arith.constant dense<0.000000e+00> : vector<64x16xf32>
    %340 = tpu.matmul %338, %339, %cst_137 {dimension_numbers = #tpu.dot_dimension_numbers<[1], [0], [0], [1], [0, 0, 1, 1], [], []>} : vector<64x32xf32>, vector<32x16xf32>, vector<64x16xf32> -> vector<64x16xf32>
    %341 = arith.addf %335, %340 : vector<64x16xf32>
    %cst_138 = arith.constant 0.000000e+00 : f32
    %342 = vector.broadcast %cst_138 : f32 to vector<9x32xf32>
    %343 = vector.extract_strided_slice %284 {offsets = [9, 0], sizes = [55, 32], strides = [1, 1]} : vector<64x32xf32> to vector<55x32xf32>
    %344 = tpu.concatenate %343, %342 in 0 : vector<55x32xf32>, vector<9x32xf32> -> vector<64x32xf32>
    %345 = vector.broadcast %24 : vector<64x1xf32> to vector<64x32xf32>
    %346 = arith.mulf %344, %345 : vector<64x32xf32>
    %c784 = arith.constant 784 : index
    %c0_139 = arith.constant 0 : index
    %347 = vector.load %arg2[%c784, %c0_139] : memref<1968x64xf32, #tpu.memory_space<vmem>>, vector<32x16xf32>
    %cst_140 = arith.constant dense<0.000000e+00> : vector<64x16xf32>
    %348 = tpu.matmul %346, %347, %cst_140 {dimension_numbers = #tpu.dot_dimension_numbers<[1], [0], [0], [1], [0, 0, 1, 1], [], []>} : vector<64x32xf32>, vector<32x16xf32>, vector<64x16xf32> -> vector<64x16xf32>
    %349 = arith.addf %341, %348 : vector<64x16xf32>
    %350 = vector.extract_strided_slice %349 {offsets = [0, 0], sizes = [64, 8], strides = [1, 1]} : vector<64x16xf32> to vector<64x8xf32>
    %351 = vector.extract_strided_slice %349 {offsets = [0, 8], sizes = [64, 8], strides = [1, 1]} : vector<64x16xf32> to vector<64x8xf32>
    %cst_141 = arith.constant 2.000000e+00 : f32
    %352 = vector.broadcast %cst_141 : f32 to vector<64x8xf32>
    %353 = arith.addf %351, %352 : vector<64x8xf32>
    %cst_142 = arith.constant 0.000000e+00 : f32
    %354 = vector.broadcast %cst_142 : f32 to vector<64x8xf32>
    %355 = arith.minimumf %353, %354 : vector<64x8xf32>
    %356 = math.absf %353 : vector<64x8xf32>
    %cst_143 = arith.constant 0.000000e+00 : f32
    %357 = vector.broadcast %cst_143 : f32 to vector<64x8xf32>
    %358 = arith.subf %357, %356 : vector<64x8xf32>
    %359 = math.exp %358 : vector<64x8xf32>
    %cst_144 = arith.constant 1.000000e+00 : f32
    %360 = vector.broadcast %cst_144 : f32 to vector<64x8xf32>
    %361 = arith.addf %360, %359 : vector<64x8xf32>
    %362 = math.log %361 : vector<64x8xf32>
    %363 = arith.subf %355, %362 : vector<64x8xf32>
    %364 = arith.addf %210, %350 : vector<64x8xf32>
    %365 = math.exp %363 : vector<64x8xf32>
    %366 = arith.mulf %364, %365 : vector<64x8xf32>
    %cst_145 = arith.constant dense<0.000000e+00> : vector<64xf32>
    %367 = vector.multi_reduction <add>, %363, %cst_145 [1] : vector<64x8xf32> to vector<64xf32>
    %368 = vector.shape_cast %367 : vector<64xf32> to vector<64x1xf32>
    %cst_146 = arith.constant dense<0.000000e+00> : vector<1xf32>
    %369 = vector.multi_reduction <add>, %368, %cst_146 [0] : vector<64x1xf32> to vector<1xf32>
    %370 = vector.shape_cast %369 : vector<1xf32> to vector<1x1xf32>
    %371 = arith.addf %200, %370 : vector<1x1xf32>
    %c1952 = arith.constant 1952 : index
    %c0_147 = arith.constant 0 : index
    %372 = vector.load %arg2[%c1952, %c0_147] : memref<1968x64xf32, #tpu.memory_space<vmem>>, vector<1x16xf32>
    %cst_148 = arith.constant 0.000000e+00 : f32
    %373 = vector.broadcast %cst_148 : f32 to vector<9x8xf32>
    %374 = vector.extract_strided_slice %209 {offsets = [0, 0], sizes = [55, 8], strides = [1, 1]} : vector<64x8xf32> to vector<55x8xf32>
    %375 = tpu.concatenate %373, %374 in 0 : vector<9x8xf32>, vector<55x8xf32> -> vector<64x8xf32>
    %376 = vector.broadcast %20 : vector<64x1xf32> to vector<64x8xf32>
    %377 = arith.mulf %375, %376 : vector<64x8xf32>
    %c816 = arith.constant 816 : index
    %c0_149 = arith.constant 0 : index
    %378 = vector.load %arg2[%c816, %c0_149] : memref<1968x64xf32, #tpu.memory_space<vmem>>, vector<8x16xf32>
    %cst_150 = arith.constant dense<0.000000e+00> : vector<64x16xf32>
    %379 = tpu.matmul %377, %378, %cst_150 {dimension_numbers = #tpu.dot_dimension_numbers<[1], [0], [0], [1], [0, 0, 1, 1], [], []>} : vector<64x8xf32>, vector<8x16xf32>, vector<64x16xf32> -> vector<64x16xf32>
    %380 = vector.broadcast %372 : vector<1x16xf32> to vector<64x16xf32>
    %381 = arith.addf %380, %379 : vector<64x16xf32>
    %cst_151 = arith.constant 0.000000e+00 : f32
    %382 = vector.broadcast %cst_151 : f32 to vector<8x8xf32>
    %383 = vector.extract_strided_slice %209 {offsets = [0, 0], sizes = [56, 8], strides = [1, 1]} : vector<64x8xf32> to vector<56x8xf32>
    %384 = tpu.concatenate %382, %383 in 0 : vector<8x8xf32>, vector<56x8xf32> -> vector<64x8xf32>
    %c824 = arith.constant 824 : index
    %c0_152 = arith.constant 0 : index
    %385 = vector.load %arg2[%c824, %c0_152] : memref<1968x64xf32, #tpu.memory_space<vmem>>, vector<8x16xf32>
    %cst_153 = arith.constant dense<0.000000e+00> : vector<64x16xf32>
    %386 = tpu.matmul %384, %385, %cst_153 {dimension_numbers = #tpu.dot_dimension_numbers<[1], [0], [0], [1], [0, 0, 1, 1], [], []>} : vector<64x8xf32>, vector<8x16xf32>, vector<64x16xf32> -> vector<64x16xf32>
    %387 = arith.addf %381, %386 : vector<64x16xf32>
    %cst_154 = arith.constant 0.000000e+00 : f32
    %388 = vector.broadcast %cst_154 : f32 to vector<7x8xf32>
    %389 = vector.extract_strided_slice %209 {offsets = [0, 0], sizes = [57, 8], strides = [1, 1]} : vector<64x8xf32> to vector<57x8xf32>
    %390 = tpu.concatenate %388, %389 in 0 : vector<7x8xf32>, vector<57x8xf32> -> vector<64x8xf32>
    %391 = vector.broadcast %24 : vector<64x1xf32> to vector<64x8xf32>
    %392 = arith.mulf %390, %391 : vector<64x8xf32>
    %c832 = arith.constant 832 : index
    %c0_155 = arith.constant 0 : index
    %393 = vector.load %arg2[%c832, %c0_155] : memref<1968x64xf32, #tpu.memory_space<vmem>>, vector<8x16xf32>
    %cst_156 = arith.constant dense<0.000000e+00> : vector<64x16xf32>
    %394 = tpu.matmul %392, %393, %cst_156 {dimension_numbers = #tpu.dot_dimension_numbers<[1], [0], [0], [1], [0, 0, 1, 1], [], []>} : vector<64x8xf32>, vector<8x16xf32>, vector<64x16xf32> -> vector<64x16xf32>
    %395 = arith.addf %387, %394 : vector<64x16xf32>
    %cst_157 = arith.constant 0.000000e+00 : f32
    %396 = vector.broadcast %cst_157 : f32 to vector<1x8xf32>
    %397 = vector.extract_strided_slice %209 {offsets = [0, 0], sizes = [63, 8], strides = [1, 1]} : vector<64x8xf32> to vector<63x8xf32>
    %398 = tpu.concatenate %396, %397 in 0 : vector<1x8xf32>, vector<63x8xf32> -> vector<64x8xf32>
    %399 = vector.broadcast %20 : vector<64x1xf32> to vector<64x8xf32>
    %400 = arith.mulf %398, %399 : vector<64x8xf32>
    %c840 = arith.constant 840 : index
    %c0_158 = arith.constant 0 : index
    %401 = vector.load %arg2[%c840, %c0_158] : memref<1968x64xf32, #tpu.memory_space<vmem>>, vector<8x16xf32>
    %cst_159 = arith.constant dense<0.000000e+00> : vector<64x16xf32>
    %402 = tpu.matmul %400, %401, %cst_159 {dimension_numbers = #tpu.dot_dimension_numbers<[1], [0], [0], [1], [0, 0, 1, 1], [], []>} : vector<64x8xf32>, vector<8x16xf32>, vector<64x16xf32> -> vector<64x16xf32>
    %403 = arith.addf %395, %402 : vector<64x16xf32>
    %c848 = arith.constant 848 : index
    %c0_160 = arith.constant 0 : index
    %404 = vector.load %arg2[%c848, %c0_160] : memref<1968x64xf32, #tpu.memory_space<vmem>>, vector<8x16xf32>
    %cst_161 = arith.constant dense<0.000000e+00> : vector<64x16xf32>
    %405 = tpu.matmul %209, %404, %cst_161 {dimension_numbers = #tpu.dot_dimension_numbers<[1], [0], [0], [1], [0, 0, 1, 1], [], []>} : vector<64x8xf32>, vector<8x16xf32>, vector<64x16xf32> -> vector<64x16xf32>
    %406 = arith.addf %403, %405 : vector<64x16xf32>
    %cst_162 = arith.constant 0.000000e+00 : f32
    %407 = vector.broadcast %cst_162 : f32 to vector<1x8xf32>
    %408 = vector.extract_strided_slice %209 {offsets = [1, 0], sizes = [63, 8], strides = [1, 1]} : vector<64x8xf32> to vector<63x8xf32>
    %409 = tpu.concatenate %408, %407 in 0 : vector<63x8xf32>, vector<1x8xf32> -> vector<64x8xf32>
    %410 = vector.broadcast %24 : vector<64x1xf32> to vector<64x8xf32>
    %411 = arith.mulf %409, %410 : vector<64x8xf32>
    %c856 = arith.constant 856 : index
    %c0_163 = arith.constant 0 : index
    %412 = vector.load %arg2[%c856, %c0_163] : memref<1968x64xf32, #tpu.memory_space<vmem>>, vector<8x16xf32>
    %cst_164 = arith.constant dense<0.000000e+00> : vector<64x16xf32>
    %413 = tpu.matmul %411, %412, %cst_164 {dimension_numbers = #tpu.dot_dimension_numbers<[1], [0], [0], [1], [0, 0, 1, 1], [], []>} : vector<64x8xf32>, vector<8x16xf32>, vector<64x16xf32> -> vector<64x16xf32>
    %414 = arith.addf %406, %413 : vector<64x16xf32>
    %cst_165 = arith.constant 0.000000e+00 : f32
    %415 = vector.broadcast %cst_165 : f32 to vector<7x8xf32>
    %416 = vector.extract_strided_slice %209 {offsets = [7, 0], sizes = [57, 8], strides = [1, 1]} : vector<64x8xf32> to vector<57x8xf32>
    %417 = tpu.concatenate %416, %415 in 0 : vector<57x8xf32>, vector<7x8xf32> -> vector<64x8xf32>
    %418 = vector.broadcast %20 : vector<64x1xf32> to vector<64x8xf32>
    %419 = arith.mulf %417, %418 : vector<64x8xf32>
    %c864 = arith.constant 864 : index
    %c0_166 = arith.constant 0 : index
    %420 = vector.load %arg2[%c864, %c0_166] : memref<1968x64xf32, #tpu.memory_space<vmem>>, vector<8x16xf32>
    %cst_167 = arith.constant dense<0.000000e+00> : vector<64x16xf32>
    %421 = tpu.matmul %419, %420, %cst_167 {dimension_numbers = #tpu.dot_dimension_numbers<[1], [0], [0], [1], [0, 0, 1, 1], [], []>} : vector<64x8xf32>, vector<8x16xf32>, vector<64x16xf32> -> vector<64x16xf32>
    %422 = arith.addf %414, %421 : vector<64x16xf32>
    %cst_168 = arith.constant 0.000000e+00 : f32
    %423 = vector.broadcast %cst_168 : f32 to vector<8x8xf32>
    %424 = vector.extract_strided_slice %209 {offsets = [8, 0], sizes = [56, 8], strides = [1, 1]} : vector<64x8xf32> to vector<56x8xf32>
    %425 = tpu.concatenate %424, %423 in 0 : vector<56x8xf32>, vector<8x8xf32> -> vector<64x8xf32>
    %c872 = arith.constant 872 : index
    %c0_169 = arith.constant 0 : index
    %426 = vector.load %arg2[%c872, %c0_169] : memref<1968x64xf32, #tpu.memory_space<vmem>>, vector<8x16xf32>
    %cst_170 = arith.constant dense<0.000000e+00> : vector<64x16xf32>
    %427 = tpu.matmul %425, %426, %cst_170 {dimension_numbers = #tpu.dot_dimension_numbers<[1], [0], [0], [1], [0, 0, 1, 1], [], []>} : vector<64x8xf32>, vector<8x16xf32>, vector<64x16xf32> -> vector<64x16xf32>
    %428 = arith.addf %422, %427 : vector<64x16xf32>
    %cst_171 = arith.constant 0.000000e+00 : f32
    %429 = vector.broadcast %cst_171 : f32 to vector<9x8xf32>
    %430 = vector.extract_strided_slice %209 {offsets = [9, 0], sizes = [55, 8], strides = [1, 1]} : vector<64x8xf32> to vector<55x8xf32>
    %431 = tpu.concatenate %430, %429 in 0 : vector<55x8xf32>, vector<9x8xf32> -> vector<64x8xf32>
    %432 = vector.broadcast %24 : vector<64x1xf32> to vector<64x8xf32>
    %433 = arith.mulf %431, %432 : vector<64x8xf32>
    %c880 = arith.constant 880 : index
    %c0_172 = arith.constant 0 : index
    %434 = vector.load %arg2[%c880, %c0_172] : memref<1968x64xf32, #tpu.memory_space<vmem>>, vector<8x16xf32>
    %cst_173 = arith.constant dense<0.000000e+00> : vector<64x16xf32>
    %435 = tpu.matmul %433, %434, %cst_173 {dimension_numbers = #tpu.dot_dimension_numbers<[1], [0], [0], [1], [0, 0, 1, 1], [], []>} : vector<64x8xf32>, vector<8x16xf32>, vector<64x16xf32> -> vector<64x16xf32>
    %436 = arith.addf %428, %435 : vector<64x16xf32>
    %437 = vector.extract_strided_slice %436 {offsets = [0, 0], sizes = [64, 8], strides = [1, 1]} : vector<64x16xf32> to vector<64x8xf32>
    %438 = vector.extract_strided_slice %436 {offsets = [0, 8], sizes = [64, 8], strides = [1, 1]} : vector<64x16xf32> to vector<64x8xf32>
    %439 = arith.subf %366, %437 : vector<64x8xf32>
    %cst_174 = arith.constant 2.000000e+00 : f32
    %440 = vector.broadcast %cst_174 : f32 to vector<64x8xf32>
    %441 = arith.mulf %440, %438 : vector<64x8xf32>
    %442 = arith.mulf %439, %439 : vector<64x8xf32>
    %cst_175 = arith.constant -2.000000e+00 : f32
    %443 = vector.broadcast %cst_175 : f32 to vector<64x8xf32>
    %444 = arith.mulf %443, %438 : vector<64x8xf32>
    %445 = math.exp %444 : vector<64x8xf32>
    %446 = arith.mulf %442, %445 : vector<64x8xf32>
    %447 = arith.addf %441, %446 : vector<64x8xf32>
    %cst_176 = arith.constant 1.83787704 : f32
    %448 = vector.broadcast %cst_176 : f32 to vector<64x8xf32>
    %449 = arith.addf %447, %448 : vector<64x8xf32>
    %cst_177 = arith.constant -5.000000e-01 : f32
    %450 = vector.broadcast %cst_177 : f32 to vector<64x8xf32>
    %451 = arith.mulf %450, %449 : vector<64x8xf32>
    %cst_178 = arith.constant dense<0.000000e+00> : vector<64xf32>
    %452 = vector.multi_reduction <add>, %451, %cst_178 [1] : vector<64x8xf32> to vector<64xf32>
    %453 = vector.shape_cast %452 : vector<64xf32> to vector<64x1xf32>
    %cst_179 = arith.constant dense<0.000000e+00> : vector<1xf32>
    %454 = vector.multi_reduction <add>, %453, %cst_179 [0] : vector<64x1xf32> to vector<1xf32>
    %455 = vector.shape_cast %454 : vector<1xf32> to vector<1x1xf32>
    %456 = arith.addf %371, %455 : vector<1x1xf32>
    %c888 = arith.constant 888 : index
    %c0_180 = arith.constant 0 : index
    %457 = vector.load %arg2[%c888, %c0_180] : memref<1968x64xf32, #tpu.memory_space<vmem>>, vector<64x64xf32>
    %cst_181 = arith.constant dense<0.000000e+00> : vector<64x8xf32>
    %458 = tpu.matmul %457, %209, %cst_181 {dimension_numbers = #tpu.dot_dimension_numbers<[1], [0], [0], [1], [0, 0, 1, 1], [], []>} : vector<64x64xf32>, vector<64x8xf32>, vector<64x8xf32> -> vector<64x8xf32>
    %459 = tpu.iota {dimensions = array<i32: 0>} : vector<16x1xi32>
    %c4_i32 = arith.constant 4 : i32
    %c0_i32_182 = arith.constant 0 : i32
    %460 = arith.cmpi eq, %c4_i32, %c0_i32_182 : i32
    %c1_i32_183 = arith.constant 1 : i32
    %461 = arith.select %460, %c1_i32_183, %c4_i32 : i32
    %462 = vector.broadcast %461 : i32 to vector<16x1xi32>
    %463 = arith.remsi %459, %462 : vector<16x1xi32>
    %c0_i32_184 = arith.constant 0 : i32
    %464 = vector.broadcast %c0_i32_184 : i32 to vector<16x1xi32>
    %465 = arith.cmpi ne, %463, %464 : vector<16x1xi32>
    %c0_i32_185 = arith.constant 0 : i32
    %466 = vector.broadcast %c0_i32_185 : i32 to vector<16x1xi32>
    %467 = arith.cmpi slt, %463, %466 : vector<16x1xi32>
    %c0_i32_186 = arith.constant 0 : i32
    %468 = arith.cmpi slt, %461, %c0_i32_186 : i32
    %469 = vector.broadcast %468 : i1 to vector<16x1xi1>
    %470 = vector.broadcast %469 : vector<16x1xi1> to vector<16x1xi1>
    %471 = arith.xori %467, %470 : vector<16x1xi1>
    %472 = arith.andi %471, %465 : vector<16x1xi1>
    %473 = vector.broadcast %461 : i32 to vector<16x1xi32>
    %474 = arith.addi %463, %473 : vector<16x1xi32>
    %475 = arith.select %472, %474, %463 : vector<16x1xi1>, vector<16x1xi32>
    %c1_i32_187 = arith.constant 1 : i32
    %476 = vector.broadcast %c1_i32_187 : i32 to vector<16x1xi32>
    %477 = arith.cmpi sge, %475, %476 : vector<16x1xi32>
    %478 = arith.extui %477 : vector<16x1xi1> to vector<16x1xi32>
    %479 = arith.sitofp %478 : vector<16x1xi32> to vector<16x1xf32>
    %c2_i32 = arith.constant 2 : i32
    %480 = vector.broadcast %c2_i32 : i32 to vector<16x1xi32>
    %481 = arith.cmpi sle, %475, %480 : vector<16x1xi32>
    %482 = arith.extui %481 : vector<16x1xi1> to vector<16x1xi32>
    %483 = arith.sitofp %482 : vector<16x1xi32> to vector<16x1xf32>
    %c1953 = arith.constant 1953 : index
    %c0_188 = arith.constant 0 : index
    %484 = vector.load %arg2[%c1953, %c0_188] : memref<1968x64xf32, #tpu.memory_space<vmem>>, vector<1x32xf32>
    %485 = vector.extract_strided_slice %458 {offsets = [0, 0], sizes = [16, 8], strides = [1, 1]} : vector<64x8xf32> to vector<16x8xf32>
    %c952 = arith.constant 952 : index
    %c0_189 = arith.constant 0 : index
    %486 = vector.load %arg2[%c952, %c0_189] : memref<1968x64xf32, #tpu.memory_space<vmem>>, vector<8x32xf32>
    %cst_190 = arith.constant dense<0.000000e+00> : vector<16x32xf32>
    %487 = tpu.matmul %485, %486, %cst_190 {dimension_numbers = #tpu.dot_dimension_numbers<[1], [0], [0], [1], [0, 0, 1, 1], [], []>} : vector<16x8xf32>, vector<8x32xf32>, vector<16x32xf32> -> vector<16x32xf32>
    %488 = vector.broadcast %484 : vector<1x32xf32> to vector<16x32xf32>
    %489 = arith.addf %488, %487 : vector<16x32xf32>
    %490 = vector.extract_strided_slice %458 {offsets = [16, 0], sizes = [16, 8], strides = [1, 1]} : vector<64x8xf32> to vector<16x8xf32>
    %c960 = arith.constant 960 : index
    %c0_191 = arith.constant 0 : index
    %491 = vector.load %arg2[%c960, %c0_191] : memref<1968x64xf32, #tpu.memory_space<vmem>>, vector<8x32xf32>
    %cst_192 = arith.constant dense<0.000000e+00> : vector<16x32xf32>
    %492 = tpu.matmul %490, %491, %cst_192 {dimension_numbers = #tpu.dot_dimension_numbers<[1], [0], [0], [1], [0, 0, 1, 1], [], []>} : vector<16x8xf32>, vector<8x32xf32>, vector<16x32xf32> -> vector<16x32xf32>
    %493 = arith.addf %489, %492 : vector<16x32xf32>
    %494 = vector.extract_strided_slice %458 {offsets = [32, 0], sizes = [16, 8], strides = [1, 1]} : vector<64x8xf32> to vector<16x8xf32>
    %c968 = arith.constant 968 : index
    %c0_193 = arith.constant 0 : index
    %495 = vector.load %arg2[%c968, %c0_193] : memref<1968x64xf32, #tpu.memory_space<vmem>>, vector<8x32xf32>
    %cst_194 = arith.constant dense<0.000000e+00> : vector<16x32xf32>
    %496 = tpu.matmul %494, %495, %cst_194 {dimension_numbers = #tpu.dot_dimension_numbers<[1], [0], [0], [1], [0, 0, 1, 1], [], []>} : vector<16x8xf32>, vector<8x32xf32>, vector<16x32xf32> -> vector<16x32xf32>
    %497 = arith.addf %493, %496 : vector<16x32xf32>
    %498 = vector.extract_strided_slice %458 {offsets = [48, 0], sizes = [16, 8], strides = [1, 1]} : vector<64x8xf32> to vector<16x8xf32>
    %c976 = arith.constant 976 : index
    %c0_195 = arith.constant 0 : index
    %499 = vector.load %arg2[%c976, %c0_195] : memref<1968x64xf32, #tpu.memory_space<vmem>>, vector<8x32xf32>
    %cst_196 = arith.constant dense<0.000000e+00> : vector<16x32xf32>
    %500 = tpu.matmul %498, %499, %cst_196 {dimension_numbers = #tpu.dot_dimension_numbers<[1], [0], [0], [1], [0, 0, 1, 1], [], []>} : vector<16x8xf32>, vector<8x32xf32>, vector<16x32xf32> -> vector<16x32xf32>
    %501 = arith.addf %497, %500 : vector<16x32xf32>
    %502 = vector.extract_strided_slice %501 {offsets = [0, 0], sizes = [16, 16], strides = [1, 1]} : vector<16x32xf32> to vector<16x16xf32>
    %503 = vector.extract_strided_slice %501 {offsets = [0, 16], sizes = [16, 16], strides = [1, 1]} : vector<16x32xf32> to vector<16x16xf32>
    %c1954 = arith.constant 1954 : index
    %c0_197 = arith.constant 0 : index
    %504 = vector.load %arg2[%c1954, %c0_197] : memref<1968x64xf32, #tpu.memory_space<vmem>>, vector<1x32xf32>
    %cst_198 = arith.constant 0.000000e+00 : f32
    %505 = vector.broadcast %cst_198 : f32 to vector<5x16xf32>
    %506 = vector.extract_strided_slice %502 {offsets = [0, 0], sizes = [11, 16], strides = [1, 1]} : vector<16x16xf32> to vector<11x16xf32>
    %507 = tpu.concatenate %505, %506 in 0 : vector<5x16xf32>, vector<11x16xf32> -> vector<16x16xf32>
    %508 = vector.broadcast %479 : vector<16x1xf32> to vector<16x16xf32>
    %509 = arith.mulf %507, %508 : vector<16x16xf32>
    %c984 = arith.constant 984 : index
    %c0_199 = arith.constant 0 : index
    %510 = vector.load %arg2[%c984, %c0_199] : memref<1968x64xf32, #tpu.memory_space<vmem>>, vector<16x32xf32>
    %cst_200 = arith.constant dense<0.000000e+00> : vector<16x32xf32>
    %511 = tpu.matmul %509, %510, %cst_200 {dimension_numbers = #tpu.dot_dimension_numbers<[1], [0], [0], [1], [0, 0, 1, 1], [], []>} : vector<16x16xf32>, vector<16x32xf32>, vector<16x32xf32> -> vector<16x32xf32>
    %512 = vector.broadcast %504 : vector<1x32xf32> to vector<16x32xf32>
    %513 = arith.addf %512, %511 : vector<16x32xf32>
    %cst_201 = arith.constant 0.000000e+00 : f32
    %514 = vector.broadcast %cst_201 : f32 to vector<4x16xf32>
    %515 = vector.extract_strided_slice %502 {offsets = [0, 0], sizes = [12, 16], strides = [1, 1]} : vector<16x16xf32> to vector<12x16xf32>
    %516 = tpu.concatenate %514, %515 in 0 : vector<4x16xf32>, vector<12x16xf32> -> vector<16x16xf32>
    %c1000 = arith.constant 1000 : index
    %c0_202 = arith.constant 0 : index
    %517 = vector.load %arg2[%c1000, %c0_202] : memref<1968x64xf32, #tpu.memory_space<vmem>>, vector<16x32xf32>
    %cst_203 = arith.constant dense<0.000000e+00> : vector<16x32xf32>
    %518 = tpu.matmul %516, %517, %cst_203 {dimension_numbers = #tpu.dot_dimension_numbers<[1], [0], [0], [1], [0, 0, 1, 1], [], []>} : vector<16x16xf32>, vector<16x32xf32>, vector<16x32xf32> -> vector<16x32xf32>
    %519 = arith.addf %513, %518 : vector<16x32xf32>
    %cst_204 = arith.constant 0.000000e+00 : f32
    %520 = vector.broadcast %cst_204 : f32 to vector<3x16xf32>
    %521 = vector.extract_strided_slice %502 {offsets = [0, 0], sizes = [13, 16], strides = [1, 1]} : vector<16x16xf32> to vector<13x16xf32>
    %522 = tpu.concatenate %520, %521 in 0 : vector<3x16xf32>, vector<13x16xf32> -> vector<16x16xf32>
    %523 = vector.broadcast %483 : vector<16x1xf32> to vector<16x16xf32>
    %524 = arith.mulf %522, %523 : vector<16x16xf32>
    %c1016 = arith.constant 1016 : index
    %c0_205 = arith.constant 0 : index
    %525 = vector.load %arg2[%c1016, %c0_205] : memref<1968x64xf32, #tpu.memory_space<vmem>>, vector<16x32xf32>
    %cst_206 = arith.constant dense<0.000000e+00> : vector<16x32xf32>
    %526 = tpu.matmul %524, %525, %cst_206 {dimension_numbers = #tpu.dot_dimension_numbers<[1], [0], [0], [1], [0, 0, 1, 1], [], []>} : vector<16x16xf32>, vector<16x32xf32>, vector<16x32xf32> -> vector<16x32xf32>
    %527 = arith.addf %519, %526 : vector<16x32xf32>
    %cst_207 = arith.constant 0.000000e+00 : f32
    %528 = vector.broadcast %cst_207 : f32 to vector<1x16xf32>
    %529 = vector.extract_strided_slice %502 {offsets = [0, 0], sizes = [15, 16], strides = [1, 1]} : vector<16x16xf32> to vector<15x16xf32>
    %530 = tpu.concatenate %528, %529 in 0 : vector<1x16xf32>, vector<15x16xf32> -> vector<16x16xf32>
    %531 = vector.broadcast %479 : vector<16x1xf32> to vector<16x16xf32>
    %532 = arith.mulf %530, %531 : vector<16x16xf32>
    %c1032 = arith.constant 1032 : index
    %c0_208 = arith.constant 0 : index
    %533 = vector.load %arg2[%c1032, %c0_208] : memref<1968x64xf32, #tpu.memory_space<vmem>>, vector<16x32xf32>
    %cst_209 = arith.constant dense<0.000000e+00> : vector<16x32xf32>
    %534 = tpu.matmul %532, %533, %cst_209 {dimension_numbers = #tpu.dot_dimension_numbers<[1], [0], [0], [1], [0, 0, 1, 1], [], []>} : vector<16x16xf32>, vector<16x32xf32>, vector<16x32xf32> -> vector<16x32xf32>
    %535 = arith.addf %527, %534 : vector<16x32xf32>
    %c1048 = arith.constant 1048 : index
    %c0_210 = arith.constant 0 : index
    %536 = vector.load %arg2[%c1048, %c0_210] : memref<1968x64xf32, #tpu.memory_space<vmem>>, vector<16x32xf32>
    %cst_211 = arith.constant dense<0.000000e+00> : vector<16x32xf32>
    %537 = tpu.matmul %502, %536, %cst_211 {dimension_numbers = #tpu.dot_dimension_numbers<[1], [0], [0], [1], [0, 0, 1, 1], [], []>} : vector<16x16xf32>, vector<16x32xf32>, vector<16x32xf32> -> vector<16x32xf32>
    %538 = arith.addf %535, %537 : vector<16x32xf32>
    %cst_212 = arith.constant 0.000000e+00 : f32
    %539 = vector.broadcast %cst_212 : f32 to vector<1x16xf32>
    %540 = vector.extract_strided_slice %502 {offsets = [1, 0], sizes = [15, 16], strides = [1, 1]} : vector<16x16xf32> to vector<15x16xf32>
    %541 = tpu.concatenate %540, %539 in 0 : vector<15x16xf32>, vector<1x16xf32> -> vector<16x16xf32>
    %542 = vector.broadcast %483 : vector<16x1xf32> to vector<16x16xf32>
    %543 = arith.mulf %541, %542 : vector<16x16xf32>
    %c1064 = arith.constant 1064 : index
    %c0_213 = arith.constant 0 : index
    %544 = vector.load %arg2[%c1064, %c0_213] : memref<1968x64xf32, #tpu.memory_space<vmem>>, vector<16x32xf32>
    %cst_214 = arith.constant dense<0.000000e+00> : vector<16x32xf32>
    %545 = tpu.matmul %543, %544, %cst_214 {dimension_numbers = #tpu.dot_dimension_numbers<[1], [0], [0], [1], [0, 0, 1, 1], [], []>} : vector<16x16xf32>, vector<16x32xf32>, vector<16x32xf32> -> vector<16x32xf32>
    %546 = arith.addf %538, %545 : vector<16x32xf32>
    %cst_215 = arith.constant 0.000000e+00 : f32
    %547 = vector.broadcast %cst_215 : f32 to vector<3x16xf32>
    %548 = vector.extract_strided_slice %502 {offsets = [3, 0], sizes = [13, 16], strides = [1, 1]} : vector<16x16xf32> to vector<13x16xf32>
    %549 = tpu.concatenate %548, %547 in 0 : vector<13x16xf32>, vector<3x16xf32> -> vector<16x16xf32>
    %550 = vector.broadcast %479 : vector<16x1xf32> to vector<16x16xf32>
    %551 = arith.mulf %549, %550 : vector<16x16xf32>
    %c1080 = arith.constant 1080 : index
    %c0_216 = arith.constant 0 : index
    %552 = vector.load %arg2[%c1080, %c0_216] : memref<1968x64xf32, #tpu.memory_space<vmem>>, vector<16x32xf32>
    %cst_217 = arith.constant dense<0.000000e+00> : vector<16x32xf32>
    %553 = tpu.matmul %551, %552, %cst_217 {dimension_numbers = #tpu.dot_dimension_numbers<[1], [0], [0], [1], [0, 0, 1, 1], [], []>} : vector<16x16xf32>, vector<16x32xf32>, vector<16x32xf32> -> vector<16x32xf32>
    %554 = arith.addf %546, %553 : vector<16x32xf32>
    %cst_218 = arith.constant 0.000000e+00 : f32
    %555 = vector.broadcast %cst_218 : f32 to vector<4x16xf32>
    %556 = vector.extract_strided_slice %502 {offsets = [4, 0], sizes = [12, 16], strides = [1, 1]} : vector<16x16xf32> to vector<12x16xf32>
    %557 = tpu.concatenate %556, %555 in 0 : vector<12x16xf32>, vector<4x16xf32> -> vector<16x16xf32>
    %c1096 = arith.constant 1096 : index
    %c0_219 = arith.constant 0 : index
    %558 = vector.load %arg2[%c1096, %c0_219] : memref<1968x64xf32, #tpu.memory_space<vmem>>, vector<16x32xf32>
    %cst_220 = arith.constant dense<0.000000e+00> : vector<16x32xf32>
    %559 = tpu.matmul %557, %558, %cst_220 {dimension_numbers = #tpu.dot_dimension_numbers<[1], [0], [0], [1], [0, 0, 1, 1], [], []>} : vector<16x16xf32>, vector<16x32xf32>, vector<16x32xf32> -> vector<16x32xf32>
    %560 = arith.addf %554, %559 : vector<16x32xf32>
    %cst_221 = arith.constant 0.000000e+00 : f32
    %561 = vector.broadcast %cst_221 : f32 to vector<5x16xf32>
    %562 = vector.extract_strided_slice %502 {offsets = [5, 0], sizes = [11, 16], strides = [1, 1]} : vector<16x16xf32> to vector<11x16xf32>
    %563 = tpu.concatenate %562, %561 in 0 : vector<11x16xf32>, vector<5x16xf32> -> vector<16x16xf32>
    %564 = vector.broadcast %483 : vector<16x1xf32> to vector<16x16xf32>
    %565 = arith.mulf %563, %564 : vector<16x16xf32>
    %c1112 = arith.constant 1112 : index
    %c0_222 = arith.constant 0 : index
    %566 = vector.load %arg2[%c1112, %c0_222] : memref<1968x64xf32, #tpu.memory_space<vmem>>, vector<16x32xf32>
    %cst_223 = arith.constant dense<0.000000e+00> : vector<16x32xf32>
    %567 = tpu.matmul %565, %566, %cst_223 {dimension_numbers = #tpu.dot_dimension_numbers<[1], [0], [0], [1], [0, 0, 1, 1], [], []>} : vector<16x16xf32>, vector<16x32xf32>, vector<16x32xf32> -> vector<16x32xf32>
    %568 = arith.addf %560, %567 : vector<16x32xf32>
    %cst_224 = arith.constant 0.000000e+00 : f32
    %569 = vector.broadcast %cst_224 : f32 to vector<16x32xf32>
    %570 = arith.maximumf %568, %569 : vector<16x32xf32>
    %c1128 = arith.constant 1128 : index
    %c0_225 = arith.constant 0 : index
    %571 = vector.load %arg2[%c1128, %c0_225] : memref<1968x64xf32, #tpu.memory_space<vmem>>, vector<32x32xf32>
    %cst_226 = arith.constant dense<0.000000e+00> : vector<16x32xf32>
    %572 = tpu.matmul %570, %571, %cst_226 {dimension_numbers = #tpu.dot_dimension_numbers<[1], [0], [0], [1], [0, 0, 1, 1], [], []>} : vector<16x32xf32>, vector<32x32xf32>, vector<16x32xf32> -> vector<16x32xf32>
    %c1955 = arith.constant 1955 : index
    %c0_227 = arith.constant 0 : index
    %573 = vector.load %arg2[%c1955, %c0_227] : memref<1968x64xf32, #tpu.memory_space<vmem>>, vector<1x32xf32>
    %574 = vector.broadcast %573 : vector<1x32xf32> to vector<16x32xf32>
    %575 = arith.addf %572, %574 : vector<16x32xf32>
    %cst_228 = arith.constant 0.000000e+00 : f32
    %576 = vector.broadcast %cst_228 : f32 to vector<16x32xf32>
    %577 = arith.maximumf %575, %576 : vector<16x32xf32>
    %c1956 = arith.constant 1956 : index
    %c0_229 = arith.constant 0 : index
    %578 = vector.load %arg2[%c1956, %c0_229] : memref<1968x64xf32, #tpu.memory_space<vmem>>, vector<1x32xf32>
    %cst_230 = arith.constant 0.000000e+00 : f32
    %579 = vector.broadcast %cst_230 : f32 to vector<5x32xf32>
    %580 = vector.extract_strided_slice %577 {offsets = [0, 0], sizes = [11, 32], strides = [1, 1]} : vector<16x32xf32> to vector<11x32xf32>
    %581 = tpu.concatenate %579, %580 in 0 : vector<5x32xf32>, vector<11x32xf32> -> vector<16x32xf32>
    %582 = vector.broadcast %479 : vector<16x1xf32> to vector<16x32xf32>
    %583 = arith.mulf %581, %582 : vector<16x32xf32>
    %c1160 = arith.constant 1160 : index
    %c0_231 = arith.constant 0 : index
    %584 = vector.load %arg2[%c1160, %c0_231] : memref<1968x64xf32, #tpu.memory_space<vmem>>, vector<32x32xf32>
    %cst_232 = arith.constant dense<0.000000e+00> : vector<16x32xf32>
    %585 = tpu.matmul %583, %584, %cst_232 {dimension_numbers = #tpu.dot_dimension_numbers<[1], [0], [0], [1], [0, 0, 1, 1], [], []>} : vector<16x32xf32>, vector<32x32xf32>, vector<16x32xf32> -> vector<16x32xf32>
    %586 = vector.broadcast %578 : vector<1x32xf32> to vector<16x32xf32>
    %587 = arith.addf %586, %585 : vector<16x32xf32>
    %cst_233 = arith.constant 0.000000e+00 : f32
    %588 = vector.broadcast %cst_233 : f32 to vector<4x32xf32>
    %589 = vector.extract_strided_slice %577 {offsets = [0, 0], sizes = [12, 32], strides = [1, 1]} : vector<16x32xf32> to vector<12x32xf32>
    %590 = tpu.concatenate %588, %589 in 0 : vector<4x32xf32>, vector<12x32xf32> -> vector<16x32xf32>
    %c1192 = arith.constant 1192 : index
    %c0_234 = arith.constant 0 : index
    %591 = vector.load %arg2[%c1192, %c0_234] : memref<1968x64xf32, #tpu.memory_space<vmem>>, vector<32x32xf32>
    %cst_235 = arith.constant dense<0.000000e+00> : vector<16x32xf32>
    %592 = tpu.matmul %590, %591, %cst_235 {dimension_numbers = #tpu.dot_dimension_numbers<[1], [0], [0], [1], [0, 0, 1, 1], [], []>} : vector<16x32xf32>, vector<32x32xf32>, vector<16x32xf32> -> vector<16x32xf32>
    %593 = arith.addf %587, %592 : vector<16x32xf32>
    %cst_236 = arith.constant 0.000000e+00 : f32
    %594 = vector.broadcast %cst_236 : f32 to vector<3x32xf32>
    %595 = vector.extract_strided_slice %577 {offsets = [0, 0], sizes = [13, 32], strides = [1, 1]} : vector<16x32xf32> to vector<13x32xf32>
    %596 = tpu.concatenate %594, %595 in 0 : vector<3x32xf32>, vector<13x32xf32> -> vector<16x32xf32>
    %597 = vector.broadcast %483 : vector<16x1xf32> to vector<16x32xf32>
    %598 = arith.mulf %596, %597 : vector<16x32xf32>
    %c1224 = arith.constant 1224 : index
    %c0_237 = arith.constant 0 : index
    %599 = vector.load %arg2[%c1224, %c0_237] : memref<1968x64xf32, #tpu.memory_space<vmem>>, vector<32x32xf32>
    %cst_238 = arith.constant dense<0.000000e+00> : vector<16x32xf32>
    %600 = tpu.matmul %598, %599, %cst_238 {dimension_numbers = #tpu.dot_dimension_numbers<[1], [0], [0], [1], [0, 0, 1, 1], [], []>} : vector<16x32xf32>, vector<32x32xf32>, vector<16x32xf32> -> vector<16x32xf32>
    %601 = arith.addf %593, %600 : vector<16x32xf32>
    %cst_239 = arith.constant 0.000000e+00 : f32
    %602 = vector.broadcast %cst_239 : f32 to vector<1x32xf32>
    %603 = vector.extract_strided_slice %577 {offsets = [0, 0], sizes = [15, 32], strides = [1, 1]} : vector<16x32xf32> to vector<15x32xf32>
    %604 = tpu.concatenate %602, %603 in 0 : vector<1x32xf32>, vector<15x32xf32> -> vector<16x32xf32>
    %605 = vector.broadcast %479 : vector<16x1xf32> to vector<16x32xf32>
    %606 = arith.mulf %604, %605 : vector<16x32xf32>
    %c1256 = arith.constant 1256 : index
    %c0_240 = arith.constant 0 : index
    %607 = vector.load %arg2[%c1256, %c0_240] : memref<1968x64xf32, #tpu.memory_space<vmem>>, vector<32x32xf32>
    %cst_241 = arith.constant dense<0.000000e+00> : vector<16x32xf32>
    %608 = tpu.matmul %606, %607, %cst_241 {dimension_numbers = #tpu.dot_dimension_numbers<[1], [0], [0], [1], [0, 0, 1, 1], [], []>} : vector<16x32xf32>, vector<32x32xf32>, vector<16x32xf32> -> vector<16x32xf32>
    %609 = arith.addf %601, %608 : vector<16x32xf32>
    %c1288 = arith.constant 1288 : index
    %c0_242 = arith.constant 0 : index
    %610 = vector.load %arg2[%c1288, %c0_242] : memref<1968x64xf32, #tpu.memory_space<vmem>>, vector<32x32xf32>
    %cst_243 = arith.constant dense<0.000000e+00> : vector<16x32xf32>
    %611 = tpu.matmul %577, %610, %cst_243 {dimension_numbers = #tpu.dot_dimension_numbers<[1], [0], [0], [1], [0, 0, 1, 1], [], []>} : vector<16x32xf32>, vector<32x32xf32>, vector<16x32xf32> -> vector<16x32xf32>
    %612 = arith.addf %609, %611 : vector<16x32xf32>
    %cst_244 = arith.constant 0.000000e+00 : f32
    %613 = vector.broadcast %cst_244 : f32 to vector<1x32xf32>
    %614 = vector.extract_strided_slice %577 {offsets = [1, 0], sizes = [15, 32], strides = [1, 1]} : vector<16x32xf32> to vector<15x32xf32>
    %615 = tpu.concatenate %614, %613 in 0 : vector<15x32xf32>, vector<1x32xf32> -> vector<16x32xf32>
    %616 = vector.broadcast %483 : vector<16x1xf32> to vector<16x32xf32>
    %617 = arith.mulf %615, %616 : vector<16x32xf32>
    %c1320 = arith.constant 1320 : index
    %c0_245 = arith.constant 0 : index
    %618 = vector.load %arg2[%c1320, %c0_245] : memref<1968x64xf32, #tpu.memory_space<vmem>>, vector<32x32xf32>
    %cst_246 = arith.constant dense<0.000000e+00> : vector<16x32xf32>
    %619 = tpu.matmul %617, %618, %cst_246 {dimension_numbers = #tpu.dot_dimension_numbers<[1], [0], [0], [1], [0, 0, 1, 1], [], []>} : vector<16x32xf32>, vector<32x32xf32>, vector<16x32xf32> -> vector<16x32xf32>
    %620 = arith.addf %612, %619 : vector<16x32xf32>
    %cst_247 = arith.constant 0.000000e+00 : f32
    %621 = vector.broadcast %cst_247 : f32 to vector<3x32xf32>
    %622 = vector.extract_strided_slice %577 {offsets = [3, 0], sizes = [13, 32], strides = [1, 1]} : vector<16x32xf32> to vector<13x32xf32>
    %623 = tpu.concatenate %622, %621 in 0 : vector<13x32xf32>, vector<3x32xf32> -> vector<16x32xf32>
    %624 = vector.broadcast %479 : vector<16x1xf32> to vector<16x32xf32>
    %625 = arith.mulf %623, %624 : vector<16x32xf32>
    %c1352 = arith.constant 1352 : index
    %c0_248 = arith.constant 0 : index
    %626 = vector.load %arg2[%c1352, %c0_248] : memref<1968x64xf32, #tpu.memory_space<vmem>>, vector<32x32xf32>
    %cst_249 = arith.constant dense<0.000000e+00> : vector<16x32xf32>
    %627 = tpu.matmul %625, %626, %cst_249 {dimension_numbers = #tpu.dot_dimension_numbers<[1], [0], [0], [1], [0, 0, 1, 1], [], []>} : vector<16x32xf32>, vector<32x32xf32>, vector<16x32xf32> -> vector<16x32xf32>
    %628 = arith.addf %620, %627 : vector<16x32xf32>
    %cst_250 = arith.constant 0.000000e+00 : f32
    %629 = vector.broadcast %cst_250 : f32 to vector<4x32xf32>
    %630 = vector.extract_strided_slice %577 {offsets = [4, 0], sizes = [12, 32], strides = [1, 1]} : vector<16x32xf32> to vector<12x32xf32>
    %631 = tpu.concatenate %630, %629 in 0 : vector<12x32xf32>, vector<4x32xf32> -> vector<16x32xf32>
    %c1384 = arith.constant 1384 : index
    %c0_251 = arith.constant 0 : index
    %632 = vector.load %arg2[%c1384, %c0_251] : memref<1968x64xf32, #tpu.memory_space<vmem>>, vector<32x32xf32>
    %cst_252 = arith.constant dense<0.000000e+00> : vector<16x32xf32>
    %633 = tpu.matmul %631, %632, %cst_252 {dimension_numbers = #tpu.dot_dimension_numbers<[1], [0], [0], [1], [0, 0, 1, 1], [], []>} : vector<16x32xf32>, vector<32x32xf32>, vector<16x32xf32> -> vector<16x32xf32>
    %634 = arith.addf %628, %633 : vector<16x32xf32>
    %cst_253 = arith.constant 0.000000e+00 : f32
    %635 = vector.broadcast %cst_253 : f32 to vector<5x32xf32>
    %636 = vector.extract_strided_slice %577 {offsets = [5, 0], sizes = [11, 32], strides = [1, 1]} : vector<16x32xf32> to vector<11x32xf32>
    %637 = tpu.concatenate %636, %635 in 0 : vector<11x32xf32>, vector<5x32xf32> -> vector<16x32xf32>
    %638 = vector.broadcast %483 : vector<16x1xf32> to vector<16x32xf32>
    %639 = arith.mulf %637, %638 : vector<16x32xf32>
    %c1416 = arith.constant 1416 : index
    %c0_254 = arith.constant 0 : index
    %640 = vector.load %arg2[%c1416, %c0_254] : memref<1968x64xf32, #tpu.memory_space<vmem>>, vector<32x32xf32>
    %cst_255 = arith.constant dense<0.000000e+00> : vector<16x32xf32>
    %641 = tpu.matmul %639, %640, %cst_255 {dimension_numbers = #tpu.dot_dimension_numbers<[1], [0], [0], [1], [0, 0, 1, 1], [], []>} : vector<16x32xf32>, vector<32x32xf32>, vector<16x32xf32> -> vector<16x32xf32>
    %642 = arith.addf %634, %641 : vector<16x32xf32>
    %643 = vector.extract_strided_slice %642 {offsets = [0, 0], sizes = [16, 16], strides = [1, 1]} : vector<16x32xf32> to vector<16x16xf32>
    %644 = vector.extract_strided_slice %642 {offsets = [0, 16], sizes = [16, 16], strides = [1, 1]} : vector<16x32xf32> to vector<16x16xf32>
    %cst_256 = arith.constant 2.000000e+00 : f32
    %645 = vector.broadcast %cst_256 : f32 to vector<16x16xf32>
    %646 = arith.addf %644, %645 : vector<16x16xf32>
    %cst_257 = arith.constant 0.000000e+00 : f32
    %647 = vector.broadcast %cst_257 : f32 to vector<16x16xf32>
    %648 = arith.minimumf %646, %647 : vector<16x16xf32>
    %649 = math.absf %646 : vector<16x16xf32>
    %cst_258 = arith.constant 0.000000e+00 : f32
    %650 = vector.broadcast %cst_258 : f32 to vector<16x16xf32>
    %651 = arith.subf %650, %649 : vector<16x16xf32>
    %652 = math.exp %651 : vector<16x16xf32>
    %cst_259 = arith.constant 1.000000e+00 : f32
    %653 = vector.broadcast %cst_259 : f32 to vector<16x16xf32>
    %654 = arith.addf %653, %652 : vector<16x16xf32>
    %655 = math.log %654 : vector<16x16xf32>
    %656 = arith.subf %648, %655 : vector<16x16xf32>
    %657 = arith.addf %503, %643 : vector<16x16xf32>
    %658 = math.exp %656 : vector<16x16xf32>
    %659 = arith.mulf %657, %658 : vector<16x16xf32>
    %cst_260 = arith.constant dense<0.000000e+00> : vector<16xf32>
    %660 = vector.multi_reduction <add>, %656, %cst_260 [1] : vector<16x16xf32> to vector<16xf32>
    %661 = vector.shape_cast %660 : vector<16xf32> to vector<16x1xf32>
    %cst_261 = arith.constant dense<0.000000e+00> : vector<1xf32>
    %662 = vector.multi_reduction <add>, %661, %cst_261 [0] : vector<16x1xf32> to vector<1xf32>
    %663 = vector.shape_cast %662 : vector<1xf32> to vector<1x1xf32>
    %664 = arith.addf %456, %663 : vector<1x1xf32>
    %c1448 = arith.constant 1448 : index
    %c0_262 = arith.constant 0 : index
    %665 = vector.load %arg2[%c1448, %c0_262] : memref<1968x64xf32, #tpu.memory_space<vmem>>, vector<16x32xf32>
    %cst_263 = arith.constant dense<0.000000e+00> : vector<16x32xf32>
    %666 = tpu.matmul %502, %665, %cst_263 {dimension_numbers = #tpu.dot_dimension_numbers<[1], [0], [0], [1], [0, 0, 1, 1], [], []>} : vector<16x16xf32>, vector<16x32xf32>, vector<16x32xf32> -> vector<16x32xf32>
    %c1464 = arith.constant 1464 : index
    %c0_264 = arith.constant 0 : index
    %667 = vector.load %arg2[%c1464, %c0_264] : memref<1968x64xf32, #tpu.memory_space<vmem>>, vector<16x32xf32>
    %cst_265 = arith.constant dense<0.000000e+00> : vector<16x32xf32>
    %668 = tpu.matmul %659, %667, %cst_265 {dimension_numbers = #tpu.dot_dimension_numbers<[1], [0], [0], [1], [0, 0, 1, 1], [], []>} : vector<16x16xf32>, vector<16x32xf32>, vector<16x32xf32> -> vector<16x32xf32>
    %669 = arith.addf %666, %668 : vector<16x32xf32>
    %c1957 = arith.constant 1957 : index
    %c0_266 = arith.constant 0 : index
    %670 = vector.load %arg2[%c1957, %c0_266] : memref<1968x64xf32, #tpu.memory_space<vmem>>, vector<1x32xf32>
    %671 = vector.broadcast %670 : vector<1x32xf32> to vector<16x32xf32>
    %672 = arith.addf %669, %671 : vector<16x32xf32>
    %673 = vector.extract_strided_slice %672 {offsets = [0, 0], sizes = [16, 16], strides = [1, 1]} : vector<16x32xf32> to vector<16x16xf32>
    %674 = vector.extract_strided_slice %672 {offsets = [0, 16], sizes = [16, 16], strides = [1, 1]} : vector<16x32xf32> to vector<16x16xf32>
    %c1958 = arith.constant 1958 : index
    %c0_267 = arith.constant 0 : index
    %675 = vector.load %arg2[%c1958, %c0_267] : memref<1968x64xf32, #tpu.memory_space<vmem>>, vector<1x32xf32>
    %cst_268 = arith.constant 0.000000e+00 : f32
    %676 = vector.broadcast %cst_268 : f32 to vector<5x16xf32>
    %677 = vector.extract_strided_slice %673 {offsets = [0, 0], sizes = [11, 16], strides = [1, 1]} : vector<16x16xf32> to vector<11x16xf32>
    %678 = tpu.concatenate %676, %677 in 0 : vector<5x16xf32>, vector<11x16xf32> -> vector<16x16xf32>
    %679 = vector.broadcast %479 : vector<16x1xf32> to vector<16x16xf32>
    %680 = arith.mulf %678, %679 : vector<16x16xf32>
    %c1480 = arith.constant 1480 : index
    %c0_269 = arith.constant 0 : index
    %681 = vector.load %arg2[%c1480, %c0_269] : memref<1968x64xf32, #tpu.memory_space<vmem>>, vector<16x32xf32>
    %cst_270 = arith.constant dense<0.000000e+00> : vector<16x32xf32>
    %682 = tpu.matmul %680, %681, %cst_270 {dimension_numbers = #tpu.dot_dimension_numbers<[1], [0], [0], [1], [0, 0, 1, 1], [], []>} : vector<16x16xf32>, vector<16x32xf32>, vector<16x32xf32> -> vector<16x32xf32>
    %683 = vector.broadcast %675 : vector<1x32xf32> to vector<16x32xf32>
    %684 = arith.addf %683, %682 : vector<16x32xf32>
    %cst_271 = arith.constant 0.000000e+00 : f32
    %685 = vector.broadcast %cst_271 : f32 to vector<4x16xf32>
    %686 = vector.extract_strided_slice %673 {offsets = [0, 0], sizes = [12, 16], strides = [1, 1]} : vector<16x16xf32> to vector<12x16xf32>
    %687 = tpu.concatenate %685, %686 in 0 : vector<4x16xf32>, vector<12x16xf32> -> vector<16x16xf32>
    %c1496 = arith.constant 1496 : index
    %c0_272 = arith.constant 0 : index
    %688 = vector.load %arg2[%c1496, %c0_272] : memref<1968x64xf32, #tpu.memory_space<vmem>>, vector<16x32xf32>
    %cst_273 = arith.constant dense<0.000000e+00> : vector<16x32xf32>
    %689 = tpu.matmul %687, %688, %cst_273 {dimension_numbers = #tpu.dot_dimension_numbers<[1], [0], [0], [1], [0, 0, 1, 1], [], []>} : vector<16x16xf32>, vector<16x32xf32>, vector<16x32xf32> -> vector<16x32xf32>
    %690 = arith.addf %684, %689 : vector<16x32xf32>
    %cst_274 = arith.constant 0.000000e+00 : f32
    %691 = vector.broadcast %cst_274 : f32 to vector<3x16xf32>
    %692 = vector.extract_strided_slice %673 {offsets = [0, 0], sizes = [13, 16], strides = [1, 1]} : vector<16x16xf32> to vector<13x16xf32>
    %693 = tpu.concatenate %691, %692 in 0 : vector<3x16xf32>, vector<13x16xf32> -> vector<16x16xf32>
    %694 = vector.broadcast %483 : vector<16x1xf32> to vector<16x16xf32>
    %695 = arith.mulf %693, %694 : vector<16x16xf32>
    %c1512 = arith.constant 1512 : index
    %c0_275 = arith.constant 0 : index
    %696 = vector.load %arg2[%c1512, %c0_275] : memref<1968x64xf32, #tpu.memory_space<vmem>>, vector<16x32xf32>
    %cst_276 = arith.constant dense<0.000000e+00> : vector<16x32xf32>
    %697 = tpu.matmul %695, %696, %cst_276 {dimension_numbers = #tpu.dot_dimension_numbers<[1], [0], [0], [1], [0, 0, 1, 1], [], []>} : vector<16x16xf32>, vector<16x32xf32>, vector<16x32xf32> -> vector<16x32xf32>
    %698 = arith.addf %690, %697 : vector<16x32xf32>
    %cst_277 = arith.constant 0.000000e+00 : f32
    %699 = vector.broadcast %cst_277 : f32 to vector<1x16xf32>
    %700 = vector.extract_strided_slice %673 {offsets = [0, 0], sizes = [15, 16], strides = [1, 1]} : vector<16x16xf32> to vector<15x16xf32>
    %701 = tpu.concatenate %699, %700 in 0 : vector<1x16xf32>, vector<15x16xf32> -> vector<16x16xf32>
    %702 = vector.broadcast %479 : vector<16x1xf32> to vector<16x16xf32>
    %703 = arith.mulf %701, %702 : vector<16x16xf32>
    %c1528 = arith.constant 1528 : index
    %c0_278 = arith.constant 0 : index
    %704 = vector.load %arg2[%c1528, %c0_278] : memref<1968x64xf32, #tpu.memory_space<vmem>>, vector<16x32xf32>
    %cst_279 = arith.constant dense<0.000000e+00> : vector<16x32xf32>
    %705 = tpu.matmul %703, %704, %cst_279 {dimension_numbers = #tpu.dot_dimension_numbers<[1], [0], [0], [1], [0, 0, 1, 1], [], []>} : vector<16x16xf32>, vector<16x32xf32>, vector<16x32xf32> -> vector<16x32xf32>
    %706 = arith.addf %698, %705 : vector<16x32xf32>
    %c1544 = arith.constant 1544 : index
    %c0_280 = arith.constant 0 : index
    %707 = vector.load %arg2[%c1544, %c0_280] : memref<1968x64xf32, #tpu.memory_space<vmem>>, vector<16x32xf32>
    %cst_281 = arith.constant dense<0.000000e+00> : vector<16x32xf32>
    %708 = tpu.matmul %673, %707, %cst_281 {dimension_numbers = #tpu.dot_dimension_numbers<[1], [0], [0], [1], [0, 0, 1, 1], [], []>} : vector<16x16xf32>, vector<16x32xf32>, vector<16x32xf32> -> vector<16x32xf32>
    %709 = arith.addf %706, %708 : vector<16x32xf32>
    %cst_282 = arith.constant 0.000000e+00 : f32
    %710 = vector.broadcast %cst_282 : f32 to vector<1x16xf32>
    %711 = vector.extract_strided_slice %673 {offsets = [1, 0], sizes = [15, 16], strides = [1, 1]} : vector<16x16xf32> to vector<15x16xf32>
    %712 = tpu.concatenate %711, %710 in 0 : vector<15x16xf32>, vector<1x16xf32> -> vector<16x16xf32>
    %713 = vector.broadcast %483 : vector<16x1xf32> to vector<16x16xf32>
    %714 = arith.mulf %712, %713 : vector<16x16xf32>
    %c1560 = arith.constant 1560 : index
    %c0_283 = arith.constant 0 : index
    %715 = vector.load %arg2[%c1560, %c0_283] : memref<1968x64xf32, #tpu.memory_space<vmem>>, vector<16x32xf32>
    %cst_284 = arith.constant dense<0.000000e+00> : vector<16x32xf32>
    %716 = tpu.matmul %714, %715, %cst_284 {dimension_numbers = #tpu.dot_dimension_numbers<[1], [0], [0], [1], [0, 0, 1, 1], [], []>} : vector<16x16xf32>, vector<16x32xf32>, vector<16x32xf32> -> vector<16x32xf32>
    %717 = arith.addf %709, %716 : vector<16x32xf32>
    %cst_285 = arith.constant 0.000000e+00 : f32
    %718 = vector.broadcast %cst_285 : f32 to vector<3x16xf32>
    %719 = vector.extract_strided_slice %673 {offsets = [3, 0], sizes = [13, 16], strides = [1, 1]} : vector<16x16xf32> to vector<13x16xf32>
    %720 = tpu.concatenate %719, %718 in 0 : vector<13x16xf32>, vector<3x16xf32> -> vector<16x16xf32>
    %721 = vector.broadcast %479 : vector<16x1xf32> to vector<16x16xf32>
    %722 = arith.mulf %720, %721 : vector<16x16xf32>
    %c1576 = arith.constant 1576 : index
    %c0_286 = arith.constant 0 : index
    %723 = vector.load %arg2[%c1576, %c0_286] : memref<1968x64xf32, #tpu.memory_space<vmem>>, vector<16x32xf32>
    %cst_287 = arith.constant dense<0.000000e+00> : vector<16x32xf32>
    %724 = tpu.matmul %722, %723, %cst_287 {dimension_numbers = #tpu.dot_dimension_numbers<[1], [0], [0], [1], [0, 0, 1, 1], [], []>} : vector<16x16xf32>, vector<16x32xf32>, vector<16x32xf32> -> vector<16x32xf32>
    %725 = arith.addf %717, %724 : vector<16x32xf32>
    %cst_288 = arith.constant 0.000000e+00 : f32
    %726 = vector.broadcast %cst_288 : f32 to vector<4x16xf32>
    %727 = vector.extract_strided_slice %673 {offsets = [4, 0], sizes = [12, 16], strides = [1, 1]} : vector<16x16xf32> to vector<12x16xf32>
    %728 = tpu.concatenate %727, %726 in 0 : vector<12x16xf32>, vector<4x16xf32> -> vector<16x16xf32>
    %c1592 = arith.constant 1592 : index
    %c0_289 = arith.constant 0 : index
    %729 = vector.load %arg2[%c1592, %c0_289] : memref<1968x64xf32, #tpu.memory_space<vmem>>, vector<16x32xf32>
    %cst_290 = arith.constant dense<0.000000e+00> : vector<16x32xf32>
    %730 = tpu.matmul %728, %729, %cst_290 {dimension_numbers = #tpu.dot_dimension_numbers<[1], [0], [0], [1], [0, 0, 1, 1], [], []>} : vector<16x16xf32>, vector<16x32xf32>, vector<16x32xf32> -> vector<16x32xf32>
    %731 = arith.addf %725, %730 : vector<16x32xf32>
    %cst_291 = arith.constant 0.000000e+00 : f32
    %732 = vector.broadcast %cst_291 : f32 to vector<5x16xf32>
    %733 = vector.extract_strided_slice %673 {offsets = [5, 0], sizes = [11, 16], strides = [1, 1]} : vector<16x16xf32> to vector<11x16xf32>
    %734 = tpu.concatenate %733, %732 in 0 : vector<11x16xf32>, vector<5x16xf32> -> vector<16x16xf32>
    %735 = vector.broadcast %483 : vector<16x1xf32> to vector<16x16xf32>
    %736 = arith.mulf %734, %735 : vector<16x16xf32>
    %c1608 = arith.constant 1608 : index
    %c0_292 = arith.constant 0 : index
    %737 = vector.load %arg2[%c1608, %c0_292] : memref<1968x64xf32, #tpu.memory_space<vmem>>, vector<16x32xf32>
    %cst_293 = arith.constant dense<0.000000e+00> : vector<16x32xf32>
    %738 = tpu.matmul %736, %737, %cst_293 {dimension_numbers = #tpu.dot_dimension_numbers<[1], [0], [0], [1], [0, 0, 1, 1], [], []>} : vector<16x16xf32>, vector<16x32xf32>, vector<16x32xf32> -> vector<16x32xf32>
    %739 = arith.addf %731, %738 : vector<16x32xf32>
    %cst_294 = arith.constant 0.000000e+00 : f32
    %740 = vector.broadcast %cst_294 : f32 to vector<16x32xf32>
    %741 = arith.maximumf %739, %740 : vector<16x32xf32>
    %c1624 = arith.constant 1624 : index
    %c0_295 = arith.constant 0 : index
    %742 = vector.load %arg2[%c1624, %c0_295] : memref<1968x64xf32, #tpu.memory_space<vmem>>, vector<32x32xf32>
    %cst_296 = arith.constant dense<0.000000e+00> : vector<16x32xf32>
    %743 = tpu.matmul %741, %742, %cst_296 {dimension_numbers = #tpu.dot_dimension_numbers<[1], [0], [0], [1], [0, 0, 1, 1], [], []>} : vector<16x32xf32>, vector<32x32xf32>, vector<16x32xf32> -> vector<16x32xf32>
    %c1959 = arith.constant 1959 : index
    %c0_297 = arith.constant 0 : index
    %744 = vector.load %arg2[%c1959, %c0_297] : memref<1968x64xf32, #tpu.memory_space<vmem>>, vector<1x32xf32>
    %745 = vector.broadcast %744 : vector<1x32xf32> to vector<16x32xf32>
    %746 = arith.addf %743, %745 : vector<16x32xf32>
    %cst_298 = arith.constant 0.000000e+00 : f32
    %747 = vector.broadcast %cst_298 : f32 to vector<16x32xf32>
    %748 = arith.maximumf %746, %747 : vector<16x32xf32>
    %c1960 = arith.constant 1960 : index
    %c0_299 = arith.constant 0 : index
    %749 = vector.load %arg2[%c1960, %c0_299] : memref<1968x64xf32, #tpu.memory_space<vmem>>, vector<1x32xf32>
    %cst_300 = arith.constant 0.000000e+00 : f32
    %750 = vector.broadcast %cst_300 : f32 to vector<5x32xf32>
    %751 = vector.extract_strided_slice %748 {offsets = [0, 0], sizes = [11, 32], strides = [1, 1]} : vector<16x32xf32> to vector<11x32xf32>
    %752 = tpu.concatenate %750, %751 in 0 : vector<5x32xf32>, vector<11x32xf32> -> vector<16x32xf32>
    %753 = vector.broadcast %479 : vector<16x1xf32> to vector<16x32xf32>
    %754 = arith.mulf %752, %753 : vector<16x32xf32>
    %c1656 = arith.constant 1656 : index
    %c0_301 = arith.constant 0 : index
    %755 = vector.load %arg2[%c1656, %c0_301] : memref<1968x64xf32, #tpu.memory_space<vmem>>, vector<32x32xf32>
    %cst_302 = arith.constant dense<0.000000e+00> : vector<16x32xf32>
    %756 = tpu.matmul %754, %755, %cst_302 {dimension_numbers = #tpu.dot_dimension_numbers<[1], [0], [0], [1], [0, 0, 1, 1], [], []>} : vector<16x32xf32>, vector<32x32xf32>, vector<16x32xf32> -> vector<16x32xf32>
    %757 = vector.broadcast %749 : vector<1x32xf32> to vector<16x32xf32>
    %758 = arith.addf %757, %756 : vector<16x32xf32>
    %cst_303 = arith.constant 0.000000e+00 : f32
    %759 = vector.broadcast %cst_303 : f32 to vector<4x32xf32>
    %760 = vector.extract_strided_slice %748 {offsets = [0, 0], sizes = [12, 32], strides = [1, 1]} : vector<16x32xf32> to vector<12x32xf32>
    %761 = tpu.concatenate %759, %760 in 0 : vector<4x32xf32>, vector<12x32xf32> -> vector<16x32xf32>
    %c1688 = arith.constant 1688 : index
    %c0_304 = arith.constant 0 : index
    %762 = vector.load %arg2[%c1688, %c0_304] : memref<1968x64xf32, #tpu.memory_space<vmem>>, vector<32x32xf32>
    %cst_305 = arith.constant dense<0.000000e+00> : vector<16x32xf32>
    %763 = tpu.matmul %761, %762, %cst_305 {dimension_numbers = #tpu.dot_dimension_numbers<[1], [0], [0], [1], [0, 0, 1, 1], [], []>} : vector<16x32xf32>, vector<32x32xf32>, vector<16x32xf32> -> vector<16x32xf32>
    %764 = arith.addf %758, %763 : vector<16x32xf32>
    %cst_306 = arith.constant 0.000000e+00 : f32
    %765 = vector.broadcast %cst_306 : f32 to vector<3x32xf32>
    %766 = vector.extract_strided_slice %748 {offsets = [0, 0], sizes = [13, 32], strides = [1, 1]} : vector<16x32xf32> to vector<13x32xf32>
    %767 = tpu.concatenate %765, %766 in 0 : vector<3x32xf32>, vector<13x32xf32> -> vector<16x32xf32>
    %768 = vector.broadcast %483 : vector<16x1xf32> to vector<16x32xf32>
    %769 = arith.mulf %767, %768 : vector<16x32xf32>
    %c1720 = arith.constant 1720 : index
    %c0_307 = arith.constant 0 : index
    %770 = vector.load %arg2[%c1720, %c0_307] : memref<1968x64xf32, #tpu.memory_space<vmem>>, vector<32x32xf32>
    %cst_308 = arith.constant dense<0.000000e+00> : vector<16x32xf32>
    %771 = tpu.matmul %769, %770, %cst_308 {dimension_numbers = #tpu.dot_dimension_numbers<[1], [0], [0], [1], [0, 0, 1, 1], [], []>} : vector<16x32xf32>, vector<32x32xf32>, vector<16x32xf32> -> vector<16x32xf32>
    %772 = arith.addf %764, %771 : vector<16x32xf32>
    %cst_309 = arith.constant 0.000000e+00 : f32
    %773 = vector.broadcast %cst_309 : f32 to vector<1x32xf32>
    %774 = vector.extract_strided_slice %748 {offsets = [0, 0], sizes = [15, 32], strides = [1, 1]} : vector<16x32xf32> to vector<15x32xf32>
    %775 = tpu.concatenate %773, %774 in 0 : vector<1x32xf32>, vector<15x32xf32> -> vector<16x32xf32>
    %776 = vector.broadcast %479 : vector<16x1xf32> to vector<16x32xf32>
    %777 = arith.mulf %775, %776 : vector<16x32xf32>
    %c1752 = arith.constant 1752 : index
    %c0_310 = arith.constant 0 : index
    %778 = vector.load %arg2[%c1752, %c0_310] : memref<1968x64xf32, #tpu.memory_space<vmem>>, vector<32x32xf32>
    %cst_311 = arith.constant dense<0.000000e+00> : vector<16x32xf32>
    %779 = tpu.matmul %777, %778, %cst_311 {dimension_numbers = #tpu.dot_dimension_numbers<[1], [0], [0], [1], [0, 0, 1, 1], [], []>} : vector<16x32xf32>, vector<32x32xf32>, vector<16x32xf32> -> vector<16x32xf32>
    %780 = arith.addf %772, %779 : vector<16x32xf32>
    %c1784 = arith.constant 1784 : index
    %c0_312 = arith.constant 0 : index
    %781 = vector.load %arg2[%c1784, %c0_312] : memref<1968x64xf32, #tpu.memory_space<vmem>>, vector<32x32xf32>
    %cst_313 = arith.constant dense<0.000000e+00> : vector<16x32xf32>
    %782 = tpu.matmul %748, %781, %cst_313 {dimension_numbers = #tpu.dot_dimension_numbers<[1], [0], [0], [1], [0, 0, 1, 1], [], []>} : vector<16x32xf32>, vector<32x32xf32>, vector<16x32xf32> -> vector<16x32xf32>
    %783 = arith.addf %780, %782 : vector<16x32xf32>
    %cst_314 = arith.constant 0.000000e+00 : f32
    %784 = vector.broadcast %cst_314 : f32 to vector<1x32xf32>
    %785 = vector.extract_strided_slice %748 {offsets = [1, 0], sizes = [15, 32], strides = [1, 1]} : vector<16x32xf32> to vector<15x32xf32>
    %786 = tpu.concatenate %785, %784 in 0 : vector<15x32xf32>, vector<1x32xf32> -> vector<16x32xf32>
    %787 = vector.broadcast %483 : vector<16x1xf32> to vector<16x32xf32>
    %788 = arith.mulf %786, %787 : vector<16x32xf32>
    %c1816 = arith.constant 1816 : index
    %c0_315 = arith.constant 0 : index
    %789 = vector.load %arg2[%c1816, %c0_315] : memref<1968x64xf32, #tpu.memory_space<vmem>>, vector<32x32xf32>
    %cst_316 = arith.constant dense<0.000000e+00> : vector<16x32xf32>
    %790 = tpu.matmul %788, %789, %cst_316 {dimension_numbers = #tpu.dot_dimension_numbers<[1], [0], [0], [1], [0, 0, 1, 1], [], []>} : vector<16x32xf32>, vector<32x32xf32>, vector<16x32xf32> -> vector<16x32xf32>
    %791 = arith.addf %783, %790 : vector<16x32xf32>
    %cst_317 = arith.constant 0.000000e+00 : f32
    %792 = vector.broadcast %cst_317 : f32 to vector<3x32xf32>
    %793 = vector.extract_strided_slice %748 {offsets = [3, 0], sizes = [13, 32], strides = [1, 1]} : vector<16x32xf32> to vector<13x32xf32>
    %794 = tpu.concatenate %793, %792 in 0 : vector<13x32xf32>, vector<3x32xf32> -> vector<16x32xf32>
    %795 = vector.broadcast %479 : vector<16x1xf32> to vector<16x32xf32>
    %796 = arith.mulf %794, %795 : vector<16x32xf32>
    %c1848 = arith.constant 1848 : index
    %c0_318 = arith.constant 0 : index
    %797 = vector.load %arg2[%c1848, %c0_318] : memref<1968x64xf32, #tpu.memory_space<vmem>>, vector<32x32xf32>
    %cst_319 = arith.constant dense<0.000000e+00> : vector<16x32xf32>
    %798 = tpu.matmul %796, %797, %cst_319 {dimension_numbers = #tpu.dot_dimension_numbers<[1], [0], [0], [1], [0, 0, 1, 1], [], []>} : vector<16x32xf32>, vector<32x32xf32>, vector<16x32xf32> -> vector<16x32xf32>
    %799 = arith.addf %791, %798 : vector<16x32xf32>
    %cst_320 = arith.constant 0.000000e+00 : f32
    %800 = vector.broadcast %cst_320 : f32 to vector<4x32xf32>
    %801 = vector.extract_strided_slice %748 {offsets = [4, 0], sizes = [12, 32], strides = [1, 1]} : vector<16x32xf32> to vector<12x32xf32>
    %802 = tpu.concatenate %801, %800 in 0 : vector<12x32xf32>, vector<4x32xf32> -> vector<16x32xf32>
    %c1880 = arith.constant 1880 : index
    %c0_321 = arith.constant 0 : index
    %803 = vector.load %arg2[%c1880, %c0_321] : memref<1968x64xf32, #tpu.memory_space<vmem>>, vector<32x32xf32>
    %cst_322 = arith.constant dense<0.000000e+00> : vector<16x32xf32>
    %804 = tpu.matmul %802, %803, %cst_322 {dimension_numbers = #tpu.dot_dimension_numbers<[1], [0], [0], [1], [0, 0, 1, 1], [], []>} : vector<16x32xf32>, vector<32x32xf32>, vector<16x32xf32> -> vector<16x32xf32>
    %805 = arith.addf %799, %804 : vector<16x32xf32>
    %cst_323 = arith.constant 0.000000e+00 : f32
    %806 = vector.broadcast %cst_323 : f32 to vector<5x32xf32>
    %807 = vector.extract_strided_slice %748 {offsets = [5, 0], sizes = [11, 32], strides = [1, 1]} : vector<16x32xf32> to vector<11x32xf32>
    %808 = tpu.concatenate %807, %806 in 0 : vector<11x32xf32>, vector<5x32xf32> -> vector<16x32xf32>
    %809 = vector.broadcast %483 : vector<16x1xf32> to vector<16x32xf32>
    %810 = arith.mulf %808, %809 : vector<16x32xf32>
    %c1912 = arith.constant 1912 : index
    %c0_324 = arith.constant 0 : index
    %811 = vector.load %arg2[%c1912, %c0_324] : memref<1968x64xf32, #tpu.memory_space<vmem>>, vector<32x32xf32>
    %cst_325 = arith.constant dense<0.000000e+00> : vector<16x32xf32>
    %812 = tpu.matmul %810, %811, %cst_325 {dimension_numbers = #tpu.dot_dimension_numbers<[1], [0], [0], [1], [0, 0, 1, 1], [], []>} : vector<16x32xf32>, vector<32x32xf32>, vector<16x32xf32> -> vector<16x32xf32>
    %813 = arith.addf %805, %812 : vector<16x32xf32>
    %814 = vector.extract_strided_slice %813 {offsets = [0, 0], sizes = [16, 16], strides = [1, 1]} : vector<16x32xf32> to vector<16x16xf32>
    %815 = vector.extract_strided_slice %813 {offsets = [0, 16], sizes = [16, 16], strides = [1, 1]} : vector<16x32xf32> to vector<16x16xf32>
    %cst_326 = arith.constant 2.000000e+00 : f32
    %816 = vector.broadcast %cst_326 : f32 to vector<16x16xf32>
    %817 = arith.addf %815, %816 : vector<16x16xf32>
    %cst_327 = arith.constant 0.000000e+00 : f32
    %818 = vector.broadcast %cst_327 : f32 to vector<16x16xf32>
    %819 = arith.minimumf %817, %818 : vector<16x16xf32>
    %820 = math.absf %817 : vector<16x16xf32>
    %cst_328 = arith.constant 0.000000e+00 : f32
    %821 = vector.broadcast %cst_328 : f32 to vector<16x16xf32>
    %822 = arith.subf %821, %820 : vector<16x16xf32>
    %823 = math.exp %822 : vector<16x16xf32>
    %cst_329 = arith.constant 1.000000e+00 : f32
    %824 = vector.broadcast %cst_329 : f32 to vector<16x16xf32>
    %825 = arith.addf %824, %823 : vector<16x16xf32>
    %826 = math.log %825 : vector<16x16xf32>
    %827 = arith.subf %819, %826 : vector<16x16xf32>
    %828 = arith.addf %674, %814 : vector<16x16xf32>
    %829 = math.exp %827 : vector<16x16xf32>
    %830 = arith.mulf %828, %829 : vector<16x16xf32>
    %cst_330 = arith.constant dense<0.000000e+00> : vector<16xf32>
    %831 = vector.multi_reduction <add>, %827, %cst_330 [1] : vector<16x16xf32> to vector<16xf32>
    %832 = vector.shape_cast %831 : vector<16xf32> to vector<16x1xf32>
    %cst_331 = arith.constant dense<0.000000e+00> : vector<1xf32>
    %833 = vector.multi_reduction <add>, %832, %cst_331 [0] : vector<16x1xf32> to vector<1xf32>
    %834 = vector.shape_cast %833 : vector<1xf32> to vector<1x1xf32>
    %835 = arith.addf %664, %834 : vector<1x1xf32>
    %836 = tpu.transpose %673, [1, 0] : vector<16x16xf32> -> vector<16x16xf32>
    %837 = tpu.transpose %830, [1, 0] : vector<16x16xf32> -> vector<16x16xf32>
    %838 = tpu.concatenate %836, %837 in 0 : vector<16x16xf32>, vector<16x16xf32> -> vector<32x16xf32>
    %839 = vector.shape_cast %838 : vector<32x16xf32> to vector<1x32x16xf32>
    %c0_332 = arith.constant 0 : index
    %c0_333 = arith.constant 0 : index
    %c0_334 = arith.constant 0 : index
    %840 = vector.load %arg3[%c0_332, %c0_333, %c0_334] : memref<1x32x16xf32, #tpu.memory_space<vmem>>, vector<1x32x16xf32>
    tpu.vector_store %arg3[%c0_332, %c0_333, %c0_334], %839 {strides = array<i32>} : memref<1x32x16xf32, #tpu.memory_space<vmem>>, vector<1x32x16xf32>,
    %841 = vector.shape_cast %835 : vector<1x1xf32> to vector<1x1x1xf32>
    %c0_335 = arith.constant 0 : index
    %c0_336 = arith.constant 0 : index
    %c0_337 = arith.constant 0 : index
    %842 = vector.load %arg4[%c0_335, %c0_336, %c0_337] : memref<1x1x1xf32, #tpu.memory_space<vmem>>, vector<1x1x1xf32>
    tpu.vector_store %arg4[%c0_335, %c0_336, %c0_337], %841 {strides = array<i32>} : memref<1x1x1xf32, #tpu.memory_space<vmem>>, vector<1x1x1xf32>,
    return
  }
  func.func @transform_0(%arg0: i32) -> (i32, i32, i32) {
    %c0_i32 = arith.constant 0 : i32
    %c0_i32_0 = arith.constant 0 : i32
    %c0_i32_1 = arith.constant 0 : i32
    return %arg0, %c0_i32, %c0_i32_0 : i32, i32, i32
  }
  func.func @transform_1(%arg0: i32) -> (i32, i32) {
    %c0_i32 = arith.constant 0 : i32
    %c0_i32_0 = arith.constant 0 : i32
    %c0_i32_1 = arith.constant 0 : i32
    return %c0_i32, %c0_i32_0 : i32, i32
  }
  func.func @transform_2(%arg0: i32) -> (i32, i32, i32) {
    %c0_i32 = arith.constant 0 : i32
    %c0_i32_0 = arith.constant 0 : i32
    %c0_i32_1 = arith.constant 0 : i32
    return %arg0, %c0_i32, %c0_i32_0 : i32, i32, i32
  }
  func.func @transform_3(%arg0: i32) -> (i32, i32, i32) {
    %c0_i32 = arith.constant 0 : i32
    %c0_i32_0 = arith.constant 0 : i32
    %c0_i32_1 = arith.constant 0 : i32
    return %arg0, %c0_i32, %c0_i32_0 : i32, i32, i32
  }
}

</mosaic_0001>

<bundles_post_ra>
// kernel: encode.1
= control target key start
LH: loop header
LB: loop body
LE: loop exit
PB: predicated region body
PF: predicated region fallthrough
CT: control target
= control target key end

     0   :  { %s15230_s12 = smov 0   ;;  %s18569_s0 = inlined_call_operand.vmem [shape: f32[2,64,16], index: 0, kind: input, shape index: {}]   ;;  %s18570_s1 = inlined_call_operand.vmem [shape: f32[1968,64], index: 1, kind: input, shape index: {}]   ;;  %s18571_s2 = inlined_call_operand.vmem [shape: f32[2,32,16], index: 2, kind: output, shape index: {0}]   ;;  %s18572_s3 = inlined_call_operand.vmem [shape: f32[2,1,1], index: 3, kind: output, shape index: {1}]  }
   0x1 LB: > { %s12515_s13 = sadd.s32 4294967295, %s15203_s12   ;;  %p12519_p0 = scmp.ge.s32.totalorder %s15203_s12, 1  ;;  %s15203_s12 = sphi %s15230_s12, %s14_s12  }
   0x2   : > { %p140_p1 = scmp.lt.s32.totalorder %s15203_s12, 3 }
   0x4   : > { %p141_p2 = pnand %p12519_p0, %p140_p1 }
   0x6   : > { %144 = sbr.rel (%p141_p2) target bundleno = 4659 (0x1233), region = 28 }
   0xb   : > { %p167_p3 = scmp.lt.s32.totalorder %s12515_s13, 1  ;;  %v341_v0 = vld [vmem:[%s18570_s1] sm:$0xff]  ;;  %v342_v1 = vld [vmem:[%s18570_s1 + $0x8] sm:$0xff]  ;;  %vm367_vm0 = vcmask 64512   ;;  %s15205_s22 = smov 120   ;;  %v661_v6 = vld [vmem:[%s18570_s1 + $0x10] sm:$0xff]  ;;  %v180_v19 = vlaneseq }
   0xc   : > { %13820 = vmatprep.subr.mxu1 %v341_v0  ;;  %13806 = vmatprep.subr.mxu0 %v342_v1  ;;  %v803_v21 = vld [vmem:[%s18570_s1 + $0x18] sm:$0xff]  ;;  %v18573_v23 = vmov 0.0   ;;  %v15297_v26 = vld [vmem:[%s18570_s1 + $0x20] sm:$0xff]  ;;  %v1117_v27 = vld [vmem:[%s18570_s1 + $0x28] sm:$0xff]  ;;  %vm631_vm5 = vcmask 1040384   ;;  %vm935_vm10 = vcmask 1046528  }
   0xd   : > { %s18996_s13 = smov (!%p167_p3, %s12515_s13), 1  ;;  %13821 = vmatpush3.msra.mxu1 %v341_v0  ;;  %13807 = vmatpush3.msra.mxu0 %v342_v1  ;;  %v15277_v20 = vshrl.u32 %v180_v19, 7  ;;  %v15317_v38 = vld [vmem:[%s18570_s1 + $0x798] ss:$0 sm:$0xff]  ;;  %s15207_s8 = smov 8  }
   0xe   : > { %s13057_s18 = sshll.u32 %s18996_s13, 6  ;;  %13834 = vmatprep.subr.mxu0 %v661_v6  ;;  %13848 = vmatprep.subr.mxu1 %v803_v21  ;;  %v15356_v58 = vld [vmem:[%s18570_s1 + $0x38] sm:$0xff]  ;;  %s15208_s15 = smov 16  }
   0xf   : > { %s171_s21 = scalar_lea.vmem %s18569_s0, %s13057_s18  ;;  %18736 = vst [vmem:[#allocation2_spill] sm:$0xff] %v15277_v20  ;;  %v193_v22 = vand.u32 7, %v15277_v20  ;;  %v15304_v31 = vadd.s32 8, %v15277_v20  ;;  %v15307_v32 = vadd.s32 16, %v15277_v20  ;;  %v15310_v33 = vadd.s32 24, %v15277_v20  ;;  %s15209_s20 = smov 112  }
  0x10   : > { %v333_v2 = vld [vmem:[%s171_s21] sm:$0xff]  ;;  %v335_v3 = vld [vmem:[%s171_s21 + $0x10] sm:$0xff]  ;;  %v334_v4 = vld [vmem:[%s171_s21 + $0x8] sm:$0xff]  ;;  %v15320_v39 = vadd.s32 32, %v15277_v20  ;;  %v15326_v44 = vadd.s32 40, %v15277_v20  ;;  %v15334_v47 = vadd.s32 48, %v15277_v20  ;;  %s179_s5 = scalar_lea.vmem %s18572_s3, %s18996_s13 }
  0x11   : > { %351 = vrot.lane.b32.xlu0 %v333_v2, %s15205_s22  ;;  %355 = vrot.lane.b32.xlu1 %v335_v3, %s15205_s22  ;;  %v336_v5 = vld [vmem:[%s171_s21 + $0x18] sm:$0xff]  ;;  %v337_v7 = vld [vmem:[%s171_s21 + $0x20] sm:$0xff]  ;;  %vm285_vm1 = vcmp.ge.s32.totalorder %v193_v22, 1  ;;  %18739 = vst [vmem:[#allocation5_spill] sm:$0xff] %v15304_v31  ;;  %v200_v35 = vand.u32 7, %v15304_v31  ;;  %v207_v36 = vand.u32 7, %v15307_v32 }
  0x12   : > { %13822 = vmatprep.mubr.msk.f32.mxu1 %vm367_vm0, %v333_v2  ;;  %v338_v8 = vld [vmem:[%s171_s21 + $0x28] sm:$0xff]  ;;  %v339_v9 = vld [vmem:[%s171_s21 + $0x30] sm:$0xff]  ;;  %v340_v10 = vld [vmem:[%s171_s21 + $0x38] sm:$0xff]  ;;  %v15287_v24 = vsel %vm285_vm1, 1.0, %v18573_v23  ;;  %v214_v41 = vand.u32 7, %v15310_v33  ;;  %v221_v49 = vand.u32 7, %v15320_v39 }
  0x13   : > { %13823 = vmatmul.mubr.msk.f32.vlgmr.msra.gmra.mxu1 %vm367_vm0, %v334_v4  ;;  %18737 = vst [vmem:[#allocation3_spill] sm:$0xff] %v15287_v24  ;;  %v15290_v25 = vmul.f32 0.0, %v15287_v24  ;;  %vm286_vm2 = vcmp.ge.s32.totalorder %v200_v35, 1  ;;  %vm287_vm3 = vcmp.ge.s32.totalorder %v207_v36, 1  ;;  %v228_v57 = vand.u32 7, %v15326_v44  ;;  %s13058_s6 = sshll.u32 %s18996_s13, 5 }
  0x14   : > { %13825 = vmatprep.mubr.msk.f32.mxu1 %vm367_vm0, %v335_v3  ;;  %13849 = vmatpush3.msra.mxu1 %v803_v21  ;;  %vm15342_vm4 = vcmp.ge.s32.totalorder %v214_v41, 1  ;;  %v15347_v55 = vsel %vm286_vm2, 1.0, %v18573_v23  ;;  %v15350_v56 = vsel %vm287_vm3, 1.0, %v18573_v23  ;;  %v235_v62 = vand.u32 7, %v15334_v47  ;;  %s176_s9 = scalar_lea.vmem %s18571_s2, %s13058_s6 }
  0x15   : > { %353 = vrot.lane.b32.xlu0 %v334_v4, %s15205_s22  ;;  %357 = vrot.lane.b32.xlu1 %v336_v5, %s15205_s22  ;;  %18738 = vst [vmem:[#allocation4_spill] sm:$0xff] %v15290_v25  ;;  %18744 = vst [vmem:[#allocation8_spill] sm:$0xff] %v15347_v55  ;;  %v15371_v1 = vsel %vm15342_vm4, 1.0, %v18573_v23  ;;  %vm15375_vm6 = vcmp.ge.s32.totalorder %v221_v49, 1  ;;  %vm15392_vm7 = vcmp.ge.s32.totalorder %v228_v57, 1  ;;  %vm309_vm9 = vcmp.le.s32.totalorder %v193_v22, 6 }
  0x16   : > { %13876 = vmatprep.subr.mxu1 %v1117_v27  ;;  %18745 = vst [vmem:[#allocation9_spill] sm:$0xff] %v15350_v56  ;;  %18747 = vst [vmem:[#allocation11_spill] sm:$0xff] %v15371_v1  ;;  %vm15407_vm8 = vcmp.ge.s32.totalorder %v235_v62, 1  ;;  %v15422_v19 = vsel %vm15375_vm6, 1.0, %v18573_v23  ;;  %vm310_vm12 = vcmp.le.s32.totalorder %v200_v35, 6  ;;  %vm311_vm13 = vcmp.le.s32.totalorder %v207_v36, 6 }
  0x17   : > { %13826 = vmatmul.mubr.msk.f32.gmra.mxu1 %vm367_vm0, %v336_v5  ;;  %18756 = vst [vmem:[#allocation14_spill] sm:$0xff] %v15422_v19  ;;  %v15509_v36 = vsel %vm310_vm12, 1.0, %v18573_v23  ;;  %vm312_vm14 = vcmp.le.s32.totalorder %v214_v41, 6  ;;  %vm313_vm15 = vcmp.le.s32.totalorder %v221_v49, 6  ;;  %vm15554_vm1 = vcmp.le.s32.totalorder %v228_v57, 6 }
  0x18   : > { %13828 = vmatprep.mubr.msk.f32.mxu1 %vm367_vm0, %v337_v7  ;;  %18763 = vst [vmem:[#allocation21_spill] sm:$0xff] %v15509_v36  ;;  %vm315_vm2 = vcmp.le.s32.totalorder %v235_v62, 6  ;;  %vm1944_vm4 = vcmask 261120   ;;  %vm8083_vm6 = vcmask 523264  }
  0x19   : > { %359 = vrot.lane.b32.xlu0 %v337_v7, %s15205_s22  ;;  %361 = vrot.lane.b32.xlu1 %v338_v8, %s15205_s22  ;;  %v15611_v62 = vsel %vm315_vm2, 1.0, %v18573_v23 }
  0x1a   : > { %18771 = vst [vmem:[#allocation27_spill] sm:$0xff] %v15611_v62 }
  0x1b   : > { %13829 = vmatmul.mubr.msk.f32.gmra.mxu1 %vm367_vm0, %v338_v8 }
  0x1c   : > { %13831 = vmatprep.mubr.msk.f32.mxu1 %vm367_vm0, %v339_v9 }
  0x1d   : > { %363 = vrot.lane.b32.xlu0 %v339_v9, %s15205_s22  ;;  %365 = vrot.lane.b32.xlu1 %v340_v10, %s15205_s22 }
  0x1f   : > { %13832 = vmatmul.mubr.msk.f32.gmra.mxu1 %vm367_vm0, %v340_v10 }
  0x20   : > { %13850 = vmatprep.mubr.f32.mxu1 %v18573_v23 }
  0x83   : > { %v352_v11 = vpop.permute.xlu0 %351  ;;  %v356_v12 = vpop.permute.xlu1 %355 }
  0x84   : > { %13808 = vmatprep.mubr.msk.f32.mxu0 %vm367_vm0, %v352_v11 }
  0x87   : > { %v354_v13 = vpop.permute.xlu0 %353  ;;  %v358_v14 = vpop.permute.xlu1 %357 }
  0x88   : > { %13809 = vmatmul.mubr.msk.f32.vlgmr.msra.gmra.mxu0 %vm367_vm0, %v354_v13 }
  0x89   : > { %13811 = vmatprep.mubr.msk.f32.mxu0 %vm367_vm0, %v356_v12  ;;  %13835 = vmatpush3.msra.mxu0 %v661_v6  ;;  %v15397_v12 = vadd.s32 56, %v15277_v20 }
  0x8a   : > { %13862 = vmatprep.subr.mxu0 %v15297_v26 }
  0x8b   : > { %v360_v15 = vpop.permute.xlu0 %359  ;;  %v362_v16 = vpop.permute.xlu1 %361 }
  0x8c   : > { %13812 = vmatmul.mubr.msk.f32.gmra.mxu0 %vm367_vm0, %v358_v14 }
  0x8d   : > { %13814 = vmatprep.mubr.msk.f32.mxu0 %vm367_vm0, %v360_v15 }
  0x8f   : > { %v364_v17 = vpop.permute.xlu0 %363  ;;  %v366_v18 = vpop.permute.xlu1 %365 }
  0x90   : > { %13815 = vmatmul.mubr.msk.f32.gmra.mxu0 %vm367_vm0, %v362_v16  ;;  %v15514_v16 = vsel %vm311_vm13, 1.0, %v18573_v23  ;;  %vm8593_vm13 = vcmask 1044480  }
  0x91   : > { %13817 = vmatprep.mubr.msk.f32.mxu0 %vm367_vm0, %v364_v17  ;;  %v15414_v17 = vld [vmem:[%s18570_s1 + $0x30] sm:$0xff]  ;;  %18764 = vst [vmem:[#allocation22_spill] sm:$0xff] %v15514_v16 }
  0x94   : > { %13818 = vmatmul.mubr.msk.f32.gmra.mxu0 %vm367_vm0, %v366_v18 }
  0x95   : > { %13836 = vmatprep.mubr.msk.f32.mxu0 %vm367_vm0, %v15290_v25 }
  0xd3   : > { %v13824_v28 = vpop.f32.mrf.mxu1 }
  0xd5   : > { %v571_v29 = vpop.f32.mrf.mxu1 }
  0xd7   : > { %v13827_v30 = vpop.f32.mrf.mxu1 }
  0xd9   : > { %v581_v34 = vpop.f32.mrf.mxu1 }
  0xdb   : > { %v13830_v43 = vpop.f32.mrf.mxu1 }
  0xdd   : > { %v591_v54 = vpop.f32.mrf.mxu1 }
  0xdf   : > { %v13833_v8 = vpop.f32.mrf.mxu1 }
 0x148   : > { %v13810_v37 = vpop.f32.mrf.mxu0 }
 0x149   : > { %v577_v40 = vadd.f32 %v13824_v28, %v13810_v37 }
 0x14a   : > { %v450_v42 = vpop.f32.mrf.mxu0 }
 0x14b   : > { %v15329_v45 = vadd.f32 %v15317_v38, %v577_v40  ;;  %v572_v46 = vadd.f32 %v571_v29, %v450_v42  ;;  %v15436_v29 = vsel %vm15392_vm7, 1.0, %v18573_v23  ;;  %v242_v42 = vand.u32 7, %v15397_v12 }
 0x14c   : > { %v13813_v48 = vpop.f32.mrf.mxu0  ;;  %18758 = vst [vmem:[#allocation16_spill] sm:$0xff] %v15436_v29 }
 0x14d   : > { %18740 = vst [vmem:[#allocation6_spill] sm:$0xff] %v15329_v45  ;;  %v15338_v50 = vadd.f32 %v15317_v38, %v572_v46  ;;  %v587_v51 = vadd.f32 %v13827_v30, %v13813_v48  ;;  %v633_v61 = vrot.slane %v15329_v45, 7  ;;  %v601_v30 = vpop.f32.mrf.mxu1  ;;  %vm292_vm11 = vcmp.ge.s32.totalorder %v242_v42, 1 }
 0x14e   : > { %v460_v53 = vpop.f32.mrf.mxu0  ;;  %vm316_vm3 = vcmp.le.s32.totalorder %v242_v42, 6 }
 0x14f   : > { %18741 = vst [vmem:[#allocation7_spill] sm:$0xff] %v15338_v50  ;;  %v582_v59 = vadd.f32 %v581_v34, %v460_v53  ;;  %13851 = vmatmul.mubr.msk.f32.vlgmr.msra.gmra.mxu1 %vm367_vm0, %v15338_v50  ;;  %v632_v60 = vrot.slane %v15338_v50, 7  ;;  %v15364_v63 = vadd.f32 %v15317_v38, %v587_v51  ;;  %v936_v52 = vrot.slane %v15338_v50, 1 }
 0x150   : > { %v13816_v0 = vpop.f32.mrf.mxu0  ;;  %13853 = vmatprep.mubr.msk.f32.mxu1 %vm367_vm0, %v15329_v45  ;;  %13877 = vmatpush3.msra.mxu1 %v1117_v27  ;;  %v15627_v12 = vsel %vm316_vm3, 1.0, %v18573_v23 }
 0x151   : > { %18746 = vst [vmem:[#allocation10_spill] sm:$0xff] %v15364_v63  ;;  %v15380_v3 = vadd.f32 %v15317_v38, %v582_v59  ;;  %v597_v4 = vadd.f32 %v13830_v43, %v13816_v0  ;;  %v652_v5 = vsel %vm631_vm5, 0.0, %v632_v60  ;;  %v15384_v6 = vsel %vm631_vm5, %v632_v60, %v633_v61  ;;  %13904 = vmatprep.subr.mxu1 %v15356_v58 }
 0x152   : > { %v470_v7 = vpop.f32.mrf.mxu0  ;;  %v654_v9 = vmul.f32 %v15347_v55, %v652_v5  ;;  %v655_v10 = vmul.f32 %v15350_v56, %v15384_v6  ;;  %v637_v21 = vrot.slane %v15364_v63, 7  ;;  %v1109_v60 = vmul.f32 %v15287_v24, %v652_v5  ;;  %18772 = vst [vmem:[#allocation28_spill] sm:$0xff] %v15627_v12 }
 0x153   : > { %18750 = vst [vmem:[#allocation12_spill] sm:$0xff] %v15380_v3  ;;  %v15400_v13 = vadd.f32 %v15317_v38, %v597_v4  ;;  %v592_v14 = vadd.f32 %v591_v54, %v470_v7  ;;  %13854 = vmatmul.mubr.msk.f32.gmra.mxu1 %vm367_vm0, %v15380_v3  ;;  %v635_v15 = vrot.slane %v15380_v3, 7  ;;  %v15480_v0 = vsel %vm309_vm9, 1.0, %v18573_v23 }
 0x154   : > { %v13819_v18 = vpop.f32.mrf.mxu0  ;;  %13837 = vmatmul.mubr.msk.f32.vlgmr.msra.gmra.mxu0 %vm367_vm0, %v654_v9  ;;  %13856 = vmatprep.mubr.msk.f32.mxu1 %vm367_vm0, %v15364_v63  ;;  %18761 = vst [vmem:[#allocation19_spill] sm:$0xff] %v15480_v0  ;;  %v959_v5 = vsel %vm935_vm10, 0.0, %v936_v52  ;;  %v939_v7 = vrot.slane %v15380_v3, 1  ;;  %v1110_v9 = vmul.f32 %v15347_v55, %v15384_v6  ;;  %vm8692_vm9 = vcmask 1043456  }
 0x155   : > { %18753 = vst [vmem:[#allocation13_spill] sm:$0xff] %v15400_v13  ;;  %v15426_v27 = vadd.f32 %v15317_v38, %v592_v14  ;;  %13863 = vmatpush3.msra.mxu0 %v15297_v26  ;;  %13839 = vmatprep.mubr.msk.f32.mxu0 %vm367_vm0, %v655_v10  ;;  %v15431_v28 = vsel %vm631_vm5, %v633_v61, %v635_v15  ;;  %v15446_v26 = vsel %vm15407_vm8, 1.0, %v18573_v23  ;;  %v641_v51 = vrot.slane %v15400_v13, 7 }
 0x156   : > { %v480_v34 = vpop.f32.mrf.mxu0  ;;  %v656_v37 = vmul.f32 %v15371_v1, %v15431_v28  ;;  %v15441_v40 = vsel %vm631_vm5, %v635_v15, %v637_v21  ;;  %18759 = vst [vmem:[#allocation17_spill] sm:$0xff] %v15446_v26  ;;  %13890 = vmatprep.subr.mxu0 %v15414_v17  ;;  %v607_v4 = vadd.f32 %v13833_v8, %v13819_v18  ;;  %v15497_v10 = vsel %vm292_vm11, 1.0, %v18573_v23  ;;  %v15519_v18 = vld [vmem:[%s18570_s1 + $0x48] sm:$0xff] }
 0x157   : > { %18757 = vst [vmem:[#allocation15_spill] sm:$0xff] %v15426_v27  ;;  %v602_v43 = vadd.f32 %v601_v30, %v480_v34  ;;  %13857 = vmatmul.mubr.msk.f32.gmra.mxu1 %vm367_vm0, %v15426_v27  ;;  %v657_v46 = vmul.f32 %v15422_v19, %v15441_v40  ;;  %v639_v48 = vrot.slane %v15426_v27, 7  ;;  %18762 = vst [vmem:[#allocation20_spill] sm:$0xff] %v15497_v10  ;;  %v937_v8 = vrot.slane %v15329_v45, 1 }
 0x158   : > { %13840 = vmatmul.mubr.msk.f32.gmra.mxu0 %vm367_vm0, %v656_v37  ;;  %13859 = vmatprep.mubr.msk.f32.mxu1 %vm367_vm0, %v15400_v13  ;;  %v1111_v32 = vmul.f32 %v15350_v56, %v15431_v28  ;;  %v960_v15 = vmul.f32 %v15480_v0, %v959_v5  ;;  %v943_v34 = vrot.slane %v15426_v27, 1  ;;  %v1112_v37 = vmul.f32 %v15371_v1, %v15441_v40 }
 0x159   : > { %v15463_v53 = vadd.f32 %v15317_v38, %v602_v43  ;;  %13842 = vmatprep.mubr.msk.f32.mxu0 %vm367_vm0, %v657_v46  ;;  %v15467_v54 = vsel %vm631_vm5, %v637_v21, %v639_v48  ;;  %v15470_v59 = vsel %vm631_vm5, %v639_v48, %v641_v51  ;;  %v938_v14 = vsel %vm935_vm10, %v936_v52, %v937_v8 }
 0x15a   : > { %v658_v22 = vmul.f32 %v15436_v29, %v15467_v54  ;;  %v659_v61 = vmul.f32 %v15446_v26, %v15470_v59  ;;  %v15522_v21 = vadd.f32 %v15317_v38, %v607_v4  ;;  %v15527_v30 = vsel %vm935_vm10, %v937_v8, %v939_v7 }
 0x15b   : > { %18760 = vst [vmem:[#allocation18_spill] sm:$0xff] %v15463_v53  ;;  %13860 = vmatmul.mubr.msk.f32.gmra.mxu1 %vm367_vm0, %v15463_v53  ;;  %v643_v2 = vrot.slane %v15463_v53, 7  ;;  %v941_v38 = vrot.slane %v15364_v63, 1  ;;  %v961_v43 = vmul.f32 %v15509_v36, %v938_v14  ;;  %v1113_v33 = vmul.f32 %v15422_v19, %v15467_v54 }
 0x15c   : > { %13843 = vmatmul.mubr.msk.f32.gmra.mxu0 %vm367_vm0, %v658_v22  ;;  %13878 = vmatprep.mubr.msk.f32.mxu1 %vm367_vm0, %v1109_v60  ;;  %18765 = vst [vmem:[#allocation23_spill] sm:$0xff] %v15522_v21  ;;  %v962_v41 = vmul.f32 %v15514_v16, %v15527_v30  ;;  %v15547_v46 = vsel %vm312_vm14, 1.0, %v18573_v23  ;;  %v15564_v48 = vsel %vm313_vm15, 1.0, %v18573_v23  ;;  %v1106_v44 = vrot.slane %v15522_v21, 7 }
 0x15d   : > { %13845 = vmatprep.mubr.msk.f32.mxu0 %vm367_vm0, %v659_v61  ;;  %v15500_v35 = vsel %vm631_vm5, %v641_v51, %v643_v2  ;;  %18766 = vst [vmem:[#allocation24_spill] sm:$0xff] %v15547_v46  ;;  %v15550_v39 = vsel %vm935_vm10, %v939_v7, %v941_v38  ;;  %18769 = vst [vmem:[#allocation25_spill] sm:$0xff] %v15564_v48  ;;  %v15567_v51 = vsel %vm935_vm10, %v941_v38, %v943_v34  ;;  %vm8604_vm8 = vcmask 130048  }
 0x15e   : > { %v660_v11 = vmul.f32 %v15497_v10, %v15500_v35  ;;  %v947_v57 = vrot.slane %v15463_v53, 1  ;;  %v1114_v52 = vmul.f32 %v15436_v29, %v15470_v59  ;;  %v945_v22 = vrot.slane %v15400_v13, 1 }
 0x15f   : > { %13879 = vmatmul.mubr.msk.f32.vlgmr.msra.gmra.mxu1 %vm367_vm0, %v1110_v9  ;;  %v963_v60 = vmul.f32 %v15547_v46, %v15550_v39  ;;  %v1115_v61 = vmul.f32 %v15446_v26, %v15500_v35  ;;  %v15583_v4 = vsel %vm631_vm5, %v643_v2, %v1106_v44  ;;  %v15591_v5 = vsel %vm15554_vm1, 1.0, %v18573_v23 }
 0x160   : > { %13846 = vmatmul.mubr.msk.f32.gmra.mxu0 %vm367_vm0, %v660_v11  ;;  %13881 = vmatprep.mubr.msk.f32.mxu1 %vm367_vm0, %v1111_v32  ;;  %18770 = vst [vmem:[#allocation26_spill] sm:$0xff] %v15591_v5  ;;  %v15594_v7 = vsel %vm935_vm10, %v943_v34, %v945_v22  ;;  %v15601_v2 = vsel %vm935_vm10, %v945_v22, %v947_v57  ;;  %v949_v8 = vrot.slane %v15522_v21, 1  ;;  %vm8782_vm14 = vcmask 1042432  }
 0x161   : > { %13864 = vmatprep.mubr.msk.f32.mxu0 %vm367_vm0, %v960_v15  ;;  %13905 = vmatpush3.msra.mxu1 %v15356_v58  ;;  %v1529_v58 = vld [vmem:[%s18570_s1 + $0x40] sm:$0xff]  ;;  %v1116_v9 = vmul.f32 %v15497_v10, %v15583_v4  ;;  %v965_v11 = vmul.f32 %v15591_v5, %v15594_v7  ;;  %v1373_v47 = vmul.f32 %v15480_v0, %v938_v14 }
 0x162   : > { %13932 = vmatprep.subr.mxu1 %v15519_v18  ;;  %v966_v32 = vmul.f32 %v15611_v62, %v15601_v2  ;;  %v15619_v15 = vsel %vm935_vm10, %v947_v57, %v949_v8  ;;  %v1374_v14 = vmul.f32 %v15509_v36, %v15527_v30  ;;  %v1375_v34 = vmul.f32 %v15514_v16, %v15550_v39 }
 0x163   : > { %13882 = vmatmul.mubr.msk.f32.gmra.mxu1 %vm367_vm0, %v1112_v37  ;;  %v967_v42 = vmul.f32 %v15627_v12, %v15619_v15  ;;  %v1376_v37 = vmul.f32 %v15547_v46, %v15567_v51  ;;  %v1377_v38 = vmul.f32 %v15564_v48, %v15594_v7  ;;  %v1522_v57 = vmul.f32 %v15347_v55, %v15431_v28 }
 0x164   : > { %13865 = vmatmul.mubr.msk.f32.vlgmr.msra.gmra.mxu0 %vm367_vm0, %v961_v43  ;;  %13884 = vmatprep.mubr.msk.f32.mxu1 %vm367_vm0, %v1113_v33  ;;  %v1789_v43 = vld [vmem:[%s18570_s1 + $0x50] sm:$0xff]  ;;  %v1379_v33 = vmul.f32 %v15611_v62, %v15619_v15  ;;  %v1525_v28 = vmul.f32 %v15422_v19, %v15470_v59  ;;  %v1527_v22 = vmul.f32 %v15446_v26, %v15583_v4 }
 0x165   : > { %13891 = vmatpush3.msra.mxu0 %v15414_v17  ;;  %13867 = vmatprep.mubr.msk.f32.mxu0 %vm367_vm0, %v962_v41  ;;  %v964_v17 = vmul.f32 %v15564_v48, %v15567_v51  ;;  %v1372_v41 = vsel %vm935_vm10, %v949_v8, 0.0  ;;  %v2121_v8 = vld [vmem:[%s18570_s1 + $0x90] sm:$0xff] }
 0x166   : > { %13918 = vmatprep.subr.mxu0 %v1529_v58  ;;  %v1380_v49 = vmul.f32 %v15627_v12, %v1372_v41  ;;  %v1787_v4 = vmul.f32 %v15611_v62, %v1372_v41 }
 0x167   : > { %13885 = vmatmul.mubr.msk.f32.gmra.mxu1 %vm367_vm0, %v1114_v52  ;;  %v1523_v52 = vmul.f32 %v15350_v56, %v15441_v40  ;;  %v1526_v40 = vmul.f32 %v15436_v29, %v15500_v35  ;;  %v1782_v35 = vmul.f32 %v15509_v36, %v15550_v39  ;;  %v1786_v39 = vmul.f32 %v15591_v5, %v15619_v15 }
 0x168   : > { %13868 = vmatmul.mubr.msk.f32.gmra.mxu0 %vm367_vm0, %v963_v60  ;;  %13887 = vmatprep.mubr.msk.f32.mxu1 %vm367_vm0, %v1115_v61  ;;  %v1781_v60 = vmul.f32 %v15480_v0, %v15527_v30  ;;  %v1784_v61 = vmul.f32 %v15547_v46, %v15594_v7  ;;  %v1785_v30 = vmul.f32 %v15564_v48, %v15601_v2  ;;  %v1937_v7 = vld [vmem:[%s18570_s1 + $0x68] sm:$0xff] }
 0x169   : > { %13870 = vmatprep.mubr.msk.f32.mxu0 %vm367_vm0, %v964_v17  ;;  %v1938_v17 = vld [vmem:[%s18570_s1 + $0x70] sm:$0xff] }
 0x16b   : > { %13888 = vmatmul.mubr.msk.f32.gmra.mxu1 %vm367_vm0, %v1116_v9  ;;  %v1935_v9 = vld [vmem:[%s18570_s1 + $0x58] sm:$0xff] }
 0x16c   : > { %13871 = vmatmul.mubr.msk.f32.gmra.mxu0 %vm367_vm0, %v965_v11  ;;  %13906 = vmatprep.mubr.msk.f32.mxu1 %vm367_vm0, %v1373_v47  ;;  %v2120_v11 = vld [vmem:[%s18570_s1 + $0x88] sm:$0xff]  ;;  %v15760_v47 = vld [vmem:[%s18570_s1 + $0xb0] sm:$0xff] }
 0x16d   : > { %13873 = vmatprep.mubr.msk.f32.mxu0 %vm367_vm0, %v966_v32  ;;  %18774 = vst [vmem:[#allocation30_spill] sm:$0xff] %v15760_v47 }
 0x16f   : > { %13907 = vmatmul.mubr.msk.f32.vlgmr.msra.gmra.mxu1 %vm367_vm0, %v1374_v14 }
 0x170   : > { %13874 = vmatmul.mubr.msk.f32.gmra.mxu0 %vm367_vm0, %v967_v42  ;;  %13909 = vmatprep.mubr.msk.f32.mxu1 %vm367_vm0, %v1375_v34 }
 0x171   : > { %13892 = vmatprep.mubr.msk.f32.mxu0 %vm367_vm0, %v15338_v50  ;;  %13933 = vmatpush3.msra.mxu1 %v15519_v18  ;;  %v1378_v18 = vmul.f32 %v15591_v5, %v15601_v2  ;;  %v1936_v2 = vld [vmem:[%s18570_s1 + $0x60] sm:$0xff] }
 0x172   : > { %13960 = vmatprep.subr.mxu1 %v1938_v17 }
 0x173   : > { %13910 = vmatmul.mubr.msk.f32.gmra.mxu1 %vm367_vm0, %v1376_v37 }
 0x174   : > { %13893 = vmatmul.mubr.msk.f32.vlgmr.msra.gmra.mxu0 %vm367_vm0, %v15329_v45  ;;  %13912 = vmatprep.mubr.msk.f32.mxu1 %vm367_vm0, %v1377_v38 }
 0x175   : > { %13919 = vmatpush3.msra.mxu0 %v1529_v58  ;;  %13895 = vmatprep.mubr.msk.f32.mxu0 %vm367_vm0, %v15380_v3  ;;  %v1521_v58 = vmul.f32 %v15287_v24, %v15384_v6  ;;  %v1524_v6 = vmul.f32 %v15371_v1, %v15467_v54  ;;  %v1520_v54 = vsel %vm631_vm5, %v1106_v44, 0.0  ;;  %v1783_v44 = vmul.f32 %v15514_v16, %v15567_v51 }
 0x176   : > { %13946 = vmatprep.subr.mxu0 %v1789_v43  ;;  %v1528_v59 = vmul.f32 %v15497_v10, %v1520_v54  ;;  %v15732_v51 = vmul.f32 0.0, %v15627_v12 }
 0x177   : > { %13913 = vmatmul.mubr.msk.f32.gmra.mxu1 %vm367_vm0, %v1378_v18 }
 0x178   : > { %13896 = vmatmul.mubr.msk.f32.gmra.mxu0 %vm367_vm0, %v15364_v63  ;;  %13915 = vmatprep.mubr.msk.f32.mxu1 %vm367_vm0, %v1379_v33  ;;  %18773 = vst [vmem:[#allocation29_spill] sm:$0xff] %v15732_v51 }
 0x179   : > { %13898 = vmatprep.mubr.msk.f32.mxu0 %vm367_vm0, %v15426_v27 }
 0x17b   : > { %13916 = vmatmul.mubr.msk.f32.gmra.mxu1 %vm367_vm0, %v1380_v49 }
 0x17c   : > { %13899 = vmatmul.mubr.msk.f32.gmra.mxu0 %vm367_vm0, %v15400_v13  ;;  %13934 = vmatprep.mubr.msk.f32.mxu1 %vm367_vm0, %v15329_v45 }
 0x17d   : > { %13901 = vmatprep.mubr.msk.f32.mxu0 %vm367_vm0, %v15463_v53 }
 0x17f   : > { %13935 = vmatmul.mubr.msk.f32.vlgmr.msra.gmra.mxu1 %vm367_vm0, %v15380_v3 }
 0x180   : > { %13902 = vmatmul.mubr.msk.f32.gmra.mxu0 %vm367_vm0, %v15522_v21  ;;  %13937 = vmatprep.mubr.msk.f32.mxu1 %vm367_vm0, %v15364_v63  ;;  %v12565_v63 = vld [vmem:[%s18570_s1 + $0x799] ss:$0 sm:$0xff] }
 0x181   : > { %13920 = vmatprep.mubr.msk.f32.mxu0 %vm367_vm0, %v1521_v58  ;;  %13961 = vmatpush3.msra.mxu1 %v1938_v17 }
 0x182   : > { %13962 = vmatprep.subr.mxu1 %v1937_v7 }
 0x183   : > { %13938 = vmatmul.mubr.msk.f32.gmra.mxu1 %vm367_vm0, %v15426_v27 }
 0x184   : > { %13921 = vmatmul.mubr.msk.f32.vlgmr.msra.gmra.mxu0 %vm367_vm0, %v1522_v57  ;;  %13940 = vmatprep.mubr.msk.f32.mxu1 %vm367_vm0, %v15400_v13 }
 0x185   : > { %13947 = vmatpush3.msra.mxu0 %v1789_v43  ;;  %13923 = vmatprep.mubr.msk.f32.mxu0 %vm367_vm0, %v1523_v52 }
 0x186   : > { %13963 = vmatpush3.msra.mxu1 %v1937_v7  ;;  %13980 = vmatprep.subr.mxu0 %v2121_v8 }
 0x187   : > { %13941 = vmatmul.mubr.msk.f32.gmra.mxu1 %vm367_vm0, %v15463_v53  ;;  %13964 = vmatprep.subr.mxu1 %v1936_v2 }
 0x188   : > { %13924 = vmatmul.mubr.msk.f32.gmra.mxu0 %vm367_vm0, %v1524_v6  ;;  %13943 = vmatprep.mubr.msk.f32.mxu1 %vm367_vm0, %v15522_v21 }
 0x189   : > { %13926 = vmatprep.mubr.msk.f32.mxu0 %vm367_vm0, %v1525_v28  ;;  %13965 = vmatpush3.msra.mxu1 %v1936_v2 }
 0x18a   : > { %13966 = vmatprep.subr.mxu1 %v1935_v9 }
 0x18b   : > { %13944 = vmatmul.mubr.f32.gmra.mxu1 %v18573_v23 }
 0x18c   : > { %13927 = vmatmul.mubr.msk.f32.gmra.mxu0 %vm367_vm0, %v1526_v40  ;;  %13967 = vmatpush3.msra.mxu1 %v1935_v9 }
 0x18d   : > { %13929 = vmatprep.mubr.msk.f32.mxu0 %vm367_vm0, %v1527_v22  ;;  %14000 = vmatprep.subr.mxu1 %v15760_v47 }
 0x190   : > { %13930 = vmatmul.mubr.msk.f32.gmra.mxu0 %vm367_vm0, %v1528_v59 }
 0x191   : > { %13948 = vmatprep.mubr.msk.f32.mxu0 %vm367_vm0, %v1781_v60 }
 0x194   : > { %13949 = vmatmul.mubr.msk.f32.vlgmr.msra.gmra.mxu0 %vm367_vm0, %v1782_v35 }
 0x195   : > { %13951 = vmatprep.mubr.msk.f32.mxu0 %vm367_vm0, %v1783_v44  ;;  %13981 = vmatpush3.msra.mxu0 %v2121_v8 }
 0x196   : > { %13982 = vmatprep.subr.mxu0 %v2120_v11 }
 0x197   : > { %13983 = vmatpush3.msra.mxu0 %v2120_v11 }
 0x198   : > { %13952 = vmatmul.mubr.msk.f32.gmra.mxu0 %vm367_vm0, %v1784_v61 }
 0x199   : > { %13954 = vmatprep.mubr.msk.f32.mxu0 %vm367_vm0, %v1785_v30 }
 0x19c   : > { %13955 = vmatmul.mubr.msk.f32.gmra.mxu0 %vm367_vm0, %v1786_v39 }
 0x19d   : > { %13957 = vmatprep.mubr.msk.f32.mxu0 %vm367_vm0, %v1787_v4 }
 0x1a0   : > { %13958 = vmatmul.mubr.msk.f32.gmra.mxu0 %vm367_vm0, %v15732_v51 }
 0x1a1   : > { %13988 = vmatprep.mubr.msk.f32.mxu0 %vm1944_vm4, %v15290_v25 }
 0x20f   : > { %v13852_v32 = vpop.f32.mrf.mxu1 }
 0x211   : > { %v887_v15 = vpop.f32.mrf.mxu1 }
 0x213   : > { %v13855_v14 = vpop.f32.mrf.mxu1 }
 0x214   : > { %v13838_v42 = vpop.f32.mrf.mxu0 }
 0x215   : > { %v897_v34 = vpop.f32.mrf.mxu1  ;;  %v796_v50 = vadd.f32 %v13838_v42, %v12565_v63 }
 0x216   : > { %v752_v37 = vpop.f32.mrf.mxu0 }
 0x217   : > { %v15763_v38 = vpop.f32.mrf.mxu1  ;;  %v795_v12 = vadd.f32 %v12565_v63, %v752_v37  ;;  %v927_v46 = vadd.f32 %v13852_v32, %v796_v50 }
 0x218   : > { %v13841_v43 = vpop.f32.mrf.mxu0 }
 0x219   : > { %v15765_v18 = vpop.f32.mrf.mxu1  ;;  %v798_v48 = vadd.f32 %v13841_v43, %v12565_v63  ;;  %v926_v0 = vadd.f32 %v887_v15, %v795_v12 }
 0x21a   : > { %v762_v33 = vpop.f32.mrf.mxu0 }
 0x21b   : > { %v15767_v41 = vpop.f32.mrf.mxu1  ;;  %v797_v36 = vadd.f32 %v12565_v63, %v762_v33  ;;  %v929_v1 = vadd.f32 %v13855_v14, %v798_v48 }
 0x21c   : > { %v13844_v49 = vpop.f32.mrf.mxu0 }
 0x21d   : > { %v15769_v58 = vpop.f32.mrf.mxu1  ;;  %v800_v19 = vadd.f32 %v13844_v49, %v12565_v63  ;;  %v928_v42 = vadd.f32 %v897_v34, %v797_v36 }
 0x21e   : > { %v772_v57 = vpop.f32.mrf.mxu0 }
 0x21f   : > { %v13880_v52 = vpop.f32.mrf.mxu1  ;;  %v799_v55 = vadd.f32 %v12565_v63, %v772_v57  ;;  %v931_v32 = vadd.f32 %v15763_v38, %v800_v19 }
 0x220   : > { %v13847_v6 = vpop.f32.mrf.mxu0 }
 0x221   : > { %v1208_v28 = vpop.f32.mrf.mxu1  ;;  %v802_v50 = vadd.f32 %v13847_v6, %v12565_v63  ;;  %v930_v15 = vadd.f32 %v15765_v18, %v799_v55 }
 0x222   : > { %v782_v40 = vpop.f32.mrf.mxu0 }
 0x223   : > { %v13883_v22 = vpop.f32.mrf.mxu1 }
 0x224   : > { %v13866_v54 = vpop.f32.mrf.mxu0 }
 0x225   : > { %v1218_v59 = vpop.f32.mrf.mxu1  ;;  %v1099_v10 = vadd.f32 %v13866_v54, %v927_v46  ;;  %v801_v46 = vadd.f32 %v12565_v63, %v782_v40 }
 0x226   : > { %v1059_v60 = vpop.f32.mrf.mxu0 }
 0x227   : > { %v15771_v35 = vpop.f32.mrf.mxu1  ;;  %v1098_v29 = vadd.f32 %v1059_v60, %v926_v0  ;;  %v1248_v37 = vadd.f32 %v13880_v52, %v1099_v10  ;;  %v933_v10 = vadd.f32 %v15767_v41, %v802_v50  ;;  %v932_v6 = vadd.f32 %v15769_v58, %v801_v46 }
 0x228   : > { %v13869_v44 = vpop.f32.mrf.mxu0 }
 0x229   : > { %v15773_v61 = vpop.f32.mrf.mxu1  ;;  %v1101_v47 = vadd.f32 %v13869_v44, %v929_v1  ;;  %v1247_v43 = vadd.f32 %v1208_v28, %v1098_v29 }
 0x22a   : > { %v1069_v30 = vpop.f32.mrf.mxu0 }
 0x22b   : > { %v15775_v39 = vpop.f32.mrf.mxu1  ;;  %v1250_v48 = vadd.f32 %v13883_v22, %v1101_v47 }
 0x22c   : > { %v13872_v4 = vpop.f32.mrf.mxu0 }
 0x22d   : > { %v15777_v17 = vpop.f32.mrf.mxu1  ;;  %v1103_v49 = vadd.f32 %v13872_v4, %v931_v32 }
 0x22e   : > { %v1079_v7 = vpop.f32.mrf.mxu0 }
 0x22f   : > { %v13908_v2 = vpop.f32.mrf.mxu1  ;;  %v1102_v36 = vadd.f32 %v1079_v7, %v930_v15  ;;  %v1252_v63 = vadd.f32 %v15771_v35, %v1103_v49  ;;  %v18781_v49 = vld [vmem:[#allocation30_spill] sm:$0xff] }
 0x230   : > { %v13875_v9 = vpop.f32.mrf.mxu0 }
 0x231   : > { %v1472_v8 = vpop.f32.mrf.mxu1  ;;  %v1105_v38 = vadd.f32 %v13875_v9, %v933_v10  ;;  %v1251_v28 = vadd.f32 %v15773_v61, %v1102_v36 }
 0x232   : > { %v1089_v11 = vpop.f32.mrf.mxu0 }
 0x233   : > { %v15779_v23 = vpop.f32.mrf.mxu1  ;;  %v1104_v47 = vadd.f32 %v1089_v11, %v932_v6 }
 0x234   : > { %v13894_v31 = vpop.f32.mrf.mxu0 }
 0x235   : > { %v15781_v20 = vpop.f32.mrf.mxu1  ;;  %v1364_v33 = vadd.f32 %v13894_v31, %v1248_v37 }
 0x236   : > { %v1324_v25 = vpop.f32.mrf.mxu0 }
 0x237   : > { %v15783_v21 = vpop.f32.mrf.mxu1  ;;  %v1363_v0 = vadd.f32 %v1324_v25, %v1247_v43  ;;  %v1512_v52 = vadd.f32 %v13908_v2, %v1364_v33 }
 0x238   : > { %v13897_v53 = vpop.f32.mrf.mxu0 }
 0x239   : > { %v15785_v13 = vpop.f32.mrf.mxu1  ;;  %v1366_v34 = vadd.f32 %v13897_v53, %v1250_v48  ;;  %v1511_v31 = vadd.f32 %v1472_v8, %v1363_v0 }
 0x23a   : > { %18775 = vst [vmem:[#allocation31_spill] sm:$0xff] %v15785_v13  ;;  %v1334_v27 = vpop.f32.mrf.mxu0  ;;  %v1100_v13 = vadd.f32 %v1069_v30, %v928_v42 }
 0x23b   : > { %v15790_v3 = vpop.f32.mrf.mxu1  ;;  %v1514_v41 = vadd.f32 %v15779_v23, %v1366_v34 }
 0x23c   : > { %18776 = vst [vmem:[#allocation32_spill] sm:$0xff] %v15790_v3  ;;  %v13900_v45 = vpop.f32.mrf.mxu0  ;;  %v1249_v1 = vadd.f32 %v1218_v59, %v1100_v13 }
 0x23d   : > { %v15792_v62 = vpop.f32.mrf.mxu1  ;;  %v1368_v13 = vadd.f32 %v13900_v45, %v1252_v63 }
 0x23e   : > { %v1344_v51 = vpop.f32.mrf.mxu0  ;;  %18777 = vst [vmem:[#allocation33_spill] sm:$0xff] %v15792_v62  ;;  %v1365_v19 = vadd.f32 %v1334_v27, %v1249_v1  ;;  %v1254_v27 = vadd.f32 %v15775_v39, %v1105_v38 }
 0x23f   : > { %v13936_v26 = vpop.f32.mrf.mxu1  ;;  %v1367_v22 = vadd.f32 %v1344_v51, %v1251_v28  ;;  %v2263_v28 = vld [vmem:[%s18570_s1 + $0xa0] sm:$0xff] }
 0x240   : > { %v13903_v5 = vpop.f32.mrf.mxu0  ;;  %v1513_v54 = vadd.f32 %v15781_v20, %v1365_v19 }
 0x241   : > { %v1734_v3 = vpop.f32.mrf.mxu1  ;;  %v1370_v4 = vadd.f32 %v13903_v5, %v1254_v27  ;;  %v18778_v51 = vld [vmem:[#allocation31_spill] sm:$0xff] }
 0x242   : > { %v15794_v16 = vpop.f32.mrf.mxu0  ;;  %v1515_v7 = vadd.f32 %v18778_v51, %v1367_v22  ;;  %v15845_v22 = vld [vmem:[%s18570_s1 + $0x79a] ss:$0 sm:$0xff]  ;;  %v2581_v51 = vld [vmem:[%s18570_s1 + $0xe0] sm:$0xff] }
 0x243   : > { %v13939_v14 = vpop.f32.mrf.mxu1 }
 0x244   : > { %v13922_v24 = vpop.f32.mrf.mxu0 }
 0x245   : > { %v1660_v55 = vadd.f32 %v13922_v24, %v1512_v52  ;;  %v1744_v25 = vpop.f32.mrf.mxu1  ;;  %v1253_v24 = vadd.f32 %v15777_v17, %v1104_v47  ;;  %v18779_v17 = vld [vmem:[#allocation32_spill] sm:$0xff]  ;;  %v18780_v43 = vld [vmem:[#allocation33_spill] sm:$0xff]  ;;  %v2119_v47 = vld [vmem:[%s18570_s1 + $0x80] sm:$0xff] }
 0x246   : > { %v1620_v56 = vpop.f32.mrf.mxu0  ;;  %v1518_v42 = vadd.f32 %v18779_v17, %v1370_v4  ;;  %13984 = vmatprep.subr.mxu0 %v2119_v47  ;;  %v2582_v4 = vld [vmem:[%s18570_s1 + $0xe8] sm:$0xff] }
 0x247   : > { %v1659_v40 = vadd.f32 %v1620_v56, %v1511_v31  ;;  %v13942_v58 = vpop.f32.mrf.mxu1  ;;  %v1774_v60 = vadd.f32 %v13936_v26, %v1660_v55  ;;  %v1516_v56 = vadd.f32 %v15783_v21, %v1368_v13  ;;  %v1369_v23 = vadd.f32 %v15794_v16, %v1253_v24  ;;  %v2118_v13 = vld [vmem:[%s18570_s1 + $0x78] sm:$0xff]  ;;  %13985 = vmatpush3.msra.mxu0 %v2119_v47  ;;  %v2430_v17 = vld [vmem:[%s18570_s1 + $0xc8] sm:$0xff]  ;;  %v2724_v47 = vld [vmem:[%s18570_s1 + $0x110] sm:$0xff] }
 0x248   : > { %v13925_v62 = vpop.f32.mrf.mxu0  ;;  %13986 = vmatprep.subr.mxu0 %v2118_v13 }
 0x249   : > { %v1662_v59 = vadd.f32 %v13925_v62, %v1514_v41  ;;  %v1773_v30 = vadd.f32 %v1734_v3, %v1659_v40  ;;  %v1754_v2 = vpop.f32.mrf.mxu1  ;;  %v1517_v50 = vadd.f32 %v18780_v43, %v1369_v23  ;;  %v2262_v40 = vld [vmem:[%s18570_s1 + $0x98] sm:$0xff]  ;;  %13987 = vmatpush3.msra.mxu0 %v2118_v13  ;;  %v2431_v41 = vld [vmem:[%s18570_s1 + $0xd0] sm:$0xff] }
 0x24a   : > { %v1630_v12 = vpop.f32.mrf.mxu0  ;;  %14020 = vmatprep.subr.mxu0 %v2431_v41 }
 0x24b   : > { %v1661_v44 = vadd.f32 %v1630_v12, %v1513_v54  ;;  %v1776_v9 = vadd.f32 %v13939_v14, %v1662_v59  ;;  %v13945_v3 = vpop.f32.mrf.mxu1 }
 0x24c   : > { %v13928_v57 = vpop.f32.mrf.mxu0 }
 0x24d   : > { %v1664_v39 = vadd.f32 %v13928_v57, %v1516_v56  ;;  %v1775_v11 = vadd.f32 %v1744_v25, %v1661_v44  ;;  %v1764_v48 = vpop.f32.mrf.mxu1  ;;  %v18782_v25 = vmov 0.0  }
 0x24e   : > { %v1640_v29 = vpop.f32.mrf.mxu0 }
 0x24f   : > { %v1663_v26 = vadd.f32 %v1640_v29, %v1515_v7  ;;  %v1778_v33 = vadd.f32 %v13942_v58, %v1664_v39 }
 0x250   : > { %v13931_v18 = vpop.f32.mrf.mxu0 }
 0x251   : > { %v1666_v16 = vadd.f32 %v13931_v18, %v1518_v42  ;;  %v1777_v0 = vadd.f32 %v1754_v2, %v1663_v26  ;;  %v2264_v18 = vld [vmem:[%s18570_s1 + $0xa8] sm:$0xff]  ;;  %v18783_v2 = vld [vmem:[#allocation8_spill] sm:$0xff] }
 0x252   : > { %v1650_v53 = vpop.f32.mrf.mxu0 }
 0x253   : > { %v1665_v46 = vadd.f32 %v1650_v53, %v1517_v50  ;;  %v1780_v10 = vadd.f32 %v13945_v3, %v1666_v16  ;;  %v2583_v53 = vld [vmem:[%s18570_s1 + $0xf0] sm:$0xff] }
 0x254   : > { %v13950_v35 = vpop.f32.mrf.mxu0 }
 0x255   : > { %v1920_v45 = vadd.f32 %v13950_v35, %v1774_v60  ;;  %v1779_v52 = vadd.f32 %v1764_v48, %v1665_v46  ;;  %v18786_v48 = vld [vmem:[#allocation14_spill] sm:$0xff] }
 0x256   : > { %v1880_v61 = vpop.f32.mrf.mxu0 }
 0x257   : > { %v1919_v20 = vadd.f32 %v1880_v61, %v1773_v30  ;;  %v1928_v5 = vmax.f32 %v1920_v45, 0.0 }
 0x258   : > { %v13953_v62 = vpop.f32.mrf.mxu0 }
 0x259   : > { %v1927_v8 = vmax.f32 %v1919_v20, 0.0  ;;  %v1922_v37 = vadd.f32 %v13953_v62, %v1776_v9 }
 0x25a   : > { %v1890_v21 = vpop.f32.mrf.mxu0 }
 0x25b   : > { %v1921_v32 = vadd.f32 %v1890_v21, %v1775_v11  ;;  %13968 = vmatprep.mubr.msk.f32.mxu1 %vm1944_vm4, %v1927_v8  ;;  %v1930_v14 = vmax.f32 %v1922_v37, 0.0  ;;  %v18784_v37 = vld [vmem:[#allocation9_spill] sm:$0xff] }
 0x25c   : > { %v13956_v12 = vpop.f32.mrf.mxu0  ;;  %13969 = vmatmul.mubr.msk.f32.vlgmr.msra.gmra.mxu1 %vm1944_vm4, %v1928_v5 }
 0x25d   : > { %v1929_v15 = vmax.f32 %v1921_v32, 0.0  ;;  %14001 = vmatpush3.msra.mxu1 %v18781_v49  ;;  %v1924_v57 = vadd.f32 %v13956_v12, %v1778_v33  ;;  %v2429_v32 = vld [vmem:[%s18570_s1 + $0xc0] sm:$0xff] }
 0x25e   : > { %v1900_v36 = vpop.f32.mrf.mxu0  ;;  %14002 = vmatprep.subr.mxu1 %v2264_v18 }
 0x25f   : > { %v1923_v1 = vadd.f32 %v1900_v36, %v1777_v0  ;;  %13971 = vmatprep.mubr.msk.f32.mxu1 %vm1944_vm4, %v1929_v15  ;;  %v1932_v6 = vmax.f32 %v1924_v57, 0.0  ;;  %14003 = vmatpush3.msra.mxu1 %v2264_v18  ;;  %v18785_v15 = vld [vmem:[#allocation11_spill] sm:$0xff]  ;;  %v2580_v36 = vld [vmem:[%s18570_s1 + $0xd8] sm:$0xff] }
 0x260   : > { %v13959_v34 = vpop.f32.mrf.mxu0  ;;  %13972 = vmatmul.mubr.msk.f32.gmra.mxu1 %vm1944_vm4, %v1930_v14  ;;  %14004 = vmatprep.subr.mxu1 %v2263_v28 }
 0x261   : > { %v1931_v29 = vmax.f32 %v1923_v1, 0.0  ;;  %v1926_v19 = vadd.f32 %v13959_v34, %v1780_v10  ;;  %14005 = vmatpush3.msra.mxu1 %v2263_v28  ;;  %v2428_v1 = vld [vmem:[%s18570_s1 + $0xb8] sm:$0xff]  ;;  %v2853_v28 = vld [vmem:[%s18570_s1 + $0x130] sm:$0xff] }
 0x262   : > { %v1910_v31 = vpop.f32.mrf.mxu0  ;;  %14006 = vmatprep.subr.mxu1 %v2262_v40 }
 0x263   : > { %v1925_v38 = vadd.f32 %v1910_v31, %v1779_v52  ;;  %13974 = vmatprep.mubr.msk.f32.mxu1 %vm1944_vm4, %v1931_v29  ;;  %v1934_v55 = vmax.f32 %v1926_v19, 0.0  ;;  %14007 = vmatpush3.msra.mxu1 %v2262_v40  ;;  %v18788_v31 = vld [vmem:[#allocation3_spill] sm:$0xff] }
 0x264   : > { %13975 = vmatmul.mubr.msk.f32.gmra.mxu1 %vm1944_vm4, %v1932_v6  ;;  %14040 = vmatprep.subr.mxu1 %v2583_v53  ;;  %v18787_v6 = vld [vmem:[#allocation16_spill] sm:$0xff] }
 0x265   : > { %v1933_v63 = vmax.f32 %v1925_v38, 0.0 }
 0x267   : > { %13977 = vmatprep.mubr.msk.f32.mxu1 %vm1944_vm4, %v1933_v63  ;;  %v18789_v63 = vld [vmem:[#allocation17_spill] sm:$0xff] }
 0x268   : > { %13978 = vmatmul.mubr.msk.f32.gmra.mxu1 %vm1944_vm4, %v1934_v55 }
 0x269   : > { %14008 = vmatprep.mubr.f32.mxu1 %v18782_v25 }
 0x31c   : > { %v13970_v54 = vpop.f32.mrf.mxu1 }
 0x31d   : > { %v2041_v27 = vadd.f32 %v13970_v54, %v15845_v22 }
 0x31e   : > { %v2035_v58 = vpop.f32.mrf.mxu1 }
 0x31f   : > { %v2036_v59 = vadd.f32 %v15845_v22, %v2035_v58  ;;  %v15849_v35 = vmax.f32 %v2041_v27, 0.0 }
 0x320   : > { %v13973_v60 = vpop.f32.mrf.mxu1 }
 0x321   : > { %v15851_v24 = vmax.f32 %v2036_v59, 0.0  ;;  %v2051_v44 = vadd.f32 %v13973_v60, %v15845_v22  ;;  %v2091_v7 = vrot.slane %v15849_v35, 7  ;;  %v2397_v54 = vrot.slane %v15849_v35, 1 }
 0x322   : > { %v2045_v30 = vpop.f32.mrf.mxu1 }
 0x323   : > { %v2090_v56 = vrot.slane %v15851_v24, 7  ;;  %v2046_v45 = vadd.f32 %v15845_v22, %v2045_v30  ;;  %14009 = vmatmul.mubr.msk.f32.vlgmr.msra.gmra.mxu1 %vm1944_vm4, %v15851_v24  ;;  %v15861_v61 = vmax.f32 %v2051_v44, 0.0  ;;  %v2396_v10 = vrot.slane %v15851_v24, 1  ;;  %v18791_v44 = vld [vmem:[#allocation19_spill] sm:$0xff] }
 0x324   : > { %v13976_v23 = vpop.f32.mrf.mxu1  ;;  %14011 = vmatprep.mubr.msk.f32.mxu1 %vm1944_vm4, %v15849_v35  ;;  %14041 = vmatpush3.msra.mxu1 %v2583_v53 }
 0x325   : > { %v2110_v20 = vsel %vm631_vm5, 0.0, %v2090_v56  ;;  %14042 = vmatprep.subr.mxu1 %v2582_v4  ;;  %v15871_v9 = vmax.f32 %v2046_v45, 0.0  ;;  %v2061_v62 = vadd.f32 %v13976_v23, %v15845_v22  ;;  %v15876_v11 = vsel %vm631_vm5, %v2090_v56, %v2091_v7 }
 0x326   : > { %v2111_v39 = vmul.f32 %v18783_v2, %v2110_v20  ;;  %v2055_v26 = vpop.f32.mrf.mxu1  ;;  %14043 = vmatpush3.msra.mxu1 %v2582_v4  ;;  %v2095_v42 = vrot.slane %v15861_v61, 7  ;;  %v2112_v21 = vmul.f32 %v18784_v37, %v15876_v11  ;;  %v2572_v38 = vmul.f32 %v18788_v31, %v2110_v20  ;;  %v2852_v4 = vld [vmem:[%s18570_s1 + $0x128] sm:$0xff]  ;;  %v18792_v20 = vld [vmem:[#allocation21_spill] sm:$0xff] }
 0x327   : > { %v2056_v8 = vadd.f32 %v15845_v22, %v2055_v26  ;;  %14044 = vmatprep.subr.mxu1 %v2581_v51  ;;  %v15882_v3 = vmax.f32 %v2061_v62, 0.0  ;;  %14012 = vmatmul.mubr.msk.f32.gmra.mxu1 %vm1944_vm4, %v15871_v9  ;;  %v2093_v43 = vrot.slane %v15871_v9, 7  ;;  %v2399_v53 = vrot.slane %v15871_v9, 1  ;;  %v18793_v26 = vld [vmem:[#allocation22_spill] sm:$0xff] }
 0x328   : > { %v13979_v5 = vpop.f32.mrf.mxu1  ;;  %13989 = vmatmul.mubr.msk.f32.vlgmr.msra.gmra.mxu0 %vm1944_vm4, %v2111_v39  ;;  %14014 = vmatprep.mubr.msk.f32.mxu1 %vm1944_vm4, %v15861_v61  ;;  %v2573_v27 = vmul.f32 %v18783_v2, %v15876_v11  ;;  %v2398_v60 = vsel %vm935_vm10, %v2396_v10, %v2397_v54 }
 0x329   : > { %v15890_v50 = vmax.f32 %v2056_v8, 0.0  ;;  %14021 = vmatpush3.msra.mxu0 %v2431_v41  ;;  %13991 = vmatprep.mubr.msk.f32.mxu0 %vm1944_vm4, %v2112_v21  ;;  %v15899_v33 = vsel %vm631_vm5, %v2091_v7, %v2093_v43  ;;  %v15902_v12 = vsel %vm631_vm5, %v2093_v43, %v2095_v42  ;;  %v2099_v49 = vrot.slane %v15882_v3, 7 }
 0x32a   : > { %v2065_v16 = vpop.f32.mrf.mxu1  ;;  %14022 = vmatprep.subr.mxu0 %v2430_v17  ;;  %v2113_v0 = vmul.f32 %v18785_v15, %v15899_v33  ;;  %14045 = vmatpush3.msra.mxu1 %v2581_v51  ;;  %v2114_v14 = vmul.f32 %v18786_v48, %v15902_v12  ;;  %v2071_v40 = vadd.f32 %v13979_v5, %v15845_v22  ;;  %v2419_v41 = vsel %vm935_vm10, 0.0, %v2396_v10  ;;  %v2851_v10 = vld [vmem:[%s18570_s1 + $0x120] sm:$0xff] }
 0x32b   : > { %v2066_v46 = vadd.f32 %v15845_v22, %v2065_v16  ;;  %14023 = vmatpush3.msra.mxu0 %v2430_v17  ;;  %14015 = vmatmul.mubr.msk.f32.gmra.mxu1 %vm1944_vm4, %v15890_v50  ;;  %v2097_v57 = vrot.slane %v15890_v50, 7  ;;  %v18790_v22 = vld [vmem:[#allocation20_spill] sm:$0xff]  ;;  %v2574_v59 = vmul.f32 %v18784_v37, %v15899_v33  ;;  %v2420_v30 = vmul.f32 %v18791_v44, %v2419_v41  ;;  %v2723_v17 = vld [vmem:[%s18570_s1 + $0x108] sm:$0xff] }
 0x32c   : > { %14024 = vmatprep.subr.mxu0 %v2429_v32  ;;  %13992 = vmatmul.mubr.msk.f32.gmra.mxu0 %vm1944_vm4, %v2113_v0  ;;  %v15968_v56 = vmax.f32 %v2071_v40, 0.0  ;;  %v15973_v45 = vsel %vm935_vm10, %v2397_v54, %v2399_v53  ;;  %v2403_v23 = vrot.slane %v15890_v50, 1  ;;  %v2401_v51 = vrot.slane %v15861_v61, 1 }
 0x32d   : > { %v15920_v34 = vmax.f32 %v2066_v46, 0.0  ;;  %14017 = vmatprep.mubr.msk.f32.mxu1 %vm1944_vm4, %v15882_v3  ;;  %13994 = vmatprep.mubr.msk.f32.mxu0 %vm1944_vm4, %v2114_v14  ;;  %v15927_v52 = vsel %vm631_vm5, %v2095_v42, %v2097_v57  ;;  %v15930_v29 = vsel %vm631_vm5, %v2097_v57, %v2099_v49  ;;  %v2575_v7 = vmul.f32 %v18785_v15, %v15902_v12  ;;  %v18794_v46 = vld [vmem:[#allocation24_spill] sm:$0xff]  ;;  %v2722_v57 = vld [vmem:[%s18570_s1 + $0x100] sm:$0xff] }
 0x32e   : > { %14025 = vmatpush3.msra.mxu0 %v2429_v32  ;;  %v2115_v19 = vmul.f32 %v18787_v6, %v15927_v52  ;;  %v2116_v55 = vmul.f32 %v18789_v63, %v15930_v29  ;;  %14046 = vmatprep.subr.mxu1 %v2580_v36  ;;  %v2421_v39 = vmul.f32 %v18792_v20, %v2398_v60  ;;  %v2569_v5 = vrot.slane %v15968_v56, 7 }
 0x32f   : > { %14026 = vmatprep.subr.mxu0 %v2428_v1  ;;  %v2101_v18 = vrot.slane %v15920_v34, 7  ;;  %14018 = vmatmul.mubr.msk.f32.gmra.mxu1 %vm1944_vm4, %v15920_v34  ;;  %v2576_v62 = vmul.f32 %v18786_v48, %v15927_v52  ;;  %v2422_v8 = vmul.f32 %v18793_v26, %v15973_v45  ;;  %v15990_v42 = vsel %vm935_vm10, %v2399_v53, %v2401_v51  ;;  %v18797_v53 = vld [vmem:[#allocation27_spill] sm:$0xff] }
 0x330   : > { %14027 = vmatpush3.msra.mxu0 %v2428_v1  ;;  %14048 = vmatprep.mubr.msk.f32.mxu1 %vm1944_vm4, %v2572_v38  ;;  %v15996_v21 = vsel %vm935_vm10, %v2401_v51, %v2403_v23  ;;  %v2407_v43 = vrot.slane %v15920_v34, 1  ;;  %v2405_v32 = vrot.slane %v15882_v3, 1  ;;  %v2577_v16 = vmul.f32 %v18787_v6, %v15930_v29  ;;  %v3145_v51 = vld [vmem:[%s18570_s1 + $0x170] sm:$0xff] }
 0x331   : > { %13995 = vmatmul.mubr.msk.f32.gmra.mxu0 %vm1944_vm4, %v2115_v19  ;;  %v15950_v13 = vsel %vm631_vm5, %v2099_v49, %v2101_v18  ;;  %14047 = vmatpush3.msra.mxu1 %v2580_v36  ;;  %v2423_v0 = vmul.f32 %v18794_v46, %v15990_v42  ;;  %v16010_v14 = vsel %vm631_vm5, %v2101_v18, %v2569_v5  ;;  %v18795_v36 = vld [vmem:[#allocation25_spill] sm:$0xff]  ;;  %v2409_v18 = vrot.slane %v15968_v56, 1 }
 0x332   : > { %13997 = vmatprep.mubr.msk.f32.mxu0 %vm1944_vm4, %v2116_v55  ;;  %v2117_v58 = vmul.f32 %v18790_v22, %v15950_v13  ;;  %14060 = vmatprep.subr.mxu0 %v2724_v47  ;;  %v2578_v49 = vmul.f32 %v18789_v63, %v15950_v13  ;;  %v2424_v1 = vmul.f32 %v18795_v36, %v15996_v21  ;;  %v2721_v55 = vld [vmem:[%s18570_s1 + $0xf8] sm:$0xff] }
 0x333   : > { %14080 = vmatprep.subr.mxu1 %v2853_v28  ;;  %14049 = vmatmul.mubr.msk.f32.vlgmr.msra.gmra.mxu1 %vm1944_vm4, %v2573_v27  ;;  %v16022_v19 = vsel %vm935_vm10, %v2403_v23, %v2405_v32  ;;  %v16027_v38 = vsel %vm935_vm10, %v2405_v32, %v2407_v43  ;;  %v2842_v41 = vmul.f32 %v18791_v44, %v2398_v60  ;;  %v2850_v27 = vld [vmem:[%s18570_s1 + $0x118] sm:$0xff]  ;;  %v3002_v32 = vld [vmem:[%s18570_s1 + $0x140] sm:$0xff] }
 0x334   : > { %14051 = vmatprep.mubr.msk.f32.mxu1 %vm1944_vm4, %v2574_v59  ;;  %14081 = vmatpush3.msra.mxu1 %v2853_v28  ;;  %v18796_v28 = vld [vmem:[#allocation26_spill] sm:$0xff]  ;;  %v2426_v54 = vmul.f32 %v18797_v53, %v16027_v38  ;;  %v3004_v59 = vld [vmem:[%s18570_s1 + $0x150] sm:$0xff]  ;;  %v2843_v60 = vmul.f32 %v18792_v20, %v15973_v45  ;;  %v2844_v23 = vmul.f32 %v18793_v26, %v15990_v42 }
 0x335   : > { %13998 = vmatmul.mubr.msk.f32.gmra.mxu0 %vm1944_vm4, %v2117_v58  ;;  %14082 = vmatprep.subr.mxu1 %v2852_v4  ;;  %v2425_v40 = vmul.f32 %v18796_v28, %v16022_v19  ;;  %v16046_v58 = vsel %vm935_vm10, %v2407_v43, %v2409_v18  ;;  %v16089_v43 = vsel %vm935_vm10, %v2409_v18, 0.0  ;;  %v18799_v18 = vld [vmem:[#allocation29_spill] sm:$0xff] }
 0x336   : > { %14028 = vmatprep.mubr.msk.f32.mxu0 %vm1944_vm4, %v2420_v30  ;;  %14083 = vmatpush3.msra.mxu1 %v2852_v4  ;;  %v18798_v30 = vld [vmem:[#allocation28_spill] sm:$0xff] }
 0x337   : > { %14052 = vmatmul.mubr.msk.f32.gmra.mxu1 %vm1944_vm4, %v2575_v7  ;;  %14084 = vmatprep.subr.mxu1 %v2851_v10  ;;  %v2427_v4 = vmul.f32 %v18798_v30, %v16046_v58  ;;  %v2845_v7 = vmul.f32 %v18794_v46, %v15996_v21 }
 0x338   : > { %14054 = vmatprep.mubr.msk.f32.mxu1 %vm1944_vm4, %v2576_v62  ;;  %14085 = vmatpush3.msra.mxu1 %v2851_v10  ;;  %v3003_v62 = vld [vmem:[%s18570_s1 + $0x148] sm:$0xff]  ;;  %v2993_v10 = vmul.f32 %v18788_v31, %v15876_v11  ;;  %v2995_v11 = vmul.f32 %v18784_v37, %v15902_v12  ;;  %v2998_v12 = vmul.f32 %v18787_v6, %v15950_v13 }
 0x339   : > { %14029 = vmatmul.mubr.msk.f32.vlgmr.msra.gmra.mxu0 %vm1944_vm4, %v2421_v39  ;;  %14086 = vmatprep.subr.mxu1 %v2850_v27  ;;  %v2846_v39 = vmul.f32 %v18795_v36, %v16022_v19 }
 0x33a   : > { %14061 = vmatpush3.msra.mxu0 %v2724_v47  ;;  %14031 = vmatprep.mubr.msk.f32.mxu0 %vm1944_vm4, %v2422_v8  ;;  %v2579_v47 = vmul.f32 %v18790_v22, %v16010_v14  ;;  %v2847_v8 = vmul.f32 %v18796_v28, %v16027_v38 }
 0x33b   : > { %14062 = vmatprep.subr.mxu0 %v2723_v17  ;;  %14055 = vmatmul.mubr.msk.f32.gmra.mxu1 %vm1944_vm4, %v2577_v16  ;;  %v3143_v16 = vld [vmem:[%s18570_s1 + $0x160] sm:$0xff] }
 0x33c   : > { %14063 = vmatpush3.msra.mxu0 %v2723_v17  ;;  %14057 = vmatprep.mubr.msk.f32.mxu1 %vm1944_vm4, %v2578_v49  ;;  %v2848_v17 = vmul.f32 %v18797_v53, %v16046_v58  ;;  %v3142_v49 = vld [vmem:[%s18570_s1 + $0x158] sm:$0xff] }
 0x33d   : > { %14032 = vmatmul.mubr.msk.f32.gmra.mxu0 %vm1944_vm4, %v2423_v0  ;;  %14064 = vmatprep.subr.mxu0 %v2722_v57  ;;  %v2849_v0 = vmul.f32 %v18798_v30, %v16089_v43  ;;  %v12645_v30 = vld [vmem:[%s18570_s1 + $0x79b] ss:$0 sm:$0xff] }
 0x33e   : > { %14034 = vmatprep.mubr.msk.f32.mxu0 %vm1944_vm4, %v2424_v1  ;;  %14065 = vmatpush3.msra.mxu0 %v2722_v57  ;;  %v3001_v57 = vld [vmem:[%s18570_s1 + $0x138] sm:$0xff]  ;;  %v3269_v1 = vld [vmem:[%s18570_s1 + $0x190] sm:$0xff] }
 0x33f   : > { %14058 = vmatmul.mubr.msk.f32.gmra.mxu1 %vm1944_vm4, %v2579_v47  ;;  %14066 = vmatprep.subr.mxu0 %v2721_v55  ;;  %v18802_v47 = vld [vmem:[#allocation12_spill] sm:$0xff] }
 0x340   : > { %14088 = vmatprep.mubr.msk.f32.mxu1 %vm1944_vm4, %v2842_v41  ;;  %14067 = vmatpush3.msra.mxu0 %v2721_v55  ;;  %v3262_v55 = vmul.f32 %v18794_v46, %v16022_v19  ;;  %v18800_v19 = vld [vmem:[#allocation7_spill] sm:$0xff] }
 0x341   : > { %14035 = vmatmul.mubr.msk.f32.gmra.mxu0 %vm1944_vm4, %v2425_v40  ;;  %14087 = vmatpush3.msra.mxu1 %v2850_v27  ;;  %v18803_v40 = vld [vmem:[#allocation10_spill] sm:$0xff]  ;;  %v18804_v41 = vld [vmem:[#allocation15_spill] sm:$0xff] }
 0x342   : > { %14037 = vmatprep.mubr.msk.f32.mxu0 %vm1944_vm4, %v2426_v54  ;;  %14100 = vmatprep.subr.mxu0 %v3004_v59  ;;  %v18805_v54 = vld [vmem:[#allocation13_spill] sm:$0xff]  ;;  %v18806_v27 = vld [vmem:[#allocation18_spill] sm:$0xff] }
 0x343   : > { %14089 = vmatmul.mubr.msk.f32.vlgmr.msra.gmra.mxu1 %vm1944_vm4, %v2843_v60  ;;  %14120 = vmatprep.subr.mxu1 %v3145_v51 }
 0x344   : > { %14091 = vmatprep.mubr.msk.f32.mxu1 %vm1944_vm4, %v2844_v23  ;;  %14121 = vmatpush3.msra.mxu1 %v3145_v51 }
 0x345   : > { %14038 = vmatmul.mubr.msk.f32.gmra.mxu0 %vm1944_vm4, %v2427_v4 }
 0x346   : > { %14068 = vmatprep.mubr.msk.f32.mxu0 %vm1944_vm4, %v15851_v24  ;;  %v3144_v24 = vld [vmem:[%s18570_s1 + $0x168] sm:$0xff] }
 0x347   : > { %14092 = vmatmul.mubr.msk.f32.gmra.mxu1 %vm1944_vm4, %v2845_v7  ;;  %14122 = vmatprep.subr.mxu1 %v3144_v24 }
 0x348   : > { %14094 = vmatprep.mubr.msk.f32.mxu1 %vm1944_vm4, %v2846_v39  ;;  %14123 = vmatpush3.msra.mxu1 %v3144_v24 }
 0x349   : > { %14069 = vmatmul.mubr.msk.f32.vlgmr.msra.gmra.mxu0 %vm1944_vm4, %v15849_v35  ;;  %14124 = vmatprep.subr.mxu1 %v3143_v16 }
 0x34a   : > { %14101 = vmatpush3.msra.mxu0 %v3004_v59  ;;  %14071 = vmatprep.mubr.msk.f32.mxu0 %vm1944_vm4, %v15871_v9 }
 0x34b   : > { %14102 = vmatprep.subr.mxu0 %v3003_v62  ;;  %14095 = vmatmul.mubr.msk.f32.gmra.mxu1 %vm1944_vm4, %v2847_v8 }
 0x34c   : > { %14103 = vmatpush3.msra.mxu0 %v3003_v62  ;;  %14097 = vmatprep.mubr.msk.f32.mxu1 %vm1944_vm4, %v2848_v17 }
 0x34d   : > { %14072 = vmatmul.mubr.msk.f32.gmra.mxu0 %vm1944_vm4, %v15861_v61  ;;  %14104 = vmatprep.subr.mxu0 %v3002_v32 }
 0x34e   : > { %14074 = vmatprep.mubr.msk.f32.mxu0 %vm1944_vm4, %v15890_v50  ;;  %14105 = vmatpush3.msra.mxu0 %v3002_v32 }
 0x34f   : > { %14098 = vmatmul.mubr.msk.f32.gmra.mxu1 %vm1944_vm4, %v2849_v0  ;;  %14106 = vmatprep.subr.mxu0 %v3001_v57 }
 0x350   : > { %14125 = vmatpush3.msra.mxu1 %v3143_v16  ;;  %14128 = vmatprep.mubr.msk.f32.mxu1 %vm1944_vm4, %v15849_v35  ;;  %v2994_v35 = vmul.f32 %v18783_v2, %v15899_v33  ;;  %v2997_v33 = vmul.f32 %v18786_v48, %v15930_v29  ;;  %v3620_v29 = vld [vmem:[%s18570_s1 + $0x198] sm:$0xff] }
 0x351   : > { %14075 = vmatmul.mubr.msk.f32.gmra.mxu0 %vm1944_vm4, %v15882_v3  ;;  %14126 = vmatprep.subr.mxu1 %v3142_v49 }
 0x352   : > { %14077 = vmatprep.mubr.msk.f32.mxu0 %vm1944_vm4, %v15920_v34  ;;  %14127 = vmatpush3.msra.mxu1 %v3142_v49 }
 0x353   : > { %14129 = vmatmul.mubr.msk.f32.vlgmr.msra.gmra.mxu1 %vm1944_vm4, %v15871_v9  ;;  %14107 = vmatpush3.msra.mxu0 %v3001_v57  ;;  %v3268_v9 = vld [vmem:[%s18570_s1 + $0x188] sm:$0xff] }
 0x354   : > { %14131 = vmatprep.mubr.msk.f32.mxu1 %vm1944_vm4, %v15861_v61  ;;  %14140 = vmatprep.subr.mxu0 %v3269_v1  ;;  %v2996_v61 = vmul.f32 %v18785_v15, %v15927_v52  ;;  %v2999_v52 = vmul.f32 %v18789_v63, %v16010_v14  ;;  %v3261_v14 = vmul.f32 %v18793_v26, %v15996_v21 }
 0x355   : > { %14078 = vmatmul.mubr.msk.f32.gmra.mxu0 %vm1944_vm4, %v15968_v56  ;;  %v3265_v21 = vmul.f32 %v18797_v53, %v16089_v43 }
 0x356   : > { %14108 = vmatprep.mubr.msk.f32.mxu0 %vm1944_vm4, %v2993_v10 }
 0x357   : > { %14132 = vmatmul.mubr.msk.f32.gmra.mxu1 %vm1944_vm4, %v15890_v50  ;;  %v3267_v50 = vld [vmem:[%s18570_s1 + $0x180] sm:$0xff] }
 0x358   : > { %14134 = vmatprep.mubr.msk.f32.mxu1 %vm1944_vm4, %v15882_v3  ;;  %v3266_v3 = vld [vmem:[%s18570_s1 + $0x178] sm:$0xff] }
 0x359   : > { %14109 = vmatmul.mubr.msk.f32.vlgmr.msra.gmra.mxu0 %vm1944_vm4, %v2994_v35 }
 0x35a   : > { %14141 = vmatpush3.msra.mxu0 %v3269_v1  ;;  %14111 = vmatprep.mubr.msk.f32.mxu0 %vm1944_vm4, %v2995_v11 }
 0x35b   : > { %14142 = vmatprep.subr.mxu0 %v3268_v9  ;;  %14135 = vmatmul.mubr.msk.f32.gmra.mxu1 %vm1944_vm4, %v15920_v34  ;;  %v2992_v34 = vsel %vm631_vm5, %v2569_v5, 0.0  ;;  %v3260_v5 = vmul.f32 %v18792_v20, %v15990_v42  ;;  %v3264_v42 = vmul.f32 %v18796_v28, %v16046_v58  ;;  %v18807_v58 = vld [vmem:[#allocation23_spill] sm:$0xff] }
 0x35c   : > { %14143 = vmatpush3.msra.mxu0 %v3268_v9  ;;  %14137 = vmatprep.mubr.msk.f32.mxu1 %vm1944_vm4, %v15968_v56  ;;  %v3000_v13 = vmul.f32 %v18790_v22, %v2992_v34  ;;  %v3259_v56 = vmul.f32 %v18791_v44, %v15973_v45  ;;  %v3263_v45 = vmul.f32 %v18795_v36, %v16027_v38  ;;  %v18801_v38 = vld [vmem:[#allocation6_spill] sm:$0xff] }
 0x35d   : > { %14112 = vmatmul.mubr.msk.f32.gmra.mxu0 %vm1944_vm4, %v2996_v61  ;;  %14144 = vmatprep.subr.mxu0 %v3267_v50 }
 0x35e   : > { %14114 = vmatprep.mubr.msk.f32.mxu0 %vm1944_vm4, %v2997_v33  ;;  %14145 = vmatpush3.msra.mxu0 %v3267_v50 }
 0x35f   : > { %14146 = vmatprep.subr.mxu0 %v3266_v3  ;;  %14138 = vmatmul.mubr.f32.gmra.mxu1 %v18782_v25 }
 0x360   : > { %14147 = vmatpush3.msra.mxu0 %v3266_v3 }
 0x361   : > { %14115 = vmatmul.mubr.msk.f32.gmra.mxu0 %vm1944_vm4, %v2998_v12  ;;  %14174 = vmatprep.subr.mxu0 %v3620_v29 }
 0x362   : > { %14117 = vmatprep.mubr.msk.f32.mxu0 %vm1944_vm4, %v2999_v52 }
 0x365   : > { %14118 = vmatmul.mubr.msk.f32.gmra.mxu0 %vm1944_vm4, %v3000_v13 }
 0x366   : > { %14148 = vmatprep.mubr.msk.f32.mxu0 %vm1944_vm4, %v3259_v56 }
 0x369   : > { %14149 = vmatmul.mubr.msk.f32.vlgmr.msra.gmra.mxu0 %vm1944_vm4, %v3260_v5 }
 0x36a   : > { %14151 = vmatprep.mubr.msk.f32.mxu0 %vm1944_vm4, %v3261_v14  ;;  %14175 = vmatpush3.msra.mxu0 %v3620_v29 }
 0x36d   : > { %14152 = vmatmul.mubr.msk.f32.gmra.mxu0 %vm1944_vm4, %v3262_v55 }
 0x36e   : > { %14154 = vmatprep.mubr.msk.f32.mxu0 %vm1944_vm4, %v3263_v45 }
 0x371   : > { %14155 = vmatmul.mubr.msk.f32.gmra.mxu0 %vm1944_vm4, %v3264_v42 }
 0x372   : > { %14157 = vmatprep.mubr.msk.f32.mxu0 %vm1944_vm4, %v3265_v21 }
 0x375   : > { %14158 = vmatmul.mubr.msk.f32.gmra.mxu0 %vm1944_vm4, %v18799_v18 }
 0x376   : > { %14176 = vmatprep.mubr.msk.f32.mxu0 %vm367_vm0, %v18800_v19 }
 0x379   : > { %14177 = vmatmul.mubr.msk.f32.vlgmr.msra.gmra.mxu0 %vm367_vm0, %v18801_v38 }
 0x37a   : > { %14179 = vmatprep.mubr.msk.f32.mxu0 %vm367_vm0, %v18802_v47 }
 0x37d   : > { %14180 = vmatmul.mubr.msk.f32.gmra.mxu0 %vm367_vm0, %v18803_v40 }
 0x37e   : > { %14182 = vmatprep.mubr.msk.f32.mxu0 %vm367_vm0, %v18804_v41 }
 0x381   : > { %14183 = vmatmul.mubr.msk.f32.gmra.mxu0 %vm367_vm0, %v18805_v54 }
 0x382   : > { %14185 = vmatprep.mubr.msk.f32.mxu0 %vm367_vm0, %v18806_v27 }
 0x385   : > { %14186 = vmatmul.mubr.msk.f32.gmra.mxu0 %vm367_vm0, %v18807_v58 }
 0x386   : > { %14204 = vmatprep.mubr.f32.mxu0 %v18782_v25 }
 0x3e3   : > { %v14010_v59 = vpop.f32.mrf.mxu1 }
 0x3e5   : > { %v2348_v60 = vpop.f32.mrf.mxu1 }
 0x3e7   : > { %v14013_v4 = vpop.f32.mrf.mxu1 }
 0x3e8   : > { %v13990_v23 = vpop.f32.mrf.mxu0 }
 0x3e9   : > { %v2358_v51 = vpop.f32.mrf.mxu1  ;;  %v2255_v46 = vadd.f32 %v13990_v23, %v12645_v30 }
 0x3ea   : > { %v2211_v7 = vpop.f32.mrf.mxu0 }
 0x3eb   : > { %v16214_v39 = vpop.f32.mrf.mxu1  ;;  %v2254_v44 = vadd.f32 %v12645_v30, %v2211_v7  ;;  %v2388_v31 = vadd.f32 %v14010_v59, %v2255_v46 }
 0x3ec   : > { %v13993_v62 = vpop.f32.mrf.mxu0 }
 0x3ed   : > { %v16216_v24 = vpop.f32.mrf.mxu1  ;;  %v2257_v63 = vadd.f32 %v13993_v62, %v12645_v30  ;;  %v2387_v37 = vadd.f32 %v2348_v60, %v2254_v44 }
 0x3ee   : > { %v2221_v8 = vpop.f32.mrf.mxu0 }
 0x3ef   : > { %v16218_v17 = vpop.f32.mrf.mxu1  ;;  %v2256_v2 = vadd.f32 %v12645_v30, %v2221_v8  ;;  %v2390_v41 = vadd.f32 %v14013_v4, %v2257_v63 }
 0x3f1   : > { %v13996_v43 = vpop.f32.mrf.mxu0  ;;  %v16220_v32 = vpop.f32.mrf.mxu1  ;;  %v2389_v7 = vadd.f32 %v2358_v51, %v2256_v2 }
 0x3f2   : > { %v2259_v47 = vadd.f32 %v13996_v43, %v12645_v30 }
 0x3f3   : > { %v2231_v16 = vpop.f32.mrf.mxu0  ;;  %v14050_v0 = vpop.f32.mrf.mxu1 }
 0x3f4   : > { %v2258_v40 = vadd.f32 %v12645_v30, %v2231_v16 }
 0x3f5   : > { %v13999_v49 = vpop.f32.mrf.mxu0  ;;  %v2674_v57 = vpop.f32.mrf.mxu1 }
 0x3f6   : > { %v2261_v62 = vadd.f32 %v13999_v49, %v12645_v30  ;;  %v2391_v60 = vadd.f32 %v16216_v24, %v2258_v40 }
 0x3f7   : > { %v2241_v1 = vpop.f32.mrf.mxu0  ;;  %v14053_v10 = vpop.f32.mrf.mxu1 }
 0x3f8   : > { %v2260_v4 = vadd.f32 %v12645_v30, %v2241_v1 }
 0x3f9   : > { %v14030_v35 = vpop.f32.mrf.mxu0  ;;  %v16222_v9 = vpop.f32.mrf.mxu1 }
 0x3fa   : > { %v2562_v15 = vadd.f32 %v14030_v35, %v2388_v31  ;;  %v2392_v31 = vadd.f32 %v16214_v39, %v2259_v47  ;;  %v2393_v39 = vadd.f32 %v16220_v32, %v2260_v4 }
 0x3fb   : > { %v2522_v11 = vpop.f32.mrf.mxu0  ;;  %v16224_v61 = vpop.f32.mrf.mxu1 }
 0x3fc   : > { %v2561_v58 = vadd.f32 %v2522_v11, %v2387_v37  ;;  %v2714_v38 = vadd.f32 %v14050_v0, %v2562_v15  ;;  %v2394_v15 = vadd.f32 %v16218_v17, %v2261_v62 }
 0x3fd   : > { %v14033_v33 = vpop.f32.mrf.mxu0  ;;  %v16226_v50 = vpop.f32.mrf.mxu1 }
 0x3fe   : > { %v2564_v19 = vadd.f32 %v14033_v33, %v2390_v41  ;;  %v2713_v59 = vadd.f32 %v2674_v57, %v2561_v58 }
 0x3ff   : > { %v2532_v3 = vpop.f32.mrf.mxu0  ;;  %v16228_v12 = vpop.f32.mrf.mxu1 }
 0x400   : > { %v2716_v63 = vadd.f32 %v14053_v10, %v2564_v19 }
 0x401   : > { %v14036_v52 = vpop.f32.mrf.mxu0  ;;  %v16230_v34 = vpop.f32.mrf.mxu1 }
 0x402   : > { %v2566_v8 = vadd.f32 %v14036_v52, %v2392_v31 }
 0x403   : > { %v2542_v29 = vpop.f32.mrf.mxu0  ;;  %v14090_v13 = vpop.f32.mrf.mxu1 }
 0x404   : > { %v2565_v16 = vadd.f32 %v2542_v29, %v2391_v60  ;;  %v2718_v19 = vadd.f32 %v16224_v61, %v2566_v8 }
 0x405   : > { %v14039_v56 = vpop.f32.mrf.mxu0  ;;  %v2944_v5 = vpop.f32.mrf.mxu1 }
 0x406   : > { %v2568_v0 = vadd.f32 %v14039_v56, %v2394_v15  ;;  %v2717_v24 = vadd.f32 %v16226_v50, %v2565_v16 }
 0x407   : > { %v16232_v14 = vpop.f32.mrf.mxu0  ;;  %v16234_v55 = vpop.f32.mrf.mxu1 }
 0x408   : > { %v2567_v17 = vadd.f32 %v16232_v14, %v2393_v39 }
 0x409   : > { %v14070_v45 = vpop.f32.mrf.mxu0  ;;  %v16236_v42 = vpop.f32.mrf.mxu1 }
 0x40a   : > { %v2833_v46 = vadd.f32 %v14070_v45, %v2714_v38  ;;  %v2719_v52 = vadd.f32 %v16230_v34, %v2567_v17 }
 0x40b   : > { %v2793_v21 = vpop.f32.mrf.mxu0  ;;  %v16238_v18 = vpop.f32.mrf.mxu1 }
 0x40c   : > { %v2832_v37 = vadd.f32 %v2793_v21, %v2713_v59  ;;  %v2984_v51 = vadd.f32 %v14090_v13, %v2833_v46 }
 0x40d   : > { %v14073_v25 = vpop.f32.mrf.mxu0  ;;  %v16243_v53 = vpop.f32.mrf.mxu1 }
 0x40e   : > { %18808 = vst [vmem:[#allocation31_spill] sm:$0xff] %v16243_v53  ;;  %v2563_v53 = vadd.f32 %v2532_v3, %v2389_v7  ;;  %v2835_v2 = vadd.f32 %v14073_v25, %v2716_v63  ;;  %v2983_v47 = vadd.f32 %v2944_v5, %v2832_v37  ;;  %v3621_v63 = vld [vmem:[%s18570_s1 + $0x1a0] sm:$0xff] }
 0x40f   : > { %v2803_v28 = vpop.f32.mrf.mxu0  ;;  %v16245_v26 = vpop.f32.mrf.mxu1  ;;  %14160 = vmatprep.subr.mxu1 %v3621_v63 }
 0x410   : > { %18809 = vst [vmem:[#allocation32_spill] sm:$0xff] %v16245_v26  ;;  %v2715_v38 = vadd.f32 %v16222_v9, %v2563_v53  ;;  %v2986_v25 = vadd.f32 %v16234_v55, %v2835_v2  ;;  %14161 = vmatpush3.msra.mxu1 %v3621_v63 }
 0x411   : > { %v14076_v36 = vpop.f32.mrf.mxu0  ;;  %v16247_v6 = vpop.f32.mrf.mxu1 }
 0x412   : > { %18810 = vst [vmem:[#allocation33_spill] sm:$0xff] %v16247_v6  ;;  %v2834_v40 = vadd.f32 %v2803_v28, %v2715_v38  ;;  %v2837_v10 = vadd.f32 %v14076_v36, %v2718_v19 }
 0x413   : > { %v2813_v20 = vpop.f32.mrf.mxu0  ;;  %v14130_v54 = vpop.f32.mrf.mxu1 }
 0x414   : > { %v2836_v35 = vadd.f32 %v2813_v20, %v2717_v24  ;;  %v2985_v28 = vadd.f32 %v16236_v42, %v2834_v40  ;;  %v2988_v13 = vadd.f32 %v16238_v18, %v2837_v10 }
 0x415   : > { %v14079_v22 = vpop.f32.mrf.mxu0  ;;  %v3212_v6 = vpop.f32.mrf.mxu1  ;;  %v18811_v36 = vld [vmem:[#allocation31_spill] sm:$0xff] }
 0x416   : > { %v2987_v5 = vadd.f32 %v18811_v36, %v2836_v35 }
 0x417   : > { %v16249_v48 = vpop.f32.mrf.mxu0  ;;  %v14133_v41 = vpop.f32.mrf.mxu1 }
 0x419   : > { %v14110_v27 = vpop.f32.mrf.mxu0  ;;  %v3222_v57 = vpop.f32.mrf.mxu1  ;;  %v18813_v7 = vld [vmem:[#allocation33_spill] sm:$0xff] }
 0x41a   : > { %v3135_v49 = vadd.f32 %v14110_v27, %v2984_v51  ;;  %v2720_v27 = vadd.f32 %v16228_v12, %v2568_v0 }
 0x41b   : > { %v3095_v23 = vpop.f32.mrf.mxu0  ;;  %v14136_v33 = vpop.f32.mrf.mxu1 }
 0x41c   : > { %v3134_v1 = vadd.f32 %v3095_v23, %v2983_v47  ;;  %v3252_v11 = vadd.f32 %v14130_v54, %v3135_v49  ;;  %v2839_v61 = vadd.f32 %v14079_v22, %v2720_v27  ;;  %v2838_v54 = vadd.f32 %v16249_v48, %v2719_v52 }
 0x41d   : > { %v14113_v26 = vpop.f32.mrf.mxu0  ;;  %v3232_v14 = vpop.f32.mrf.mxu1 }
 0x41e   : > { %v3137_v9 = vadd.f32 %v14113_v26, %v2986_v25  ;;  %v3251_v50 = vadd.f32 %v3212_v6, %v3134_v1  ;;  %v18812_v6 = vld [vmem:[#allocation32_spill] sm:$0xff]  ;;  %v2989_v62 = vadd.f32 %v18813_v7, %v2838_v54 }
 0x41f   : > { %v3105_v44 = vpop.f32.mrf.mxu0  ;;  %v2990_v45 = vadd.f32 %v18812_v6, %v2839_v61  ;;  %v14139_v23 = vpop.f32.mrf.mxu1 }
 0x420   : > { %v3136_v29 = vadd.f32 %v3105_v44, %v2985_v28  ;;  %v3254_v26 = vadd.f32 %v14133_v41, %v3137_v9 }
 0x421   : > { %v14116_v43 = vpop.f32.mrf.mxu0  ;;  %v3242_v8 = vpop.f32.mrf.mxu1 }
 0x422   : > { %v3139_v12 = vadd.f32 %v14116_v43, %v2988_v13  ;;  %v3253_v18 = vadd.f32 %v3222_v57, %v3136_v29 }
 0x423   : > { %v3115_v58 = vpop.f32.mrf.mxu0 }
 0x424   : > { %v3138_v55 = vadd.f32 %v3115_v58, %v2987_v5  ;;  %v3256_v59 = vadd.f32 %v14136_v33, %v3139_v12 }
 0x425   : > { %v14119_v30 = vpop.f32.mrf.mxu0 }
 0x426   : > { %v3141_v21 = vadd.f32 %v14119_v30, %v2990_v45  ;;  %v3255_v31 = vadd.f32 %v3232_v14, %v3138_v55 }
 0x427   : > { %v3125_v53 = vpop.f32.mrf.mxu0 }
 0x428   : > { %v3140_v44 = vadd.f32 %v3125_v53, %v2989_v62  ;;  %v3258_v4 = vadd.f32 %v14139_v23, %v3141_v21 }
 0x429   : > { %v14150_v32 = vpop.f32.mrf.mxu0 }
 0x42a   : > { %v3399_v3 = vadd.f32 %v14150_v32, %v3252_v11  ;;  %v3257_v2 = vadd.f32 %v3242_v8, %v3140_v44 }
 0x42b   : > { %v3359_v56 = vpop.f32.mrf.mxu0 }
 0x42c   : > { %v3398_v20 = vadd.f32 %v3359_v56, %v3251_v50  ;;  %3496 = vrot.lane.b32.xlu1 %v3399_v3, %s15207_s8  ;;  %v16279_v38 = vadd.f32 2.0, %v3399_v3 }
 0x42d   : > { %v14153_v22 = vpop.f32.mrf.mxu0 }
 0x42e   : > { %v3401_v34 = vadd.f32 %v14153_v22, %v3254_v26  ;;  %3494 = vrot.lane.b32.xlu0 %v3398_v20, %s15207_s8  ;;  %v16281_v58 = vadd.f32 2.0, %v3398_v20  ;;  %v3423_v0 = vand.u32 2147483647, %v16279_v38  ;;  %v3415_v44 = vmin.f32 %v16279_v38, 0.0 }
 0x42f   : > { %v3369_v42 = vpop.f32.mrf.mxu0 }
 0x430   : > { %3500 = vrot.lane.b32.xlu1 %v3401_v34, %s15207_s8  ;;  %v3400_v46 = vadd.f32 %v3369_v42, %v3253_v18  ;;  %v16284_v49 = vadd.f32 2.0, %v3401_v34  ;;  %v3422_v47 = vand.u32 2147483647, %v16281_v58  ;;  %v3431_v40 = vsub.f32 0.0, %v3423_v0 }
 0x431   : > { %v14156_v48 = vpop.f32.mrf.mxu0 }
 0x432   : > { %v3403_v60 = vadd.f32 %v14156_v48, %v3256_v59  ;;  %3498 = vrot.lane.b32.xlu0 %v3400_v46, %s15207_s8  ;;  %v16287_v39 = vadd.f32 2.0, %v3400_v46  ;;  %v3425_v19 = vand.u32 2147483647, %v16284_v49  ;;  %v3430_v24 = vsub.f32 0.0, %v3422_v47 }
 0x433   : > { %v3379_v37 = vpop.f32.mrf.mxu0  ;;  %v3440_v25 = vmul.f32 1.442695, %v3431_v40 }
 0x434   : > { %v3402_v43 = vadd.f32 %v3379_v37, %v3255_v31  ;;  %3504 = vrot.lane.b32.xlu1 %v3403_v60, %s15207_s8  ;;  %v16290_v30 = vadd.f32 2.0, %v3403_v60  ;;  %v3424_v57 = vand.u32 2147483647, %v16287_v39  ;;  %v3433_v17 = vsub.f32 0.0, %v3425_v19 }
 0x435   : > { %v14159_v16 = vpop.f32.mrf.mxu0  ;;  %v3438_v35 = vmul.f32 1.442695, %v3430_v24  ;;  %15061 = vpow2.f32 %v3440_v25  ;;  %v3416_v38 = vmin.f32 %v16287_v39, 0.0 }
 0x436   : > { %v3405_v15 = vadd.f32 %v14159_v16, %v3258_v4  ;;  %3502 = vrot.lane.b32.xlu0 %v3402_v43, %s15207_s8  ;;  %v16293_v1 = vadd.f32 2.0, %v3402_v43  ;;  %v3427_v10 = vand.u32 2147483647, %v16290_v30  ;;  %v3432_v27 = vsub.f32 0.0, %v3424_v57 }
 0x437   : > { %v3389_v41 = vpop.f32.mrf.mxu0  ;;  %v3444_v28 = vmul.f32 1.442695, %v3433_v17  ;;  %15063 = vpow2.f32 %v3438_v35  ;;  %v3414_v4 = vmin.f32 %v16281_v58, 0.0  ;;  %v3419_v58 = vmin.f32 %v16290_v30, 0.0 }
 0x438   : > { %v3404_v51 = vadd.f32 %v3389_v41, %v3257_v2  ;;  %3508 = vrot.lane.b32.xlu1 %v3405_v15, %s15207_s8  ;;  %v16296_v53 = vadd.f32 2.0, %v3405_v15  ;;  %v3426_v9 = vand.u32 2147483647, %v16293_v1  ;;  %v3435_v32 = vsub.f32 0.0, %v3427_v10 }
 0x439   : > { %v3442_v33 = vmul.f32 1.442695, %v3432_v27  ;;  %15065 = vpow2.f32 %v3444_v28  ;;  %v3417_v15 = vmin.f32 %v16284_v49, 0.0  ;;  %v3418_v10 = vmin.f32 %v16293_v1, 0.0 }
 0x43a   : > { %3506 = vrot.lane.b32.xlu0 %v3404_v51, %s15207_s8  ;;  %v16299_v11 = vadd.f32 2.0, %v3404_v51  ;;  %v3429_v61 = vand.u32 2147483647, %v16296_v53  ;;  %v3434_v3 = vsub.f32 0.0, %v3426_v9  ;;  %v3448_v52 = vmul.f32 1.442695, %v3435_v32 }
 0x43b   : > { %15067 = vpow2.f32 %v3442_v33  ;;  %v3421_v9 = vmin.f32 %v16296_v53, 0.0 }
 0x43c   : > { %v3428_v50 = vand.u32 2147483647, %v16299_v11  ;;  %v3437_v29 = vsub.f32 0.0, %v3429_v61  ;;  %v3446_v13 = vmul.f32 1.442695, %v3434_v3  ;;  %15069 = vpow2.f32 %v3448_v52  ;;  %v18822_v52 = vld [vmem:[#allocation6_spill] sm:$0xff] }
 0x43d   : > { %v3420_v61 = vmin.f32 %v16299_v11, 0.0 }
 0x43e   : > { %v3436_v56 = vsub.f32 0.0, %v3428_v50  ;;  %v3452_v36 = vmul.f32 1.442695, %v3437_v29  ;;  %15071 = vpow2.f32 %v3446_v13 }
 0x440   : > { %v3450_v5 = vmul.f32 1.442695, %v3436_v56  ;;  %15073 = vpow2.f32 %v3452_v36 }
 0x442   : > { %v15062_v20 = vpop.eup %15061  ;;  %15075 = vpow2.f32 %v3450_v5  ;;  %v18823_v5 = vld [vmem:[#allocation7_spill] sm:$0xff] }
 0x443   : > { %v3455_v54 = vadd.f32 1.0, %v15062_v20 }
 0x444   : > { %v15064_v26 = vpop.eup %15063 }
 0x445   : > { %v3454_v22 = vadd.f32 1.0, %v15064_v26  ;;  %15077 = vlog2.f32 %v3455_v54 }
 0x446   : > { %v15066_v12 = vpop.eup %15065 }
 0x447   : > { %v3457_v55 = vadd.f32 1.0, %v15066_v12  ;;  %15079 = vlog2.f32 %v3454_v22  ;;  %v18824_v12 = vld [vmem:[#allocation10_spill] sm:$0xff] }
 0x448   : > { %v15068_v14 = vpop.eup %15067 }
 0x449   : > { %v15070_v6 = vpop.eup %15069  ;;  %v3456_v45 = vadd.f32 1.0, %v15068_v14  ;;  %15081 = vlog2.f32 %v3457_v55 }
 0x44a   : > { %v3459_v18 = vadd.f32 1.0, %v15070_v6 }
 0x44b   : > { %v15072_v34 = vpop.eup %15071  ;;  %15083 = vlog2.f32 %v3456_v45  ;;  %v18825_v45 = vld [vmem:[#allocation12_spill] sm:$0xff] }
 0x44c   : > { %v3458_v21 = vadd.f32 1.0, %v15072_v34  ;;  %15085 = vlog2.f32 %v3459_v18  ;;  %v3921_v18 = vld [vmem:[%s18570_s1 + $0x1a8] sm:$0xff] }
 0x44d   : > { %v15074_v42 = vpop.eup %15073  ;;  %14188 = vmatprep.subr.mxu1 %v3921_v18 }
 0x44e   : > { %v3461_v7 = vadd.f32 1.0, %v15074_v42  ;;  %15087 = vlog2.f32 %v3458_v21 }
 0x44f   : > { %v15076_v23 = vpop.eup %15075 }
 0x450   : > { %v3460_v62 = vadd.f32 1.0, %v15076_v23  ;;  %15089 = vlog2.f32 %v3461_v7  ;;  %v18826_v7 = vld [vmem:[#allocation13_spill] sm:$0xff] }
 0x452   : > { %v15078_v46 = vpop.eup %15077  ;;  %15091 = vlog2.f32 %v3460_v62 }
 0x453   : > { %v3465_v48 = vmul.f32 0.6931472, %v15078_v46 }
 0x454   : > { %v15080_v59 = vpop.eup %15079 }
 0x455   : > { %v3463_v60 = vmul.f32 0.6931472, %v15080_v59  ;;  %v16304_v63 = vsub.f32 %v3415_v44, %v3465_v48 }
 0x456   : > { %v15082_v31 = vpop.eup %15081 }
 0x457   : > { %18814 = vst [vmem:[#allocation30_spill] sm:$0xff] %v16304_v63  ;;  %v3469_v8 = vmul.f32 0.6931472, %v15082_v31  ;;  %v16307_v16 = vsub.f32 %v3414_v4, %v3463_v60  ;;  %v3528_v51 = vmul.f32 1.442695, %v16304_v63  ;;  %v18827_v31 = vld [vmem:[#allocation15_spill] sm:$0xff] }
 0x458   : > { %v15084_v37 = vpop.eup %15083 }
 0x459   : > { %v15086_v43 = vpop.eup %15085  ;;  %18815 = vst [vmem:[#allocation31_spill] sm:$0xff] %v16307_v16  ;;  %v3467_v2 = vmul.f32 0.6931472, %v15084_v37  ;;  %v16311_v0 = vsub.f32 %v3417_v15, %v3469_v8  ;;  %v3526_v19 = vmul.f32 1.442695, %v16307_v16  ;;  %15093 = vpow2.f32 %v3528_v51  ;;  %v18828_v8 = vld [vmem:[#allocation23_spill] sm:$0xff] }
 0x45a   : > { %v3473_v47 = vmul.f32 0.6931472, %v15086_v43  ;;  %v18829_v51 = vld [vmem:[#allocation18_spill] sm:$0xff] }
 0x45b   : > { %v15088_v41 = vpop.eup %15087  ;;  %18816 = vst [vmem:[#allocation32_spill] sm:$0xff] %v16311_v0  ;;  %v16315_v24 = vsub.f32 %v3416_v38, %v3467_v2  ;;  %v3532_v49 = vmul.f32 1.442695, %v16311_v0  ;;  %15095 = vpow2.f32 %v3526_v19 }
 0x45c   : > { %v3471_v57 = vmul.f32 0.6931472, %v15088_v41  ;;  %v16319_v17 = vsub.f32 %v3419_v58, %v3473_v47 }
 0x45d   : > { %v15090_v40 = vpop.eup %15089  ;;  %18817 = vst [vmem:[#allocation33_spill] sm:$0xff] %v16315_v24  ;;  %v3530_v39 = vmul.f32 1.442695, %v16315_v24  ;;  %15097 = vpow2.f32 %v3532_v49 }
 0x45e   : > { %18818 = vst [vmem:[#allocation34_spill] sm:$0xff] %v16319_v17  ;;  %v3477_v35 = vmul.f32 0.6931472, %v15090_v40  ;;  %v16323_v27 = vsub.f32 %v3418_v10, %v3471_v57  ;;  %v3536_v30 = vmul.f32 1.442695, %v16319_v17 }
 0x45f   : > { %v15092_v25 = vpop.eup %15091  ;;  %15099 = vpow2.f32 %v3530_v39 }
 0x460   : > { %18819 = vst [vmem:[#allocation35_spill] sm:$0xff] %v16323_v27  ;;  %v3475_v28 = vmul.f32 0.6931472, %v15092_v25  ;;  %v16327_v32 = vsub.f32 %v3421_v9, %v3477_v35  ;;  %v3534_v33 = vmul.f32 1.442695, %v16323_v27  ;;  %15101 = vpow2.f32 %v3536_v30  ;;  %v18830_v9 = vld [vmem:[#allocation4_spill] sm:$0xff] }
 0x461   : > { %v4221_v30 = vld [vmem:[%s18570_s1 + $0x1b8] sm:$0xff] }
 0x462   : > { %18820 = vst [vmem:[#allocation36_spill] sm:$0xff] %v16327_v32  ;;  %v16331_v1 = vsub.f32 %v3420_v61, %v3475_v28  ;;  %v3540_v3 = vmul.f32 1.442695, %v16327_v32  ;;  %15103 = vpow2.f32 %v3534_v33  ;;  %v4060_v28 = vld [vmem:[%s18570_s1 + $0x1b0] sm:$0xff]  ;;  %v4370_v61 = vld [vmem:[%s18570_s1 + $0x1c0] sm:$0xff]  ;;  %v14178_v33 = vpop.f32.mrf.mxu0  ;;  %v18869_v32 = vld [vmem:[#allocation25_spill] sm:$0xff] }
 0x463   : > { %14202 = vmatprep.subr.mxu0 %v4060_v28 }
 0x464   : > { %18821 = vst [vmem:[#allocation37_spill] sm:$0xff] %v16331_v1  ;;  %v3538_v50 = vmul.f32 1.442695, %v16331_v1  ;;  %15105 = vpow2.f32 %v3540_v3  ;;  %14203 = vmatpush3.msra.mxu0 %v4060_v28  ;;  %v3833_v3 = vpop.f32.mrf.mxu0 }
 0x465   : > { %14230 = vmatprep.subr.mxu0 %v4370_v61 }
 0x466   : > { %v15094_v13 = vpop.eup %15093  ;;  %15107 = vpow2.f32 %v3538_v50  ;;  %v14181_v50 = vpop.f32.mrf.mxu0 }
 0x468   : > { %v15096_v20 = vpop.eup %15095 }
 0x46a   : > { %v15098_v14 = vpop.eup %15097 }
 0x46c   : > { %v15100_v42 = vpop.eup %15099 }
 0x46d   : > { %v15102_v46 = vpop.eup %15101 }
 0x46f   : > { %v15104_v60 = vpop.eup %15103 }
 0x471   : > { %v15106_v15 = vpop.eup %15105 }
 0x473   : > { %v15108_v47 = vpop.eup %15107 }
 0x49e   : > { %v3497_v53 = vpop.permute.xlu1 %3496 }
 0x49f   : > { %v3519_v29 = vadd.f32 %v3497_v53, %v18822_v52  ;;  %v3843_v53 = vpop.f32.mrf.mxu0 }
 0x4a0   : > { %v3495_v56 = vpop.permute.xlu0 %3494 }
 0x4a1   : > { %v3543_v36 = vmul.f32 %v15094_v13, %v3519_v29  ;;  %v3518_v11 = vadd.f32 %v3495_v56, %v18823_v5  ;;  %v16376_v29 = vld [vmem:[%s18570_s1 + $0x79c] ss:$0 sm:$0xff] }
 0x4a2   : > { %v3501_v26 = vpop.permute.xlu1 %3500 }
 0x4a3   : > { %v3542_v54 = vmul.f32 %v15096_v20, %v3518_v11  ;;  %v3521_v22 = vadd.f32 %v3501_v26, %v18824_v12  ;;  %3632 = vrot.lane.b32.xlu1 %v3543_v36, %s15205_s22  ;;  %v14184_v36 = vpop.f32.mrf.mxu0  ;;  %v16387_v12 = vld [vmem:[%s18570_s1 + $0x1d0] sm:$0xff] }
 0x4a4   : > { %v3499_v6 = vpop.permute.xlu0 %3498 }
 0x4a5   : > { %v3545_v55 = vmul.f32 %v15098_v14, %v3521_v22  ;;  %3630 = vrot.lane.b32.xlu0 %v3542_v54, %s15205_s22  ;;  %v3520_v34 = vadd.f32 %v3499_v6, %v18825_v45  ;;  %v3853_v22 = vpop.f32.mrf.mxu0 }
 0x4a6   : > { %v3505_v21 = vpop.permute.xlu1 %3504 }
 0x4a7   : > { %3636 = vrot.lane.b32.xlu1 %v3545_v55, %s15205_s22  ;;  %v3544_v23 = vmul.f32 %v15100_v42, %v3520_v34  ;;  %v3523_v62 = vadd.f32 %v3505_v21, %v18826_v7 }
 0x4a8   : > { %v3503_v59 = vpop.permute.xlu0 %3502 }
 0x4a9   : > { %v3547_v48 = vmul.f32 %v15102_v46, %v3523_v62  ;;  %v3522_v44 = vadd.f32 %v3503_v59, %v18827_v31  ;;  %3634 = vrot.lane.b32.xlu0 %v3544_v23, %s15205_s22  ;;  %v18835_v62 = vld [vmem:[#allocation8_spill] sm:$0xff]  ;;  %v18837_v59 = vld [vmem:[#allocation9_spill] sm:$0xff]  ;;  %v14187_v31 = vpop.f32.mrf.mxu0 }
 0x4aa   : > { %v3509_v37 = vpop.permute.xlu1 %3508 }
 0x4ab   : > { %v3546_v4 = vmul.f32 %v15104_v60, %v3522_v44  ;;  %v3525_v43 = vadd.f32 %v3509_v37, %v18828_v8  ;;  %3640 = vrot.lane.b32.xlu1 %v3547_v48, %s15205_s22 }
 0x4ac   : > { %v3507_v2 = vpop.permute.xlu0 %3506 }
 0x4ad   : > { %v3549_v41 = vmul.f32 %v15106_v15, %v3525_v43  ;;  %v3524_v38 = vadd.f32 %v3507_v2, %v18829_v51  ;;  %3638 = vrot.lane.b32.xlu0 %v3546_v4, %s15205_s22  ;;  %v16425_v43 = vld [vmem:[%s18570_s1 + $0x1c8] sm:$0xff] }
 0x4af   : > { %v3548_v40 = vmul.f32 %v15108_v47, %v3524_v38  ;;  %3644 = vrot.lane.b32.xlu1 %v3549_v41, %s15205_s22  ;;  %v3863_v38 = vpop.f32.mrf.mxu0 }
 0x4b1   : > { %3642 = vrot.lane.b32.xlu0 %v3548_v40, %s15205_s22  ;;  %v18841_v40 = vld [vmem:[#allocation11_spill] sm:$0xff] }
 0x515   : > { %v3633_v19 = vpop.permute.xlu1 %3632 }
 0x517   : > { %v3631_v58 = vpop.permute.xlu0 %3630 }
 0x518   : > { %14162 = vmatprep.mubr.msk.f32.mxu1 %vm367_vm0, %v3631_v58  ;;  %v18843_v58 = vld [vmem:[#allocation14_spill] sm:$0xff] }
 0x519   : > { %v3637_v57 = vpop.permute.xlu1 %3636  ;;  %14163 = vmatmul.mubr.msk.f32.vlgmr.msra.gmra.mxu1 %vm367_vm0, %v3633_v19 }
 0x51a   : > { %14189 = vmatpush3.msra.mxu1 %v3921_v18 }
 0x51b   : > { %v3635_v25 = vpop.permute.xlu0 %3634  ;;  %14216 = vmatprep.subr.mxu1 %v4221_v30 }
 0x51c   : > { %14165 = vmatprep.mubr.msk.f32.mxu1 %vm367_vm0, %v3635_v25 }
 0x51d   : > { %14166 = vmatmul.mubr.msk.f32.gmra.mxu1 %vm367_vm0, %v3637_v57  ;;  %v3641_v49 = vpop.permute.xlu1 %3640 }
 0x51f   : > { %v3639_v10 = vpop.permute.xlu0 %3638 }
 0x520   : > { %14168 = vmatprep.mubr.msk.f32.mxu1 %vm367_vm0, %v3639_v10 }
 0x521   : > { %14169 = vmatmul.mubr.msk.f32.gmra.mxu1 %vm367_vm0, %v3641_v49  ;;  %v3645_v39 = vpop.permute.xlu1 %3644 }
 0x523   : > { %v3643_v35 = vpop.permute.xlu0 %3642 }
 0x524   : > { %14171 = vmatprep.mubr.msk.f32.mxu1 %vm367_vm0, %v3643_v35 }
 0x525   : > { %14172 = vmatmul.mubr.msk.f32.gmra.mxu1 %vm367_vm0, %v3645_v39 }
 0x526   : > { %14190 = vmatprep.mubr.msk.f32.mxu1 %vm367_vm0, %v18830_v9 }
 0x5d9   : > { %v14164_v52 = vpop.f32.mrf.mxu1 }
 0x5da   : > { %v3839_v13 = vadd.f32 %v14178_v33, %v14164_v52 }
 0x5db   : > { %v3728_v56 = vpop.f32.mrf.mxu1 }
 0x5dc   : > { %v16379_v5 = vadd.f32 %v16376_v29, %v3839_v13  ;;  %v3834_v11 = vadd.f32 %v3833_v3, %v3728_v56  ;;  %v18848_v3 = vld [vmem:[#allocation3_spill] sm:$0xff] }
 0x5dd   : > { %v14167_v26 = vpop.f32.mrf.mxu1 }
 0x5de   : > { %18831 = vst [vmem:[#allocation6_spill] sm:$0xff] %v16379_v5  ;;  %v16382_v20 = vadd.f32 %v16376_v29, %v3834_v11  ;;  %v3849_v54 = vadd.f32 %v14181_v50, %v14167_v26  ;;  %v3894_v6 = vrot.slane %v16379_v5, 7 }
 0x5df   : > { %v3738_v14 = vpop.f32.mrf.mxu1 }
 0x5e0   : > { %18832 = vst [vmem:[#allocation7_spill] sm:$0xff] %v16382_v20  ;;  %14205 = vmatmul.mubr.msk.f32.vlgmr.msra.gmra.mxu0 %vm367_vm0, %v16382_v20  ;;  %v3893_v55 = vrot.slane %v16382_v20, 7  ;;  %v16394_v45 = vadd.f32 %v16376_v29, %v3849_v54  ;;  %v3844_v34 = vadd.f32 %v3843_v53, %v3738_v14  ;;  %v4189_v35 = vrot.slane %v16382_v20, 1  ;;  %v18850_v53 = vld [vmem:[#allocation17_spill] sm:$0xff]  ;;  %v18853_v14 = vld [vmem:[#allocation20_spill] sm:$0xff] }
 0x5e1   : > { %14207 = vmatprep.mubr.msk.f32.mxu0 %vm367_vm0, %v16379_v5  ;;  %14231 = vmatpush3.msra.mxu0 %v4370_v61  ;;  %v14170_v18 = vpop.f32.mrf.mxu1  ;;  %v18846_v61 = vld [vmem:[#allocation16_spill] sm:$0xff] }
 0x5e2   : > { %18833 = vst [vmem:[#allocation10_spill] sm:$0xff] %v16394_v45  ;;  %v3913_v42 = vsel %vm631_vm5, 0.0, %v3893_v55  ;;  %v16400_v21 = vsel %vm631_vm5, %v3893_v55, %v3894_v6  ;;  %14258 = vmatprep.subr.mxu0 %v16387_v12  ;;  %v16404_v23 = vadd.f32 %v16376_v29, %v3844_v34  ;;  %v3859_v7 = vadd.f32 %v14184_v36, %v14170_v18  ;;  %v18856_v18 = vld [vmem:[#allocation19_spill] sm:$0xff] }
 0x5e3   : > { %v16407_v46 = vmul.f32 %v18835_v62, %v3913_v42  ;;  %v16411_v48 = vmul.f32 %v18837_v59, %v16400_v21  ;;  %v3748_v44 = vpop.f32.mrf.mxu1  ;;  %v3898_v8 = vrot.slane %v16394_v45, 7  ;;  %v16474_v50 = vmul.f32 %v18848_v3, %v3913_v42 }
 0x5e4   : > { %18834 = vst [vmem:[#allocation12_spill] sm:$0xff] %v16404_v23  ;;  %v16414_v60 = vadd.f32 %v16376_v29, %v3859_v7  ;;  %v3854_v37 = vadd.f32 %v3853_v22, %v3748_v44  ;;  %14208 = vmatmul.mubr.msk.f32.gmra.mxu0 %vm367_vm0, %v16404_v23  ;;  %v3896_v4 = vrot.slane %v16404_v23, 7  ;;  %v4212_v36 = vsel %vm935_vm10, 0.0, %v4189_v35  ;;  %v4920_v7 = vld [vmem:[%s18570_s1 + $0x1e0] sm:$0xff] }
 0x5e5   : > { %18836 = vst [vmem:[#allocation13_spill] sm:$0xff] %v16407_v46  ;;  %18838 = vst [vmem:[#allocation15_spill] sm:$0xff] %v16411_v48  ;;  %14191 = vmatmul.mubr.msk.f32.vlgmr.msra.gmra.mxu1 %vm367_vm0, %v16407_v46  ;;  %v14173_v15 = vpop.f32.mrf.mxu1  ;;  %14210 = vmatprep.mubr.msk.f32.mxu0 %vm367_vm0, %v16394_v45  ;;  %v4192_v11 = vrot.slane %v16404_v23, 1  ;;  %v16491_v26 = vmul.f32 %v18835_v62, %v16400_v21  ;;  %v4190_v22 = vrot.slane %v16379_v5, 1 }
 0x5e6   : > { %18839 = vst [vmem:[#allocation23_spill] sm:$0xff] %v16414_v60  ;;  %14217 = vmatpush3.msra.mxu1 %v4221_v30  ;;  %v16430_v2 = vadd.f32 %v16376_v29, %v3854_v37  ;;  %14193 = vmatprep.mubr.msk.f32.mxu1 %vm367_vm0, %v16411_v48  ;;  %v16435_v41 = vsel %vm631_vm5, %v3894_v6, %v3896_v4  ;;  %v3902_v10 = vrot.slane %v16414_v60, 7  ;;  %18849 = vst [vmem:[#allocation42_spill] sm:$0xff] %v16474_v50 }
 0x5e7   : > { %v16438_v51 = vsel %vm631_vm5, %v3896_v4, %v3898_v8  ;;  %v3758_v47 = vpop.f32.mrf.mxu1  ;;  %v16442_v19 = vmul.f32 %v18841_v40, %v16435_v41  ;;  %14244 = vmatprep.subr.mxu1 %v16425_v43  ;;  %v3869_v56 = vadd.f32 %v14187_v31, %v14173_v15  ;;  %18852 = vst [vmem:[#allocation44_spill] sm:$0xff] %v16491_v26 }
 0x5e8   : > { %18840 = vst [vmem:[#allocation18_spill] sm:$0xff] %v16430_v2  ;;  %v16446_v57 = vmul.f32 %v18843_v58, %v16438_v51  ;;  %v3864_v25 = vadd.f32 %v3863_v38, %v3758_v47  ;;  %14211 = vmatmul.mubr.msk.f32.gmra.mxu0 %vm367_vm0, %v16430_v2  ;;  %v3900_v49 = vrot.slane %v16430_v2, 7  ;;  %v16505_v6 = vmul.f32 %v18837_v59, %v16435_v41  ;;  %v18863_v47 = vld [vmem:[#allocation22_spill] sm:$0xff] }
 0x5e9   : > { %18842 = vst [vmem:[#allocation38_spill] sm:$0xff] %v16442_v19  ;;  %14194 = vmatmul.mubr.msk.f32.gmra.mxu1 %vm367_vm0, %v16442_v19  ;;  %14213 = vmatprep.mubr.msk.f32.mxu0 %vm367_vm0, %v16414_v60  ;;  %v4191_v34 = vsel %vm935_vm10, %v4189_v35, %v4190_v22  ;;  %v16511_v42 = vmul.f32 %v18856_v18, %v4212_v36  ;;  %v4196_v37 = vrot.slane %v16430_v2, 1  ;;  %v12733_v19 = vld [vmem:[%s18570_s1 + $0x79d] ss:$0 sm:$0xff] }
 0x5ea   : > { %18844 = vst [vmem:[#allocation39_spill] sm:$0xff] %v16446_v57  ;;  %v16459_v39 = vadd.f32 %v16376_v29, %v3864_v25  ;;  %14196 = vmatprep.mubr.msk.f32.mxu1 %vm367_vm0, %v16446_v57  ;;  %v16464_v28 = vsel %vm631_vm5, %v3898_v8, %v3900_v49  ;;  %v16467_v30 = vsel %vm631_vm5, %v3900_v49, %v3902_v10  ;;  %18855 = vst [vmem:[#allocation46_spill] sm:$0xff] %v16505_v6  ;;  %v18860_v8 = vld [vmem:[#allocation21_spill] sm:$0xff] }
 0x5eb   : > { %v16471_v33 = vmul.f32 %v18846_v61, %v16464_v28  ;;  %v16478_v52 = vmul.f32 %v18850_v53, %v16467_v30  ;;  %18857 = vst [vmem:[#allocation47_spill] sm:$0xff] %v16511_v42  ;;  %v16517_v31 = vadd.f32 %v16376_v29, %v3869_v56  ;;  %v16524_v44 = vsel %vm935_vm10, %v4190_v22, %v4192_v11  ;;  %v18866_v22 = vld [vmem:[#allocation24_spill] sm:$0xff] }
 0x5ec   : > { %18845 = vst [vmem:[#allocation40_spill] sm:$0xff] %v16459_v39  ;;  %14214 = vmatmul.mubr.msk.f32.gmra.mxu0 %vm367_vm0, %v16459_v39  ;;  %v3904_v13 = vrot.slane %v16459_v39, 7  ;;  %v16531_v4 = vmul.f32 %v18841_v40, %v16438_v51  ;;  %v4194_v29 = vrot.slane %v16394_v45, 1  ;;  %v16536_v15 = vmul.f32 %v18860_v8, %v4191_v34 }
 0x5ed   : > { %18847 = vst [vmem:[#allocation41_spill] sm:$0xff] %v16471_v33  ;;  %18851 = vst [vmem:[#allocation43_spill] sm:$0xff] %v16478_v52  ;;  %14197 = vmatmul.mubr.msk.f32.gmra.mxu1 %vm367_vm0, %v16471_v33  ;;  %14232 = vmatprep.mubr.msk.f32.mxu0 %vm367_vm0, %v16474_v50  ;;  %v16540_v38 = vmul.f32 %v18843_v58, %v16464_v28  ;;  %v16546_v25 = vmul.f32 %v18863_v47, %v16524_v44  ;;  %v18651_v35 = vrot.slane %v16517_v31, 7 }
 0x5ee   : > { %14199 = vmatprep.mubr.msk.f32.mxu1 %vm367_vm0, %v16478_v52  ;;  %v16496_v54 = vsel %vm631_vm5, %v3902_v10, %v3904_v13  ;;  %18858 = vst [vmem:[#allocation48_spill] sm:$0xff] %v16517_v31  ;;  %18859 = vst [vmem:[#allocation49_spill] sm:$0xff] %v16531_v4  ;;  %v16549_v49 = vsel %vm935_vm10, %v4192_v11, %v4194_v29  ;;  %v16559_v10 = vsel %vm935_vm10, %v4194_v29, %v4196_v37 }
 0x5ef   : > { %v16501_v55 = vmul.f32 %v18853_v14, %v16496_v54  ;;  %18861 = vst [vmem:[#allocation50_spill] sm:$0xff] %v16536_v15  ;;  %18862 = vst [vmem:[#allocation51_spill] sm:$0xff] %v16540_v38  ;;  %v4200_v56 = vrot.slane %v16459_v39, 1  ;;  %v16568_v36 = vmul.f32 %v18846_v61, %v16467_v30  ;;  %v4198_v11 = vrot.slane %v16414_v60, 1 }
 0x5f0   : > { %14233 = vmatmul.mubr.msk.f32.vlgmr.msra.gmra.mxu0 %vm367_vm0, %v16491_v26  ;;  %18864 = vst [vmem:[#allocation52_spill] sm:$0xff] %v16546_v25  ;;  %v16573_v1 = vmul.f32 %v18866_v22, %v16549_v49  ;;  %v16577_v29 = vmul.f32 %v18850_v53, %v16496_v54  ;;  %v16588_v27 = vmul.f32 %v18869_v32, %v16559_v10  ;;  %v4202_v24 = vrot.slane %v16517_v31, 1 }
 0x5f1   : > { %18854 = vst [vmem:[#allocation45_spill] sm:$0xff] %v16501_v55  ;;  %14200 = vmatmul.mubr.msk.f32.gmra.mxu1 %vm367_vm0, %v16501_v55  ;;  %14235 = vmatprep.mubr.msk.f32.mxu0 %vm367_vm0, %v16505_v6  ;;  %18865 = vst [vmem:[#allocation53_spill] sm:$0xff] %v16568_v36  ;;  %v16591_v17 = vsel %vm935_vm10, %v4196_v37, %v4198_v11  ;;  %v18872_v37 = vld [vmem:[#allocation26_spill] sm:$0xff]  ;;  %v16612_v16 = vmul.f32 %v18856_v18, %v4191_v34 }
 0x5f2   : > { %14218 = vmatprep.mubr.msk.f32.mxu1 %vm367_vm0, %v16511_v42  ;;  %14259 = vmatpush3.msra.mxu0 %v16387_v12  ;;  %v4782_v12 = vld [vmem:[%s18570_s1 + $0x1d8] sm:$0xff]  ;;  %18867 = vst [vmem:[#allocation54_spill] sm:$0xff] %v16573_v1  ;;  %18868 = vst [vmem:[#allocation55_spill] sm:$0xff] %v16577_v29  ;;  %v16609_v0 = vmul.f32 %v18872_v37, %v16591_v17  ;;  %v16629_v34 = vmul.f32 %v18860_v8, %v16524_v44 }
 0x5f3   : > { %14286 = vmatprep.subr.mxu0 %v4920_v7  ;;  %18870 = vst [vmem:[#allocation56_spill] sm:$0xff] %v16588_v27  ;;  %18874 = vst [vmem:[#allocation59_spill] sm:$0xff] %v16612_v16 }
 0x5f4   : > { %14236 = vmatmul.mubr.msk.f32.gmra.mxu0 %vm367_vm0, %v16531_v4  ;;  %18873 = vst [vmem:[#allocation58_spill] sm:$0xff] %v16609_v0  ;;  %18877 = vst [vmem:[#allocation61_spill] sm:$0xff] %v16629_v34 }
 0x5f5   : > { %14219 = vmatmul.mubr.msk.f32.vlgmr.msra.gmra.mxu1 %vm367_vm0, %v16536_v15  ;;  %14238 = vmatprep.mubr.msk.f32.mxu0 %vm367_vm0, %v16540_v38  ;;  %v16655_v38 = vmul.f32 %v18869_v32, %v16591_v17 }
 0x5f6   : > { %14245 = vmatpush3.msra.mxu1 %v16425_v43  ;;  %14221 = vmatprep.mubr.msk.f32.mxu1 %vm367_vm0, %v16546_v25  ;;  %v16582_v43 = vsel %vm631_vm5, %v3904_v13, %v18651_v35  ;;  %v16598_v13 = vsel %vm935_vm10, %v4198_v11, %v4200_v56  ;;  %v18875_v11 = vld [vmem:[#allocation27_spill] sm:$0xff] }
 0x5f7   : > { %14272 = vmatprep.subr.mxu1 %v4782_v12  ;;  %v16604_v35 = vmul.f32 %v18853_v14, %v16582_v43  ;;  %v16618_v63 = vmul.f32 %v18875_v11, %v16598_v13  ;;  %18882 = vst [vmem:[#allocation65_spill] sm:$0xff] %v16655_v38 }
 0x5f8   : > { %14239 = vmatmul.mubr.msk.f32.gmra.mxu0 %vm367_vm0, %v16568_v36 }
 0x5f9   : > { %14222 = vmatmul.mubr.msk.f32.gmra.mxu1 %vm367_vm0, %v16573_v1  ;;  %14241 = vmatprep.mubr.msk.f32.mxu0 %vm367_vm0, %v16577_v29  ;;  %18871 = vst [vmem:[#allocation57_spill] sm:$0xff] %v16604_v35  ;;  %18876 = vst [vmem:[#allocation60_spill] sm:$0xff] %v16618_v63  ;;  %v16621_v29 = vsel %vm935_vm10, %v4200_v56, %v4202_v24  ;;  %v16639_v56 = vmul.f32 %v18863_v47, %v16549_v49 }
 0x5fa   : > { %14224 = vmatprep.mubr.msk.f32.mxu1 %vm367_vm0, %v16588_v27 }
 0x5fb   : > { %18880 = vst [vmem:[#allocation63_spill] sm:$0xff] %v16639_v56 }
 0x5fc   : > { %14242 = vmatmul.mubr.msk.f32.gmra.mxu0 %vm367_vm0, %v16604_v35  ;;  %v18878_v35 = vld [vmem:[#allocation28_spill] sm:$0xff] }
 0x5fd   : > { %14225 = vmatmul.mubr.msk.f32.gmra.mxu1 %vm367_vm0, %v16609_v0  ;;  %14260 = vmatprep.mubr.msk.f32.mxu0 %vm367_vm0, %v16612_v16  ;;  %v16635_v36 = vmul.f32 %v18878_v35, %v16621_v29  ;;  %v16651_v16 = vmul.f32 %v18866_v22, %v16559_v10 }
 0x5fe   : > { %14227 = vmatprep.mubr.msk.f32.mxu1 %vm367_vm0, %v16618_v63 }
 0x5ff   : > { %18879 = vst [vmem:[#allocation62_spill] sm:$0xff] %v16635_v36  ;;  %18881 = vst [vmem:[#allocation64_spill] sm:$0xff] %v16651_v16 }
 0x600   : > { %14261 = vmatmul.mubr.msk.f32.vlgmr.msra.gmra.mxu0 %vm367_vm0, %v16629_v34  ;;  %v5041_v34 = vld [vmem:[%s18570_s1 + $0x1e8] sm:$0xff] }
 0x601   : > { %14228 = vmatmul.mubr.msk.f32.gmra.mxu1 %vm367_vm0, %v16635_v36  ;;  %14263 = vmatprep.mubr.msk.f32.mxu0 %vm367_vm0, %v16639_v56  ;;  %v4625_v56 = vsel %vm935_vm10, %v4202_v24, 0.0  ;;  %v16700_v24 = vmul.f32 %v18848_v3, %v16400_v21  ;;  %v16716_v21 = vmul.f32 %v18837_v59, %v16438_v51  ;;  %v16732_v51 = vmul.f32 %v18843_v58, %v16467_v30 }
 0x602   : > { %14246 = vmatprep.mubr.msk.f32.mxu1 %vm367_vm0, %v16382_v20  ;;  %14287 = vmatpush3.msra.mxu0 %v4920_v7  ;;  %v16670_v7 = vmul.f32 %v18872_v37, %v16598_v13  ;;  %v18893_v30 = vrot.slane %v16517_v31, 7 }
 0x603   : > { %18886 = vst [vmem:[#allocation69_spill] sm:$0xff] %v16700_v24  ;;  %18888 = vst [vmem:[#allocation71_spill] sm:$0xff] %v16716_v21 }
 0x604   : > { %14264 = vmatmul.mubr.msk.f32.gmra.mxu0 %vm367_vm0, %v16651_v16  ;;  %18883 = vst [vmem:[#allocation66_spill] sm:$0xff] %v16670_v7  ;;  %v16674_v16 = vmul.f32 %v18875_v11, %v16621_v29  ;;  %18890 = vst [vmem:[#allocation73_spill] sm:$0xff] %v16732_v51 }
 0x605   : > { %14247 = vmatmul.mubr.msk.f32.vlgmr.msra.gmra.mxu1 %vm367_vm0, %v16379_v5  ;;  %14266 = vmatprep.mubr.msk.f32.mxu0 %vm367_vm0, %v16655_v38 }
 0x606   : > { %14273 = vmatpush3.msra.mxu1 %v4782_v12  ;;  %14249 = vmatprep.mubr.msk.f32.mxu1 %vm367_vm0, %v16404_v23  ;;  %18884 = vst [vmem:[#allocation67_spill] sm:$0xff] %v16674_v16  ;;  %v16686_v12 = vmul.f32 %v18878_v35, %v4625_v56 }
 0x607   : > { %14300 = vmatprep.subr.mxu1 %v5041_v34 }
 0x608   : > { %14267 = vmatmul.mubr.msk.f32.gmra.mxu0 %vm367_vm0, %v16670_v7  ;;  %18885 = vst [vmem:[#allocation68_spill] sm:$0xff] %v16686_v12  ;;  %v18894_v7 = vmov 0.0  }
 0x609   : > { %14250 = vmatmul.mubr.msk.f32.gmra.mxu1 %vm367_vm0, %v16394_v45  ;;  %14269 = vmatprep.mubr.msk.f32.mxu0 %vm367_vm0, %v16674_v16  ;;  %v4773_v16 = vsel %vm631_vm5, %v18893_v30, 0.0  ;;  %v16773_v30 = vmul.f32 %v18863_v47, %v16559_v10  ;;  %v16796_v10 = vmul.f32 %v18875_v11, %v4625_v56  ;;  %v5185_v56 = vld [vmem:[%s18570_s1 + $0x1f8] sm:$0xff] }
 0x60a   : > { %14252 = vmatprep.mubr.msk.f32.mxu1 %vm367_vm0, %v16430_v2  ;;  %v16757_v38 = vmul.f32 %v18853_v14, %v4773_v16  ;;  %v16781_v16 = vmul.f32 %v18866_v22, %v16591_v17  ;;  %v18903_v17 = vld [vmem:[#allocation29_spill] sm:$0xff] }
 0x60b   : > { %18898 = vst [vmem:[#allocation79_spill] sm:$0xff] %v16773_v30  ;;  %18902 = vst [vmem:[#allocation83_spill] sm:$0xff] %v16796_v10 }
 0x60c   : > { %14270 = vmatmul.mubr.msk.f32.gmra.mxu0 %vm367_vm0, %v16686_v12  ;;  %v16710_v12 = vmul.f32 %v18835_v62, %v16435_v41  ;;  %v16726_v41 = vmul.f32 %v18841_v40, %v16464_v28  ;;  %v16742_v28 = vmul.f32 %v18846_v61, %v16496_v54  ;;  %18895 = vst [vmem:[#allocation76_spill] sm:$0xff] %v16757_v38  ;;  %18899 = vst [vmem:[#allocation80_spill] sm:$0xff] %v16781_v16 }
 0x60d   : > { %14253 = vmatmul.mubr.msk.f32.gmra.mxu1 %vm367_vm0, %v16414_v60  ;;  %14288 = vmatprep.mubr.msk.f32.mxu0 %vm367_vm0, %v16379_v5  ;;  %v16761_v54 = vmul.f32 %v18856_v18, %v16524_v44  ;;  %v16785_v44 = vmul.f32 %v18869_v32, %v16598_v13  ;;  %v5186_v13 = vld [vmem:[%s18570_s1 + $0x200] sm:$0xff] }
 0x60e   : > { %14255 = vmatprep.mubr.msk.f32.mxu1 %vm367_vm0, %v16459_v39  ;;  %18887 = vst [vmem:[#allocation70_spill] sm:$0xff] %v16710_v12  ;;  %18889 = vst [vmem:[#allocation72_spill] sm:$0xff] %v16726_v41 }
 0x60f   : > { %18891 = vst [vmem:[#allocation74_spill] sm:$0xff] %v16742_v28  ;;  %18896 = vst [vmem:[#allocation77_spill] sm:$0xff] %v16761_v54 }
 0x610   : > { %14289 = vmatmul.mubr.msk.f32.vlgmr.msra.gmra.mxu0 %vm367_vm0, %v16404_v23  ;;  %18900 = vst [vmem:[#allocation81_spill] sm:$0xff] %v16785_v44 }
 0x611   : > { %14256 = vmatmul.mubr.msk.f32.gmra.mxu1 %vm367_vm0, %v16517_v31  ;;  %14291 = vmatprep.mubr.msk.f32.mxu0 %vm367_vm0, %v16394_v45 }
 0x612   : > { %14274 = vmatprep.mubr.msk.f32.mxu1 %vm367_vm0, %v16700_v24 }
 0x614   : > { %14292 = vmatmul.mubr.msk.f32.gmra.mxu0 %vm367_vm0, %v16430_v2 }
 0x615   : > { %14275 = vmatmul.mubr.msk.f32.vlgmr.msra.gmra.mxu1 %vm367_vm0, %v16710_v12  ;;  %14294 = vmatprep.mubr.msk.f32.mxu0 %vm367_vm0, %v16414_v60 }
 0x616   : > { %14301 = vmatpush3.msra.mxu1 %v5041_v34  ;;  %14277 = vmatprep.mubr.msk.f32.mxu1 %vm367_vm0, %v16716_v21  ;;  %v16746_v34 = vmul.f32 %v18850_v53, %v16582_v43  ;;  %v16769_v43 = vmul.f32 %v18860_v8, %v16549_v49  ;;  %v16793_v49 = vmul.f32 %v18872_v37, %v16621_v29  ;;  %v5187_v29 = vld [vmem:[%s18570_s1 + $0x208] sm:$0xff] }
 0x617   : > { %14314 = vmatprep.subr.mxu0 %v5187_v29 }
 0x618   : > { %14295 = vmatmul.mubr.msk.f32.gmra.mxu0 %vm367_vm0, %v16459_v39  ;;  %18892 = vst [vmem:[#allocation75_spill] sm:$0xff] %v16746_v34  ;;  %18897 = vst [vmem:[#allocation78_spill] sm:$0xff] %v16769_v43 }
 0x619   : > { %14278 = vmatmul.mubr.msk.f32.gmra.mxu1 %vm367_vm0, %v16726_v41  ;;  %14297 = vmatprep.mubr.msk.f32.mxu0 %vm367_vm0, %v16517_v31  ;;  %18901 = vst [vmem:[#allocation82_spill] sm:$0xff] %v16793_v49 }
 0x61a   : > { %14280 = vmatprep.mubr.msk.f32.mxu1 %vm367_vm0, %v16732_v51  ;;  %14315 = vmatpush3.msra.mxu0 %v5187_v29  ;;  %v5369_v29 = vld [vmem:[%s18570_s1 + $0x228] sm:$0xff] }
 0x61b   : > { %14316 = vmatprep.subr.mxu0 %v5186_v13  ;;  %14334 = vmatprep.subr.mxu1 %v5369_v29 }
 0x61c   : > { %14298 = vmatmul.mubr.f32.gmra.mxu0 %v18894_v7 }
 0x61d   : > { %14281 = vmatmul.mubr.msk.f32.gmra.mxu1 %vm367_vm0, %v16742_v28  ;;  %14317 = vmatpush3.msra.mxu0 %v5186_v13  ;;  %v5368_v13 = vld [vmem:[%s18570_s1 + $0x220] sm:$0xff] }
 0x61e   : > { %14283 = vmatprep.mubr.msk.f32.mxu1 %vm367_vm0, %v16746_v34  ;;  %14318 = vmatprep.subr.mxu0 %v5185_v56 }
 0x61f   : > { %14319 = vmatpush3.msra.mxu0 %v5185_v56 }
 0x621   : > { %14284 = vmatmul.mubr.msk.f32.gmra.mxu1 %vm367_vm0, %v16757_v38 }
 0x622   : > { %14302 = vmatprep.mubr.msk.f32.mxu1 %vm367_vm0, %v16761_v54 }
 0x625   : > { %14303 = vmatmul.mubr.msk.f32.vlgmr.msra.gmra.mxu1 %vm367_vm0, %v16769_v43 }
 0x626   : > { %14305 = vmatprep.mubr.msk.f32.mxu1 %vm367_vm0, %v16773_v30  ;;  %14335 = vmatpush3.msra.mxu1 %v5369_v29 }
 0x627   : > { %14336 = vmatprep.subr.mxu1 %v5368_v13 }
 0x628   : > { %14337 = vmatpush3.msra.mxu1 %v5368_v13 }
 0x629   : > { %14306 = vmatmul.mubr.msk.f32.gmra.mxu1 %vm367_vm0, %v16781_v16 }
 0x62a   : > { %14308 = vmatprep.mubr.msk.f32.mxu1 %vm367_vm0, %v16785_v44 }
 0x62d   : > { %14309 = vmatmul.mubr.msk.f32.gmra.mxu1 %vm367_vm0, %v16793_v49  ;;  %v16827_v49 = vld [vmem:[%s18570_s1 + $0x248] sm:$0xff] }
 0x62e   : > { %14311 = vmatprep.mubr.msk.f32.mxu1 %vm367_vm0, %v16796_v10  ;;  %v5184_v10 = vld [vmem:[%s18570_s1 + $0x1f0] sm:$0xff]  ;;  %18904 = vst [vmem:[#allocation84_spill] sm:$0xff] %v16827_v49 }
 0x62f   : > { %14320 = vmatprep.subr.mxu0 %v5184_v10 }
 0x630   : > { %14321 = vmatpush3.msra.mxu0 %v5184_v10 }
 0x631   : > { %14312 = vmatmul.mubr.msk.f32.gmra.mxu1 %vm367_vm0, %v18903_v17  ;;  %14354 = vmatprep.subr.mxu0 %v16827_v49 }
 0x632   : > { %14342 = vmatprep.mubr.msk.f32.mxu1 %vm1944_vm4, %v18830_v9 }
 0x6a0   : > { %v14206_v10 = vpop.f32.mrf.mxu0 }
 0x6a2   : > { %v4141_v56 = vpop.f32.mrf.mxu0 }
 0x6a4   : > { %v14209_v44 = vpop.f32.mrf.mxu0 }
 0x6a5   : > { %v14192_v16 = vpop.f32.mrf.mxu1 }
 0x6a6   : > { %v4151_v30 = vpop.f32.mrf.mxu0  ;;  %v4053_v9 = vadd.f32 %v14192_v16, %v12733_v19 }
 0x6a7   : > { %v4009_v43 = vpop.f32.mrf.mxu1 }
 0x6a8   : > { %v16830_v54 = vpop.f32.mrf.mxu0  ;;  %v4052_v11 = vadd.f32 %v12733_v19, %v4009_v43  ;;  %v4181_v47 = vadd.f32 %v14206_v10, %v4053_v9 }
 0x6a9   : > { %v14195_v38 = vpop.f32.mrf.mxu1 }
 0x6aa   : > { %v16832_v34 = vpop.f32.mrf.mxu0  ;;  %v4055_v22 = vadd.f32 %v14195_v38, %v12733_v19  ;;  %v4180_v14 = vadd.f32 %v4141_v56, %v4052_v11 }
 0x6ab   : > { %v4019_v28 = vpop.f32.mrf.mxu1 }
 0x6ac   : > { %v16834_v51 = vpop.f32.mrf.mxu0  ;;  %v4054_v18 = vadd.f32 %v12733_v19, %v4019_v28  ;;  %v4183_v59 = vadd.f32 %v14209_v44, %v4055_v22 }
 0x6ad   : > { %v14198_v41 = vpop.f32.mrf.mxu1 }
 0x6ae   : > { %v16836_v21 = vpop.f32.mrf.mxu0  ;;  %v4057_v40 = vadd.f32 %v14198_v41, %v12733_v19  ;;  %v4182_v16 = vadd.f32 %v4151_v30, %v4054_v18 }
 0x6af   : > { %v4029_v29 = vpop.f32.mrf.mxu1 }
 0x6b0   : > { %v14234_v12 = vpop.f32.mrf.mxu0  ;;  %v4056_v7 = vadd.f32 %v12733_v19, %v4029_v29  ;;  %v4185_v10 = vadd.f32 %v16830_v54, %v4057_v40 }
 0x6b1   : > { %v14201_v13 = vpop.f32.mrf.mxu1 }
 0x6b2   : > { %v4461_v24 = vpop.f32.mrf.mxu0  ;;  %v4059_v9 = vadd.f32 %v14201_v13, %v12733_v19 }
 0x6b3   : > { %v4039_v31 = vpop.f32.mrf.mxu1 }
 0x6b4   : > { %v14237_v4 = vpop.f32.mrf.mxu0 }
 0x6b5   : > { %v14220_v6 = vpop.f32.mrf.mxu1 }
 0x6b6   : > { %v4471_v26 = vpop.f32.mrf.mxu0  ;;  %v4352_v53 = vadd.f32 %v14220_v6, %v4181_v47  ;;  %v4058_v6 = vadd.f32 %v12733_v19, %v4039_v31  ;;  %v4184_v47 = vadd.f32 %v16832_v34, %v4056_v7 }
 0x6b7   : > { %v4312_v50 = vpop.f32.mrf.mxu1 }
 0x6b8   : > { %v16838_v39 = vpop.f32.mrf.mxu0  ;;  %v4351_v58 = vadd.f32 %v4312_v50, %v4180_v14  ;;  %v4501_v43 = vadd.f32 %v14234_v12, %v4352_v53  ;;  %v4186_v12 = vadd.f32 %v16836_v21, %v4058_v6 }
 0x6b9   : > { %v14223_v60 = vpop.f32.mrf.mxu1 }
 0x6ba   : > { %v16840_v2 = vpop.f32.mrf.mxu0  ;;  %v4354_v49 = vadd.f32 %v14223_v60, %v4183_v59  ;;  %v4500_v38 = vadd.f32 %v4461_v24, %v4351_v58  ;;  %v4187_v60 = vadd.f32 %v16834_v51, %v4059_v9 }
 0x6bb   : > { %v4322_v36 = vpop.f32.mrf.mxu1 }
 0x6bc   : > { %v16842_v45 = vpop.f32.mrf.mxu0  ;;  %v4503_v22 = vadd.f32 %v14237_v4, %v4354_v49 }
 0x6bd   : > { %v14226_v63 = vpop.f32.mrf.mxu1 }
 0x6be   : > { %v16844_v23 = vpop.f32.mrf.mxu0  ;;  %v4356_v14 = vadd.f32 %v14226_v63, %v4185_v10 }
 0x6bf   : > { %v4332_v0 = vpop.f32.mrf.mxu1 }
 0x6c0   : > { %v14262_v5 = vpop.f32.mrf.mxu0  ;;  %v4355_v18 = vadd.f32 %v4332_v0, %v4184_v47  ;;  %v4505_v19 = vadd.f32 %v16838_v39, %v4356_v14  ;;  %v18911_v14 = vld [vmem:[#allocation84_spill] sm:$0xff] }
 0x6c1   : > { %v14229_v27 = vpop.f32.mrf.mxu1 }
 0x6c2   : > { %v4725_v20 = vpop.f32.mrf.mxu0  ;;  %v4358_v54 = vadd.f32 %v14229_v27, %v4187_v60  ;;  %v4504_v7 = vadd.f32 %v16840_v2, %v4355_v18 }
 0x6c3   : > { %v4342_v1 = vpop.f32.mrf.mxu1 }
 0x6c4   : > { %v16846_v25 = vpop.f32.mrf.mxu0  ;;  %v4357_v4 = vadd.f32 %v4342_v1, %v4186_v12 }
 0x6c5   : > { %v14248_v17 = vpop.f32.mrf.mxu1 }
 0x6c6   : > { %v16848_v15 = vpop.f32.mrf.mxu0  ;;  %v4617_v28 = vadd.f32 %v14248_v17, %v4501_v43 }
 0x6c7   : > { %v4577_v42 = vpop.f32.mrf.mxu1 }
 0x6c8   : > { %v16850_v55 = vpop.f32.mrf.mxu0  ;;  %v4616_v50 = vadd.f32 %v4577_v42, %v4500_v38 }
 0x6c9   : > { %v14251_v52 = vpop.f32.mrf.mxu1 }
 0x6ca   : > { %v16852_v33 = vpop.f32.mrf.mxu0  ;;  %v4619_v53 = vadd.f32 %v14251_v52, %v4503_v22  ;;  %v4764_v24 = vadd.f32 %v4725_v20, %v4616_v50 }
 0x6cb   : > { %18905 = vst [vmem:[#allocation85_spill] sm:$0xff] %v16852_v33  ;;  %v4587_v57 = vpop.f32.mrf.mxu1  ;;  %v4353_v33 = vadd.f32 %v4322_v36, %v4182_v16  ;;  %v4765_v36 = vadd.f32 %v14262_v5, %v4617_v28 }
 0x6cc   : > { %v16857_v48 = vpop.f32.mrf.mxu0 }
 0x6cd   : > { %18906 = vst [vmem:[#allocation86_spill] sm:$0xff] %v16857_v48  ;;  %v14254_v46 = vpop.f32.mrf.mxu1  ;;  %v4502_v59 = vadd.f32 %v4471_v26, %v4353_v33  ;;  %v4767_v26 = vadd.f32 %v16846_v25, %v4619_v53 }
 0x6ce   : > { %v16859_v37 = vpop.f32.mrf.mxu0  ;;  %v4621_v33 = vadd.f32 %v14254_v46, %v4505_v19 }
 0x6cf   : > { %v4597_v35 = vpop.f32.mrf.mxu1  ;;  %18907 = vst [vmem:[#allocation87_spill] sm:$0xff] %v16859_v37  ;;  %v4618_v40 = vadd.f32 %v4587_v57, %v4502_v59  ;;  %v4507_v57 = vadd.f32 %v16842_v45, %v4358_v54 }
 0x6d0   : > { %v14290_v3 = vpop.f32.mrf.mxu0  ;;  %v4620_v5 = vadd.f32 %v4597_v35, %v4504_v7  ;;  %v5509_v7 = vld [vmem:[%s18570_s1 + $0x238] sm:$0xff] }
 0x6d1   : > { %v14257_v32 = vpop.f32.mrf.mxu1  ;;  %v4766_v51 = vadd.f32 %v16848_v15, %v4618_v40 }
 0x6d2   : > { %v4987_v48 = vpop.f32.mrf.mxu0  ;;  %v4623_v30 = vadd.f32 %v14257_v32, %v4507_v57  ;;  %v18908_v35 = vld [vmem:[#allocation85_spill] sm:$0xff] }
 0x6d3   : > { %v16861_v8 = vpop.f32.mrf.mxu1  ;;  %v4768_v49 = vadd.f32 %v18908_v35, %v4620_v5  ;;  %v16912_v5 = vld [vmem:[%s18570_s1 + $0x79e] ss:$0 sm:$0xff] }
 0x6d4   : > { %v14293_v41 = vpop.f32.mrf.mxu0  ;;  %v5825_v35 = vld [vmem:[%s18570_s1 + $0x278] sm:$0xff] }
 0x6d5   : > { %v14276_v61 = vpop.f32.mrf.mxu1 }
 0x6d6   : > { %v4913_v31 = vadd.f32 %v14276_v61, %v4765_v36  ;;  %v4997_v42 = vpop.f32.mrf.mxu0  ;;  %v4506_v61 = vadd.f32 %v16844_v23, %v4357_v4  ;;  %v18909_v23 = vld [vmem:[#allocation86_spill] sm:$0xff]  ;;  %v18910_v38 = vld [vmem:[#allocation87_spill] sm:$0xff]  ;;  %v5367_v4 = vld [vmem:[%s18570_s1 + $0x218] sm:$0xff] }
 0x6d7   : > { %v4873_v62 = vpop.f32.mrf.mxu1  ;;  %v4771_v16 = vadd.f32 %v18909_v23, %v4623_v30  ;;  %14338 = vmatprep.subr.mxu1 %v5367_v4  ;;  %v5826_v30 = vld [vmem:[%s18570_s1 + $0x280] sm:$0xff] }
 0x6d8   : > { %v4912_v0 = vadd.f32 %v4873_v62, %v4764_v24  ;;  %v14296_v20 = vpop.f32.mrf.mxu0  ;;  %v5027_v21 = vadd.f32 %v14290_v3, %v4913_v31  ;;  %v4769_v62 = vadd.f32 %v16850_v55, %v4621_v33  ;;  %v4622_v25 = vadd.f32 %v16861_v8, %v4506_v61  ;;  %14339 = vmatpush3.msra.mxu1 %v5367_v4  ;;  %v5366_v33 = vld [vmem:[%s18570_s1 + $0x210] sm:$0xff]  ;;  %v5674_v23 = vld [vmem:[%s18570_s1 + $0x260] sm:$0xff]  ;;  %v5968_v4 = vld [vmem:[%s18570_s1 + $0x2a8] sm:$0xff] }
 0x6d9   : > { %v14279_v37 = vpop.f32.mrf.mxu1  ;;  %14340 = vmatprep.subr.mxu1 %v5366_v33 }
 0x6da   : > { %v4915_v27 = vadd.f32 %v14279_v37, %v4767_v26  ;;  %v5026_v1 = vadd.f32 %v4987_v48, %v4912_v0  ;;  %v5007_v17 = vpop.f32.mrf.mxu0  ;;  %v4770_v9 = vadd.f32 %v18910_v38, %v4622_v25  ;;  %v5508_v0 = vld [vmem:[%s18570_s1 + $0x230] sm:$0xff]  ;;  %14341 = vmatpush3.msra.mxu1 %v5366_v33  ;;  %v5675_v26 = vld [vmem:[%s18570_s1 + $0x268] sm:$0xff] }
 0x6db   : > { %v4883_v11 = vpop.f32.mrf.mxu1  ;;  %14374 = vmatprep.subr.mxu1 %v5675_v26 }
 0x6dc   : > { %v4914_v34 = vadd.f32 %v4883_v11, %v4766_v51  ;;  %v5029_v56 = vadd.f32 %v14293_v41, %v4915_v27  ;;  %v14299_v48 = vpop.f32.mrf.mxu0 }
 0x6dd   : > { %v14282_v44 = vpop.f32.mrf.mxu1 }
 0x6de   : > { %v4917_v45 = vadd.f32 %v14282_v44, %v4769_v62  ;;  %v5028_v13 = vadd.f32 %v4997_v42, %v4914_v34  ;;  %v5017_v22 = vpop.f32.mrf.mxu0  ;;  %v18912_v42 = vmov 0.0  }
 0x6df   : > { %v4893_v58 = vpop.f32.mrf.mxu1 }
 0x6e0   : > { %v4916_v3 = vadd.f32 %v4893_v58, %v4768_v49  ;;  %v5031_v28 = vadd.f32 %v14296_v20, %v4917_v45 }
 0x6e1   : > { %v14285_v63 = vpop.f32.mrf.mxu1 }
 0x6e2   : > { %v4919_v8 = vadd.f32 %v14285_v63, %v4771_v16  ;;  %v5030_v50 = vadd.f32 %v5007_v17, %v4916_v3  ;;  %v5510_v63 = vld [vmem:[%s18570_s1 + $0x240] sm:$0xff]  ;;  %v18913_v17 = vld [vmem:[#allocation8_spill] sm:$0xff] }
 0x6e3   : > { %v4903_v52 = vpop.f32.mrf.mxu1 }
 0x6e4   : > { %v4918_v6 = vadd.f32 %v4903_v52, %v4770_v9  ;;  %v5033_v60 = vadd.f32 %v14299_v48, %v4919_v8  ;;  %v5827_v52 = vld [vmem:[%s18570_s1 + $0x288] sm:$0xff] }
 0x6e5   : > { %v14304_v39 = vpop.f32.mrf.mxu1 }
 0x6e6   : > { %v5169_v46 = vadd.f32 %v14304_v39, %v5027_v21  ;;  %v5032_v36 = vadd.f32 %v5017_v22, %v4918_v6 }
 0x6e7   : > { %v5129_v2 = vpop.f32.mrf.mxu1 }
 0x6e8   : > { %v5168_v15 = vadd.f32 %v5129_v2, %v5026_v1  ;;  %v5177_v32 = vmax.f32 %v5169_v46, 0.0 }
 0x6e9   : > { %v14307_v37 = vpop.f32.mrf.mxu1 }
 0x6ea   : > { %v5176_v29 = vmax.f32 %v5168_v15, 0.0  ;;  %v5171_v43 = vadd.f32 %v14307_v37, %v5029_v56 }
 0x6eb   : > { %v5139_v55 = vpop.f32.mrf.mxu1 }
 0x6ec   : > { %v5170_v10 = vadd.f32 %v5139_v55, %v5028_v13  ;;  %14322 = vmatprep.mubr.msk.f32.mxu0 %vm1944_vm4, %v5176_v29  ;;  %v5179_v41 = vmax.f32 %v5171_v43, 0.0  ;;  %v18914_v55 = vld [vmem:[#allocation9_spill] sm:$0xff] }
 0x6ed   : > { %v14310_v11 = vpop.f32.mrf.mxu1  ;;  %14323 = vmatmul.mubr.msk.f32.vlgmr.msra.gmra.mxu0 %vm1944_vm4, %v5177_v32 }
 0x6ee   : > { %v5178_v47 = vmax.f32 %v5170_v10, 0.0  ;;  %14355 = vmatpush3.msra.mxu0 %v18911_v14  ;;  %v5173_v44 = vadd.f32 %v14310_v11, %v5031_v28  ;;  %v5673_v10 = vld [vmem:[%s18570_s1 + $0x258] sm:$0xff] }
 0x6ef   : > { %v5149_v18 = vpop.f32.mrf.mxu1  ;;  %14356 = vmatprep.subr.mxu0 %v5510_v63 }
 0x6f0   : > { %v5172_v59 = vadd.f32 %v5149_v18, %v5030_v50  ;;  %14325 = vmatprep.mubr.msk.f32.mxu0 %vm1944_vm4, %v5178_v47  ;;  %v5181_v12 = vmax.f32 %v5173_v44, 0.0  ;;  %14357 = vmatpush3.msra.mxu0 %v5510_v63  ;;  %v18915_v50 = vld [vmem:[#allocation11_spill] sm:$0xff]  ;;  %v5824_v18 = vld [vmem:[%s18570_s1 + $0x270] sm:$0xff] }
 0x6f1   : > { %v14313_v53 = vpop.f32.mrf.mxu1  ;;  %14326 = vmatmul.mubr.msk.f32.gmra.mxu0 %vm1944_vm4, %v5179_v41  ;;  %14358 = vmatprep.subr.mxu0 %v5509_v7  ;;  %v18916_v41 = vld [vmem:[#allocation14_spill] sm:$0xff] }
 0x6f2   : > { %v5180_v58 = vmax.f32 %v5172_v59, 0.0  ;;  %v5175_v40 = vadd.f32 %v14313_v53, %v5033_v60  ;;  %14359 = vmatpush3.msra.mxu0 %v5509_v7  ;;  %v5672_v59 = vld [vmem:[%s18570_s1 + $0x250] sm:$0xff]  ;;  %v6097_v7 = vld [vmem:[%s18570_s1 + $0x2c8] sm:$0xff] }
 0x6f3   : > { %v5159_v24 = vpop.f32.mrf.mxu1  ;;  %14360 = vmatprep.subr.mxu0 %v5508_v0 }
 0x6f4   : > { %v5174_v54 = vadd.f32 %v5159_v24, %v5032_v36  ;;  %14328 = vmatprep.mubr.msk.f32.mxu0 %vm1944_vm4, %v5180_v58  ;;  %v5183_v31 = vmax.f32 %v5175_v40, 0.0  ;;  %14361 = vmatpush3.msra.mxu0 %v5508_v0  ;;  %v18917_v58 = vld [vmem:[#allocation16_spill] sm:$0xff] }
 0x6f5   : > { %14329 = vmatmul.mubr.msk.f32.gmra.mxu0 %vm1944_vm4, %v5181_v12  ;;  %14394 = vmatprep.subr.mxu0 %v5827_v52 }
 0x6f6   : > { %v5182_v19 = vmax.f32 %v5174_v54, 0.0  ;;  %v18918_v54 = vld [vmem:[#allocation3_spill] sm:$0xff] }
 0x6f8   : > { %14331 = vmatprep.mubr.msk.f32.mxu0 %vm1944_vm4, %v5182_v19 }
 0x6f9   : > { %14332 = vmatmul.mubr.msk.f32.gmra.mxu0 %vm1944_vm4, %v5183_v31  ;;  %v18919_v31 = vld [vmem:[#allocation17_spill] sm:$0xff] }
 0x6fa   : > { %14362 = vmatprep.mubr.f32.mxu0 %v18912_v42 }
 0x7ad   : > { %v14324_v51 = vpop.f32.mrf.mxu0 }
 0x7ae   : > { %v5289_v57 = vadd.f32 %v14324_v51, %v16912_v5 }
 0x7af   : > { %v5283_v20 = vpop.f32.mrf.mxu0 }
 0x7b0   : > { %v5284_v27 = vadd.f32 %v16912_v5, %v5283_v20  ;;  %v16916_v39 = vmax.f32 %v5289_v57, 0.0 }
 0x7b1   : > { %v14327_v21 = vpop.f32.mrf.mxu0 }
 0x7b2   : > { %v16918_v61 = vmax.f32 %v5284_v27, 0.0  ;;  %v5299_v34 = vadd.f32 %v14327_v21, %v16912_v5  ;;  %v5339_v49 = vrot.slane %v16916_v39, 7  ;;  %v5641_v51 = vrot.slane %v16916_v39, 1 }
 0x7b3   : > { %v5293_v1 = vpop.f32.mrf.mxu0 }
 0x7b4   : > { %v5338_v62 = vrot.slane %v16918_v61, 7  ;;  %v5294_v46 = vadd.f32 %v16912_v5, %v5293_v1  ;;  %14363 = vmatmul.mubr.msk.f32.vlgmr.msra.gmra.mxu0 %vm1944_vm4, %v16918_v61  ;;  %v16928_v2 = vmax.f32 %v5299_v34, 0.0  ;;  %v5640_v60 = vrot.slane %v16918_v61, 1  ;;  %v18921_v34 = vld [vmem:[#allocation19_spill] sm:$0xff] }
 0x7b5   : > { %v14330_v25 = vpop.f32.mrf.mxu0  ;;  %14365 = vmatprep.mubr.msk.f32.mxu0 %vm1944_vm4, %v16916_v39  ;;  %14395 = vmatpush3.msra.mxu0 %v5827_v52 }
 0x7b6   : > { %v5358_v15 = vsel %vm631_vm5, 0.0, %v5338_v62  ;;  %14396 = vmatprep.subr.mxu0 %v5826_v30  ;;  %v16938_v56 = vmax.f32 %v5294_v46, 0.0  ;;  %v5309_v37 = vadd.f32 %v14330_v25, %v16912_v5  ;;  %v16943_v13 = vsel %vm631_vm5, %v5338_v62, %v5339_v49 }
 0x7b7   : > { %v5359_v45 = vmul.f32 %v18913_v17, %v5358_v15  ;;  %v5303_v3 = vpop.f32.mrf.mxu0  ;;  %14397 = vmatpush3.msra.mxu0 %v5826_v30  ;;  %v5343_v16 = vrot.slane %v16928_v2, 7  ;;  %v5360_v38 = vmul.f32 %v18914_v55, %v16943_v13  ;;  %v5816_v19 = vmul.f32 %v18918_v54, %v5358_v15  ;;  %v6096_v30 = vld [vmem:[%s18570_s1 + $0x2c0] sm:$0xff]  ;;  %v18922_v15 = vld [vmem:[#allocation21_spill] sm:$0xff] }
 0x7b8   : > { %v5304_v29 = vadd.f32 %v16912_v5, %v5303_v3  ;;  %14398 = vmatprep.subr.mxu0 %v5825_v35  ;;  %v5341_v48 = vrot.slane %v16938_v56, 7  ;;  %v16950_v32 = vmax.f32 %v5309_v37, 0.0  ;;  %14366 = vmatmul.mubr.msk.f32.gmra.mxu0 %vm1944_vm4, %v16938_v56  ;;  %v5643_v52 = vrot.slane %v16938_v56, 1  ;;  %v18923_v3 = vld [vmem:[#allocation22_spill] sm:$0xff] }
 0x7b9   : > { %v14333_v43 = vpop.f32.mrf.mxu0  ;;  %14343 = vmatmul.mubr.msk.f32.vlgmr.msra.gmra.mxu1 %vm1944_vm4, %v5359_v45  ;;  %14368 = vmatprep.mubr.msk.f32.mxu0 %vm1944_vm4, %v16928_v2  ;;  %v5817_v57 = vmul.f32 %v18913_v17, %v16943_v13  ;;  %v5642_v21 = vsel %vm935_vm10, %v5640_v60, %v5641_v51 }
 0x7ba   : > { %v16957_v9 = vmax.f32 %v5304_v29, 0.0  ;;  %14375 = vmatpush3.msra.mxu1 %v5675_v26  ;;  %14345 = vmatprep.mubr.msk.f32.mxu1 %vm1944_vm4, %v5360_v38  ;;  %v16966_v28 = vsel %vm631_vm5, %v5339_v49, %v5341_v48  ;;  %v16969_v11 = vsel %vm631_vm5, %v5341_v48, %v5343_v16  ;;  %v5347_v22 = vrot.slane %v16950_v32, 7 }
 0x7bb   : > { %v5313_v8 = vpop.f32.mrf.mxu0  ;;  %14376 = vmatprep.subr.mxu1 %v5674_v23  ;;  %v5361_v14 = vmul.f32 %v18915_v50, %v16966_v28  ;;  %14399 = vmatpush3.msra.mxu0 %v5825_v35  ;;  %v5362_v44 = vmul.f32 %v18916_v41, %v16969_v11  ;;  %v5319_v0 = vadd.f32 %v14333_v43, %v16912_v5  ;;  %v5663_v26 = vsel %vm935_vm10, 0.0, %v5640_v60  ;;  %v6095_v60 = vld [vmem:[%s18570_s1 + $0x2b8] sm:$0xff] }
 0x7bc   : > { %v5345_v6 = vrot.slane %v16957_v9, 7  ;;  %v5314_v47 = vadd.f32 %v16912_v5, %v5313_v8  ;;  %14377 = vmatpush3.msra.mxu1 %v5674_v23  ;;  %14369 = vmatmul.mubr.msk.f32.gmra.mxu0 %vm1944_vm4, %v16957_v9  ;;  %v18920_v5 = vld [vmem:[#allocation20_spill] sm:$0xff]  ;;  %v5818_v27 = vmul.f32 %v18914_v55, %v16966_v28  ;;  %v5664_v1 = vmul.f32 %v18921_v34, %v5663_v26  ;;  %v5967_v23 = vld [vmem:[%s18570_s1 + $0x2a0] sm:$0xff] }
 0x7bd   : > { %14378 = vmatprep.subr.mxu1 %v5673_v10  ;;  %14346 = vmatmul.mubr.msk.f32.gmra.mxu1 %vm1944_vm4, %v5361_v14  ;;  %v17035_v62 = vmax.f32 %v5319_v0, 0.0  ;;  %v17040_v46 = vsel %vm935_vm10, %v5641_v51, %v5643_v52  ;;  %v5647_v25 = vrot.slane %v16957_v9, 1  ;;  %v5645_v35 = vrot.slane %v16928_v2, 1 }
 0x7be   : > { %v16987_v53 = vmax.f32 %v5314_v47, 0.0  ;;  %14371 = vmatprep.mubr.msk.f32.mxu0 %vm1944_vm4, %v16950_v32  ;;  %v16993_v36 = vsel %vm631_vm5, %v5343_v16, %v5345_v6  ;;  %14348 = vmatprep.mubr.msk.f32.mxu1 %vm1944_vm4, %v5362_v44  ;;  %v16999_v40 = vsel %vm631_vm5, %v5345_v6, %v5347_v22  ;;  %v5819_v49 = vmul.f32 %v18915_v50, %v16969_v11  ;;  %v18924_v6 = vld [vmem:[#allocation24_spill] sm:$0xff]  ;;  %v5966_v44 = vld [vmem:[%s18570_s1 + $0x298] sm:$0xff] }
 0x7bf   : > { %v5363_v12 = vmul.f32 %v18917_v58, %v16993_v36  ;;  %14379 = vmatpush3.msra.mxu1 %v5673_v10  ;;  %v5364_v63 = vmul.f32 %v18919_v31, %v16999_v40  ;;  %14400 = vmatprep.subr.mxu0 %v5824_v18  ;;  %v5665_v45 = vmul.f32 %v18922_v15, %v5642_v21  ;;  %v5813_v48 = vrot.slane %v17035_v62, 7 }
 0x7c0   : > { %v5349_v24 = vrot.slane %v16987_v53, 7  ;;  %14380 = vmatprep.subr.mxu1 %v5672_v59  ;;  %14372 = vmatmul.mubr.msk.f32.gmra.mxu0 %vm1944_vm4, %v16987_v53  ;;  %v5820_v37 = vmul.f32 %v18916_v41, %v16993_v36  ;;  %v5666_v29 = vmul.f32 %v18923_v3, %v17040_v46  ;;  %v17057_v16 = vsel %vm935_vm10, %v5643_v52, %v5645_v35  ;;  %v18927_v52 = vld [vmem:[#allocation27_spill] sm:$0xff] }
 0x7c1   : > { %14381 = vmatpush3.msra.mxu1 %v5672_v59  ;;  %14402 = vmatprep.mubr.msk.f32.mxu0 %vm1944_vm4, %v5816_v19  ;;  %v17063_v43 = vsel %vm935_vm10, %v5645_v35, %v5647_v25  ;;  %v5651_v38 = vrot.slane %v16987_v53, 1  ;;  %v5649_v10 = vrot.slane %v16950_v32, 1  ;;  %v5821_v8 = vmul.f32 %v18917_v58, %v16999_v40  ;;  %v5965_v19 = vld [vmem:[%s18570_s1 + $0x290] sm:$0xff]  ;;  %v6389_v35 = vld [vmem:[%s18570_s1 + $0x308] sm:$0xff] }
 0x7c2   : > { %14349 = vmatmul.mubr.msk.f32.gmra.mxu1 %vm1944_vm4, %v5363_v12  ;;  %v17017_v33 = vsel %vm631_vm5, %v5347_v22, %v5349_v24  ;;  %14401 = vmatpush3.msra.mxu0 %v5824_v18  ;;  %v5667_v47 = vmul.f32 %v18924_v6, %v17057_v16  ;;  %v17077_v22 = vsel %vm631_vm5, %v5349_v24, %v5813_v48  ;;  %v18925_v18 = vld [vmem:[#allocation25_spill] sm:$0xff] }
 0x7c3   : > { %14351 = vmatprep.mubr.msk.f32.mxu1 %vm1944_vm4, %v5364_v63  ;;  %v5365_v20 = vmul.f32 %v18920_v5, %v17017_v33  ;;  %14414 = vmatprep.subr.mxu1 %v5968_v4  ;;  %v5822_v14 = vmul.f32 %v18919_v31, %v17017_v33  ;;  %v5668_v59 = vmul.f32 %v18925_v18, %v17063_v43  ;;  %v5653_v63 = vrot.slane %v17035_v62, 1 }
 0x7c4   : > { %14434 = vmatprep.subr.mxu0 %v6097_v7  ;;  %14403 = vmatmul.mubr.msk.f32.vlgmr.msra.gmra.mxu0 %vm1944_vm4, %v5817_v57  ;;  %v17089_v12 = vsel %vm935_vm10, %v5647_v25, %v5649_v10  ;;  %v17094_v24 = vsel %vm935_vm10, %v5649_v10, %v5651_v38  ;;  %v6086_v26 = vmul.f32 %v18921_v34, %v5642_v21  ;;  %v6094_v57 = vld [vmem:[%s18570_s1 + $0x2b0] sm:$0xff]  ;;  %v6246_v10 = vld [vmem:[%s18570_s1 + $0x2d8] sm:$0xff] }
 0x7c5   : > { %14405 = vmatprep.mubr.msk.f32.mxu0 %vm1944_vm4, %v5818_v27  ;;  %14435 = vmatpush3.msra.mxu0 %v6097_v7  ;;  %v18926_v7 = vld [vmem:[#allocation26_spill] sm:$0xff]  ;;  %v5670_v51 = vmul.f32 %v18927_v52, %v17094_v24  ;;  %v6248_v27 = vld [vmem:[%s18570_s1 + $0x2e8] sm:$0xff]  ;;  %v6087_v21 = vmul.f32 %v18922_v15, %v17040_v46  ;;  %v6088_v25 = vmul.f32 %v18923_v3, %v17057_v16 }
 0x7c6   : > { %14352 = vmatmul.mubr.msk.f32.gmra.mxu1 %vm1944_vm4, %v5365_v20  ;;  %14436 = vmatprep.subr.mxu0 %v6096_v30  ;;  %v5669_v0 = vmul.f32 %v18926_v7, %v17089_v12  ;;  %v17113_v20 = vsel %vm935_vm10, %v5651_v38, %v5653_v63 }
 0x7c7   : > { %14382 = vmatprep.mubr.msk.f32.mxu1 %vm1944_vm4, %v5664_v1  ;;  %14437 = vmatpush3.msra.mxu0 %v6096_v30  ;;  %v18928_v1 = vld [vmem:[#allocation28_spill] sm:$0xff]  ;;  %v6092_v38 = vmul.f32 %v18927_v52, %v17113_v20 }
 0x7c8   : > { %14406 = vmatmul.mubr.msk.f32.gmra.mxu0 %vm1944_vm4, %v5819_v49  ;;  %14438 = vmatprep.subr.mxu0 %v6095_v60  ;;  %v5671_v30 = vmul.f32 %v18928_v1, %v17113_v20  ;;  %v6089_v49 = vmul.f32 %v18924_v6, %v17063_v43 }
 0x7c9   : > { %14408 = vmatprep.mubr.msk.f32.mxu0 %vm1944_vm4, %v5820_v37  ;;  %14439 = vmatpush3.msra.mxu0 %v6095_v60  ;;  %v6247_v37 = vld [vmem:[%s18570_s1 + $0x2e0] sm:$0xff]  ;;  %v6237_v60 = vmul.f32 %v18918_v54, %v16943_v13  ;;  %v6239_v13 = vmul.f32 %v18914_v55, %v16969_v11  ;;  %v6242_v55 = vmul.f32 %v18917_v58, %v17017_v33  ;;  %v6981_v58 = vld [vmem:[%s18570_s1 + $0x338] sm:$0xff]  ;;  %v7323_v54 = vld [vmem:[%s18570_s1 + $0x350] sm:$0xff] }
 0x7ca   : > { %14383 = vmatmul.mubr.msk.f32.vlgmr.msra.gmra.mxu1 %vm1944_vm4, %v5665_v45  ;;  %14440 = vmatprep.subr.mxu0 %v6094_v57  ;;  %v6090_v45 = vmul.f32 %v18925_v18, %v17089_v12  ;;  %v6243_v11 = vmul.f32 %v18919_v31, %v17077_v22  ;;  %v18931_v31 = vld [vmem:[#allocation15_spill] sm:$0xff]  ;;  %v6504_v33 = vmul.f32 %v18922_v15, %v17057_v16 }
 0x7cb   : > { %14415 = vmatpush3.msra.mxu1 %v5968_v4  ;;  %14385 = vmatprep.mubr.msk.f32.mxu1 %vm1944_vm4, %v5666_v29  ;;  %v5823_v4 = vmul.f32 %v18920_v5, %v17077_v22  ;;  %v6091_v29 = vmul.f32 %v18926_v7, %v17094_v24  ;;  %v6506_v15 = vmul.f32 %v18924_v6, %v17089_v12  ;;  %v18935_v22 = vld [vmem:[#allocation43_spill] sm:$0xff]  ;;  %v18936_v6 = vld [vmem:[#allocation45_spill] sm:$0xff]  ;;  %v18938_v12 = vld [vmem:[#allocation50_spill] sm:$0xff] }
 0x7cc   : > { %14416 = vmatprep.subr.mxu1 %v5967_v23  ;;  %14409 = vmatmul.mubr.msk.f32.gmra.mxu0 %vm1944_vm4, %v5821_v8  ;;  %v6387_v8 = vld [vmem:[%s18570_s1 + $0x2f8] sm:$0xff]  ;;  %v6507_v16 = vmul.f32 %v18925_v18, %v17094_v24  ;;  %v18937_v18 = vld [vmem:[#allocation47_spill] sm:$0xff] }
 0x7cd   : > { %14417 = vmatpush3.msra.mxu1 %v5967_v23  ;;  %14411 = vmatprep.mubr.msk.f32.mxu0 %vm1944_vm4, %v5822_v14  ;;  %v17154_v23 = vsel %vm935_vm10, %v5653_v63, 0.0  ;;  %v6386_v14 = vld [vmem:[%s18570_s1 + $0x2f0] sm:$0xff]  ;;  %v18939_v24 = vld [vmem:[#allocation29_spill] sm:$0xff]  ;;  %v7551_v63 = vld [vmem:[%s18570_s1 + $0x360] sm:$0xff] }
 0x7ce   : > { %14386 = vmatmul.mubr.msk.f32.gmra.mxu1 %vm1944_vm4, %v5667_v47  ;;  %14418 = vmatprep.subr.mxu1 %v5966_v44  ;;  %v6093_v47 = vmul.f32 %v18928_v1, %v17154_v23  ;;  %v18949_v1 = vld [vmem:[#allocation62_spill] sm:$0xff] }
 0x7cf   : > { %14388 = vmatprep.mubr.msk.f32.mxu1 %vm1944_vm4, %v5668_v59  ;;  %14419 = vmatpush3.msra.mxu1 %v5966_v44  ;;  %v6245_v44 = vld [vmem:[%s18570_s1 + $0x2d0] sm:$0xff]  ;;  %v6513_v59 = vld [vmem:[%s18570_s1 + $0x328] sm:$0xff] }
 0x7d0   : > { %14412 = vmatmul.mubr.msk.f32.gmra.mxu0 %vm1944_vm4, %v5823_v4  ;;  %14420 = vmatprep.subr.mxu1 %v5965_v19  ;;  %v18940_v4 = vld [vmem:[#allocation52_spill] sm:$0xff] }
 0x7d1   : > { %14442 = vmatprep.mubr.msk.f32.mxu0 %vm1944_vm4, %v6086_v26  ;;  %14421 = vmatpush3.msra.mxu1 %v5965_v19  ;;  %v6238_v19 = vmul.f32 %v18913_v17, %v16966_v28  ;;  %v6241_v17 = vmul.f32 %v18916_v41, %v16999_v40  ;;  %v6236_v28 = vsel %vm631_vm5, %v5813_v48, 0.0  ;;  %v18929_v41 = vld [vmem:[#allocation4_spill] sm:$0xff]  ;;  %v18930_v40 = vld [vmem:[#allocation13_spill] sm:$0xff]  ;;  %v18942_v26 = vld [vmem:[#allocation7_spill] sm:$0xff] }
 0x7d2   : > { %14389 = vmatmul.mubr.msk.f32.gmra.mxu1 %vm1944_vm4, %v5669_v0  ;;  %14441 = vmatpush3.msra.mxu0 %v6094_v57  ;;  %v18934_v48 = vld [vmem:[#allocation41_spill] sm:$0xff]  ;;  %v18941_v0 = vld [vmem:[#allocation54_spill] sm:$0xff] }
 0x7d3   : > { %14391 = vmatprep.mubr.msk.f32.mxu1 %vm1944_vm4, %v5670_v51  ;;  %14454 = vmatprep.subr.mxu1 %v6248_v27  ;;  %v18944_v51 = vld [vmem:[#allocation6_spill] sm:$0xff] }
 0x7d4   : > { %14443 = vmatmul.mubr.msk.f32.vlgmr.msra.gmra.mxu0 %vm1944_vm4, %v6087_v21  ;;  %14474 = vmatprep.subr.mxu0 %v6389_v35  ;;  %v18945_v57 = vld [vmem:[#allocation58_spill] sm:$0xff] }
 0x7d5   : > { %14445 = vmatprep.mubr.msk.f32.mxu0 %vm1944_vm4, %v6088_v25  ;;  %14475 = vmatpush3.msra.mxu0 %v6389_v35  ;;  %v18948_v21 = vld [vmem:[#allocation10_spill] sm:$0xff]  ;;  %v18951_v25 = vld [vmem:[#allocation23_spill] sm:$0xff]  ;;  %v18952_v35 = vld [vmem:[#allocation40_spill] sm:$0xff] }
 0x7d6   : > { %14392 = vmatmul.mubr.msk.f32.gmra.mxu1 %vm1944_vm4, %v5671_v30  ;;  %v18950_v30 = vld [vmem:[#allocation18_spill] sm:$0xff] }
 0x7d7   : > { %14422 = vmatprep.mubr.msk.f32.mxu1 %vm1944_vm4, %v16918_v61  ;;  %v6388_v61 = vld [vmem:[%s18570_s1 + $0x300] sm:$0xff] }
 0x7d8   : > { %14446 = vmatmul.mubr.msk.f32.gmra.mxu0 %vm1944_vm4, %v6089_v49  ;;  %14476 = vmatprep.subr.mxu0 %v6388_v61  ;;  %v7779_v49 = vld [vmem:[%s18570_s1 + $0x370] sm:$0xff] }
 0x7d9   : > { %14448 = vmatprep.mubr.msk.f32.mxu0 %vm1944_vm4, %v6090_v45  ;;  %14477 = vmatpush3.msra.mxu0 %v6388_v61  ;;  %v18953_v45 = vld [vmem:[#allocation42_spill] sm:$0xff]  ;;  %v18954_v61 = vld [vmem:[#allocation44_spill] sm:$0xff] }
 0x7da   : > { %14423 = vmatmul.mubr.msk.f32.vlgmr.msra.gmra.mxu1 %vm1944_vm4, %v16916_v39  ;;  %14478 = vmatprep.subr.mxu0 %v6387_v8 }
 0x7db   : > { %14455 = vmatpush3.msra.mxu1 %v6248_v27  ;;  %14425 = vmatprep.mubr.msk.f32.mxu1 %vm1944_vm4, %v16938_v56  ;;  %v18947_v27 = vld [vmem:[#allocation60_spill] sm:$0xff] }
 0x7dc   : > { %14456 = vmatprep.subr.mxu1 %v6247_v37  ;;  %14449 = vmatmul.mubr.msk.f32.gmra.mxu0 %vm1944_vm4, %v6091_v29  ;;  %v18955_v29 = vld [vmem:[#allocation46_spill] sm:$0xff] }
 0x7dd   : > { %14457 = vmatpush3.msra.mxu1 %v6247_v37  ;;  %14451 = vmatprep.mubr.msk.f32.mxu0 %vm1944_vm4, %v6092_v38  ;;  %v7665_v37 = vld [vmem:[%s18570_s1 + $0x368] sm:$0xff] }
 0x7de   : > { %14426 = vmatmul.mubr.msk.f32.gmra.mxu1 %vm1944_vm4, %v16928_v2  ;;  %14458 = vmatprep.subr.mxu1 %v6246_v10  ;;  %v18957_v38 = vld [vmem:[#allocation51_spill] sm:$0xff] }
 0x7df   : > { %14428 = vmatprep.mubr.msk.f32.mxu1 %vm1944_vm4, %v16957_v9  ;;  %14459 = vmatpush3.msra.mxu1 %v6246_v10  ;;  %v18958_v10 = vld [vmem:[#allocation48_spill] sm:$0xff] }
 0x7e0   : > { %14452 = vmatmul.mubr.msk.f32.gmra.mxu0 %vm1944_vm4, %v6093_v47  ;;  %14460 = vmatprep.subr.mxu1 %v6245_v44  ;;  %v18960_v47 = vld [vmem:[#allocation69_spill] sm:$0xff] }
 0x7e1   : > { %14479 = vmatpush3.msra.mxu0 %v6387_v8  ;;  %14482 = vmatprep.mubr.msk.f32.mxu0 %vm1944_vm4, %v16916_v39  ;;  %v6863_v39 = vld [vmem:[%s18570_s1 + $0x330] sm:$0xff]  ;;  %v18959_v8 = vld [vmem:[#allocation53_spill] sm:$0xff] }
 0x7e2   : > { %14429 = vmatmul.mubr.msk.f32.gmra.mxu1 %vm1944_vm4, %v16950_v32  ;;  %14480 = vmatprep.subr.mxu0 %v6386_v14 }
 0x7e3   : > { %14431 = vmatprep.mubr.msk.f32.mxu1 %vm1944_vm4, %v16987_v53  ;;  %14481 = vmatpush3.msra.mxu0 %v6386_v14  ;;  %v18961_v14 = vld [vmem:[#allocation55_spill] sm:$0xff] }
 0x7e4   : > { %14483 = vmatmul.mubr.msk.f32.vlgmr.msra.gmra.mxu0 %vm1944_vm4, %v16938_v56  ;;  %14461 = vmatpush3.msra.mxu1 %v6245_v44  ;;  %v6512_v56 = vld [vmem:[%s18570_s1 + $0x320] sm:$0xff] }
 0x7e5   : > { %14485 = vmatprep.mubr.msk.f32.mxu0 %vm1944_vm4, %v16928_v2  ;;  %14494 = vmatprep.subr.mxu1 %v6513_v59  ;;  %v6240_v2 = vmul.f32 %v18915_v50, %v16993_v36  ;;  %v6510_v50 = vld [vmem:[%s18570_s1 + $0x310] sm:$0xff]  ;;  %v6503_v36 = vmul.f32 %v18921_v34, %v17040_v46  ;;  %v18932_v34 = vld [vmem:[#allocation38_spill] sm:$0xff]  ;;  %v18933_v46 = vld [vmem:[#allocation39_spill] sm:$0xff] }
 0x7e6   : > { %14432 = vmatmul.mubr.msk.f32.gmra.mxu1 %vm1944_vm4, %v17035_v62  ;;  %14514 = vmatprep.subr.mxu0 %v6863_v39  ;;  %v18962_v44 = vld [vmem:[#allocation70_spill] sm:$0xff] }
 0x7e7   : > { %14462 = vmatprep.mubr.msk.f32.mxu1 %vm1944_vm4, %v6237_v60  ;;  %14515 = vmatpush3.msra.mxu0 %v6863_v39  ;;  %v18964_v60 = vld [vmem:[#allocation71_spill] sm:$0xff] }
 0x7e8   : > { %14486 = vmatmul.mubr.msk.f32.gmra.mxu0 %vm1944_vm4, %v16957_v9  ;;  %v6511_v9 = vld [vmem:[%s18570_s1 + $0x318] sm:$0xff]  ;;  %v18965_v39 = vld [vmem:[#allocation59_spill] sm:$0xff] }
 0x7e9   : > { %14488 = vmatprep.mubr.msk.f32.mxu0 %vm1944_vm4, %v16950_v32  ;;  %v7095_v32 = vld [vmem:[%s18570_s1 + $0x340] sm:$0xff] }
 0x7ea   : > { %14463 = vmatmul.mubr.msk.f32.vlgmr.msra.gmra.mxu1 %vm1944_vm4, %v6238_v19  ;;  %14542 = vmatprep.subr.mxu0 %v7095_v32  ;;  %v18966_v19 = vld [vmem:[#allocation72_spill] sm:$0xff] }
 0x7eb   : > { %14495 = vmatpush3.msra.mxu1 %v6513_v59  ;;  %14465 = vmatprep.mubr.msk.f32.mxu1 %vm1944_vm4, %v6239_v13  ;;  %v18963_v59 = vld [vmem:[#allocation57_spill] sm:$0xff] }
 0x7ec   : > { %14496 = vmatprep.subr.mxu1 %v6512_v56  ;;  %14489 = vmatmul.mubr.msk.f32.gmra.mxu0 %vm1944_vm4, %v16987_v53  ;;  %v6244_v53 = vmul.f32 %v18920_v5, %v6236_v28  ;;  %v7209_v5 = vld [vmem:[%s18570_s1 + $0x348] sm:$0xff]  ;;  %v18968_v13 = vld [vmem:[#allocation73_spill] sm:$0xff]  ;;  %v18974_v28 = vld [vmem:[#allocation76_spill] sm:$0xff] }
 0x7ed   : > { %14497 = vmatpush3.msra.mxu1 %v6512_v56  ;;  %14491 = vmatprep.mubr.msk.f32.mxu0 %vm1944_vm4, %v17035_v62  ;;  %v6505_v62 = vmul.f32 %v18923_v3, %v17063_v43  ;;  %v6508_v3 = vmul.f32 %v18926_v7, %v17113_v20  ;;  %v6509_v43 = vmul.f32 %v18927_v52, %v17154_v23  ;;  %v7437_v7 = vld [vmem:[%s18570_s1 + $0x358] sm:$0xff]  ;;  %v18943_v52 = vld [vmem:[#allocation56_spill] sm:$0xff] }
 0x7ee   : > { %14466 = vmatmul.mubr.msk.f32.gmra.mxu1 %vm1944_vm4, %v6240_v2  ;;  %14498 = vmatprep.subr.mxu1 %v6511_v9  ;;  %v18946_v20 = vld [vmem:[#allocation12_spill] sm:$0xff]  ;;  %v18956_v23 = vld [vmem:[#allocation49_spill] sm:$0xff]  ;;  %v18969_v2 = vld [vmem:[#allocation63_spill] sm:$0xff] }
 0x7ef   : > { %14468 = vmatprep.mubr.msk.f32.mxu1 %vm1944_vm4, %v6241_v17  ;;  %14499 = vmatpush3.msra.mxu1 %v6511_v9  ;;  %v18967_v56 = vld [vmem:[#allocation61_spill] sm:$0xff]  ;;  %v18970_v17 = vld [vmem:[#allocation74_spill] sm:$0xff]  ;;  %v18971_v9 = vld [vmem:[#allocation64_spill] sm:$0xff] }
 0x7f0   : > { %14492 = vmatmul.mubr.f32.gmra.mxu0 %v18912_v42  ;;  %14500 = vmatprep.subr.mxu1 %v6510_v50 }
 0x7f1   : > { %14516 = vmatprep.mubr.msk.f32.mxu0 %vm367_vm0, %v18929_v41  ;;  %14501 = vmatpush3.msra.mxu1 %v6510_v50  ;;  %v18976_v50 = vld [vmem:[#allocation77_spill] sm:$0xff]  ;;  %v18977_v41 = vld [vmem:[#allocation67_spill] sm:$0xff] }
 0x7f2   : > { %14469 = vmatmul.mubr.msk.f32.gmra.mxu1 %vm1944_vm4, %v6242_v55  ;;  %14528 = vmatprep.subr.mxu1 %v6981_v58  ;;  %v18973_v55 = vld [vmem:[#allocation65_spill] sm:$0xff] }
 0x7f3   : > { %14471 = vmatprep.mubr.msk.f32.mxu1 %vm1944_vm4, %v6243_v11  ;;  %v18975_v11 = vld [vmem:[#allocation66_spill] sm:$0xff] }
 0x7f4   : > { %14517 = vmatmul.mubr.msk.f32.vlgmr.msra.gmra.mxu0 %vm367_vm0, %v18930_v40  ;;  %v18981_v40 = vld [vmem:[#allocation80_spill] sm:$0xff] }
 0x7f5   : > { %14519 = vmatprep.mubr.msk.f32.mxu0 %vm367_vm0, %v18931_v31  ;;  %14543 = vmatpush3.msra.mxu0 %v7095_v32  ;;  %v18972_v32 = vld [vmem:[#allocation75_spill] sm:$0xff]  ;;  %v18983_v31 = vld [vmem:[#allocation82_spill] sm:$0xff] }
 0x7f6   : > { %14472 = vmatmul.mubr.msk.f32.gmra.mxu1 %vm1944_vm4, %v6244_v53  ;;  %14570 = vmatprep.subr.mxu0 %v7323_v54  ;;  %v18978_v53 = vld [vmem:[#allocation78_spill] sm:$0xff] }
 0x7f7   : > { %14502 = vmatprep.mubr.msk.f32.mxu1 %vm1944_vm4, %v6503_v36  ;;  %v18979_v36 = vld [vmem:[#allocation68_spill] sm:$0xff] }
 0x7f8   : > { %14520 = vmatmul.mubr.msk.f32.gmra.mxu0 %vm367_vm0, %v18932_v34  ;;  %v8076_v34 = vld [vmem:[%s18570_s1 + $0x380] sm:$0xff] }
 0x7f9   : > { %14522 = vmatprep.mubr.msk.f32.mxu0 %vm367_vm0, %v18933_v46  ;;  %v8078_v46 = vld [vmem:[%s18570_s1 + $0x390] sm:$0xff] }
 0x7fa   : > { %14503 = vmatmul.mubr.msk.f32.vlgmr.msra.gmra.mxu1 %vm1944_vm4, %v6504_v33  ;;  %v18984_v33 = vld [vmem:[#allocation83_spill] sm:$0xff] }
 0x7fb   : > { %14529 = vmatpush3.msra.mxu1 %v6981_v58  ;;  %14505 = vmatprep.mubr.msk.f32.mxu1 %vm1944_vm4, %v6505_v62  ;;  %v18980_v58 = vld [vmem:[#allocation79_spill] sm:$0xff] }
 0x7fc   : > { %14556 = vmatprep.subr.mxu1 %v7209_v5  ;;  %14523 = vmatmul.mubr.msk.f32.gmra.mxu0 %vm367_vm0, %v18934_v48  ;;  %v8077_v62 = vld [vmem:[%s18570_s1 + $0x388] sm:$0xff] }
 0x7fd   : > { %14525 = vmatprep.mubr.msk.f32.mxu0 %vm367_vm0, %v18935_v22  ;;  %v8081_v48 = vld [vmem:[%s18570_s1 + $0x3a8] sm:$0xff]  ;;  %v8082_v22 = vld [vmem:[%s18570_s1 + $0x3b0] sm:$0xff] }
 0x7fe   : > { %14506 = vmatmul.mubr.msk.f32.gmra.mxu1 %vm1944_vm4, %v6506_v15  ;;  %v8079_v15 = vld [vmem:[%s18570_s1 + $0x398] sm:$0xff] }
 0x7ff   : > { %14508 = vmatprep.mubr.msk.f32.mxu1 %vm1944_vm4, %v6507_v16  ;;  %v8080_v16 = vld [vmem:[%s18570_s1 + $0x3a0] sm:$0xff] }
 0x800   : > { %14526 = vmatmul.mubr.msk.f32.gmra.mxu0 %vm367_vm0, %v18936_v6  ;;  %v12813_v6 = vld [vmem:[%s18570_s1 + $0x79f] ss:$0 sm:$0xff] }
 0x801   : > { %14544 = vmatprep.mubr.msk.f32.mxu0 %vm367_vm0, %v18937_v18 }
 0x802   : > { %14509 = vmatmul.mubr.msk.f32.gmra.mxu1 %vm1944_vm4, %v6508_v3 }
 0x803   : > { %14511 = vmatprep.mubr.msk.f32.mxu1 %vm1944_vm4, %v6509_v43 }
 0x804   : > { %14545 = vmatmul.mubr.msk.f32.vlgmr.msra.gmra.mxu0 %vm367_vm0, %v18938_v12 }
 0x805   : > { %14547 = vmatprep.mubr.msk.f32.mxu0 %vm367_vm0, %v18940_v4  ;;  %14571 = vmatpush3.msra.mxu0 %v7323_v54  ;;  %v18982_v54 = vld [vmem:[#allocation81_spill] sm:$0xff] }
 0x806   : > { %14512 = vmatmul.mubr.msk.f32.gmra.mxu1 %vm1944_vm4, %v18939_v24  ;;  %14598 = vmatprep.subr.mxu0 %v7551_v63 }
 0x807   : > { %14530 = vmatprep.mubr.f32.mxu1 %v18912_v42 }
 0x808   : > { %14548 = vmatmul.mubr.msk.f32.gmra.mxu0 %vm367_vm0, %v18941_v0 }
 0x809   : > { %14550 = vmatprep.mubr.msk.f32.mxu0 %vm367_vm0, %v18943_v52 }
 0x80a   : > { %14531 = vmatmul.mubr.msk.f32.vlgmr.msra.gmra.mxu1 %vm367_vm0, %v18942_v26 }
 0x80b   : > { %14557 = vmatpush3.msra.mxu1 %v7209_v5  ;;  %14533 = vmatprep.mubr.msk.f32.mxu1 %vm367_vm0, %v18944_v51  ;;  %v8075_v5 = vld [vmem:[%s18570_s1 + $0x378] sm:$0xff] }
 0x80c   : > { %14584 = vmatprep.subr.mxu1 %v7437_v7  ;;  %14551 = vmatmul.mubr.msk.f32.gmra.mxu0 %vm367_vm0, %v18945_v57 }
 0x80d   : > { %14553 = vmatprep.mubr.msk.f32.mxu0 %vm367_vm0, %v18947_v27 }
 0x80e   : > { %14534 = vmatmul.mubr.msk.f32.gmra.mxu1 %vm367_vm0, %v18946_v20 }
 0x80f   : > { %14536 = vmatprep.mubr.msk.f32.mxu1 %vm367_vm0, %v18948_v21 }
 0x810   : > { %14554 = vmatmul.mubr.msk.f32.gmra.mxu0 %vm367_vm0, %v18949_v1 }
 0x811   : > { %14572 = vmatprep.mubr.msk.f32.mxu0 %vm367_vm0, %v18942_v26 }
 0x812   : > { %14537 = vmatmul.mubr.msk.f32.gmra.mxu1 %vm367_vm0, %v18950_v30 }
 0x813   : > { %14539 = vmatprep.mubr.msk.f32.mxu1 %vm367_vm0, %v18951_v25 }
 0x814   : > { %14573 = vmatmul.mubr.msk.f32.vlgmr.msra.gmra.mxu0 %vm367_vm0, %v18944_v51 }
 0x815   : > { %14575 = vmatprep.mubr.msk.f32.mxu0 %vm367_vm0, %v18946_v20  ;;  %14599 = vmatpush3.msra.mxu0 %v7551_v63 }
 0x816   : > { %14540 = vmatmul.mubr.msk.f32.gmra.mxu1 %vm367_vm0, %v18952_v35  ;;  %14626 = vmatprep.subr.mxu0 %v7779_v49 }
 0x817   : > { %14558 = vmatprep.mubr.msk.f32.mxu1 %vm367_vm0, %v18953_v45 }
 0x818   : > { %14576 = vmatmul.mubr.msk.f32.gmra.mxu0 %vm367_vm0, %v18948_v21 }
 0x819   : > { %14578 = vmatprep.mubr.msk.f32.mxu0 %vm367_vm0, %v18950_v30 }
 0x81a   : > { %14559 = vmatmul.mubr.msk.f32.vlgmr.msra.gmra.mxu1 %vm367_vm0, %v18954_v61 }
 0x81b   : > { %14585 = vmatpush3.msra.mxu1 %v7437_v7  ;;  %14561 = vmatprep.mubr.msk.f32.mxu1 %vm367_vm0, %v18955_v29 }
 0x81c   : > { %14612 = vmatprep.subr.mxu1 %v7665_v37  ;;  %14579 = vmatmul.mubr.msk.f32.gmra.mxu0 %vm367_vm0, %v18951_v25 }
 0x81d   : > { %14581 = vmatprep.mubr.msk.f32.mxu0 %vm367_vm0, %v18952_v35 }
 0x81e   : > { %14562 = vmatmul.mubr.msk.f32.gmra.mxu1 %vm367_vm0, %v18956_v23 }
 0x81f   : > { %14564 = vmatprep.mubr.msk.f32.mxu1 %vm367_vm0, %v18957_v38 }
 0x820   : > { %14582 = vmatmul.mubr.msk.f32.gmra.mxu0 %vm367_vm0, %v18958_v10 }
 0x821   : > { %14600 = vmatprep.mubr.msk.f32.mxu0 %vm367_vm0, %v18960_v47 }
 0x822   : > { %14565 = vmatmul.mubr.msk.f32.gmra.mxu1 %vm367_vm0, %v18959_v8 }
 0x823   : > { %14567 = vmatprep.mubr.msk.f32.mxu1 %vm367_vm0, %v18961_v14 }
 0x824   : > { %14601 = vmatmul.mubr.msk.f32.vlgmr.msra.gmra.mxu0 %vm367_vm0, %v18962_v44 }
 0x825   : > { %14603 = vmatprep.mubr.msk.f32.mxu0 %vm367_vm0, %v18964_v60  ;;  %14627 = vmatpush3.msra.mxu0 %v7779_v49 }
 0x826   : > { %14568 = vmatmul.mubr.msk.f32.gmra.mxu1 %vm367_vm0, %v18963_v59 }
 0x827   : > { %14586 = vmatprep.mubr.msk.f32.mxu1 %vm367_vm0, %v18965_v39 }
 0x828   : > { %14604 = vmatmul.mubr.msk.f32.gmra.mxu0 %vm367_vm0, %v18966_v19 }
 0x829   : > { %14606 = vmatprep.mubr.msk.f32.mxu0 %vm367_vm0, %v18968_v13 }
 0x82a   : > { %14587 = vmatmul.mubr.msk.f32.vlgmr.msra.gmra.mxu1 %vm367_vm0, %v18967_v56 }
 0x82b   : > { %14613 = vmatpush3.msra.mxu1 %v7665_v37  ;;  %14589 = vmatprep.mubr.msk.f32.mxu1 %vm367_vm0, %v18969_v2 }
 0x82c   : > { %14640 = vmatprep.subr.mxu1 %v18958_v10  ;;  %14607 = vmatmul.mubr.msk.f32.gmra.mxu0 %vm367_vm0, %v18970_v17  ;;  %v8250_v17 = vld [vmem:[%s18570_s1 + $0x3b8] sm:$0xff] }
 0x82d   : > { %14609 = vmatprep.mubr.msk.f32.mxu0 %vm367_vm0, %v18972_v32  ;;  %14668 = vmatprep.subr.mxu0 %v8250_v17 }
 0x82e   : > { %14590 = vmatmul.mubr.msk.f32.gmra.mxu1 %vm367_vm0, %v18971_v9 }
 0x82f   : > { %14592 = vmatprep.mubr.msk.f32.mxu1 %vm367_vm0, %v18973_v55 }
 0x830   : > { %14610 = vmatmul.mubr.msk.f32.gmra.mxu0 %vm367_vm0, %v18974_v28  ;;  %v8338_v28 = vld [vmem:[%s18570_s1 + $0x3c0] sm:$0xff] }
 0x831   : > { %14628 = vmatprep.mubr.msk.f32.mxu0 %vm367_vm0, %v18976_v50 }
 0x832   : > { %14593 = vmatmul.mubr.msk.f32.gmra.mxu1 %vm367_vm0, %v18975_v11 }
 0x833   : > { %14595 = vmatprep.mubr.msk.f32.mxu1 %vm367_vm0, %v18977_v41 }
 0x834   : > { %14629 = vmatmul.mubr.msk.f32.vlgmr.msra.gmra.mxu0 %vm367_vm0, %v18978_v53 }
 0x835   : > { %14631 = vmatprep.mubr.msk.f32.mxu0 %vm367_vm0, %v18980_v58  ;;  %14669 = vmatpush3.msra.mxu0 %v8250_v17 }
 0x836   : > { %14596 = vmatmul.mubr.msk.f32.gmra.mxu1 %vm367_vm0, %v18979_v36 }
 0x837   : > { %14614 = vmatprep.mubr.msk.f32.mxu1 %vm367_vm0, %v18944_v51 }
 0x838   : > { %14632 = vmatmul.mubr.msk.f32.gmra.mxu0 %vm367_vm0, %v18981_v40 }
 0x839   : > { %14634 = vmatprep.mubr.msk.f32.mxu0 %vm367_vm0, %v18982_v54 }
 0x83a   : > { %14615 = vmatmul.mubr.msk.f32.vlgmr.msra.gmra.mxu1 %vm367_vm0, %v18946_v20 }
 0x83b   : > { %14641 = vmatpush3.msra.mxu1 %v18958_v10  ;;  %14617 = vmatprep.mubr.msk.f32.mxu1 %vm367_vm0, %v18948_v21 }
 0x83c   : > { %14642 = vmatprep.subr.mxu1 %v18952_v35  ;;  %14635 = vmatmul.mubr.msk.f32.gmra.mxu0 %vm367_vm0, %v18983_v31 }
 0x83d   : > { %14643 = vmatpush3.msra.mxu1 %v18952_v35  ;;  %14637 = vmatprep.mubr.msk.f32.mxu0 %vm367_vm0, %v18984_v33 }
 0x83e   : > { %14644 = vmatprep.subr.mxu1 %v18951_v25  ;;  %14618 = vmatmul.mubr.msk.f32.gmra.mxu1 %vm367_vm0, %v18950_v30 }
 0x83f   : > { %14645 = vmatpush3.msra.mxu1 %v18951_v25  ;;  %14620 = vmatprep.mubr.msk.f32.mxu1 %vm367_vm0, %v18951_v25 }
 0x840   : > { %14646 = vmatprep.subr.mxu1 %v18950_v30  ;;  %14638 = vmatmul.mubr.msk.f32.gmra.mxu0 %vm367_vm0, %v18939_v24 }
 0x841   : > { %14647 = vmatpush3.msra.mxu1 %v18950_v30 }
 0x842   : > { %14648 = vmatprep.subr.mxu1 %v18948_v21  ;;  %14621 = vmatmul.mubr.msk.f32.gmra.mxu1 %vm367_vm0, %v18952_v35 }
 0x843   : > { %14649 = vmatpush3.msra.mxu1 %v18948_v21  ;;  %14623 = vmatprep.mubr.msk.f32.mxu1 %vm367_vm0, %v18958_v10 }
 0x844   : > { %14650 = vmatprep.subr.mxu1 %v18946_v20 }
 0x845   : > { %14651 = vmatpush3.msra.mxu1 %v18946_v20 }
 0x846   : > { %14652 = vmatprep.subr.mxu1 %v18944_v51  ;;  %14624 = vmatmul.mubr.f32.gmra.mxu1 %v18912_v42 }
 0x847   : > { %14653 = vmatpush3.msra.mxu1 %v18944_v51  ;;  %14656 = vmatprep.mubr.msk.f32.mxu1 %vm8083_vm6, %v8075_v5 }
 0x848   : > { %14654 = vmatprep.subr.mxu1 %v18942_v26 }
 0x849   : > { %14655 = vmatpush3.msra.mxu1 %v18942_v26 }
 0x84a   : > { %14657 = vmatmul.mubr.msk.f32.vlgmr.msra.gmra.mxu1 %vm8083_vm6, %v8076_v34  ;;  %14673 = vmatprep.subr.mxu1 %v8338_v28 }
 0x84b   : > { %14659 = vmatprep.mubr.msk.f32.mxu1 %vm8083_vm6, %v8077_v62  ;;  %14674 = vmatpush3.msra.mxu1 %v8338_v28  ;;  %v17492_v62 = vld [vmem:[%s18570_s1 + $0x3c8] sm:$0xff] }
 0x84c   : > { %14678 = vmatprep.subr.mxu0 %v17492_v62 }
 0x84e   : > { %14660 = vmatmul.mubr.msk.f32.gmra.mxu1 %vm8083_vm6, %v8078_v46 }
 0x84f   : > { %14662 = vmatprep.mubr.msk.f32.mxu1 %vm8083_vm6, %v8079_v15 }
 0x852   : > { %14663 = vmatmul.mubr.msk.f32.gmra.mxu1 %vm8083_vm6, %v8080_v16 }
 0x853   : > { %14665 = vmatprep.mubr.msk.f32.mxu1 %vm8083_vm6, %v8081_v48 }
 0x856   : > { %14666 = vmatmul.mubr.msk.f32.gmra.mxu1 %vm8083_vm6, %v8082_v22 }
 0x874   : > { %v14364_v3 = vpop.f32.mrf.mxu0 }
 0x876   : > { %v5592_v43 = vpop.f32.mrf.mxu0 }
 0x878   : > { %v14367_v18 = vpop.f32.mrf.mxu0 }
 0x879   : > { %v14344_v12 = vpop.f32.mrf.mxu1 }
 0x87a   : > { %v5501_v24 = vadd.f32 %v14344_v12, %v12813_v6  ;;  %v17481_v63 = vpop.f32.mrf.mxu0  ;;  %v17498_v12 = vld [vmem:[%s18570_s1 + $0x3d0] sm:$0xff] }
 0x87b   : > { %v5457_v4 = vpop.f32.mrf.mxu1  ;;  %14683 = vmatprep.subr.mxu1 %v17498_v12 }
 0x87c   : > { %v5632_v7 = vadd.f32 %v14364_v3, %v5501_v24  ;;  %v14370_v0 = vpop.f32.mrf.mxu0  ;;  %v5500_v36 = vadd.f32 %v12813_v6, %v5457_v4 }
 0x87d   : > { %v14347_v52 = vpop.f32.mrf.mxu1 }
 0x87e   : > { %v5503_v57 = vadd.f32 %v14347_v52, %v12813_v6  ;;  %v5612_v27 = vpop.f32.mrf.mxu0  ;;  %v5631_v16 = vadd.f32 %v5592_v43, %v5500_v36 }
 0x87f   : > { %v5467_v1 = vpop.f32.mrf.mxu1 }
 0x880   : > { %v14373_v49 = vpop.f32.mrf.mxu0  ;;  %v5634_v45 = vadd.f32 %v14367_v18, %v5503_v57  ;;  %v5502_v15 = vadd.f32 %v12813_v6, %v5467_v1 }
 0x882   : > { %v14350_v37 = vpop.f32.mrf.mxu1  ;;  %v5622_v29 = vpop.f32.mrf.mxu0 }
 0x883   : > { %v5505_v61 = vadd.f32 %v14350_v37, %v12813_v6 }
 0x884   : > { %v5477_v23 = vpop.f32.mrf.mxu1  ;;  %v14404_v38 = vpop.f32.mrf.mxu0 }
 0x885   : > { %v5636_v8 = vadd.f32 %v14370_v0, %v5505_v61  ;;  %v5504_v11 = vadd.f32 %v12813_v6, %v5477_v23 }
 0x886   : > { %v14353_v47 = vpop.f32.mrf.mxu1  ;;  %v5918_v44 = vpop.f32.mrf.mxu0 }
 0x887   : > { %v5507_v14 = vadd.f32 %v14353_v47, %v12813_v6  ;;  %v5635_v34 = vadd.f32 %v5612_v27, %v5504_v11 }
 0x888   : > { %v5487_v59 = vpop.f32.mrf.mxu1  ;;  %v14407_v60 = vpop.f32.mrf.mxu0 }
 0x889   : > { %v5638_v39 = vadd.f32 %v14373_v49, %v5507_v14  ;;  %v5506_v31 = vadd.f32 %v12813_v6, %v5487_v59  ;;  %v5633_v6 = vadd.f32 %v17481_v63, %v5502_v15 }
 0x88a   : > { %v14384_v19 = vpop.f32.mrf.mxu1  ;;  %v5928_v13 = vpop.f32.mrf.mxu0 }
 0x88b   : > { %v5806_v56 = vadd.f32 %v14384_v19, %v5632_v7  ;;  %v5637_v7 = vadd.f32 %v5622_v29, %v5506_v31 }
 0x88c   : > { %v5766_v2 = vpop.f32.mrf.mxu1  ;;  %v14410_v9 = vpop.f32.mrf.mxu0 }
 0x88d   : > { %v5958_v32 = vadd.f32 %v14404_v38, %v5806_v56  ;;  %v5805_v24 = vadd.f32 %v5766_v2, %v5631_v16 }
 0x88e   : > { %v14387_v55 = vpop.f32.mrf.mxu1  ;;  %v5938_v41 = vpop.f32.mrf.mxu0 }
 0x88f   : > { %v5808_v50 = vadd.f32 %v14387_v55, %v5634_v45  ;;  %v5957_v61 = vadd.f32 %v5918_v44, %v5805_v24 }
 0x890   : > { %v5776_v53 = vpop.f32.mrf.mxu1  ;;  %v14413_v58 = vpop.f32.mrf.mxu0 }
 0x891   : > { %v5960_v40 = vadd.f32 %v14407_v60, %v5808_v50  ;;  %v5807_v45 = vadd.f32 %v5776_v53, %v5633_v6 }
 0x892   : > { %v14390_v54 = vpop.f32.mrf.mxu1  ;;  %v5948_v5 = vpop.f32.mrf.mxu0 }
 0x893   : > { %v5810_v33 = vadd.f32 %v14390_v54, %v5636_v8 }
 0x894   : > { %v5786_v46 = vpop.f32.mrf.mxu1  ;;  %v14444_v3 = vpop.f32.mrf.mxu0 }
 0x895   : > { %v5809_v48 = vadd.f32 %v5786_v46, %v5635_v34  ;;  %v5962_v22 = vadd.f32 %v14410_v9, %v5810_v33 }
 0x896   : > { %v14393_v18 = vpop.f32.mrf.mxu1  ;;  %v6188_v52 = vpop.f32.mrf.mxu0 }
 0x897   : > { %v5812_v4 = vadd.f32 %v14393_v18, %v5638_v39  ;;  %v5961_v0 = vadd.f32 %v5938_v41, %v5809_v48  ;;  %v5959_v39 = vadd.f32 %v5928_v13, %v5807_v45 }
 0x898   : > { %v5796_v57 = vpop.f32.mrf.mxu1  ;;  %v14447_v1 = vpop.f32.mrf.mxu0 }
 0x899   : > { %v5811_v43 = vadd.f32 %v5796_v57, %v5637_v7  ;;  %v5964_v27 = vadd.f32 %v14413_v58, %v5812_v4 }
 0x89a   : > { %v14424_v49 = vpop.f32.mrf.mxu1  ;;  %v6198_v38 = vpop.f32.mrf.mxu0 }
 0x89b   : > { %v6077_v37 = vadd.f32 %v14424_v49, %v5958_v32  ;;  %v5963_v23 = vadd.f32 %v5948_v5, %v5811_v43 }
 0x89c   : > { %v6037_v8 = vpop.f32.mrf.mxu1  ;;  %v14450_v29 = vpop.f32.mrf.mxu0 }
 0x89d   : > { %v6076_v47 = vadd.f32 %v6037_v8, %v5957_v61  ;;  %v6228_v14 = vadd.f32 %v14444_v3, %v6077_v37 }
 0x89e   : > { %v14427_v59 = vpop.f32.mrf.mxu1  ;;  %v6208_v56 = vpop.f32.mrf.mxu0 }
 0x89f   : > { %v6079_v60 = vadd.f32 %v14427_v59, %v5960_v40  ;;  %v6227_v19 = vadd.f32 %v6188_v52, %v6076_v47 }
 0x8a0   : > { %v6047_v2 = vpop.f32.mrf.mxu1  ;;  %v14453_v9 = vpop.f32.mrf.mxu0 }
 0x8a1   : > { %v6078_v63 = vadd.f32 %v6047_v2, %v5959_v39  ;;  %v6230_v17 = vadd.f32 %v14447_v1, %v6079_v60 }
 0x8a2   : > { %v14430_v55 = vpop.f32.mrf.mxu1  ;;  %v6218_v32 = vpop.f32.mrf.mxu0 }
 0x8a3   : > { %v6081_v28 = vadd.f32 %v14430_v55, %v5962_v22  ;;  %v6229_v11 = vadd.f32 %v6198_v38, %v6078_v63 }
 0x8a4   : > { %v6057_v44 = vpop.f32.mrf.mxu1  ;;  %v14484_v53 = vpop.f32.mrf.mxu0 }
 0x8a5   : > { %v6080_v50 = vadd.f32 %v6057_v44, %v5961_v0  ;;  %v6232_v41 = vadd.f32 %v14450_v29, %v6081_v28 }
 0x8a6   : > { %v14433_v36 = vpop.f32.mrf.mxu1  ;;  %v6456_v31 = vpop.f32.mrf.mxu0 }
 0x8a7   : > { %v6083_v58 = vadd.f32 %v14433_v36, %v5964_v27  ;;  %v6231_v54 = vadd.f32 %v6208_v56, %v6080_v50 }
 0x8a8   : > { %v6067_v40 = vpop.f32.mrf.mxu1  ;;  %v14487_v5 = vpop.f32.mrf.mxu0 }
 0x8a9   : > { %v6082_v13 = vadd.f32 %v6067_v40, %v5963_v23  ;;  %v6234_v33 = vadd.f32 %v14453_v9, %v6083_v58 }
 0x8aa   : > { %v14464_v34 = vpop.f32.mrf.mxu1  ;;  %v6466_v16 = vpop.f32.mrf.mxu0 }
 0x8ab   : > { %v6379_v46 = vadd.f32 %v14464_v34, %v6228_v14  ;;  %v6233_v15 = vadd.f32 %v6218_v32, %v6082_v13 }
 0x8ac   : > { %v6339_v48 = vpop.f32.mrf.mxu1  ;;  %v14490_v18 = vpop.f32.mrf.mxu0 }
 0x8ad   : > { %v6378_v22 = vadd.f32 %v6339_v48, %v6227_v19  ;;  %v6496_v3 = vadd.f32 %v14484_v53, %v6379_v46 }
 0x8ae   : > { %v14467_v24 = vpop.f32.mrf.mxu1  ;;  %v6476_v0 = vpop.f32.mrf.mxu0 }
 0x8af   : > { %v6381_v4 = vadd.f32 %v14467_v24, %v6230_v17  ;;  %v6495_v7 = vadd.f32 %v6456_v31, %v6378_v22 }
 0x8b0   : > { %v6349_v52 = vpop.f32.mrf.mxu1  ;;  %v14493_v43 = vpop.f32.mrf.mxu0 }
 0x8b1   : > { %v6380_v57 = vadd.f32 %v6349_v52, %v6229_v11  ;;  %v6498_v6 = vadd.f32 %v14487_v5, %v6381_v4  ;;  %v12884_v5 = vld [vmem:[%s18570_s1 + $0x7a0] ss:$0 sm:$0xff] }
 0x8b2   : > { %v14470_v27 = vpop.f32.mrf.mxu1  ;;  %v6486_v45 = vpop.f32.mrf.mxu0 }
 0x8b3   : > { %v6383_v1 = vadd.f32 %v14470_v27, %v6232_v41  ;;  %v6497_v49 = vadd.f32 %v6466_v16, %v6380_v57 }
 0x8b4   : > { %v6359_v37 = vpop.f32.mrf.mxu1  ;;  %v14518_v38 = vpop.f32.mrf.mxu0 }
 0x8b5   : > { %v6382_v61 = vadd.f32 %v6359_v37, %v6231_v54  ;;  %v6500_v23 = vadd.f32 %v14490_v18, %v6383_v1  ;;  %v6974_v48 = vadd.f32 %v14518_v38, %v12884_v5 }
 0x8b6   : > { %v14473_v8 = vpop.f32.mrf.mxu1  ;;  %v6930_v29 = vpop.f32.mrf.mxu0 }
 0x8b7   : > { %v6385_v47 = vadd.f32 %v14473_v8, %v6234_v33  ;;  %v6499_v14 = vadd.f32 %v6476_v0, %v6382_v61  ;;  %v6973_v18 = vadd.f32 %v12884_v5, %v6930_v29 }
 0x8b8   : > { %v6369_v59 = vpop.f32.mrf.mxu1  ;;  %v14521_v19 = vpop.f32.mrf.mxu0 }
 0x8b9   : > { %v6384_v60 = vadd.f32 %v6369_v59, %v6233_v15  ;;  %v6502_v39 = vadd.f32 %v14493_v43, %v6385_v47  ;;  %v6976_v0 = vadd.f32 %v14521_v19, %v12884_v5 }
 0x8ba   : > { %v14504_v56 = vpop.f32.mrf.mxu1  ;;  %v6940_v17 = vpop.f32.mrf.mxu0 }
 0x8bb   : > { %v17502_v2 = vadd.f32 %v14504_v56, %v6496_v3  ;;  %v6501_v63 = vadd.f32 %v6486_v45, %v6384_v60  ;;  %v6975_v27 = vadd.f32 %v12884_v5, %v6940_v17 }
 0x8bc   : > { %v6601_v9 = vpop.f32.mrf.mxu1  ;;  %v14524_v28 = vpop.f32.mrf.mxu0 }
 0x8bd   : > { %v17504_v55 = vadd.f32 %v6601_v9, %v6495_v7  ;;  %v6978_v61 = vadd.f32 %v14524_v28, %v12884_v5 }
 0x8be   : > { %v14507_v11 = vpop.f32.mrf.mxu1  ;;  %v6950_v44 = vpop.f32.mrf.mxu0 }
 0x8bf   : > { %v17506_v32 = vadd.f32 %v14507_v11, %v6498_v6 }
 0x8c0   : > { %v6611_v50 = vpop.f32.mrf.mxu1  ;;  %v14527_v53 = vpop.f32.mrf.mxu0 }
 0x8c1   : > { %v17508_v41 = vadd.f32 %v6611_v50, %v6497_v49  ;;  %v6980_v19 = vadd.f32 %v14527_v53, %v12884_v5 }
 0x8c2   : > { %v14510_v36 = vpop.f32.mrf.mxu1  ;;  %v6960_v54 = vpop.f32.mrf.mxu0 }
 0x8c3   : > { %v17510_v58 = vadd.f32 %v14510_v36, %v6500_v23  ;;  %v6979_v17 = vadd.f32 %v12884_v5, %v6960_v54 }
 0x8c4   : > { %v6621_v31 = vpop.f32.mrf.mxu1  ;;  %v14546_v13 = vpop.f32.mrf.mxu0 }
 0x8c5   : > { %v17512_v40 = vadd.f32 %v6621_v31, %v6499_v14  ;;  %v6977_v14 = vadd.f32 %v12884_v5, %v6950_v44 }
 0x8c6   : > { %v14513_v33 = vpop.f32.mrf.mxu1  ;;  %v7162_v46 = vpop.f32.mrf.mxu0 }
 0x8c7   : > { %v17517_v34 = vadd.f32 %v14513_v33, %v6502_v39 }
 0x8c8   : > { %v6631_v15 = vpop.f32.mrf.mxu1  ;;  %v14549_v22 = vpop.f32.mrf.mxu0 }
 0x8c9   : > { %v17519_v16 = vadd.f32 %v6631_v15, %v6501_v63 }
 0x8ca   : > { %v14532_v3 = vpop.f32.mrf.mxu1  ;;  %v7172_v4 = vpop.f32.mrf.mxu0 }
 0x8cb   : > { %v7088_v24 = vadd.f32 %v14532_v3, %v6974_v48 }
 0x8cc   : > { %v7048_v7 = vpop.f32.mrf.mxu1  ;;  %v14552_v57 = vpop.f32.mrf.mxu0 }
 0x8cd   : > { %v7087_v52 = vadd.f32 %v7048_v7, %v6973_v18  ;;  %v7202_v43 = vadd.f32 %v14546_v13, %v7088_v24 }
 0x8ce   : > { %v14535_v6 = vpop.f32.mrf.mxu1  ;;  %v7182_v49 = vpop.f32.mrf.mxu0 }
 0x8cf   : > { %v7090_v1 = vadd.f32 %v14535_v6, %v6976_v0  ;;  %v7201_v37 = vadd.f32 %v7162_v46, %v7087_v52 }
 0x8d0   : > { %v7058_v45 = vpop.f32.mrf.mxu1  ;;  %v14555_v38 = vpop.f32.mrf.mxu0 }
 0x8d1   : > { %v7089_v23 = vadd.f32 %v7058_v45, %v6975_v27  ;;  %v7204_v8 = vadd.f32 %v14549_v22, %v7090_v1 }
 0x8d2   : > { %v14538_v47 = vpop.f32.mrf.mxu1  ;;  %v7192_v60 = vpop.f32.mrf.mxu0 }
 0x8d3   : > { %v7092_v29 = vadd.f32 %v14538_v47, %v6978_v61  ;;  %v7203_v59 = vadd.f32 %v7172_v4, %v7089_v23 }
 0x8d4   : > { %v7068_v39 = vpop.f32.mrf.mxu1  ;;  %v14574_v9 = vpop.f32.mrf.mxu0 }
 0x8d5   : > { %v7091_v56 = vadd.f32 %v7068_v39, %v6977_v14  ;;  %v7206_v63 = vadd.f32 %v14552_v57, %v7092_v29 }
 0x8d6   : > { %v14541_v11 = vpop.f32.mrf.mxu1  ;;  %v7390_v31 = vpop.f32.mrf.mxu0 }
 0x8d7   : > { %v7094_v50 = vadd.f32 %v14541_v11, %v6980_v19  ;;  %v7205_v36 = vadd.f32 %v7182_v49, %v7091_v56 }
 0x8d8   : > { %v7078_v13 = vpop.f32.mrf.mxu1  ;;  %v14577_v46 = vpop.f32.mrf.mxu0 }
 0x8d9   : > { %v7093_v28 = vadd.f32 %v7078_v13, %v6979_v17  ;;  %v7208_v33 = vadd.f32 %v14555_v38, %v7094_v50 }
 0x8da   : > { %v14560_v15 = vpop.f32.mrf.mxu1  ;;  %v7400_v22 = vpop.f32.mrf.mxu0 }
 0x8db   : > { %v7316_v48 = vadd.f32 %v14560_v15, %v7202_v43  ;;  %v7207_v44 = vadd.f32 %v7192_v60, %v7093_v28 }
 0x8dc   : > { %v7276_v3 = vpop.f32.mrf.mxu1  ;;  %v14580_v53 = vpop.f32.mrf.mxu0 }
 0x8dd   : > { %v7315_v18 = vadd.f32 %v7276_v3, %v7201_v37  ;;  %v7430_v24 = vadd.f32 %v14574_v9, %v7316_v48 }
 0x8de   : > { %v14563_v4 = vpop.f32.mrf.mxu1  ;;  %v7410_v52 = vpop.f32.mrf.mxu0 }
 0x8df   : > { %v7318_v7 = vadd.f32 %v14563_v4, %v7204_v8  ;;  %v7429_v0 = vadd.f32 %v7390_v31, %v7315_v18 }
 0x8e0   : > { %v7286_v54 = vpop.f32.mrf.mxu1  ;;  %v14583_v6 = vpop.f32.mrf.mxu0 }
 0x8e1   : > { %v7317_v5 = vadd.f32 %v7286_v54, %v7203_v59  ;;  %v7432_v57 = vadd.f32 %v14577_v46, %v7318_v7 }
 0x8e2   : > { %v14566_v27 = vpop.f32.mrf.mxu1  ;;  %v7420_v45 = vpop.f32.mrf.mxu0 }
 0x8e3   : > { %v7320_v1 = vadd.f32 %v14566_v27, %v7206_v63  ;;  %v7431_v49 = vadd.f32 %v7400_v22, %v7317_v5 }
 0x8e4   : > { %v7296_v61 = vpop.f32.mrf.mxu1  ;;  %v14602_v38 = vpop.f32.mrf.mxu0 }
 0x8e5   : > { %v7319_v43 = vadd.f32 %v7296_v61, %v7205_v36  ;;  %v7434_v23 = vadd.f32 %v14580_v53, %v7320_v1 }
 0x8e6   : > { %v14569_v47 = vpop.f32.mrf.mxu1  ;;  %v7618_v29 = vpop.f32.mrf.mxu0 }
 0x8e7   : > { %v7322_v37 = vadd.f32 %v14569_v47, %v7208_v33  ;;  %v7433_v14 = vadd.f32 %v7410_v52, %v7319_v43 }
 0x8e8   : > { %v7306_v60 = vpop.f32.mrf.mxu1  ;;  %v14605_v19 = vpop.f32.mrf.mxu0 }
 0x8e9   : > { %v7321_v8 = vadd.f32 %v7306_v60, %v7207_v44  ;;  %v7436_v39 = vadd.f32 %v14583_v6, %v7322_v37 }
 0x8ea   : > { %v14588_v56 = vpop.f32.mrf.mxu1  ;;  %v7628_v11 = vpop.f32.mrf.mxu0 }
 0x8eb   : > { %v7544_v59 = vadd.f32 %v14588_v56, %v7430_v24  ;;  %v7435_v9 = vadd.f32 %v7420_v45, %v7321_v8 }
 0x8ec   : > { %v7504_v17 = vpop.f32.mrf.mxu1  ;;  %v14608_v31 = vpop.f32.mrf.mxu0 }
 0x8ed   : > { %v7543_v63 = vadd.f32 %v7504_v17, %v7429_v0  ;;  %v7658_v50 = vadd.f32 %v14602_v38, %v7544_v59 }
 0x8ee   : > { %v14591_v13 = vpop.f32.mrf.mxu1  ;;  %v7638_v46 = vpop.f32.mrf.mxu0 }
 0x8ef   : > { %v7546_v36 = vadd.f32 %v14591_v13, %v7432_v57  ;;  %v7657_v28 = vadd.f32 %v7618_v29, %v7543_v63 }
 0x8f0   : > { %v7514_v15 = vpop.f32.mrf.mxu1  ;;  %v14611_v22 = vpop.f32.mrf.mxu0 }
 0x8f1   : > { %v7545_v33 = vadd.f32 %v7514_v15, %v7431_v49  ;;  %v7660_v48 = vadd.f32 %v14605_v19, %v7546_v36 }
 0x8f2   : > { %v14594_v3 = vpop.f32.mrf.mxu1  ;;  %v7648_v53 = vpop.f32.mrf.mxu0 }
 0x8f3   : > { %v7548_v44 = vadd.f32 %v14594_v3, %v7434_v23  ;;  %v7659_v18 = vadd.f32 %v7628_v11, %v7545_v33 }
 0x8f4   : > { %v7524_v4 = vpop.f32.mrf.mxu1  ;;  %v14630_v52 = vpop.f32.mrf.mxu0 }
 0x8f5   : > { %v7547_v24 = vadd.f32 %v7524_v4, %v7433_v14  ;;  %v7662_v7 = vadd.f32 %v14608_v31, %v7548_v44 }
 0x8f6   : > { %v14597_v54 = vpop.f32.mrf.mxu1  ;;  %v7846_v6 = vpop.f32.mrf.mxu0 }
 0x8f7   : > { %v7550_v0 = vadd.f32 %v14597_v54, %v7436_v39  ;;  %v7661_v5 = vadd.f32 %v7638_v46, %v7547_v24  ;;  %v8602_v54 = vld [vmem:[%s18570_s1 + $0x3d8] sm:$0xff] }
 0x8f8   : > { %v7534_v27 = vpop.f32.mrf.mxu1  ;;  %v14633_v45 = vpop.f32.mrf.mxu0 }
 0x8f9   : > { %v7549_v57 = vadd.f32 %v7534_v27, %v7435_v9  ;;  %v7664_v1 = vadd.f32 %v14611_v22, %v7550_v0  ;;  %v8885_v0 = vld [vmem:[%s18570_s1 + $0x410] sm:$0xff] }
 0x8fa   : > { %v14616_v61 = vpop.f32.mrf.mxu1  ;;  %v7856_v37 = vpop.f32.mrf.mxu0 }
 0x8fb   : > { %v7772_v49 = vadd.f32 %v14616_v61, %v7658_v50  ;;  %v7663_v43 = vadd.f32 %v7648_v53, %v7549_v57  ;;  %v12961_v57 = vld [vmem:[%s18570_s1 + $0x7a1] ss:$0 sm:$0xff] }
 0x8fc   : > { %v7732_v38 = vpop.f32.mrf.mxu1  ;;  %v14636_v39 = vpop.f32.mrf.mxu0 }
 0x8fd   : > { %v17521_v47 = vadd.f32 %v14630_v52, %v7772_v49  ;;  %v7771_v23 = vadd.f32 %v7732_v38, %v7657_v28  ;;  %v8603_v52 = vld [vmem:[%s18570_s1 + $0x3e0] sm:$0xff] }
 0x8fe   : > { %v14619_v14 = vpop.f32.mrf.mxu1  ;;  %v7866_v63 = vpop.f32.mrf.mxu0 }
 0x8ff   : > { %v17523_v29 = vadd.f32 %v7846_v6, %v7771_v23  ;;  %v7774_v60 = vadd.f32 %v14619_v14, %v7660_v48 }
 0x900   : > { %v7742_v8 = vpop.f32.mrf.mxu1  ;;  %v14639_v28 = vpop.f32.mrf.mxu0 }
 0x901   : > { %v17525_v19 = vadd.f32 %v14633_v45, %v7774_v60  ;;  %v7773_v56 = vadd.f32 %v7742_v8, %v7659_v18 }
 0x902   : > { %v14622_v59 = vpop.f32.mrf.mxu1  ;;  %v17565_v6 = vpop.f32.mrf.mxu0 }
 0x903   : > { %v17527_v9 = vadd.f32 %v7856_v37, %v7773_v56  ;;  %v7776_v11 = vadd.f32 %v14622_v59, %v7662_v7  ;;  %v18985_v37 = vld [vmem:[#allocation2_spill] sm:$0xff]  ;;  %v18986_v56 = vld [vmem:[#allocation5_spill] sm:$0xff] }
 0x904   : > { %v7752_v17 = vpop.f32.mrf.mxu1  ;;  %v8217_v14 = vand.u32 3, %v18985_v37  ;;  %v8224_v59 = vand.u32 3, %v18986_v56  ;;  %v8970_v56 = vld [vmem:[%s18570_s1 + $0x420] sm:$0xff] }
 0x905   : > { %v17529_v50 = vadd.f32 %v14636_v39, %v7776_v11  ;;  %v7775_v31 = vadd.f32 %v7752_v17, %v7661_v5  ;;  %v8792_v5 = vld [vmem:[%s18570_s1 + $0x400] sm:$0xff] }
 0x906   : > { %v14625_v13 = vpop.f32.mrf.mxu1  ;;  %vm8237_vm7 = vcmp.ge.s32.totalorder %v8217_v14, 1  ;;  %vm8238_vm11 = vcmp.ge.s32.totalorder %v8224_v59, 1  ;;  %vm8243_vm12 = vcmp.le.s32.totalorder %v8217_v14, 2  ;;  %vm8244_vm15 = vcmp.le.s32.totalorder %v8224_v59, 2 }
 0x907   : > { %v17531_v36 = vadd.f32 %v7866_v63, %v7775_v31  ;;  %v7778_v46 = vadd.f32 %v14625_v13, %v7664_v1 }
 0x908   : > { %v7762_v15 = vpop.f32.mrf.mxu1 }
 0x909   : > { %v17533_v33 = vadd.f32 %v7762_v15, %v7663_v43  ;;  %v17535_v48 = vadd.f32 %v14639_v28, %v7778_v46  ;;  %v17578_v46 = vsel %vm8237_vm7, 1.0, %v18912_v42 }
 0x90a   : > { %v14658_v22 = vpop.f32.mrf.mxu1 }
 0x90c   : > { %v8174_v3 = vpop.f32.mrf.mxu1 }
 0x90d   : > { %14670 = vmatprep.mubr.msk.f32.mxu0 %vm367_vm0, %v8174_v3 }
 0x90e   : > { %v14661_v44 = vpop.f32.mrf.mxu1  ;;  %14671 = vmatmul.mubr.msk.f32.vlgmr.msra.gmra.mxu0 %vm367_vm0, %v14658_v22 }
 0x90f   : > { %14679 = vmatpush3.msra.mxu0 %v17492_v62  ;;  %v8699_v62 = vld [vmem:[%s18570_s1 + $0x3f0] sm:$0xff] }
 0x910   : > { %v8184_v18 = vpop.f32.mrf.mxu1  ;;  %14688 = vmatprep.subr.mxu0 %v8603_v52 }
 0x911   : > { %14675 = vmatprep.mubr.msk.f32.mxu1 %vm367_vm0, %v8184_v18 }
 0x912   : > { %v14664_v53 = vpop.f32.mrf.mxu1  ;;  %14676 = vmatmul.mubr.msk.f32.vlgmr.msra.gmra.mxu1 %vm367_vm0, %v14661_v44 }
 0x913   : > { %14684 = vmatpush3.msra.mxu1 %v17498_v12  ;;  %v8698_v12 = vld [vmem:[%s18570_s1 + $0x3e8] sm:$0xff] }
 0x914   : > { %v8194_v4 = vpop.f32.mrf.mxu1  ;;  %14695 = vmatprep.subr.mxu1 %v8699_v62 }
 0x915   : > { %14680 = vmatprep.mubr.msk.f32.mxu0 %vm367_vm0, %v8194_v4 }
 0x916   : > { %v14667_v24 = vpop.f32.mrf.mxu1  ;;  %14681 = vmatmul.mubr.msk.f32.vlgmr.msra.gmra.mxu0 %vm367_vm0, %v14664_v53  ;;  %v17586_v53 = vsel %vm8238_vm11, 1.0, %v18912_v42 }
 0x917   : > { %14689 = vmatpush3.msra.mxu0 %v8603_v52 }
 0x918   : > { %v8204_v7 = vpop.f32.mrf.mxu1  ;;  %14690 = vmatprep.subr.mxu0 %v8602_v54 }
 0x919   : > { %14685 = vmatprep.mubr.msk.f32.mxu1 %vm367_vm0, %v8204_v7  ;;  %14691 = vmatpush3.msra.mxu0 %v8602_v54 }
 0x91a   : > { %14686 = vmatmul.mubr.msk.f32.vlgmr.msra.gmra.mxu1 %vm367_vm0, %v14667_v24  ;;  %14702 = vmatprep.subr.mxu0 %v8792_v5  ;;  %v17590_v24 = vsel %vm8243_vm12, 1.0, %v18912_v42 }
 0x91b   : > { %14696 = vmatpush3.msra.mxu1 %v8699_v62 }
 0x91c   : > { %14697 = vmatprep.subr.mxu1 %v8698_v12 }
 0x91d   : > { %14698 = vmatpush3.msra.mxu1 %v8698_v12 }
 0x91e   : > { %14709 = vmatprep.subr.mxu1 %v8885_v0 }
 0x9ce   : > { %v14672_v27 = vpop.f32.mrf.mxu0 }
 0x9cf   : > { %v8337_v61 = vadd.f32 %v14672_v27, %v12961_v57 }
 0x9d0   : > { %v8323_v45 = vpop.f32.mrf.mxu0 }
 0x9d1   : > { %v8336_v38 = vadd.f32 %v12961_v57, %v8323_v45 }
 0x9d2   : > { %v14677_v1 = vpop.f32.mrf.mxu1 }
 0x9d3   : > { %v8421_v23 = vadd.f32 %v14677_v1, %v8337_v61  ;;  %v8884_v61 = vld [vmem:[%s18570_s1 + $0x408] sm:$0xff] }
 0x9d4   : > { %v8411_v49 = vpop.f32.mrf.mxu1 }
 0x9d5   : > { %v8420_v8 = vadd.f32 %v8411_v49, %v8336_v38  ;;  %v8791_v38 = vld [vmem:[%s18570_s1 + $0x3f8] sm:$0xff] }
 0x9d6   : > { %v14682_v43 = vpop.f32.mrf.mxu0 }
 0x9d7   : > { %v8505_v39 = vadd.f32 %v14682_v43, %v8421_v23 }
 0x9d8   : > { %v8495_v60 = vpop.f32.mrf.mxu0 }
 0x9d9   : > { %v8504_v17 = vadd.f32 %v8495_v60, %v8420_v8  ;;  %v9061_v60 = vld [vmem:[%s18570_s1 + $0x430] sm:$0xff] }
 0x9da   : > { %v14687_v11 = vpop.f32.mrf.mxu1 }
 0x9db   : > { %v17572_v63 = vadd.f32 %v14687_v11, %v8505_v39 }
 0x9dc   : > { %v8579_v31 = vpop.f32.mrf.mxu1 }
 0x9dd   : > { %v17574_v13 = vadd.f32 %v8579_v31, %v8504_v17  ;;  %v8694_v28 = vrot.slane %v17572_v63, 4  ;;  %v8595_v15 = vrot.slane %v17572_v63, 3  ;;  %v8877_v4 = vrot.slane %v17572_v63, 7  ;;  %v9060_v17 = vld [vmem:[%s18570_s1 + $0x428] sm:$0xff] }
 0x9de   : > { %v8784_v23 = vrot.slane %v17572_v63, 5  ;;  %v9053_v37 = vrot.slane %v17572_v63, 1 }
 0x9df   : > { %v8693_v22 = vrot.slane %v17574_v13, 4  ;;  %v8594_v3 = vrot.slane %v17574_v13, 3  ;;  %v8876_v44 = vrot.slane %v17574_v13, 7  ;;  %v8783_v18 = vrot.slane %v17574_v13, 5 }
 0x9e0   : > { %v9052_v1 = vrot.slane %v17574_v13, 1  ;;  %v9057_v31 = vsel %vm935_vm10, %v9053_v37, 0.0 }
 0x9e1   : > { %v8697_v7 = vsel %vm8692_vm9, 0.0, %v8693_v22  ;;  %v8695_v62 = vsel %vm8692_vm9, %v8693_v22, %v8694_v28  ;;  %v8596_v52 = vsel %vm8593_vm13, %v8594_v3, %v8595_v15  ;;  %v8599_v12 = vsel %vm8593_vm13, 0.0, %v8594_v3  ;;  %v9237_v22 = vld [vmem:[%s18570_s1 + $0x450] sm:$0xff] }
 0x9e2   : > { %14699 = vmatprep.mubr.msk.f32.mxu1 %vm8604_vm8, %v8697_v7  ;;  %v8600_v54 = vmul.f32 %v17578_v46, %v8599_v12  ;;  %v8601_v27 = vmul.f32 %v17586_v53, %v8596_v52  ;;  %v8881_v57 = vsel %vm631_vm5, 0.0, %v8876_v44  ;;  %v8788_v49 = vsel %vm8782_vm14, 0.0, %v8783_v18 }
 0x9e3   : > { %14700 = vmatmul.mubr.msk.f32.vlgmr.msra.gmra.mxu1 %vm8604_vm8, %v8695_v62  ;;  %v8882_v45 = vmul.f32 %v17578_v46, %v8881_v57  ;;  %v8878_v43 = vsel %vm631_vm5, %v8876_v44, %v8877_v4  ;;  %v8789_v14 = vmul.f32 %v17590_v24, %v8788_v49  ;;  %v9054_v8 = vsel %vm935_vm10, %v9052_v1, %v9053_v37  ;;  %v9150_v44 = vld [vmem:[%s18570_s1 + $0x440] sm:$0xff]  ;;  %v9149_v4 = vld [vmem:[%s18570_s1 + $0x438] sm:$0xff]  ;;  %v9409_v49 = vld [vmem:[%s18570_s1 + $0x468] sm:$0xff] }
 0x9e4   : > { %14692 = vmatprep.mubr.msk.f32.mxu0 %vm8604_vm8, %v8600_v54  ;;  %14710 = vmatpush3.msra.mxu1 %v8885_v0  ;;  %v8785_v0 = vsel %vm8782_vm14, %v8783_v18, %v8784_v23  ;;  %v8883_v39 = vmul.f32 %v17586_v53, %v8878_v43  ;;  %v9058_v11 = vmul.f32 %v17590_v24, %v9054_v8  ;;  %v9236_v18 = vld [vmem:[%s18570_s1 + $0x448] sm:$0xff]  ;;  %v9146_v12 = vsel %vm8593_vm13, %v8595_v15, 0.0  ;;  %v9323_v54 = vld [vmem:[%s18570_s1 + $0x460] sm:$0xff]  ;;  %v9322_v15 = vld [vmem:[%s18570_s1 + $0x458] sm:$0xff] }
 0x9e5   : > { %14713 = vmatprep.mubr.msk.f32.mxu1 %vm8604_vm8, %v8882_v45  ;;  %14693 = vmatmul.mubr.msk.f32.vlgmr.msra.gmra.mxu0 %vm8604_vm8, %v8601_v27  ;;  %v9147_v7 = vmul.f32 %v17578_v46, %v8596_v52  ;;  %v9148_v52 = vmul.f32 %v17586_v53, %v9146_v12  ;;  %v9320_v27 = vmul.f32 %v17590_v24, %v8785_v0  ;;  %v9319_v57 = vsel %vm8782_vm14, %v8784_v23, 0.0  ;;  %v9412_v1 = vld [vmem:[%s18570_s1 + $0x480] sm:$0xff]  ;;  %v9411_v45 = vld [vmem:[%s18570_s1 + $0x478] sm:$0xff] }
 0x9e6   : > { %14703 = vmatpush3.msra.mxu0 %v8792_v5  ;;  %14711 = vmatprep.subr.mxu1 %v8884_v61  ;;  %v17632_v5 = vsel %vm8244_vm15, 1.0, %v18912_v42  ;;  %v8969_v42 = vld [vmem:[%s18570_s1 + $0x418] sm:$0xff] }
 0x9e7   : > { %14704 = vmatprep.subr.mxu0 %v8791_v38  ;;  %14706 = vmatprep.mubr.msk.f32.mxu0 %vm8604_vm8, %v8789_v14  ;;  %v8790_v59 = vmul.f32 %v17632_v5, %v8785_v0  ;;  %v9059_v3 = vmul.f32 %v17632_v5, %v9057_v31 }
 0x9e8   : > { %14712 = vmatpush3.msra.mxu1 %v8884_v61  ;;  %14705 = vmatpush3.msra.mxu0 %v8791_v38  ;;  %v9410_v61 = vld [vmem:[%s18570_s1 + $0x470] sm:$0xff]  ;;  %v12970_v38 = vld [vmem:[%s18570_s1 + $0x7a2] ss:$0 sm:$0xff] }
 0x9e9   : > { %14714 = vmatmul.mubr.msk.f32.vlgmr.msra.gmra.mxu1 %vm8604_vm8, %v8883_v39  ;;  %14723 = vmatprep.subr.mxu1 %v9061_v60 }
 0x9ea   : > { %14716 = vmatprep.subr.mxu0 %v8970_v56  ;;  %14724 = vmatpush3.msra.mxu1 %v9061_v60 }
 0x9eb   : > { %14727 = vmatprep.mubr.msk.f32.mxu1 %vm8604_vm8, %v9058_v11  ;;  %14707 = vmatmul.mubr.msk.f32.vlgmr.msra.gmra.mxu0 %vm8604_vm8, %v8790_v59 }
 0x9ec   : > { %14717 = vmatpush3.msra.mxu0 %v8970_v56  ;;  %14725 = vmatprep.subr.mxu1 %v9060_v17 }
 0x9ed   : > { %14718 = vmatprep.subr.mxu0 %v8969_v42  ;;  %14720 = vmatprep.mubr.msk.f32.mxu0 %vm8604_vm8, %v17574_v13 }
 0x9ee   : > { %14726 = vmatpush3.msra.mxu1 %v9060_v17  ;;  %14719 = vmatpush3.msra.mxu0 %v8969_v42 }
 0x9ef   : > { %14728 = vmatmul.mubr.msk.f32.vlgmr.msra.gmra.mxu1 %vm8604_vm8, %v9059_v3  ;;  %14737 = vmatprep.subr.mxu1 %v9237_v22 }
 0x9f0   : > { %14730 = vmatprep.subr.mxu0 %v9150_v44  ;;  %14738 = vmatpush3.msra.mxu1 %v9237_v22 }
 0x9f1   : > { %14741 = vmatprep.mubr.msk.f32.mxu1 %vm8604_vm8, %v8695_v62  ;;  %14721 = vmatmul.mubr.msk.f32.vlgmr.msra.gmra.mxu0 %vm8604_vm8, %v17572_v63  ;;  %v9235_v62 = vsel %vm8692_vm9, %v8694_v28, 0.0  ;;  %v9321_v28 = vmul.f32 %v17632_v5, %v9319_v57 }
 0x9f2   : > { %14731 = vmatpush3.msra.mxu0 %v9150_v44  ;;  %14739 = vmatprep.subr.mxu1 %v9236_v18 }
 0x9f3   : > { %14732 = vmatprep.subr.mxu0 %v9149_v4  ;;  %14734 = vmatprep.mubr.msk.f32.mxu0 %vm8604_vm8, %v9147_v7 }
 0x9f4   : > { %14740 = vmatpush3.msra.mxu1 %v9236_v18  ;;  %14733 = vmatpush3.msra.mxu0 %v9149_v4 }
 0x9f5   : > { %14742 = vmatmul.mubr.msk.f32.vlgmr.msra.gmra.mxu1 %vm8604_vm8, %v9235_v62  ;;  %14744 = vmatprep.subr.mxu0 %v9323_v54 }
 0x9f6   : > { %14735 = vmatmul.mubr.msk.f32.vlgmr.msra.gmra.mxu0 %vm8604_vm8, %v9148_v52  ;;  %14751 = vmatprep.subr.mxu1 %v9412_v1 }
 0x9f7   : > { %14745 = vmatpush3.msra.mxu0 %v9323_v54  ;;  %14748 = vmatprep.mubr.msk.f32.mxu0 %vm8604_vm8, %v9320_v27 }
 0x9f8   : > { %14746 = vmatprep.subr.mxu0 %v9322_v15  ;;  %14752 = vmatpush3.msra.mxu1 %v9412_v1 }
 0x9f9   : > { %14747 = vmatpush3.msra.mxu0 %v9322_v15  ;;  %14753 = vmatprep.subr.mxu1 %v9411_v45 }
 0x9fa   : > { %14749 = vmatmul.mubr.msk.f32.vlgmr.msra.gmra.mxu0 %vm8604_vm8, %v9321_v28  ;;  %14754 = vmatpush3.msra.mxu1 %v9411_v45 }
 0x9fb   : > { %14755 = vmatprep.subr.mxu1 %v9410_v61 }
 0x9fc   : > { %14756 = vmatpush3.msra.mxu1 %v9410_v61 }
 0x9fd   : > { %14757 = vmatprep.subr.mxu1 %v9409_v49 }
 0x9fe   : > { %14758 = vmatpush3.msra.mxu1 %v9409_v49 }
 0xaa3   : > { %v14701_v43 = vpop.f32.mrf.mxu1 }
 0xaa5   : > { %v14694_v23 = vpop.f32.mrf.mxu0  ;;  %v8771_v37 = vpop.f32.mrf.mxu1 }
 0xaa6   : > { %v8691_v14 = vadd.f32 %v14694_v23, %v12970_v38 }
 0xaa7   : > { %v8677_v0 = vpop.f32.mrf.mxu0 }
 0xaa8   : > { %v8690_v60 = vadd.f32 %v12970_v38, %v8677_v0  ;;  %v8781_v8 = vadd.f32 %v14701_v43, %v8691_v14 }
 0xaa9   : > { %v14715_v39 = vpop.f32.mrf.mxu1 }
 0xaaa   : > { %v8780_v56 = vadd.f32 %v8771_v37, %v8690_v60  ;;  %v9611_v60 = vld [vmem:[%s18570_s1 + $0x4c0] sm:$0xff] }
 0xaab   : > { %v14708_v59 = vpop.f32.mrf.mxu0  ;;  %v8958_v11 = vpop.f32.mrf.mxu1  ;;  %14773 = vmatprep.subr.mxu1 %v9611_v60 }
 0xaac   : > { %v8875_v17 = vadd.f32 %v14708_v59, %v8781_v8  ;;  %v9515_v8 = vld [vmem:[%s18570_s1 + $0x4a0] sm:$0xff]  ;;  %v9609_v59 = vld [vmem:[%s18570_s1 + $0x4b0] sm:$0xff] }
 0xaad   : > { %v8865_v31 = vpop.f32.mrf.mxu0  ;;  %14762 = vmatprep.subr.mxu0 %v9515_v8 }
 0xaae   : > { %v8874_v42 = vadd.f32 %v8865_v31, %v8780_v56  ;;  %v8968_v22 = vadd.f32 %v14715_v39, %v8875_v17  ;;  %v9610_v39 = vld [vmem:[%s18570_s1 + $0x4b8] sm:$0xff]  ;;  %14763 = vmatpush3.msra.mxu0 %v9515_v8  ;;  %v9608_v17 = vld [vmem:[%s18570_s1 + $0x4a8] sm:$0xff] }
 0xaaf   : > { %v14729_v3 = vpop.f32.mrf.mxu1  ;;  %v9514_v56 = vld [vmem:[%s18570_s1 + $0x498] sm:$0xff]  ;;  %v9512_v31 = vld [vmem:[%s18570_s1 + $0x488] sm:$0xff] }
 0xab0   : > { %v8967_v44 = vadd.f32 %v8958_v11, %v8874_v42  ;;  %v9513_v11 = vld [vmem:[%s18570_s1 + $0x490] sm:$0xff]  ;;  %14764 = vmatprep.subr.mxu0 %v9514_v56  ;;  %v9800_v42 = vld [vmem:[%s18570_s1 + $0x500] sm:$0xff]  ;;  %v9704_v8 = vld [vmem:[%s18570_s1 + $0x4d8] sm:$0xff] }
 0xab1   : > { %v14722_v18 = vpop.f32.mrf.mxu0  ;;  %v9134_v7 = vpop.f32.mrf.mxu1  ;;  %14765 = vmatpush3.msra.mxu0 %v9514_v56  ;;  %v9798_v56 = vld [vmem:[%s18570_s1 + $0x4f0] sm:$0xff] }
 0xab2   : > { %v9051_v4 = vadd.f32 %v14722_v18, %v8968_v22  ;;  %14766 = vmatprep.subr.mxu0 %v9513_v11  ;;  %v9705_v22 = vld [vmem:[%s18570_s1 + $0x4e0] sm:$0xff] }
 0xab3   : > { %v9041_v12 = vpop.f32.mrf.mxu0  ;;  %14767 = vmatpush3.msra.mxu0 %v9513_v11 }
 0xab4   : > { %v9050_v54 = vadd.f32 %v9041_v12, %v8967_v44  ;;  %v9144_v62 = vadd.f32 %v14729_v3, %v9051_v4  ;;  %14768 = vmatprep.subr.mxu0 %v9512_v31  ;;  %v12987_v3 = vld [vmem:[%s18570_s1 + $0x7a3] ss:$0 sm:$0xff] }
 0xab5   : > { %v14743_v52 = vpop.f32.mrf.mxu1  ;;  %14769 = vmatpush3.msra.mxu0 %v9512_v31  ;;  %v9797_v31 = vld [vmem:[%s18570_s1 + $0x4e8] sm:$0xff] }
 0xab6   : > { %v14736_v15 = vpop.f32.mrf.mxu0  ;;  %v9143_v27 = vadd.f32 %v9134_v7, %v9050_v54  ;;  %14784 = vmatprep.subr.mxu0 %v9705_v22 }
 0xab7   : > { %v9233_v57 = vadd.f32 %v14736_v15, %v9144_v62  ;;  %v9307_v61 = vpop.f32.mrf.mxu1 }
 0xab8   : > { %v9223_v28 = vpop.f32.mrf.mxu0 }
 0xab9   : > { %v9232_v1 = vadd.f32 %v9223_v28, %v9143_v27  ;;  %v9317_v45 = vadd.f32 %v14743_v52, %v9233_v57 }
 0xaba   : > { %v14750_v49 = vpop.f32.mrf.mxu0 }
 0xabb   : > { %v9316_v43 = vadd.f32 %v9307_v61, %v9232_v1  ;;  %v9406_v38 = vadd.f32 %v14750_v49, %v9317_v45 }
 0xabc   : > { %v9396_v23 = vpop.f32.mrf.mxu0 }
 0xabd   : > { %v9405_v37 = vadd.f32 %v9396_v23, %v9316_v43  ;;  %v9408_v0 = vmax.f32 %v9406_v38, 0.0  ;;  %v9799_v23 = vld [vmem:[%s18570_s1 + $0x4f8] sm:$0xff] }
 0xabf   : > { %v9407_v14 = vmax.f32 %v9405_v37, 0.0 }
 0xac1   : > { %14759 = vmatprep.mubr.msk.f32.mxu1 %vm1944_vm4, %v9407_v14 }
 0xac2   : > { %14760 = vmatmul.mubr.msk.f32.vlgmr.msra.gmra.mxu1 %vm1944_vm4, %v9408_v0 }
 0xac3   : > { %14774 = vmatpush3.msra.mxu1 %v9611_v60 }
 0xac4   : > { %14775 = vmatprep.subr.mxu1 %v9610_v39 }
 0xac5   : > { %14776 = vmatpush3.msra.mxu1 %v9610_v39 }
 0xac6   : > { %14777 = vmatprep.subr.mxu1 %v9609_v59 }
 0xac7   : > { %14778 = vmatpush3.msra.mxu1 %v9609_v59 }
 0xac8   : > { %14779 = vmatprep.subr.mxu1 %v9608_v17 }
 0xac9   : > { %14780 = vmatpush3.msra.mxu1 %v9608_v17  ;;  %v9703_v17 = vld [vmem:[%s18570_s1 + $0x4d0] sm:$0xff] }
 0xaca   : > { %14795 = vmatprep.subr.mxu1 %v9800_v42 }
 0xb82   : > { %v14761_v44 = vpop.f32.mrf.mxu1 }
 0xb83   : > { %v9496_v18 = vadd.f32 %v14761_v44, %v12987_v3 }
 0xb84   : > { %v9490_v4 = vpop.f32.mrf.mxu1 }
 0xb85   : > { %v17737_v7 = vmax.f32 %v9496_v18, 0.0  ;;  %v9491_v12 = vadd.f32 %v12987_v3, %v9490_v4 }
 0xb87   : > { %v17739_v54 = vmax.f32 %v9491_v12, 0.0  ;;  %v9505_v62 = vrot.slane %v17737_v7, 3  ;;  %v9604_v52 = vrot.slane %v17737_v7, 4  ;;  %v9790_v60 = vrot.slane %v17737_v7, 7  ;;  %v9980_v12 = vld [vmem:[%s18570_s1 + $0x540] sm:$0xff] }
 0xb88   : > { %v9695_v3 = vrot.slane %v17737_v7, 5 }
 0xb89   : > { %v9603_v15 = vrot.slane %v17739_v54, 4  ;;  %v9504_v27 = vrot.slane %v17739_v54, 3  ;;  %v9789_v57 = vrot.slane %v17739_v54, 7  ;;  %v9694_v28 = vrot.slane %v17739_v54, 5 }
 0xb8a   : > { %v9969_v59 = vrot.slane %v17739_v54, 1 }
 0xb8b   : > { %v9607_v1 = vsel %vm8692_vm9, 0.0, %v9603_v15  ;;  %v17751_v45 = vsel %vm8692_vm9, %v9603_v15, %v9604_v52  ;;  %v17756_v61 = vsel %vm8593_vm13, %v9504_v27, %v9505_v62  ;;  %v9509_v49 = vsel %vm8593_vm13, 0.0, %v9504_v27  ;;  %v9887_v27 = vld [vmem:[%s18570_s1 + $0x520] sm:$0xff] }
 0xb8c   : > { %14781 = vmatprep.mubr.msk.f32.mxu1 %vm1944_vm4, %v9607_v1  ;;  %v9510_v43 = vmul.f32 %v17578_v46, %v9509_v49  ;;  %v9511_v38 = vmul.f32 %v17586_v53, %v17756_v61  ;;  %v9794_v37 = vsel %vm631_vm5, 0.0, %v9789_v57  ;;  %v9699_v0 = vsel %vm8782_vm14, 0.0, %v9694_v28  ;;  %v9886_v1 = vld [vmem:[%s18570_s1 + $0x518] sm:$0xff]  ;;  %v9978_v49 = vld [vmem:[%s18570_s1 + $0x530] sm:$0xff] }
 0xb8d   : > { %14782 = vmatmul.mubr.msk.f32.vlgmr.msra.gmra.mxu1 %vm1944_vm4, %v17751_v45  ;;  %v9795_v14 = vmul.f32 %v17578_v46, %v9794_v37  ;;  %v9700_v39 = vmul.f32 %v17590_v24, %v9699_v0  ;;  %v9791_v11 = vsel %vm631_vm5, %v9789_v57, %v9790_v60  ;;  %v17801_v4 = vsel %vm8782_vm14, %v9694_v28, %v9695_v3  ;;  %v9979_v28 = vld [vmem:[%s18570_s1 + $0x538] sm:$0xff]  ;;  %v9884_v37 = vld [vmem:[%s18570_s1 + $0x508] sm:$0xff]  ;;  %v10071_v0 = vld [vmem:[%s18570_s1 + $0x560] sm:$0xff] }
 0xb8e   : > { %14796 = vmatpush3.msra.mxu1 %v9800_v42  ;;  %14770 = vmatprep.mubr.msk.f32.mxu0 %vm1944_vm4, %v9510_v43  ;;  %v9970_v42 = vrot.slane %v17737_v7, 1  ;;  %v9796_v18 = vmul.f32 %v17586_v53, %v9791_v11  ;;  %v9701_v57 = vmul.f32 %v17632_v5, %v17801_v4  ;;  %v10159_v60 = vld [vmem:[%s18570_s1 + $0x578] sm:$0xff]  ;;  %v10065_v11 = vsel %vm8593_vm13, %v9505_v62, 0.0 }
 0xb8f   : > { %14797 = vmatprep.subr.mxu1 %v9799_v23  ;;  %14803 = vmatprep.mubr.msk.f32.mxu1 %vm1944_vm4, %v9795_v14  ;;  %v10243_v62 = vmul.f32 %v17590_v24, %v17801_v4  ;;  %v10391_v4 = vld [vmem:[%s18570_s1 + $0x5b0] sm:$0xff] }
 0xb90   : > { %14771 = vmatmul.mubr.msk.f32.vlgmr.msra.gmra.mxu0 %vm1944_vm4, %v9511_v38  ;;  %14798 = vmatpush3.msra.mxu1 %v9799_v23  ;;  %v9971_v44 = vsel %vm935_vm10, %v9969_v59, %v9970_v42  ;;  %v9974_v43 = vsel %vm935_vm10, %v9970_v42, 0.0  ;;  %v9885_v38 = vld [vmem:[%s18570_s1 + $0x510] sm:$0xff]  ;;  %v9977_v23 = vld [vmem:[%s18570_s1 + $0x528] sm:$0xff]  ;;  %v10067_v42 = vmul.f32 %v17586_v53, %v10065_v11 }
 0xb91   : > { %14785 = vmatpush3.msra.mxu0 %v9705_v22  ;;  %14792 = vmatprep.mubr.msk.f32.mxu0 %vm1944_vm4, %v9700_v39  ;;  %v9702_v22 = vld [vmem:[%s18570_s1 + $0x4c8] sm:$0xff]  ;;  %v9975_v15 = vmul.f32 %v17590_v24, %v9971_v44  ;;  %v9976_v14 = vmul.f32 %v17632_v5, %v9974_v43  ;;  %v10070_v39 = vld [vmem:[%s18570_s1 + $0x558] sm:$0xff] }
 0xb92   : > { %14786 = vmatprep.subr.mxu0 %v9704_v8  ;;  %14799 = vmatprep.subr.mxu1 %v9798_v56  ;;  %v10068_v59 = vld [vmem:[%s18570_s1 + $0x548] sm:$0xff] }
 0xb93   : > { %14787 = vmatpush3.msra.mxu0 %v9704_v8  ;;  %14800 = vmatpush3.msra.mxu1 %v9798_v56  ;;  %v10066_v8 = vmul.f32 %v17578_v46, %v17756_v61  ;;  %v10158_v56 = vld [vmem:[%s18570_s1 + $0x570] sm:$0xff]  ;;  %v10157_v61 = vld [vmem:[%s18570_s1 + $0x568] sm:$0xff] }
 0xb94   : > { %14788 = vmatprep.subr.mxu0 %v9703_v17  ;;  %14801 = vmatprep.subr.mxu1 %v9797_v31  ;;  %v10245_v44 = vld [vmem:[%s18570_s1 + $0x588] sm:$0xff] }
 0xb95   : > { %14789 = vmatpush3.msra.mxu0 %v9703_v17  ;;  %14802 = vmatpush3.msra.mxu1 %v9797_v31  ;;  %v10156_v17 = vsel %vm8692_vm9, %v9604_v52, 0.0  ;;  %v10248_v31 = vld [vmem:[%s18570_s1 + $0x5a0] sm:$0xff]  ;;  %v10246_v52 = vld [vmem:[%s18570_s1 + $0x590] sm:$0xff] }
 0xb96   : > { %14790 = vmatprep.subr.mxu0 %v9702_v22  ;;  %14804 = vmatmul.mubr.msk.f32.vlgmr.msra.gmra.mxu1 %vm1944_vm4, %v9796_v18  ;;  %v10242_v18 = vsel %vm8782_vm14, %v9695_v3, 0.0  ;;  %v12992_v3 = vld [vmem:[%s18570_s1 + $0x7a4] ss:$0 sm:$0xff] }
 0xb97   : > { %14817 = vmatprep.subr.mxu1 %v9980_v12  ;;  %14791 = vmatpush3.msra.mxu0 %v9702_v22  ;;  %v10247_v22 = vld [vmem:[%s18570_s1 + $0x598] sm:$0xff] }
 0xb98   : > { %14818 = vmatpush3.msra.mxu1 %v9980_v12  ;;  %14825 = vmatprep.mubr.msk.f32.mxu1 %vm1944_vm4, %v9975_v15  ;;  %v10244_v12 = vmul.f32 %v17632_v5, %v10242_v18  ;;  %v10390_v15 = vld [vmem:[%s18570_s1 + $0x5a8] sm:$0xff] }
 0xb99   : > { %14793 = vmatmul.mubr.msk.f32.vlgmr.msra.gmra.mxu0 %vm1944_vm4, %v9701_v57  ;;  %14806 = vmatprep.subr.mxu0 %v9887_v27 }
 0xb9a   : > { %14819 = vmatprep.subr.mxu1 %v9979_v28  ;;  %14807 = vmatpush3.msra.mxu0 %v9887_v27 }
 0xb9b   : > { %14814 = vmatprep.mubr.msk.f32.mxu0 %vm1944_vm4, %v17739_v54  ;;  %14820 = vmatpush3.msra.mxu1 %v9979_v28  ;;  %v10160_v54 = vld [vmem:[%s18570_s1 + $0x580] sm:$0xff] }
 0xb9c   : > { %14808 = vmatprep.subr.mxu0 %v9886_v1  ;;  %14821 = vmatprep.subr.mxu1 %v9978_v49 }
 0xb9d   : > { %14809 = vmatpush3.msra.mxu0 %v9886_v1  ;;  %14822 = vmatpush3.msra.mxu1 %v9978_v49 }
 0xb9e   : > { %14810 = vmatprep.subr.mxu0 %v9885_v38  ;;  %14823 = vmatprep.subr.mxu1 %v9977_v23 }
 0xb9f   : > { %14811 = vmatpush3.msra.mxu0 %v9885_v38  ;;  %14824 = vmatpush3.msra.mxu1 %v9977_v23 }
 0xba0   : > { %14812 = vmatprep.subr.mxu0 %v9884_v37  ;;  %14826 = vmatmul.mubr.msk.f32.vlgmr.msra.gmra.mxu1 %vm1944_vm4, %v9976_v14 }
 0xba1   : > { %14839 = vmatprep.subr.mxu1 %v10160_v54  ;;  %14813 = vmatpush3.msra.mxu0 %v9884_v37 }
 0xba2   : > { %14840 = vmatpush3.msra.mxu1 %v10160_v54  ;;  %14847 = vmatprep.mubr.msk.f32.mxu1 %vm1944_vm4, %v17751_v45  ;;  %v10069_v45 = vld [vmem:[%s18570_s1 + $0x550] sm:$0xff] }
 0xba3   : > { %14815 = vmatmul.mubr.msk.f32.vlgmr.msra.gmra.mxu0 %vm1944_vm4, %v17737_v7  ;;  %14828 = vmatprep.subr.mxu0 %v10071_v0 }
 0xba4   : > { %14841 = vmatprep.subr.mxu1 %v10159_v60  ;;  %14829 = vmatpush3.msra.mxu0 %v10071_v0 }
 0xba5   : > { %14836 = vmatprep.mubr.msk.f32.mxu0 %vm1944_vm4, %v10066_v8  ;;  %14842 = vmatpush3.msra.mxu1 %v10159_v60 }
 0xba6   : > { %14830 = vmatprep.subr.mxu0 %v10070_v39  ;;  %14843 = vmatprep.subr.mxu1 %v10158_v56 }
 0xba7   : > { %14831 = vmatpush3.msra.mxu0 %v10070_v39  ;;  %14844 = vmatpush3.msra.mxu1 %v10158_v56 }
 0xba8   : > { %14832 = vmatprep.subr.mxu0 %v10069_v45  ;;  %14845 = vmatprep.subr.mxu1 %v10157_v61 }
 0xba9   : > { %14833 = vmatpush3.msra.mxu0 %v10069_v45  ;;  %14846 = vmatpush3.msra.mxu1 %v10157_v61 }
 0xbaa   : > { %14834 = vmatprep.subr.mxu0 %v10068_v59  ;;  %14848 = vmatmul.mubr.msk.f32.vlgmr.msra.gmra.mxu1 %vm1944_vm4, %v10156_v17 }
 0xbab   : > { %14835 = vmatpush3.msra.mxu0 %v10068_v59 }
 0xbac   : > { %14837 = vmatmul.mubr.msk.f32.vlgmr.msra.gmra.mxu0 %vm1944_vm4, %v10067_v42  ;;  %14850 = vmatprep.subr.mxu0 %v10248_v31 }
 0xbad   : > { %14851 = vmatpush3.msra.mxu0 %v10248_v31  ;;  %14858 = vmatprep.mubr.msk.f32.mxu0 %vm1944_vm4, %v10243_v62 }
 0xbae   : > { %14852 = vmatprep.subr.mxu0 %v10247_v22 }
 0xbaf   : > { %14853 = vmatpush3.msra.mxu0 %v10247_v22 }
 0xbb0   : > { %14854 = vmatprep.subr.mxu0 %v10246_v52 }
 0xbb1   : > { %14855 = vmatpush3.msra.mxu0 %v10246_v52 }
 0xbb2   : > { %14856 = vmatprep.subr.mxu0 %v10245_v44 }
 0xbb3   : > { %14857 = vmatpush3.msra.mxu0 %v10245_v44 }
 0xbb4   : > { %14859 = vmatmul.mubr.msk.f32.vlgmr.msra.gmra.mxu0 %vm1944_vm4, %v10244_v12  ;;  %14868 = vmatprep.subr.mxu0 %v10391_v4 }
 0xbb5   : > { %14869 = vmatpush3.msra.mxu0 %v10391_v4  ;;  %14872 = vmatprep.mubr.msk.f32.mxu0 %vm8604_vm8, %v17574_v13 }
 0xbb6   : > { %14870 = vmatprep.subr.mxu0 %v10390_v15 }
 0xbb7   : > { %14871 = vmatpush3.msra.mxu0 %v10390_v15 }
 0xbb8   : > { %14873 = vmatmul.mubr.msk.f32.vlgmr.msra.gmra.mxu0 %vm8604_vm8, %v17572_v63 }
 0xc4d   : > { %v14783_v28 = vpop.f32.mrf.mxu1 }
 0xc4f   : > { %v9683_v38 = vpop.f32.mrf.mxu1 }
 0xc50   : > { %v14772_v7 = vpop.f32.mrf.mxu0 }
 0xc51   : > { %v9602_v57 = vadd.f32 %v14772_v7, %v12992_v3 }
 0xc52   : > { %v9588_v27 = vpop.f32.mrf.mxu0 }
 0xc53   : > { %v9601_v49 = vadd.f32 %v12992_v3, %v9588_v27  ;;  %v9693_v43 = vadd.f32 %v14783_v28, %v9602_v57  ;;  %v10393_v28 = vld [vmem:[%s18570_s1 + $0x5c0] sm:$0xff] }
 0xc54   : > { %14861 = vmatprep.subr.mxu1 %v10393_v28 }
 0xc55   : > { %v9692_v14 = vadd.f32 %v9683_v38, %v9601_v49  ;;  %14862 = vmatpush3.msra.mxu1 %v10393_v28  ;;  %v18988_v28 = vld [vmem:[#allocation31_spill] sm:$0xff] }
 0xc56   : > { %v14805_v54 = vpop.f32.mrf.mxu1 }
 0xc58   : > { %v9873_v39 = vpop.f32.mrf.mxu1 }
 0xc59   : > { %v14794_v1 = vpop.f32.mrf.mxu0 }
 0xc5a   : > { %v9788_v37 = vadd.f32 %v14794_v1, %v9693_v43 }
 0xc5b   : > { %v9778_v23 = vpop.f32.mrf.mxu0 }
 0xc5c   : > { %v9787_v60 = vadd.f32 %v9778_v23, %v9692_v14  ;;  %v9883_v8 = vadd.f32 %v14805_v54, %v9788_v37 }
 0xc5e   : > { %v9882_v61 = vadd.f32 %v9873_v39, %v9787_v60 }
 0xc60   : > { %v14827_v59 = vpop.f32.mrf.mxu1 }
 0xc62   : > { %v10053_v42 = vpop.f32.mrf.mxu1 }
 0xc63   : > { %v14816_v0 = vpop.f32.mrf.mxu0 }
 0xc64   : > { %v9968_v45 = vadd.f32 %v14816_v0, %v9883_v8 }
 0xc65   : > { %v9958_v56 = vpop.f32.mrf.mxu0 }
 0xc66   : > { %v9967_v11 = vadd.f32 %v9958_v56, %v9882_v61  ;;  %v10063_v31 = vadd.f32 %v14827_v59, %v9968_v45 }
 0xc68   : > { %v10062_v52 = vadd.f32 %v10053_v42, %v9967_v11 }
 0xc6a   : > { %v14849_v44 = vpop.f32.mrf.mxu1 }
 0xc6c   : > { %v14838_v17 = vpop.f32.mrf.mxu0  ;;  %v10230_v12 = vpop.f32.mrf.mxu1 }
 0xc6d   : > { %v10154_v22 = vadd.f32 %v14838_v17, %v10063_v31 }
 0xc6e   : > { %v10144_v62 = vpop.f32.mrf.mxu0 }
 0xc6f   : > { %v10153_v18 = vadd.f32 %v10144_v62, %v10062_v52  ;;  %v10240_v4 = vadd.f32 %v14849_v44, %v10154_v22  ;;  %v10392_v52 = vld [vmem:[%s18570_s1 + $0x5b8] sm:$0xff] }
 0xc70   : > { %14863 = vmatprep.subr.mxu1 %v10392_v52 }
 0xc71   : > { %v10239_v3 = vadd.f32 %v10230_v12, %v10153_v18  ;;  %14864 = vmatpush3.msra.mxu1 %v10392_v52 }
 0xc74   : > { %v14860_v15 = vpop.f32.mrf.mxu0 }
 0xc75   : > { %v10331_v7 = vadd.f32 %v14860_v15, %v10240_v4 }
 0xc76   : > { %v10321_v27 = vpop.f32.mrf.mxu0 }
 0xc77   : > { %v10330_v57 = vadd.f32 %v10321_v27, %v10239_v3  ;;  %10356 = vrot.lane.b32.xlu1 %v10331_v7, %s15208_s15  ;;  %v10333_v1 = vadd.f32 2.0, %v10331_v7 }
 0xc79   : > { %10354 = vrot.lane.b32.xlu0 %v10330_v57, %s15208_s15  ;;  %v10332_v49 = vadd.f32 2.0, %v10330_v57  ;;  %v10337_v43 = vand.u32 2147483647, %v10333_v1  ;;  %v10335_v59 = vmin.f32 %v10333_v1, 0.0  ;;  %v18987_v57 = vld [vmem:[#allocation30_spill] sm:$0xff]  ;;  %v18990_v1 = vld [vmem:[#allocation33_spill] sm:$0xff] }
 0xc7b   : > { %v10336_v38 = vand.u32 2147483647, %v10332_v49  ;;  %v10339_v23 = vsub.f32 0.0, %v10337_v43  ;;  %v10334_v31 = vmin.f32 %v10332_v49, 0.0  ;;  %v18992_v49 = vld [vmem:[#allocation35_spill] sm:$0xff]  ;;  %v18993_v43 = vld [vmem:[#allocation36_spill] sm:$0xff] }
 0xc7d   : > { %v10338_v37 = vsub.f32 0.0, %v10336_v38  ;;  %v10342_v14 = vmul.f32 1.442695, %v10339_v23  ;;  %v18994_v38 = vld [vmem:[#allocation37_spill] sm:$0xff]  ;;  %v17946_v23 = vadd.f32 2.0, %v17502_v2 }
 0xc7f   : > { %v10340_v54 = vmul.f32 1.442695, %v10338_v37  ;;  %15109 = vpow2.f32 %v10342_v14  ;;  %v17949_v37 = vadd.f32 2.0, %v17504_v55 }
 0xc81   : > { %15111 = vpow2.f32 %v10340_v54  ;;  %v6665_v54 = vand.u32 2147483647, %v17946_v23 }
 0xc8c   : > { %v15110_v0 = vpop.eup %15109 }
 0xc8d   : > { %v10345_v8 = vadd.f32 1.0, %v15110_v0  ;;  %v17953_v0 = vadd.f32 2.0, %v17506_v32 }
 0xc8e   : > { %v15112_v60 = vpop.eup %15111 }
 0xc8f   : > { %v10344_v39 = vadd.f32 1.0, %v15112_v60  ;;  %15113 = vlog2.f32 %v10345_v8  ;;  %v6664_v8 = vand.u32 2147483647, %v17949_v37 }
 0xc91   : > { %15115 = vlog2.f32 %v10344_v39  ;;  %v17958_v39 = vadd.f32 2.0, %v17508_v41 }
 0xc93   : > { %v6666_v52 = vand.u32 2147483647, %v17958_v39 }
 0xc9c   : > { %v15114_v56 = vpop.eup %15113 }
 0xc9d   : > { %v10349_v61 = vmul.f32 0.6931472, %v15114_v56 }
 0xc9e   : > { %v15116_v45 = vpop.eup %15115 }
 0xc9f   : > { %v10347_v11 = vmul.f32 0.6931472, %v15116_v45  ;;  %v17916_v17 = vsub.f32 %v10335_v59, %v10349_v61  ;;  %v6673_v61 = vsub.f32 0.0, %v6665_v54  ;;  %v6667_v59 = vand.u32 2147483647, %v17953_v0 }
 0xca1   : > { %v17918_v42 = vsub.f32 %v10334_v31, %v10347_v11  ;;  %v10364_v62 = vmul.f32 1.442695, %v17916_v17  ;;  %v17964_v31 = vadd.f32 2.0, %v17510_v58 }
 0xca3   : > { %v10362_v22 = vmul.f32 1.442695, %v17918_v42  ;;  %15117 = vpow2.f32 %v10364_v62 }
 0xca5   : > { %15119 = vpow2.f32 %v10362_v22  ;;  %v6672_v22 = vsub.f32 0.0, %v6664_v8 }
 0xcb0   : > { %v15118_v4 = vpop.eup %15117 }
 0xcb2   : > { %v15120_v3 = vpop.eup %15119 }
 0xce9   : > { %v10357_v44 = vpop.permute.xlu1 %10356 }
 0xcea   : > { %v10361_v18 = vadd.f32 %v10357_v44, %v17572_v63  ;;  %v18989_v63 = vld [vmem:[#allocation32_spill] sm:$0xff]  ;;  %v17969_v44 = vadd.f32 2.0, %v17512_v40 }
 0xceb   : > { %v10355_v12 = vpop.permute.xlu0 %10354 }
 0xcec   : > { %v10367_v15 = vmul.f32 %v15118_v4, %v10361_v18  ;;  %v10360_v7 = vadd.f32 %v10355_v12, %v17574_v13  ;;  %v18991_v13 = vld [vmem:[#allocation34_spill] sm:$0xff]  ;;  %v6682_v4 = vmul.f32 1.442695, %v6673_v61  ;;  %v6675_v12 = vsub.f32 0.0, %v6667_v59 }
 0xcee   : > { %v10366_v27 = vmul.f32 %v15120_v3, %v10360_v7  ;;  %10398 = vrot.lane.b32.xlu1 %v10367_v15, %s15209_s20  ;;  %v6669_v7 = vand.u32 2147483647, %v17964_v31  ;;  %v17973_v3 = vadd.f32 2.0, %v17517_v34  ;;  %15121 = vpow2.f32 %v6682_v4 }
 0xcf0   : > { %10396 = vrot.lane.b32.xlu0 %v10366_v27, %s15209_s20 }
 0xcf2   : > { %3560 = vrot.lane.b32.xlu1 %v18987_v57, %s15205_s22  ;;  %v6680_v57 = vmul.f32 1.442695, %v6672_v22 }
 0xcf4   : > { %3558 = vrot.lane.b32.xlu0 %v18988_v28, %s15205_s22  ;;  %v6674_v28 = vsub.f32 0.0, %v6666_v52  ;;  %15123 = vpow2.f32 %v6680_v57 }
 0xcf6   : > { %3564 = vrot.lane.b32.xlu1 %v18989_v63, %s15205_s22  ;;  %v6668_v63 = vand.u32 2147483647, %v17969_v44  ;;  %v6684_v8 = vmul.f32 1.442695, %v6674_v28 }
 0xcf8   : > { %3562 = vrot.lane.b32.xlu0 %v18990_v1, %s15205_s22  ;;  %v17978_v1 = vadd.f32 2.0, %v17519_v16 }
 0xcfa   : > { %3568 = vrot.lane.b32.xlu1 %v18991_v13, %s15205_s22  ;;  %v6686_v13 = vmul.f32 1.442695, %v6675_v12 }
 0xcfc   : > { %3566 = vrot.lane.b32.xlu0 %v18992_v49, %s15205_s22  ;;  %15125 = vpow2.f32 %v6686_v13 }
 0xcfd   : > { %15127 = vpow2.f32 %v6684_v8 }
 0xcfe   : > { %3572 = vrot.lane.b32.xlu1 %v18993_v43, %s15205_s22 }
 0xd00   : > { %3570 = vrot.lane.b32.xlu0 %v18994_v38, %s15205_s22  ;;  %v6677_v38 = vsub.f32 0.0, %v6669_v7 }
 0xd02   : > { %v6690_v59 = vmul.f32 1.442695, %v6677_v38 }
 0xd04   : > { %15129 = vpow2.f32 %v6690_v59 }
 0xd60   : > { %v10399_v14 = vpop.permute.xlu1 %10398 }
 0xd62   : > { %v10397_v60 = vpop.permute.xlu0 %10396 }
 0xd63   : > { %14865 = vmatprep.mubr.msk.f32.mxu1 %vm8604_vm8, %v10397_v60 }
 0xd64   : > { %v3561_v56 = vpop.permute.xlu1 %3560  ;;  %14866 = vmatmul.mubr.msk.f32.vlgmr.msra.gmra.mxu1 %vm8604_vm8, %v10399_v14  ;;  %v6671_v14 = vand.u32 2147483647, %v17973_v3 }
 0xd65   : > { %v3585_v45 = vsel %vm367_vm0, %v3561_v56, 0.0  ;;  %v6676_v56 = vsub.f32 0.0, %v6668_v63 }
 0xd66   : > { %3586 = vadd.xlane.f32.xlu1 %v3585_v45  ;;  %v3559_v11 = vpop.permute.xlu0 %3558  ;;  %v6670_v45 = vand.u32 2147483647, %v17978_v1 }
 0xd67   : > { %v3582_v62 = vsel %vm367_vm0, %v3559_v11, 0.0  ;;  %v6679_v11 = vsub.f32 0.0, %v6671_v14  ;;  %v6688_v52 = vmul.f32 1.442695, %v6676_v56 }
 0xd68   : > { %v3565_v18 = vpop.permute.xlu1 %3564  ;;  %3583 = vadd.xlane.f32.xlu0 %v3582_v62 }
 0xd69   : > { %v3591_v54 = vsel %vm367_vm0, %v3565_v18, 0.0  ;;  %v6678_v18 = vsub.f32 0.0, %v6670_v45  ;;  %v6694_v12 = vmul.f32 1.442695, %v6679_v11  ;;  %15131 = vpow2.f32 %v6688_v52 }
 0xd6a   : > { %v3563_v15 = vpop.permute.xlu0 %3562 }
 0xd6b   : > { %v3588_v27 = vsel %vm367_vm0, %v3563_v15, 0.0  ;;  %v6692_v7 = vmul.f32 1.442695, %v6678_v18  ;;  %15133 = vpow2.f32 %v6694_v12  ;;  %v6657_v18 = vmin.f32 %v17946_v23, 0.0 }
 0xd6c   : > { %3589 = vadd.xlane.f32.xlu0 %v3588_v27  ;;  %v3569_v49 = vpop.permute.xlu1 %3568  ;;  %v15122_v27 = vpop.eup %15121 }
 0xd6d   : > { %v3597_v62 = vsel %vm367_vm0, %v3569_v49, 0.0  ;;  %15135 = vpow2.f32 %v6692_v7  ;;  %v15124_v57 = vpop.eup %15123  ;;  %v6697_v63 = vadd.f32 1.0, %v15122_v27  ;;  %v6659_v7 = vmin.f32 %v17953_v0, 0.0 }
 0xd6e   : > { %v3567_v43 = vpop.permute.xlu0 %3566  ;;  %v15126_v28 = vpop.eup %15125  ;;  %v6696_v13 = vadd.f32 1.0, %v15124_v57  ;;  %v6660_v0 = vmin.f32 %v17969_v44, 0.0 }
 0xd6f   : > { %v3594_v60 = vsel %vm367_vm0, %v3567_v43, 0.0  ;;  %v15128_v49 = vpop.eup %15127  ;;  %v6699_v43 = vadd.f32 1.0, %v15126_v28  ;;  %15137 = vlog2.f32 %v6697_v63  ;;  %v6661_v63 = vmin.f32 %v17964_v31, 0.0 }
 0xd70   : > { %3592 = vadd.xlane.f32.xlu0 %v3591_v54  ;;  %3595 = vadd.xlane.f32.xlu1 %v3594_v60  ;;  %v3573_v4 = vpop.permute.xlu1 %3572  ;;  %v15130_v38 = vpop.eup %15129  ;;  %v6698_v14 = vadd.f32 1.0, %v15128_v49  ;;  %15139 = vlog2.f32 %v6696_v13  ;;  %v6662_v31 = vmin.f32 %v17978_v1, 0.0  ;;  %v10573_v1 = vld [vmem:[%s18570_s1 + $0x5d0] sm:$0xff] }
 0xd71   : > { %v3603_v15 = vsel %vm367_vm0, %v3573_v4, 0.0  ;;  %v6701_v60 = vadd.f32 1.0, %v15130_v38  ;;  %15141 = vlog2.f32 %v6699_v43  ;;  %v6663_v38 = vmin.f32 %v17973_v3, 0.0  ;;  %v10667_v3 = vld [vmem:[%s18570_s1 + $0x5e0] sm:$0xff]  ;;  %14875 = vmatprep.subr.mxu1 %v10573_v1 }
 0xd72   : > { %v3571_v61 = vpop.permute.xlu0 %3570  ;;  %15143 = vlog2.f32 %v6698_v14  ;;  %14882 = vmatprep.subr.mxu0 %v10667_v3  ;;  %14876 = vmatpush3.msra.mxu1 %v10573_v1 }
 0xd73   : > { %v3600_v22 = vsel %vm367_vm0, %v3571_v61, 0.0  ;;  %15145 = vlog2.f32 %v6701_v60  ;;  %14883 = vmatpush3.msra.mxu0 %v10667_v3  ;;  %v10572_v60 = vld [vmem:[%s18570_s1 + $0x5c8] sm:$0xff] }
 0xd74   : > { %3598 = vadd.xlane.f32.xlu0 %v3597_v62  ;;  %3601 = vadd.xlane.f32.xlu1 %v3600_v22 }
 0xd75   : > { %14877 = vmatprep.subr.mxu1 %v10572_v60 }
 0xd76   : > { %v15132_v54 = vpop.eup %15131  ;;  %14878 = vmatpush3.msra.mxu1 %v10572_v60 }
 0xd77   : > { %v6700_v56 = vadd.f32 1.0, %v15132_v54  ;;  %v10666_v54 = vld [vmem:[%s18570_s1 + $0x5d8] sm:$0xff] }
 0xd78   : > { %3604 = vadd.xlane.f32.xlu0 %v3603_v15  ;;  %v15134_v8 = vpop.eup %15133  ;;  %14884 = vmatprep.subr.mxu0 %v10666_v54 }
 0xd79   : > { %v6703_v61 = vadd.f32 1.0, %v15134_v8  ;;  %15147 = vlog2.f32 %v6700_v56  ;;  %14885 = vmatpush3.msra.mxu0 %v10666_v54  ;;  %v18064_v8 = vld [vmem:[%s18570_s1 + $0x600] sm:$0xff]  ;;  %v18069_v56 = vld [vmem:[%s18570_s1 + $0x5f0] sm:$0xff] }
 0xd7a   : > { %v15136_v45 = vpop.eup %15135  ;;  %14896 = vmatprep.subr.mxu0 %v18064_v8  ;;  %14889 = vmatprep.subr.mxu1 %v18069_v56 }
 0xd7b   : > { %v6702_v59 = vadd.f32 1.0, %v15136_v45  ;;  %15149 = vlog2.f32 %v6703_v61  ;;  %v18081_v45 = vadd.f32 %v17565_v6, %v17533_v33 }
 0xd7d   : > { %15151 = vlog2.f32 %v6702_v59 }
 0xd85   : > { %6736 = vrot.lane.b32.xlu1 %v17504_v55, %s15207_s8  ;;  %v15138_v55 = vpop.eup %15137 }
 0xd86   : > { %v15140_v11 = vpop.eup %15139 }
 0xd87   : > { %v15142_v62 = vpop.eup %15141  ;;  %v6705_v22 = vmul.f32 0.6931472, %v15140_v11 }
 0xd88   : > { %v15144_v52 = vpop.eup %15143 }
 0xd89   : > { %6740 = vrot.lane.b32.xlu1 %v17508_v41, %s15207_s8  ;;  %v6707_v41 = vmul.f32 0.6931472, %v15138_v55  ;;  %v15146_v4 = vpop.eup %15145 }
 0xd8a   : > { %v15148_v15 = vpop.eup %15147 }
 0xd8b   : > { %v6713_v57 = vmul.f32 0.6931472, %v15148_v15 }
 0xd8d   : > { %6742 = vrot.lane.b32.xlu1 %v17506_v32, %s15207_s8  ;;  %v18005_v32 = vsub.f32 %v6657_v18, %v6707_v41  ;;  %v18027_v49 = vsub.f32 %v6660_v0, %v6713_v57 }
 0xd8e   : > { %6738 = vrot.lane.b32.xlu0 %v17502_v2, %s15207_s8  ;;  %v6656_v2 = vmin.f32 %v17949_v37, 0.0  ;;  %v15150_v37 = vpop.eup %15149 }
 0xd8f   : > { %v15152_v28 = vpop.eup %15151  ;;  %v6719_v13 = vmul.f32 0.6931472, %v15150_v37 }
 0xd90   : > { %v18007_v12 = vsub.f32 %v6656_v2, %v6705_v22  ;;  %v6717_v43 = vmul.f32 0.6931472, %v15152_v28 }
 0xd91   : > { %6746 = vrot.lane.b32.xlu1 %v17510_v58, %s15207_s8  ;;  %v6711_v58 = vmul.f32 0.6931472, %v15142_v62  ;;  %v18035_v44 = vsub.f32 %v6663_v38, %v6719_v13 }
 0xd92   : > { %6744 = vrot.lane.b32.xlu0 %v17512_v40, %s15207_s8  ;;  %v6709_v40 = vmul.f32 0.6931472, %v15144_v52  ;;  %v18037_v14 = vsub.f32 %v6662_v31, %v6717_v43  ;;  %v6770_v43 = vmul.f32 1.442695, %v18005_v32  ;;  %v6768_v3 = vmul.f32 1.442695, %v18007_v12 }
 0xd93   : > { %v18015_v23 = vsub.f32 %v6659_v7, %v6711_v58 }
 0xd94   : > { %15153 = vpow2.f32 %v6770_v43 }
 0xd95   : > { %6750 = vrot.lane.b32.xlu1 %v17517_v34, %s15207_s8  ;;  %v6658_v34 = vmin.f32 %v17958_v39, 0.0  ;;  %15155 = vpow2.f32 %v6768_v3 }
 0xd96   : > { %6748 = vrot.lane.b32.xlu0 %v17519_v16, %s15207_s8  ;;  %v6715_v16 = vmul.f32 0.6931472, %v15146_v4 }
 0xd97   : > { %v18017_v27 = vsub.f32 %v6658_v34, %v6709_v40 }
 0xd98   : > { %v18025_v39 = vsub.f32 %v6661_v63, %v6715_v16 }
 0xd99   : > { %6802 = vrot.lane.b32.xlu1 %v18005_v32, %s15205_s22  ;;  %v6772_v60 = vmul.f32 1.442695, %v18017_v27 }
 0xd9a   : > { %6800 = vrot.lane.b32.xlu0 %v18007_v12, %s15205_s22  ;;  %v6778_v12 = vmul.f32 1.442695, %v18025_v39 }
 0xd9b   : > { %15157 = vpow2.f32 %v6772_v60 }
 0xd9d   : > { %6806 = vrot.lane.b32.xlu1 %v18015_v23, %s15205_s22 }
 0xd9e   : > { %6804 = vrot.lane.b32.xlu0 %v18017_v27, %s15205_s22  ;;  %v7952_v27 = vmul.f32 -2.0, %v17525_v19 }
 0xda1   : > { %6810 = vrot.lane.b32.xlu1 %v18025_v39, %s15205_s22  ;;  %v7963_v39 = vmul.f32 1.442695, %v7952_v27 }
 0xda2   : > { %6808 = vrot.lane.b32.xlu0 %v18027_v49, %s15205_s22 }
 0xda5   : > { %6814 = vrot.lane.b32.xlu1 %v18035_v44, %s15205_s22 }
 0xda6   : > { %6812 = vrot.lane.b32.xlu0 %v18037_v14, %s15205_s22 }
 0xda9   : > { %7901 = vrot.lane.b32.xlu1 %v17523_v29, %s15207_s8 }
 0xdad   : > { %7903 = vrot.lane.b32.xlu1 %v17521_v47, %s15207_s8 }
 0xdb1   : > { %7905 = vrot.lane.b32.xlu1 %v17527_v9, %s15207_s8 }
 0xdb5   : > { %7907 = vrot.lane.b32.xlu1 %v17525_v19, %s15207_s8 }
 0xdb9   : > { %7909 = vrot.lane.b32.xlu1 %v17531_v36, %s15207_s8 }
 0xdbd   : > { %7911 = vrot.lane.b32.xlu1 %v17529_v50, %s15207_s8 }
 0xdc1   : > { %7913 = vrot.lane.b32.xlu1 %v18081_v45, %s15207_s8 }
 0xdc5   : > { %7915 = vrot.lane.b32.xlu1 %v17535_v48, %s15207_s8 }
 0xdef   : > { %v3587_v61 = vpop.xlane.xlu1 %3586 }
 0xdf1   : > { %v3584_v59 = vpop.xlane.xlu0 %3583 }
 0xdf2   : > { %v3606_v55 = vadd.f32 %v3587_v61, %v3584_v59  ;;  %v7950_v61 = vmul.f32 -2.0, %v17521_v47 }
 0xdf5   : > { %v3590_v11 = vpop.xlane.xlu0 %3589 }
 0xdf6   : > { %v3607_v41 = vadd.f32 %v3606_v55, %v3590_v11  ;;  %v6774_v55 = vmul.f32 1.442695, %v18015_v23  ;;  %v7949_v11 = vmul.f32 -2.0, %v17523_v29  ;;  %v6780_v23 = vmul.f32 1.442695, %v18037_v14 }
 0xdf8   : > { %15159 = vpow2.f32 %v6774_v55 }
 0xdf9   : > { %v3596_v62 = vpop.xlane.xlu1 %3595  ;;  %v3593_v22 = vpop.xlane.xlu0 %3592  ;;  %15161 = vpow2.f32 %v6778_v12 }
 0xdfa   : > { %v3608_v52 = vadd.f32 %v3607_v41, %v3593_v22  ;;  %v7959_v22 = vmul.f32 1.442695, %v7950_v61 }
 0xdfc   : > { %v3609_v18 = vadd.f32 %v3608_v52, %v3596_v62  ;;  %v6776_v62 = vmul.f32 1.442695, %v18027_v49 }
 0xdfd   : > { %v3602_v2 = vpop.xlane.xlu1 %3601  ;;  %v3599_v58 = vpop.xlane.xlu0 %3598 }
 0xdfe   : > { %v3610_v4 = vadd.f32 %v3609_v18, %v3599_v58  ;;  %v7951_v18 = vmul.f32 -2.0, %v17527_v9  ;;  %v7957_v58 = vmul.f32 1.442695, %v7949_v11  ;;  %15163 = vpow2.f32 %v6776_v62 }
 0xdff   : > { %15165 = vpow2.f32 %v7959_v22 }
 0xe00   : > { %v3611_v33 = vadd.f32 %v3610_v4, %v3602_v2  ;;  %v7954_v4 = vmul.f32 -2.0, %v17529_v50  ;;  %15167 = vpow2.f32 %v6780_v23 }
 0xe01   : > { %v18087_v6 = vpop.permute.xlu1 %6736  ;;  %v3605_v40 = vpop.xlane.xlu0 %3604  ;;  %15169 = vpow2.f32 %v7957_v58 }
 0xe02   : > { %v18089_v15 = vadd.f32 %v3611_v33, %v3605_v40  ;;  %v7953_v33 = vmul.f32 -2.0, %v17531_v36  ;;  %v7961_v40 = vmul.f32 1.442695, %v7951_v18  ;;  %v7967_v14 = vmul.f32 1.442695, %v7954_v4 }
 0xe03   : > { %15171 = vpow2.f32 %v7963_v39  ;;  %v6760_v60 = vadd.f32 %v18087_v6, %v18942_v26  ;;  %v18132_v26 = vmul.f32 -2.0, %v17535_v48 }
 0xe04   : > { %15173 = vpow2.f32 %v7961_v40 }
 0xe05   : > { %v6741_v7 = vpop.permute.xlu1 %6740  ;;  %v6739_v34 = vpop.permute.xlu0 %6738  ;;  %15175 = vpow2.f32 %v7967_v14 }
 0xe06   : > { %v6762_v61 = vadd.f32 %v6741_v7, %v18946_v20  ;;  %v6782_v20 = vmul.f32 1.442695, %v18035_v44 }
 0xe09   : > { %v18091_v16 = vpop.permute.xlu1 %6742  ;;  %v18093_v37 = vpop.permute.xlu0 %6744 }
 0xe0d   : > { %v18095_v57 = vpop.permute.xlu1 %6746  ;;  %v18097_v28 = vpop.permute.xlu0 %6748 }
 0xe11   : > { %v18099_v63 = vpop.permute.xlu1 %6750  ;;  %v6801_v0 = vpop.permute.xlu0 %6800 }
 0xe12   : > { %v6824_v13 = vsel %vm367_vm0, %v6801_v0, 0.0  ;;  %v14874_v0 = vpop.f32.mrf.mxu0 }
 0xe13   : > { %6825 = vadd.xlane.f32.xlu0 %v6824_v13 }
 0xe14   : > { %v10545_v11 = vpop.f32.mrf.mxu0 }
 0xe15   : > { %v6803_v38 = vpop.permute.xlu1 %6802  ;;  %v6805_v31 = vpop.permute.xlu0 %6804 }
 0xe16   : > { %v6830_v1 = vsel %vm367_vm0, %v6805_v31, 0.0  ;;  %v6827_v54 = vsel %vm367_vm0, %v6803_v38, 0.0  ;;  %v7965_v38 = vmul.f32 1.442695, %v7953_v33  ;;  %v6761_v31 = vadd.f32 %v6739_v34, %v18944_v51 }
 0xe17   : > { %6831 = vadd.xlane.f32.xlu1 %v6830_v1  ;;  %6828 = vadd.xlane.f32.xlu0 %v6827_v54  ;;  %v13013_v1 = vld [vmem:[%s18570_s1 + $0x7a5] ss:$0 sm:$0xff]  ;;  %v7955_v54 = vmul.f32 -2.0, %v18081_v45 }
 0xe18   : > { %15177 = vpow2.f32 %v7965_v38 }
 0xe19   : > { %v6807_v59 = vpop.permute.xlu1 %6806  ;;  %v6809_v41 = vpop.permute.xlu0 %6808  ;;  %v18135_v7 = vmul.f32 1.442695, %v7955_v54  ;;  %15179 = vpow2.f32 %v6782_v20  ;;  %v11028_v20 = vld [vmem:[%s18570_s1 + $0x620] sm:$0xff] }
 0xe1a   : > { %v6833_v32 = vsel %vm367_vm0, %v6807_v59, 0.0  ;;  %v6836_v2 = vsel %vm367_vm0, %v6809_v41, 0.0 }
 0xe1b   : > { %6834 = vadd.xlane.f32.xlu0 %v6833_v32  ;;  %v15154_v32 = vpop.eup %15153  ;;  %15181 = vpow2.f32 %v18135_v7  ;;  %v11027_v7 = vld [vmem:[%s18570_s1 + $0x618] sm:$0xff] }
 0xe1c   : > { %v15156_v34 = vpop.eup %15155  ;;  %v6785_v6 = vmul.f32 %v15154_v32, %v6761_v31 }
 0xe1d   : > { %v6811_v52 = vpop.permute.xlu1 %6810  ;;  %v6813_v43 = vpop.permute.xlu0 %6812  ;;  %v6784_v22 = vmul.f32 %v15156_v34, %v6760_v60 }
 0xe1e   : > { %v6839_v13 = vsel %vm367_vm0, %v6811_v52, 0.0  ;;  %v6842_v51 = vsel %vm367_vm0, %v6813_v43, 0.0  ;;  %v15158_v62 = vpop.eup %15157  ;;  %v6763_v43 = vadd.f32 %v18091_v16, %v18948_v21 }
 0xe1f   : > { %6837 = vadd.xlane.f32.xlu0 %v6836_v2  ;;  %v6786_v23 = vmul.f32 %v15158_v62, %v6762_v61  ;;  %v15160_v33 = vpop.eup %15159 }
 0xe20   : > { %v18146_v14 = vpop.eup %15161 }
 0xe21   : > { %v6815_v49 = vpop.permute.xlu1 %6814 }
 0xe22   : > { %v6845_v58 = vsel %vm367_vm0, %v6815_v49, 0.0  ;;  %v6764_v49 = vadd.f32 %v18093_v37, %v18950_v30 }
 0xe23   : > { %6840 = vadd.xlane.f32.xlu0 %v6839_v13 }
 0xe24   : > { %v14867_v3 = vpop.f32.mrf.mxu1 }
 0xe25   : > { %v10551_v59 = vadd.f32 %v14874_v0, %v14867_v3  ;;  %v7902_v55 = vpop.permute.xlu1 %7901  ;;  %v15164_v3 = vpop.eup %15163 }
 0xe26   : > { %v10470_v12 = vpop.f32.mrf.mxu1  ;;  %v7925_v38 = vsub.f32 %v6784_v22, %v7902_v55  ;;  %v15166_v16 = vpop.eup %15165  ;;  %v10851_v55 = vld [vmem:[%s18570_s1 + $0x5f8] sm:$0xff] }
 0xe27   : > { %v18129_v41 = vadd.f32 %v13013_v1, %v10551_v59  ;;  %v10546_v27 = vadd.f32 %v10545_v11, %v10470_v12  ;;  %6843 = vadd.xlane.f32.xlu0 %v6842_v51  ;;  %v18173_v11 = vpop.eup %15167 }
 0xe28   : > { %v15170_v62 = vpop.eup %15169 }
 0xe29   : > { %v18137_v52 = vadd.f32 %v13013_v1, %v10546_v27  ;;  %v7904_v18 = vpop.permute.xlu1 %7903  ;;  %v10662_v4 = vrot.slane %v18129_v41, 4  ;;  %v10565_v39 = vrot.slane %v18129_v41, 3  ;;  %v10844_v59 = vrot.slane %v18129_v41, 7 }
 0xe2a   : > { %v7926_v2 = vsub.f32 %v6785_v6, %v7904_v18  ;;  %v10751_v34 = vrot.slane %v18129_v41, 5 }
 0xe2b   : > { %6846 = vadd.xlane.f32.xlu0 %v6845_v58  ;;  %v10661_v40 = vrot.slane %v18137_v52, 4  ;;  %v10564_v44 = vrot.slane %v18137_v52, 3  ;;  %v10843_v0 = vrot.slane %v18137_v52, 7  ;;  %v10750_v13 = vrot.slane %v18137_v52, 5 }
 0xe2c   : > { %v7942_v31 = vmul.f32 %v7926_v2, %v7926_v2  ;;  %v11019_v32 = vrot.slane %v18137_v52, 1  ;;  %v10758_v2 = vld [vmem:[%s18570_s1 + $0x5e8] sm:$0xff]  ;;  %v11020_v58 = vrot.slane %v18129_v41, 1 }
 0xe2d   : > { %v7906_v1 = vpop.permute.xlu1 %7905  ;;  %v10665_v54 = vsel %vm8692_vm9, 0.0, %v10661_v40  ;;  %v18156_v60 = vsel %vm8692_vm9, %v10661_v40, %v10662_v4  ;;  %v18161_v61 = vsel %vm8593_vm13, %v10564_v44, %v10565_v39  ;;  %v10569_v21 = vsel %vm8593_vm13, 0.0, %v10564_v44  ;;  %v18188_v40 = vpop.eup %15171 }
 0xe2e   : > { %14886 = vmatprep.mubr.msk.f32.mxu0 %vm8604_vm8, %v10665_v54  ;;  %v10570_v30 = vmul.f32 %v17578_v46, %v10569_v21  ;;  %v10571_v37 = vmul.f32 %v17586_v53, %v18161_v61  ;;  %v7974_v12 = vmul.f32 %v15166_v16, %v7942_v31  ;;  %v10848_v51 = vsel %vm631_vm5, 0.0, %v10843_v0  ;;  %v15174_v54 = vpop.eup %15173 }
 0xe2f   : > { %14887 = vmatmul.mubr.msk.f32.vlgmr.msra.gmra.mxu0 %vm8604_vm8, %v18156_v60  ;;  %v10755_v27 = vsel %vm8782_vm14, 0.0, %v10750_v13  ;;  %v7927_v6 = vsub.f32 %v6786_v23, %v7906_v1  ;;  %v10845_v22 = vsel %vm631_vm5, %v10843_v0, %v10844_v59  ;;  %v10849_v18 = vmul.f32 %v17578_v46, %v10848_v51  ;;  %v18210_v16 = vpop.eup %15175 }
 0xe30   : > { %14879 = vmatprep.mubr.msk.f32.mxu1 %vm8604_vm8, %v10570_v30  ;;  %14897 = vmatpush3.msra.mxu0 %v18064_v8  ;;  %v10756_v44 = vmul.f32 %v17590_v24, %v10755_v27  ;;  %v7934_v8 = vmul.f32 2.0, %v17521_v47  ;;  %v7941_v0 = vmul.f32 %v7925_v38, %v7925_v38  ;;  %v18198_v31 = vsel %vm8782_vm14, %v10750_v13, %v10751_v34 }
 0xe31   : > { %14880 = vmatmul.mubr.msk.f32.vlgmr.msra.gmra.mxu1 %vm8604_vm8, %v10571_v37  ;;  %14898 = vmatprep.subr.mxu0 %v10851_v55  ;;  %v7908_v23 = vpop.permute.xlu1 %7907  ;;  %v11021_v1 = vsel %vm935_vm10, %v11019_v32, %v11020_v58  ;;  %v7971_v21 = vmul.f32 1.442695, %v18132_v26  ;;  %v10850_v47 = vmul.f32 %v17586_v53, %v10845_v22  ;;  %v6787_v38 = vmul.f32 %v15160_v33, %v6763_v43  ;;  %v15178_v33 = vpop.eup %15177 }
 0xe32   : > { %14900 = vmatprep.mubr.msk.f32.mxu0 %vm8604_vm8, %v10849_v18  ;;  %14890 = vmatpush3.msra.mxu1 %v18069_v56  ;;  %v10937_v56 = vld [vmem:[%s18570_s1 + $0x610] sm:$0xff]  ;;  %v7982_v13 = vadd.f32 %v7974_v12, %v7934_v8  ;;  %v6765_v30 = vadd.f32 %v18095_v57, %v18951_v25  ;;  %v7943_v37 = vmul.f32 %v7927_v6, %v7927_v6  ;;  %v7933_v27 = vmul.f32 2.0, %v17523_v29  ;;  %v11204_v29 = vld [vmem:[%s18570_s1 + $0x640] sm:$0xff] }
 0xe33   : > { %14891 = vmatprep.subr.mxu1 %v10758_v2  ;;  %14893 = vmatprep.mubr.msk.f32.mxu1 %vm8604_vm8, %v10756_v44  ;;  %v6788_v26 = vmul.f32 %v15164_v3, %v6764_v49  ;;  %v7928_v43 = vsub.f32 %v6787_v38, %v7908_v23  ;;  %v10757_v59 = vmul.f32 %v17632_v5, %v18198_v31  ;;  %v11024_v49 = vsel %vm935_vm10, %v11020_v58, 0.0 }
 0xe34   : > { %14899 = vmatpush3.msra.mxu0 %v10851_v55  ;;  %14892 = vmatpush3.msra.mxu1 %v10758_v2  ;;  %v11025_v32 = vmul.f32 %v17590_v24, %v11021_v1  ;;  %v7990_v25 = vadd.f32 1.837877, %v7982_v13  ;;  %v7973_v57 = vmul.f32 %v15170_v62, %v7941_v0  ;;  %v10936_v55 = vld [vmem:[%s18570_s1 + $0x608] sm:$0xff]  ;;  %15183 = vpow2.f32 %v7971_v21 }
 0xe35   : > { %14901 = vmatmul.mubr.msk.f32.vlgmr.msra.gmra.mxu0 %vm8604_vm8, %v10850_v47  ;;  %14910 = vmatprep.subr.mxu0 %v11028_v20  ;;  %v7910_v12 = vpop.permute.xlu1 %7909  ;;  %v6766_v62 = vadd.f32 %v18097_v28, %v18952_v35  ;;  %v6789_v22 = vmul.f32 %v18146_v14, %v6765_v30  ;;  %v7975_v18 = vmul.f32 %v15174_v54, %v7943_v37  ;;  %v11117_v35 = vld [vmem:[%s18570_s1 + $0x630] sm:$0xff]  ;;  %v7937_v8 = vmul.f32 2.0, %v17531_v36 }
 0xe36   : > { %14903 = vmatprep.subr.mxu1 %v10937_v56  ;;  %14911 = vmatpush3.msra.mxu0 %v11028_v20  ;;  %v7929_v3 = vsub.f32 %v6788_v26, %v7910_v12  ;;  %v7998_v51 = vmul.f32 -0.5, %v7990_v25  ;;  %v7944_v2 = vmul.f32 %v7928_v43, %v7928_v43  ;;  %v11026_v58 = vmul.f32 %v17632_v5, %v11024_v49  ;;  %v11203_v20 = vld [vmem:[%s18570_s1 + $0x638] sm:$0xff] }
 0xe37   : > { %14914 = vmatprep.mubr.msk.f32.mxu0 %vm8604_vm8, %v11025_v32  ;;  %14894 = vmatmul.mubr.msk.f32.vlgmr.msra.gmra.mxu1 %vm8604_vm8, %v10757_v59  ;;  %v7981_v44 = vadd.f32 %v7973_v57, %v7933_v27  ;;  %v6767_v0 = vadd.f32 %v18099_v63, %v18958_v10  ;;  %v7935_v1 = vmul.f32 2.0, %v17527_v9  ;;  %v6790_v21 = vmul.f32 %v18173_v11, %v6766_v62  ;;  %v11116_v10 = vld [vmem:[%s18570_s1 + $0x628] sm:$0xff] }
 0xe38   : > { %14904 = vmatpush3.msra.mxu1 %v10937_v56  ;;  %14912 = vmatprep.subr.mxu0 %v11027_v7  ;;  %v7945_v6 = vmul.f32 %v7929_v3, %v7929_v3  ;;  %v7938_v36 = vmul.f32 2.0, %v17529_v50  ;;  %v7976_v38 = vmul.f32 %v18188_v40, %v7944_v2  ;;  %v11114_v9 = vmul.f32 %v17578_v46, %v18161_v61  ;;  %v15180_v50 = vpop.eup %15179 }
 0xe39   : > { %14905 = vmatprep.subr.mxu1 %v10936_v55  ;;  %14907 = vmatprep.mubr.msk.f32.mxu1 %vm8604_vm8, %v18137_v52  ;;  %v7912_v28 = vpop.permute.xlu1 %7911  ;;  %v11113_v63 = vsel %vm8593_vm13, %v10565_v39, 0.0  ;;  %v7983_v56 = vadd.f32 %v7975_v18, %v7935_v1  ;;  %v7989_v13 = vadd.f32 1.837877, %v7981_v44  ;;  %v11202_v61 = vsel %vm8692_vm9, %v10662_v4, 0.0  ;;  %v11290_v39 = vld [vmem:[%s18570_s1 + $0x650] sm:$0xff]  ;;  %v15182_v32 = vpop.eup %15181  ;;  %v11289_v4 = vld [vmem:[%s18570_s1 + $0x648] sm:$0xff] }
 0xe3a   : > { %v7977_v23 = vmul.f32 %v15178_v33, %v7945_v6  ;;  %14913 = vmatpush3.msra.mxu0 %v11027_v7  ;;  %8015 = vrot.lane.b32.xlu1 %v7998_v51, %s15205_s22  ;;  %v7930_v14 = vsub.f32 %v6789_v22, %v7912_v28  ;;  %v6791_v37 = vmul.f32 %v15180_v50, %v6767_v0  ;;  %v7936_v26 = vmul.f32 2.0, %v17525_v19  ;;  %v11379_v44 = vld [vmem:[%s18570_s1 + $0x670] sm:$0xff]  ;;  %v11377_v0 = vld [vmem:[%s18570_s1 + $0x660] sm:$0xff] }
 0xe3b   : > { %14906 = vmatpush3.msra.mxu1 %v10936_v55  ;;  %14915 = vmatmul.mubr.msk.f32.vlgmr.msra.gmra.mxu0 %vm8604_vm8, %v11026_v58  ;;  %v11286_v43 = vsel %vm8782_vm14, %v10751_v34, 0.0  ;;  %v11287_v19 = vmul.f32 %v17590_v24, %v18198_v31  ;;  %v7991_v25 = vadd.f32 1.837877, %v7983_v56  ;;  %v7997_v3 = vmul.f32 -0.5, %v7989_v13 }
 0xe3c   : > { %14924 = vmatprep.subr.mxu0 %v11204_v29  ;;  %14917 = vmatprep.subr.mxu1 %v11117_v35  ;;  %v7946_v54 = vmul.f32 %v7930_v14, %v7930_v14  ;;  %v7985_v47 = vadd.f32 %v7977_v23, %v7937_v8  ;;  %v7984_v57 = vadd.f32 %v7976_v38, %v7936_v26  ;;  %v7939_v51 = vmul.f32 2.0, %v18081_v45  ;;  %v11378_v8 = vld [vmem:[%s18570_s1 + $0x668] sm:$0xff] }
 0xe3d   : > { %14925 = vmatpush3.msra.mxu0 %v11204_v29  ;;  %14928 = vmatprep.mubr.msk.f32.mxu0 %vm8604_vm8, %v18156_v60  ;;  %v7914_v11 = vpop.permute.xlu1 %7913  ;;  %v11288_v27 = vmul.f32 %v17632_v5, %v11286_v43  ;;  %v7940_v6 = vmul.f32 2.0, %v17535_v48  ;;  %v7999_v2 = vmul.f32 -0.5, %v7991_v25 }
 0xe3e   : > { %14908 = vmatmul.mubr.msk.f32.vlgmr.msra.gmra.mxu1 %vm8604_vm8, %v18129_v41  ;;  %14926 = vmatprep.subr.mxu0 %v11203_v20  ;;  %v7978_v60 = vmul.f32 %v18210_v16, %v7946_v54  ;;  %v7931_v40 = vsub.f32 %v6790_v21, %v7914_v11  ;;  %v7993_v30 = vadd.f32 1.837877, %v7985_v47  ;;  %v11115_v16 = vmul.f32 %v17586_v53, %v11113_v63 }
 0xe3f   : > { %14918 = vmatpush3.msra.mxu1 %v11117_v35  ;;  %14921 = vmatprep.mubr.msk.f32.mxu1 %vm8604_vm8, %v11114_v9  ;;  %v7992_v58 = vadd.f32 1.837877, %v7984_v57  ;;  %v3613_v11 = vrot.slane %v18089_v15, 4 }
 0xe40   : > { %14919 = vmatprep.subr.mxu1 %v11116_v10  ;;  %14927 = vmatpush3.msra.mxu0 %v11203_v20  ;;  %v7947_v33 = vmul.f32 %v7931_v40, %v7931_v40  ;;  %v7986_v59 = vadd.f32 %v7978_v60, %v7938_v36  ;;  %v8001_v12 = vmul.f32 -0.5, %v7993_v30 }
 0xe41   : > { %14920 = vmatpush3.msra.mxu1 %v11116_v10  ;;  %14929 = vmatmul.mubr.msk.f32.vlgmr.msra.gmra.mxu0 %vm8604_vm8, %v11202_v61  ;;  %v7916_v7 = vpop.permute.xlu1 %7915  ;;  %v15184_v62 = vpop.eup %15183  ;;  %v8000_v35 = vmul.f32 -0.5, %v7992_v58  ;;  %v3614_v40 = vadd.f32 %v3613_v11, %v18089_v15 }
 0xe42   : > { %14931 = vmatprep.subr.mxu1 %v11290_v39  ;;  %14922 = vmatmul.mubr.msk.f32.vlgmr.msra.gmra.mxu1 %vm8604_vm8, %v11115_v16  ;;  %v7979_v34 = vmul.f32 %v15182_v32, %v7947_v33  ;;  %v7932_v49 = vsub.f32 %v6791_v37, %v7916_v7  ;;  %v7994_v55 = vadd.f32 1.837877, %v7986_v59 }
 0xe43   : > { %14932 = vmatpush3.msra.mxu1 %v11290_v39  ;;  %14935 = vmatprep.mubr.msk.f32.mxu1 %vm8604_vm8, %v11287_v19  ;;  %v3615_v61 = vrot.slane %v3614_v40, 2 }
 0xe44   : > { %14933 = vmatprep.subr.mxu1 %v11289_v4  ;;  %v7948_v31 = vmul.f32 %v7932_v49, %v7932_v49  ;;  %8013 = vrot.lane.b32.xlu0 %v7997_v3, %s15205_s22  ;;  %v8002_v22 = vmul.f32 -0.5, %v7994_v55  ;;  %v7987_v29 = vadd.f32 %v7979_v34, %v7939_v51 }
 0xe45   : > { %14934 = vmatpush3.msra.mxu1 %v11289_v4  ;;  %8021 = vrot.lane.b32.xlu1 %v8001_v12, %s15205_s22  ;;  %v3616_v43 = vadd.f32 %v3615_v61, %v3614_v40 }
 0xe46   : > { %14936 = vmatmul.mubr.msk.f32.vlgmr.msra.gmra.mxu1 %vm8604_vm8, %v11288_v27  ;;  %v7980_v18 = vmul.f32 %v15184_v62, %v7948_v31  ;;  %v7995_v28 = vadd.f32 1.837877, %v7987_v29  ;;  %14938 = vmatprep.subr.mxu0 %v11379_v44 }
 0xe47   : > { %14939 = vmatpush3.msra.mxu0 %v11379_v44  ;;  %v3617_v7 = vrot.slane %v3616_v43, 1 }
 0xe48   : > { %8017 = vrot.lane.b32.xlu0 %v7999_v2, %s15205_s22  ;;  %v7988_v45 = vadd.f32 %v7980_v18, %v7940_v6  ;;  %v8003_v14 = vmul.f32 -0.5, %v7995_v28  ;;  %14940 = vmatprep.subr.mxu0 %v11378_v8 }
 0xe49   : > { %8023 = vrot.lane.b32.xlu1 %v8002_v22, %s15205_s22  ;;  %14941 = vmatpush3.msra.mxu0 %v11378_v8  ;;  %v3618_v34 = vadd.f32 %v3617_v7, %v3616_v43  ;;  %v13016_v22 = vld [vmem:[%s18570_s1 + $0x7a6] ss:$0 sm:$0xff] }
 0xe4a   : > { %v7996_v23 = vadd.f32 1.837877, %v7988_v45  ;;  %14942 = vmatprep.subr.mxu0 %v11377_v0 }
 0xe4b   : > { %14943 = vmatpush3.msra.mxu0 %v11377_v0 }
 0xe4c   : > { %8019 = vrot.lane.b32.xlu0 %v8000_v35, %s15205_s22  ;;  %v8004_v48 = vmul.f32 -0.5, %v7996_v23 }
 0xe4e   : > { %8027 = vrot.lane.b32.xlu1 %v8004_v48, %s15205_s22 }
 0xe50   : > { %8025 = vrot.lane.b32.xlu0 %v8003_v14, %s15205_s22 }
 0xe52   : > { %10372 = vrot.lane.b32.xlu1 %v17916_v17, %s15209_s20  ;;  %v11376_v17 = vld [vmem:[%s18570_s1 + $0x658] sm:$0xff] }
 0xe53   : > { %14944 = vmatprep.subr.mxu0 %v11376_v17 }
 0xe54   : > { %10370 = vrot.lane.b32.xlu0 %v17918_v42, %s15209_s20  ;;  %14945 = vmatpush3.msra.mxu0 %v11376_v17 }
 0xe9c   : > { %v6826_v42 = vpop.xlane.xlu0 %6825 }
 0xea0   : > { %v6829_v20 = vpop.xlane.xlu0 %6828  ;;  %v6832_v54 = vpop.xlane.xlu1 %6831 }
 0xea1   : > { %v6848_v1 = vadd.f32 %v6829_v20, %v6826_v42 }
 0xea3   : > { %v6849_v21 = vadd.f32 %v6848_v1, %v6832_v54 }
 0xea4   : > { %v6835_v47 = vpop.xlane.xlu0 %6834 }
 0xea5   : > { %v6850_v36 = vadd.f32 %v6849_v21, %v6835_v47 }
 0xea8   : > { %v6838_v38 = vpop.xlane.xlu0 %6837 }
 0xea9   : > { %v6851_v10 = vadd.f32 %v6850_v36, %v6838_v38 }
 0xeac   : > { %v8016_v9 = vpop.permute.xlu1 %8015  ;;  %v6841_v63 = vpop.xlane.xlu0 %6840 }
 0xead   : > { %v8040_v56 = vsel %vm367_vm0, %v8016_v9, 0.0  ;;  %v6852_v50 = vadd.f32 %v6851_v10, %v6841_v63 }
 0xeae   : > { %8041 = vadd.xlane.f32.xlu1 %v8040_v56 }
 0xeb0   : > { %v6844_v60 = vpop.xlane.xlu0 %6843 }
 0xeb1   : > { %v6853_v13 = vadd.f32 %v6852_v50, %v6844_v60 }
 0xeb4   : > { %v6847_v30 = vpop.xlane.xlu0 %6846 }
 0xeb5   : > { %v6854_v39 = vadd.f32 %v6853_v13, %v6847_v30 }
 0xeb7   : > { %v8022_v37 = vpop.permute.xlu1 %8021  ;;  %v6855_v26 = vrot.slane %v6854_v39, 4 }
 0xeb8   : > { %v8049_v16 = vsel %vm367_vm0, %v8022_v37, 0.0  ;;  %v8014_v33 = vpop.permute.xlu0 %8013 }
 0xeb9   : > { %v6856_v59 = vadd.f32 %v6855_v26, %v6854_v39  ;;  %8050 = vadd.xlane.f32.xlu1 %v8049_v16  ;;  %v8037_v32 = vsel %vm367_vm0, %v8014_v33, 0.0 }
 0xeba   : > { %8038 = vadd.xlane.f32.xlu0 %v8037_v32 }
 0xebb   : > { %v6857_v4 = vrot.slane %v6856_v59, 2  ;;  %v8024_v55 = vpop.permute.xlu1 %8023 }
 0xebc   : > { %v8018_v19 = vpop.permute.xlu0 %8017  ;;  %v8052_v31 = vsel %vm367_vm0, %v8024_v55, 0.0  ;;  %v11577_v55 = vld [vmem:[%s18570_s1 + $0x6a8] sm:$0xff] }
 0xebd   : > { %v6858_v12 = vadd.f32 %v6857_v4, %v6856_v59  ;;  %v8043_v15 = vsel %vm367_vm0, %v8018_v19, 0.0 }
 0xebe   : > { %8044 = vadd.xlane.f32.xlu0 %v8043_v15 }
 0xebf   : > { %v6859_v25 = vrot.slane %v6858_v12, 1 }
 0xec0   : > { %v8020_v57 = vpop.permute.xlu0 %8019  ;;  %v18329_v33 = vpop.permute.xlu1 %8027 }
 0xec1   : > { %v6860_v49 = vadd.f32 %v6859_v25, %v6858_v12  ;;  %v8046_v3 = vsel %vm367_vm0, %v8020_v57, 0.0 }
 0xec2   : > { %8047 = vadd.xlane.f32.xlu0 %v8046_v3  ;;  %v11482_v3 = vld [vmem:[%s18570_s1 + $0x690] sm:$0xff] }
 0xec3   : > { %v18320_v51 = vadd.f32 %v6860_v49, %v3618_v34  ;;  %v11578_v49 = vld [vmem:[%s18570_s1 + $0x6b0] sm:$0xff]  ;;  %14949 = vmatprep.subr.mxu1 %v11482_v3 }
 0xec4   : > { %v8026_v27 = vpop.permute.xlu0 %8025  ;;  %v18331_v43 = vpop.permute.xlu1 %10372  ;;  %14960 = vmatprep.subr.mxu0 %v11578_v49  ;;  %14950 = vmatpush3.msra.mxu1 %v11482_v3 }
 0xec5   : > { %v8055_v62 = vsel %vm367_vm0, %v8026_v27, 0.0  ;;  %v11481_v27 = vld [vmem:[%s18570_s1 + $0x688] sm:$0xff] }
 0xec6   : > { %8053 = vadd.xlane.f32.xlu0 %v8052_v31  ;;  %8056 = vadd.xlane.f32.xlu1 %v8055_v62  ;;  %v11576_v31 = vld [vmem:[%s18570_s1 + $0x6a0] sm:$0xff] }
 0xec7   : > { %v11480_v62 = vld [vmem:[%s18570_s1 + $0x680] sm:$0xff]  ;;  %14951 = vmatprep.subr.mxu1 %v11481_v27 }
 0xec8   : > { %v18333_v59 = vpop.permute.xlu0 %10370  ;;  %14952 = vmatpush3.msra.mxu1 %v11481_v27  ;;  %v11944_v27 = vld [vmem:[%s18570_s1 + $0x718] sm:$0xff] }
 0xec9   : > { %14953 = vmatprep.subr.mxu1 %v11480_v62 }
 0xeca   : > { %14954 = vmatpush3.msra.mxu1 %v11480_v62 }
 0xeef   : > { %v14888_v6 = vpop.f32.mrf.mxu0 }
 0xef1   : > { %v14881_v18 = vpop.f32.mrf.mxu1  ;;  %v10739_v2 = vpop.f32.mrf.mxu0 }
 0xef2   : > { %v10660_v58 = vadd.f32 %v14881_v18, %v13016_v22  ;;  %v11767_v18 = vld [vmem:[%s18570_s1 + $0x6f0] sm:$0xff] }
 0xef3   : > { %v10646_v29 = vpop.f32.mrf.mxu1 }
 0xef4   : > { %v10659_v45 = vadd.f32 %v13016_v22, %v10646_v29  ;;  %v10749_v35 = vadd.f32 %v14888_v6, %v10660_v58  ;;  %v11575_v6 = vld [vmem:[%s18570_s1 + $0x698] sm:$0xff]  ;;  %v13033_v58 = vld [vmem:[%s18570_s1 + $0x7a7] ss:$0 sm:$0xff] }
 0xef5   : > { %v14902_v28 = vpop.f32.mrf.mxu0  ;;  %v11479_v22 = vld [vmem:[%s18570_s1 + $0x678] sm:$0xff] }
 0xef6   : > { %v10748_v23 = vadd.f32 %v10739_v2, %v10659_v45  ;;  %14955 = vmatprep.subr.mxu1 %v11479_v22  ;;  %v11672_v2 = vld [vmem:[%s18570_s1 + $0x6d0] sm:$0xff] }
 0xef7   : > { %v14895_v48 = vpop.f32.mrf.mxu1  ;;  %v10925_v14 = vpop.f32.mrf.mxu0  ;;  %14956 = vmatpush3.msra.mxu1 %v11479_v22  ;;  %v12038_v22 = vld [vmem:[%s18570_s1 + $0x750] sm:$0xff] }
 0xef8   : > { %v10842_v44 = vadd.f32 %v14895_v48, %v10749_v35  ;;  %14971 = vmatprep.subr.mxu1 %v11672_v2 }
 0xef9   : > { %v10832_v8 = vpop.f32.mrf.mxu1 }
 0xefa   : > { %v10841_v0 = vadd.f32 %v10832_v8, %v10748_v23  ;;  %v10935_v42 = vadd.f32 %v14902_v28, %v10842_v44 }
 0xefb   : > { %v14916_v17 = vpop.f32.mrf.mxu0 }
 0xefc   : > { %v10934_v20 = vadd.f32 %v10925_v14, %v10841_v0 }
 0xefd   : > { %v11101_v54 = vpop.f32.mrf.mxu0 }
 0xefe   : > { %v14909_v1 = vpop.f32.mrf.mxu1 }
 0xeff   : > { %v11018_v21 = vadd.f32 %v14909_v1, %v10935_v42 }
 0xf00   : > { %v11008_v47 = vpop.f32.mrf.mxu1 }
 0xf01   : > { %v11017_v36 = vadd.f32 %v11008_v47, %v10934_v20  ;;  %v11111_v38 = vadd.f32 %v14916_v17, %v11018_v21  ;;  %v14930_v10 = vpop.f32.mrf.mxu0 }
 0xf02   : > { %v14923_v9 = vpop.f32.mrf.mxu1 }
 0xf03   : > { %v11200_v63 = vadd.f32 %v14923_v9, %v11111_v38  ;;  %v11110_v11 = vadd.f32 %v11101_v54, %v11017_v36  ;;  %v11274_v40 = vpop.f32.mrf.mxu0  ;;  %v11766_v38 = vld [vmem:[%s18570_s1 + $0x6e8] sm:$0xff] }
 0xf04   : > { %v11190_v56 = vpop.f32.mrf.mxu1 }
 0xf05   : > { %v11199_v50 = vadd.f32 %v11190_v56, %v11110_v11  ;;  %v11284_v60 = vadd.f32 %v14930_v10, %v11200_v63  ;;  %v11671_v56 = vld [vmem:[%s18570_s1 + $0x6c8] sm:$0xff] }
 0xf06   : > { %v14937_v13 = vpop.f32.mrf.mxu1 }
 0xf07   : > { %v11283_v30 = vadd.f32 %v11274_v40, %v11199_v50  ;;  %v11373_v61 = vadd.f32 %v14937_v13, %v11284_v60  ;;  %v11765_v60 = vld [vmem:[%s18570_s1 + $0x6e0] sm:$0xff] }
 0xf08   : > { %v11363_v39 = vpop.f32.mrf.mxu1 }
 0xf09   : > { %v11372_v37 = vadd.f32 %v11363_v39, %v11283_v30  ;;  %v11375_v16 = vmax.f32 %v11373_v61, 0.0  ;;  %v11670_v30 = vld [vmem:[%s18570_s1 + $0x6c0] sm:$0xff]  ;;  %v11764_v61 = vld [vmem:[%s18570_s1 + $0x6d8] sm:$0xff] }
 0xf0b   : > { %v11374_v26 = vmax.f32 %v11372_v37, 0.0 }
 0xf0d   : > { %14946 = vmatprep.mubr.msk.f32.mxu0 %vm1944_vm4, %v11374_v26  ;;  %v11669_v26 = vld [vmem:[%s18570_s1 + $0x6b8] sm:$0xff] }
 0xf0e   : > { %14947 = vmatmul.mubr.msk.f32.vlgmr.msra.gmra.mxu0 %vm1944_vm4, %v11375_v16 }
 0xf0f   : > { %14961 = vmatpush3.msra.mxu0 %v11578_v49  ;;  %v11945_v49 = vld [vmem:[%s18570_s1 + $0x720] sm:$0xff] }
 0xf10   : > { %14962 = vmatprep.subr.mxu0 %v11577_v55 }
 0xf11   : > { %14963 = vmatpush3.msra.mxu0 %v11577_v55  ;;  %v11852_v55 = vld [vmem:[%s18570_s1 + $0x700] sm:$0xff] }
 0xf12   : > { %14964 = vmatprep.subr.mxu0 %v11576_v31 }
 0xf13   : > { %14965 = vmatpush3.msra.mxu0 %v11576_v31  ;;  %v11851_v31 = vld [vmem:[%s18570_s1 + $0x6f8] sm:$0xff] }
 0xf14   : > { %14966 = vmatprep.subr.mxu0 %v11575_v6 }
 0xf15   : > { %14967 = vmatpush3.msra.mxu0 %v11575_v6  ;;  %v12127_v6 = vld [vmem:[%s18570_s1 + $0x770] sm:$0xff] }
 0xf16   : > { %14982 = vmatprep.subr.mxu0 %v11767_v18 }
 0xf37   : > { %v8042_v32 = vpop.xlane.xlu1 %8041 }
 0xf42   : > { %v8051_v57 = vpop.xlane.xlu1 %8050 }
 0xf43   : > { %v8039_v4 = vpop.xlane.xlu0 %8038 }
 0xf44   : > { %v8061_v19 = vadd.f32 %v8042_v32, %v8039_v4 }
 0xf47   : > { %v8045_v7 = vpop.xlane.xlu0 %8044 }
 0xf48   : > { %v8062_v12 = vadd.f32 %v8061_v19, %v8045_v7  ;;  %v11947_v19 = vld [vmem:[%s18570_s1 + $0x730] sm:$0xff] }
 0xf4b   : > { %v8048_v15 = vpop.xlane.xlu0 %8047 }
 0xf4c   : > { %v8063_v25 = vadd.f32 %v8062_v12, %v8048_v15  ;;  %v11854_v12 = vld [vmem:[%s18570_s1 + $0x710] sm:$0xff] }
 0xf4e   : > { %v18335_v34 = vadd.f32 %v8063_v25, %v8051_v57  ;;  %v11946_v25 = vld [vmem:[%s18570_s1 + $0x728] sm:$0xff] }
 0xf4f   : > { %v11853_v57 = vld [vmem:[%s18570_s1 + $0x708] sm:$0xff] }
 0xfce   : > { %v14948_v29 = vpop.f32.mrf.mxu0 }
 0xfcf   : > { %v11463_v45 = vadd.f32 %v14948_v29, %v13033_v58  ;;  %v12125_v29 = vld [vmem:[%s18570_s1 + $0x760] sm:$0xff] }
 0xfd0   : > { %v11457_v35 = vpop.f32.mrf.mxu0 }
 0xfd1   : > { %v18370_v28 = vmax.f32 %v11463_v45, 0.0  ;;  %v11458_v23 = vadd.f32 %v13033_v58, %v11457_v35  ;;  %v12037_v58 = vld [vmem:[%s18570_s1 + $0x748] sm:$0xff]  ;;  %v12036_v45 = vld [vmem:[%s18570_s1 + $0x740] sm:$0xff]  ;;  %v12035_v35 = vld [vmem:[%s18570_s1 + $0x738] sm:$0xff] }
 0xfd3   : > { %v18372_v48 = vmax.f32 %v11458_v23, 0.0  ;;  %v11472_v14 = vrot.slane %v18370_v28, 3  ;;  %v11571_v44 = vrot.slane %v18370_v28, 4  ;;  %v11757_v11 = vrot.slane %v18370_v28, 7 }
 0xfd4   : > { %v11937_v39 = vrot.slane %v18370_v28, 1  ;;  %v11662_v37 = vrot.slane %v18370_v28, 5 }
 0xfd5   : > { %v11570_v8 = vrot.slane %v18372_v48, 4  ;;  %v11471_v0 = vrot.slane %v18372_v48, 3  ;;  %v11756_v17 = vrot.slane %v18372_v48, 7  ;;  %v11661_v42 = vrot.slane %v18372_v48, 5 }
 0xfd6   : > { %v11936_v40 = vrot.slane %v18372_v48, 1  ;;  %v11941_v3 = vsel %vm935_vm10, %v11937_v39, 0.0  ;;  %v12032_v23 = vsel %vm8593_vm13, %v11472_v14, 0.0 }
 0xfd7   : > { %v11574_v20 = vsel %vm8692_vm9, 0.0, %v11570_v8  ;;  %v18384_v1 = vsel %vm8692_vm9, %v11570_v8, %v11571_v44  ;;  %v18389_v54 = vsel %vm8593_vm13, %v11471_v0, %v11472_v14  ;;  %v11476_v21 = vsel %vm8593_vm13, 0.0, %v11471_v0  ;;  %v12215_v8 = vld [vmem:[%s18570_s1 + $0x790] sm:$0xff] }
 0xfd8   : > { %14968 = vmatprep.mubr.msk.f32.mxu0 %vm1944_vm4, %v11574_v20  ;;  %v11477_v47 = vmul.f32 %v17578_v46, %v11476_v21  ;;  %v11478_v36 = vmul.f32 %v17586_v53, %v18389_v54  ;;  %v11761_v10 = vsel %vm631_vm5, 0.0, %v11756_v17  ;;  %v11666_v63 = vsel %vm8782_vm14, 0.0, %v11661_v42 }
 0xfd9   : > { %14969 = vmatmul.mubr.msk.f32.vlgmr.msra.gmra.mxu0 %vm1944_vm4, %v18384_v1  ;;  %v11762_v9 = vmul.f32 %v17578_v46, %v11761_v10  ;;  %v11667_v50 = vmul.f32 %v17590_v24, %v11666_v63  ;;  %v11758_v13 = vsel %vm631_vm5, %v11756_v17, %v11757_v11  ;;  %v11938_v16 = vsel %vm935_vm10, %v11936_v40, %v11937_v39  ;;  %v12214_v17 = vld [vmem:[%s18570_s1 + $0x788] sm:$0xff] }
 0xfda   : > { %14983 = vmatpush3.msra.mxu0 %v11767_v18  ;;  %14957 = vmatprep.mubr.msk.f32.mxu1 %vm1944_vm4, %v11477_v47  ;;  %v11763_v32 = vmul.f32 %v17586_v53, %v11758_v13  ;;  %v18434_v4 = vsel %vm8782_vm14, %v11661_v42, %v11662_v37  ;;  %v11942_v7 = vmul.f32 %v17590_v24, %v11938_v16  ;;  %v12126_v18 = vld [vmem:[%s18570_s1 + $0x768] sm:$0xff] }
 0xfdb   : > { %14984 = vmatprep.subr.mxu0 %v11766_v38  ;;  %14990 = vmatprep.mubr.msk.f32.mxu0 %vm1944_vm4, %v11762_v9  ;;  %v11668_v15 = vmul.f32 %v17632_v5, %v18434_v4  ;;  %v11943_v62 = vmul.f32 %v17632_v5, %v11941_v3  ;;  %v12034_v0 = vmul.f32 %v17586_v53, %v12032_v23  ;;  %v12212_v53 = vld [vmem:[%s18570_s1 + $0x778] sm:$0xff] }
 0xfdc   : > { %14958 = vmatmul.mubr.msk.f32.vlgmr.msra.gmra.mxu1 %vm1944_vm4, %v11478_v36  ;;  %14985 = vmatpush3.msra.mxu0 %v11766_v38  ;;  %v12210_v14 = vmul.f32 %v17590_v24, %v18434_v4  ;;  %v12209_v24 = vsel %vm8782_vm14, %v11662_v37, 0.0 }
 0xfdd   : > { %14972 = vmatpush3.msra.mxu1 %v11672_v2  ;;  %14979 = vmatprep.mubr.msk.f32.mxu1 %vm1944_vm4, %v11667_v50  ;;  %v12033_v2 = vmul.f32 %v17578_v46, %v18389_v54  ;;  %v12124_v46 = vld [vmem:[%s18570_s1 + $0x758] sm:$0xff]  ;;  %v12211_v42 = vmul.f32 %v17632_v5, %v12209_v24 }
 0xfde   : > { %14973 = vmatprep.subr.mxu1 %v11671_v56  ;;  %14986 = vmatprep.subr.mxu0 %v11765_v60 }
 0xfdf   : > { %14974 = vmatpush3.msra.mxu1 %v11671_v56  ;;  %14987 = vmatpush3.msra.mxu0 %v11765_v60 }
 0xfe0   : > { %14975 = vmatprep.subr.mxu1 %v11670_v30  ;;  %14988 = vmatprep.subr.mxu0 %v11764_v61 }
 0xfe1   : > { %14976 = vmatpush3.msra.mxu1 %v11670_v30  ;;  %14989 = vmatpush3.msra.mxu0 %v11764_v61 }
 0xfe2   : > { %14977 = vmatprep.subr.mxu1 %v11669_v26  ;;  %14991 = vmatmul.mubr.msk.f32.vlgmr.msra.gmra.mxu0 %vm1944_vm4, %v11763_v32 }
 0xfe3   : > { %15004 = vmatprep.subr.mxu0 %v11947_v19  ;;  %14978 = vmatpush3.msra.mxu1 %v11669_v26 }
 0xfe4   : > { %15005 = vmatpush3.msra.mxu0 %v11947_v19  ;;  %15012 = vmatprep.mubr.msk.f32.mxu0 %vm1944_vm4, %v11942_v7 }
 0xfe5   : > { %14980 = vmatmul.mubr.msk.f32.vlgmr.msra.gmra.mxu1 %vm1944_vm4, %v11668_v15  ;;  %14993 = vmatprep.subr.mxu1 %v11854_v12 }
 0xfe6   : > { %15006 = vmatprep.subr.mxu0 %v11946_v25  ;;  %14994 = vmatpush3.msra.mxu1 %v11854_v12 }
 0xfe7   : > { %15001 = vmatprep.mubr.msk.f32.mxu1 %vm1944_vm4, %v18372_v48  ;;  %15007 = vmatpush3.msra.mxu0 %v11946_v25  ;;  %v12123_v48 = vsel %vm8692_vm9, %v11571_v44, 0.0  ;;  %v12213_v44 = vld [vmem:[%s18570_s1 + $0x780] sm:$0xff] }
 0xfe8   : > { %14995 = vmatprep.subr.mxu1 %v11853_v57  ;;  %15008 = vmatprep.subr.mxu0 %v11945_v49 }
 0xfe9   : > { %14996 = vmatpush3.msra.mxu1 %v11853_v57  ;;  %15009 = vmatpush3.msra.mxu0 %v11945_v49 }
 0xfea   : > { %14997 = vmatprep.subr.mxu1 %v11852_v55  ;;  %15010 = vmatprep.subr.mxu0 %v11944_v27 }
 0xfeb   : > { %14998 = vmatpush3.msra.mxu1 %v11852_v55  ;;  %15011 = vmatpush3.msra.mxu0 %v11944_v27 }
 0xfec   : > { %14999 = vmatprep.subr.mxu1 %v11851_v31  ;;  %15013 = vmatmul.mubr.msk.f32.vlgmr.msra.gmra.mxu0 %vm1944_vm4, %v11943_v62 }
 0xfed   : > { %15026 = vmatprep.subr.mxu0 %v12127_v6  ;;  %15000 = vmatpush3.msra.mxu1 %v11851_v31 }
 0xfee   : > { %15027 = vmatpush3.msra.mxu0 %v12127_v6  ;;  %15034 = vmatprep.mubr.msk.f32.mxu0 %vm1944_vm4, %v18384_v1  ;;  %v13038_v1 = vld [vmem:[%s18570_s1 + $0x7a8] ss:$0 sm:$0xff] }
 0xfef   : > { %15002 = vmatmul.mubr.msk.f32.vlgmr.msra.gmra.mxu1 %vm1944_vm4, %v18370_v28  ;;  %15015 = vmatprep.subr.mxu1 %v12038_v22 }
 0xff0   : > { %15028 = vmatprep.subr.mxu0 %v12126_v18  ;;  %15016 = vmatpush3.msra.mxu1 %v12038_v22 }
 0xff1   : > { %15023 = vmatprep.mubr.msk.f32.mxu1 %vm1944_vm4, %v12033_v2  ;;  %15029 = vmatpush3.msra.mxu0 %v12126_v18 }
 0xff2   : > { %15017 = vmatprep.subr.mxu1 %v12037_v58  ;;  %15030 = vmatprep.subr.mxu0 %v12125_v29 }
 0xff3   : > { %15018 = vmatpush3.msra.mxu1 %v12037_v58  ;;  %15031 = vmatpush3.msra.mxu0 %v12125_v29 }
 0xff4   : > { %15019 = vmatprep.subr.mxu1 %v12036_v45  ;;  %15032 = vmatprep.subr.mxu0 %v12124_v46 }
 0xff5   : > { %15020 = vmatpush3.msra.mxu1 %v12036_v45  ;;  %15033 = vmatpush3.msra.mxu0 %v12124_v46 }
 0xff6   : > { %15021 = vmatprep.subr.mxu1 %v12035_v35  ;;  %15035 = vmatmul.mubr.msk.f32.vlgmr.msra.gmra.mxu0 %vm1944_vm4, %v12123_v48 }
 0xff7   : > { %15022 = vmatpush3.msra.mxu1 %v12035_v35 }
 0xff8   : > { %15024 = vmatmul.mubr.msk.f32.vlgmr.msra.gmra.mxu1 %vm1944_vm4, %v12034_v0  ;;  %15037 = vmatprep.subr.mxu1 %v12215_v8 }
 0xff9   : > { %15038 = vmatpush3.msra.mxu1 %v12215_v8  ;;  %15045 = vmatprep.mubr.msk.f32.mxu1 %vm1944_vm4, %v12210_v14 }
 0xffa   : > { %15039 = vmatprep.subr.mxu1 %v12214_v17 }
 0xffb   : > { %15040 = vmatpush3.msra.mxu1 %v12214_v17 }
 0xffc   : > { %15041 = vmatprep.subr.mxu1 %v12213_v44 }
 0xffd   : > { %15042 = vmatpush3.msra.mxu1 %v12213_v44 }
 0xffe   : > { %15043 = vmatprep.subr.mxu1 %v12212_v53 }
 0xfff   : > { %15044 = vmatpush3.msra.mxu1 %v12212_v53 }
0x1000   : > { %15046 = vmatmul.mubr.msk.f32.vlgmr.msra.gmra.mxu1 %vm1944_vm4, %v12211_v42 }
0x1099   : > { %v14970_v47 = vpop.f32.mrf.mxu0 }
0x109b   : > { %v11650_v10 = vpop.f32.mrf.mxu0 }
0x109c   : > { %v14959_v20 = vpop.f32.mrf.mxu1 }
0x109d   : > { %v11569_v21 = vadd.f32 %v14959_v20, %v13038_v1  ;;  %v8058_v20 = vsel %vm367_vm0, %v18329_v33, 0.0  ;;  %vm12433_vm0 = vcmask 0  }
0x109e   : > { %v11555_v54 = vpop.f32.mrf.mxu1 }
0x109f   : > { %v11568_v28 = vadd.f32 %v13038_v1, %v11555_v54  ;;  %v11660_v38 = vadd.f32 %v14970_v47, %v11569_v21  ;;  %v10376_v1 = vsel %vm8604_vm8, %v18333_v59, 0.0  ;;  %v8054_v47 = vpop.xlane.xlu0 %8053  ;;  %v10379_v59 = vsel %vm8604_vm8, %v18331_v43, 0.0 }
0x10a1   : > { %v11659_v11 = vadd.f32 %v11650_v10, %v11568_v28 }
0x10a2   : > { %v14992_v56 = vpop.f32.mrf.mxu0 }
0x10a4   : > { %v11840_v40 = vpop.f32.mrf.mxu0 }
0x10a5   : > { %v14981_v36 = vpop.f32.mrf.mxu1 }
0x10a6   : > { %v11755_v63 = vadd.f32 %v14981_v36, %v11660_v38 }
0x10a7   : > { %v11745_v9 = vpop.f32.mrf.mxu1 }
0x10a8   : > { %v11754_v50 = vadd.f32 %v11745_v9, %v11659_v11  ;;  %v11850_v60 = vadd.f32 %v14992_v56, %v11755_v63  ;;  %v8057_v56 = vpop.xlane.xlu1 %8056 }
0x10aa   : > { %v11849_v61 = vadd.f32 %v11840_v40, %v11754_v50 }
0x10ac   : > { %v15014_v39 = vpop.f32.mrf.mxu0 }
0x10ae   : > { %v12020_v32 = vpop.f32.mrf.mxu0 }
0x10af   : > { %v15003_v5 = vpop.f32.mrf.mxu1 }
0x10b0   : > { %v11935_v30 = vadd.f32 %v15003_v5, %v11850_v60 }
0x10b1   : > { %v11925_v13 = vpop.f32.mrf.mxu1 }
0x10b2   : > { %v11934_v37 = vadd.f32 %v11925_v13, %v11849_v61  ;;  %v12030_v16 = vadd.f32 %v15014_v39, %v11935_v30  ;;  %v8065_v13 = vadd.f32 %v18335_v34, %v8054_v47 }
0x10b4   : > { %v12029_v7 = vadd.f32 %v12020_v32, %v11934_v37  ;;  %v8066_v30 = vadd.f32 %v8065_v13, %v8057_v56 }
0x10b6   : > { %v15036_v12 = vpop.f32.mrf.mxu0 }
0x10b8   : > { %v15025_v26 = vpop.f32.mrf.mxu1  ;;  %v12197_v57 = vpop.f32.mrf.mxu0 }
0x10b9   : > { %v12121_v19 = vadd.f32 %v15025_v26, %v12030_v16 }
0x10ba   : > { %v12111_v4 = vpop.f32.mrf.mxu1 }
0x10bb   : > { %v12120_v15 = vadd.f32 %v12111_v4, %v12029_v7  ;;  %v12207_v25 = vadd.f32 %v15036_v12, %v12121_v19 }
0x10bd   : > { %v12206_v55 = vadd.f32 %v12197_v57, %v12120_v15 }
0x10c0   : > { %v15047_v49 = vpop.f32.mrf.mxu1 }
0x10c1   : > { %v12298_v3 = vadd.f32 %v15047_v49, %v12207_v25 }
0x10c2   : > { %v12288_v27 = vpop.f32.mrf.mxu1 }
0x10c3   : > { %v12300_v31 = vadd.f32 2.0, %v12298_v3  ;;  %v12297_v62 = vadd.f32 %v12288_v27, %v12206_v55  ;;  %12323 = vrot.lane.b32.xlu0 %v12298_v3, %s15208_s15 }
0x10c5   : > { %v12304_v6 = vand.u32 2147483647, %v12300_v31  ;;  %v12299_v22 = vadd.f32 2.0, %v12297_v62  ;;  %v12302_v0 = vmin.f32 %v12300_v31, 0.0 }
0x10c7   : > { %v12306_v18 = vsub.f32 0.0, %v12304_v6  ;;  %v12303_v2 = vand.u32 2147483647, %v12299_v22  ;;  %12321 = vrot.lane.b32.xlu0 %v12297_v62, %s15208_s15  ;;  %v12301_v44 = vmin.f32 %v12299_v22, 0.0 }
0x10c9   : > { %v12309_v58 = vmul.f32 1.442695, %v12306_v18  ;;  %v12305_v29 = vsub.f32 0.0, %v12303_v2 }
0x10cb   : > { %15185 = vpow2.f32 %v12309_v58  ;;  %v12307_v45 = vmul.f32 1.442695, %v12305_v29 }
0x10cd   : > { %15187 = vpow2.f32 %v12307_v45 }
0x10d8   : > { %v15186_v46 = vpop.eup %15185 }
0x10d9   : > { %v12312_v35 = vadd.f32 1.0, %v15186_v46 }
0x10da   : > { %v15188_v23 = vpop.eup %15187 }
0x10db   : > { %v12311_v48 = vadd.f32 1.0, %v15188_v23  ;;  %15189 = vlog2.f32 %v12312_v35 }
0x10dd   : > { %15191 = vlog2.f32 %v12311_v48 }
0x10e8   : > { %v15190_v8 = vpop.eup %15189 }
0x10e9   : > { %v12316_v14 = vmul.f32 0.6931472, %v15190_v8 }
0x10ea   : > { %v15192_v17 = vpop.eup %15191 }
0x10eb   : > { %v12318_v53 = vsub.f32 %v12302_v0, %v12316_v14  ;;  %v12314_v24 = vmul.f32 0.6931472, %v15192_v17 }
0x10ed   : > { %12339 = vrot.lane.b32.xlu1 %v12318_v53, %s15209_s20  ;;  %v12317_v42 = vsub.f32 %v12301_v44, %v12314_v24  ;;  %v12331_v54 = vmul.f32 1.442695, %v12318_v53 }
0x10ef   : > { %12337 = vrot.lane.b32.xlu0 %v12317_v42, %s15209_s20  ;;  %15193 = vpow2.f32 %v12331_v54  ;;  %v12329_v21 = vmul.f32 1.442695, %v12317_v42 }
0x10f1   : > { %15195 = vpow2.f32 %v12329_v21 }
0x10fc   : > { %v15194_v38 = vpop.eup %15193 }
0x10fe   : > { %v15196_v33 = vpop.eup %15195 }
0x110e   : > { %8059 = vadd.xlane.f32.xlu0 %v8058_v20 }
0x1111   : > { %10377 = vadd.xlane.f32.xlu1 %v10376_v1 }
0x1135   : > { %v12324_v36 = vpop.permute.xlu0 %12323 }
0x1136   : > { %v12328_v28 = vadd.f32 %v12324_v36, %v18129_v41 }
0x1138   : > { %v12334_v10 = vmul.f32 %v15194_v38, %v12328_v28 }
0x1139   : > { %v12322_v9 = vpop.permute.xlu0 %12321 }
0x113a   : > { %v12327_v63 = vadd.f32 %v12322_v9, %v18137_v52  ;;  %12393 = vrot.lane.b32.xlu1 %v12334_v10, %s15209_s20 }
0x113c   : > { %v12333_v11 = vmul.f32 %v15196_v33, %v12327_v63 }
0x113e   : > { %12391 = vrot.lane.b32.xlu0 %v12333_v11, %s15209_s20 }
0x115e   : > { %10380 = vadd.xlane.f32.xlu1 %v10379_v59 }
0x115f   : > { %v12340_v60 = vpop.permute.xlu1 %12339 }
0x1160   : > { %v12346_v40 = vsel %vm8604_vm8, %v12340_v60, 0.0 }
0x1161   : > { %v12338_v5 = vpop.permute.xlu0 %12337 }
0x1162   : > { %v12343_v50 = vsel %vm8604_vm8, %v12338_v5, 0.0 }
0x1163   : > { %12344 = vadd.xlane.f32.xlu0 %v12343_v50 }
0x1167   : > { %12347 = vadd.xlane.f32.xlu0 %v12346_v40 }
0x1191   : > { %12357 = vxpose.xlu1.b32.start [1/2] (short) (narrow) %v18137_v52, 16 }
0x1195   : > { %12358 = vxpose.xlu1.b32.end [2/2] (short) (narrow) %v18129_v41, 16 }
0x1197   : > { %v8060_v61 = vpop.xlane.xlu0 %8059 }
0x1198   : > { %v8067_v39 = vadd.f32 %v8066_v30, %v8060_v61 }
0x119a   : > { %v8068_v43 = vrot.slane %v8067_v39, 4  ;;  %v10378_v7 = vpop.xlane.xlu1 %10377 }
0x119c   : > { %v8069_v37 = vadd.f32 %v8068_v43, %v8067_v39 }
0x119e   : > { %v8070_v26 = vrot.slane %v8069_v37, 2 }
0x11a0   : > { %v8071_v16 = vadd.f32 %v8070_v26, %v8069_v37 }
0x11a2   : > { %v8072_v32 = vrot.slane %v8071_v16, 1 }
0x11a4   : > { %v8073_v4 = vadd.f32 %v8072_v32, %v8071_v16 }
0x11a6   : > { %v8074_v19 = vadd.f32 %v8073_v4, %v18320_v51 }
0x11ac   : > { %v12394_v15 = vpop.permute.xlu1 %12393 }
0x11b0   : > { %v12392_v12 = vpop.permute.xlu0 %12391 }
0x11b1   : > { %12397 = vxpose.xlu0.b32.start [1/2] (short) (narrow) %v12392_v12, 16 }
0x11b5   : > { %12398 = vxpose.xlu0.b32.end [2/2] (short) (narrow) %v12394_v15, 16 }
0x11e7   : > { %v10381_v52 = vpop.xlane.xlu1 %10380 }
0x11e8   : > { %v10382_v34 = vadd.f32 %v10381_v52, %v10378_v7 }
0x11ea   : > { %v10383_v25 = vrot.slane %v10382_v34, 4 }
0x11ec   : > { %v10384_v41 = vadd.f32 %v10383_v25, %v10382_v34  ;;  %v12345_v57 = vpop.xlane.xlu0 %12344 }
0x11ee   : > { %v10385_v49 = vrot.slane %v10384_v41, 2 }
0x11f0   : > { %v12348_v3 = vpop.xlane.xlu0 %12347  ;;  %v10386_v55 = vadd.f32 %v10385_v49, %v10384_v41 }
0x11f1   : > { %v12349_v27 = vadd.f32 %v12348_v3, %v12345_v57 }
0x11f2   : > { %v10387_v62 = vrot.slane %v10386_v55, 1 }
0x11f3   : > { %v12350_v31 = vrot.slane %v12349_v27, 4 }
0x11f4   : > { %v10388_v22 = vadd.f32 %v10387_v62, %v10386_v55 }
0x11f5   : > { %v12351_v6 = vadd.f32 %v12350_v31, %v12349_v27 }
0x11f6   : > { %v10389_v58 = vadd.f32 %v10388_v22, %v8074_v19 }
0x11f7   : > { %v12352_v51 = vrot.slane %v12351_v6, 2 }
0x11f9   : > { %v12353_v18 = vadd.f32 %v12352_v51, %v12351_v6 }
0x11fb   : > { %v12354_v2 = vrot.slane %v12353_v18, 1 }
0x11fd   : > { %v12355_v29 = vadd.f32 %v12354_v2, %v12353_v18 }
0x11ff   : > { %v12356_v45 = vadd.f32 %v12355_v29, %v10389_v58 }
0x1201   : > { %12434 = vst.msk [vmem:[%s179_s5] sm:$0x1] %vm12433_vm0, %v12356_v45 }
0x120d   : > { %v12373_v46 = vpop.trf.xlu1 }
0x120e   : > { %12429 = vst.msk [vmem:[%s176_s9] sm:$0xff] %vm8604_vm8, %v12373_v46 }
0x1211   : > { %v12374_v35 = vpop.trf.xlu1 }
0x1212   : > { %12430 = vst.msk [vmem:[%s176_s9 + $0x8] sm:$0xff] %vm8604_vm8, %v12374_v35 }
0x122d   : > { %v12413_v23 = vpop.trf.xlu0 }
0x122e   : > { %12431 = vst.msk [vmem:[%s176_s9 + $0x10] sm:$0xff] %vm8604_vm8, %v12413_v23 }
0x1231   : > { %v12414_v48 = vpop.trf.xlu0 }
0x1232   : > { %12432 = vst.msk [vmem:[%s176_s9 + $0x18] sm:$0xff] %vm8604_vm8, %v12414_v48 }
0x1233 PF: > { %s14_s12 = sadd.s32 1, %s15203_s12  }
0x1234   : > { %p11_p4 = scmp.ge.s32.totalorder %s14_s12, 4  }
0x1236   :  { %13 = sbr.rel (!%p11_p4) target bundleno = 1 (0x1), region = 70 }

</bundles_post_ra>
